<compile_context>
chip_gen: v5e
topology: v5e:2x2
jax: 0.10.0
libtpu: 0.0.40
codegen_flags: <defaults>
</compile_context>

<pallas_src>
import jax
import jax.numpy as jnp
from jax.experimental import pallas as pl
from jax.experimental.pallas import tpu as pltpu

EPS = 1e-5


def _fused_bn_relu_conv_bn_relu_kernel(x_ref, w_hbm_ref, gb1_ref, gb2_ref, o_ref,
                                       w_vmem, w_sem):
    # x_ref: [Cin, P] f32 (VMEM), w_hbm_ref: [Cout, Cin] f32 (HBM),
    # gb1_ref: [Cin, 2] f32, gb2_ref: [Cout, 2] f32, o_ref: [Cout, P] f32,
    # w_vmem: [Cout, Cin] f32 scratch, w_sem: DMA semaphore.

    # Kick off the conv-weight copy first so it overlaps all of BN1.
    w_copy = pltpu.make_async_copy(w_hbm_ref, w_vmem, w_sem)
    w_copy.start()

    x = x_ref[...]                                        # [Cin, P]
    P = x.shape[1]
    inv_p = 1.0 / P

    # Ones matrix for MXU row-sums.  Logical shape [P, 128] => the contraction runs over the
    # logical pixel count only (padding-safe); result lanes are all identical, take lane 0.
    ones_p = jnp.ones((P, 128), dtype=jnp.float32)

    # --- BatchNorm #1 (training-mode batch stats, biased variance) + ReLU.
    #     Affine folded into a single per-channel scale/shift; reductions on the MXU. ---
    s1 = jnp.dot(x, ones_p, preferred_element_type=jnp.float32)[:, :1]      # [Cin, 1]
    q1 = jnp.dot(x * x, ones_p, preferred_element_type=jnp.float32)[:, :1]  # [Cin, 1]
    mean1 = s1 * inv_p
    var1 = jnp.maximum(q1 * inv_p - mean1 * mean1, 0.0)   # clamp one-pass cancellation
    g1 = gb1_ref[:, 0:1]
    b1 = gb1_ref[:, 1:2]
    a1 = g1 * jax.lax.rsqrt(var1 + EPS)                   # [Cin, 1]
    d1 = b1 - mean1 * a1                                  # [Cin, 1]
    y = jnp.maximum(x * a1 + d1, 0.0)                     # [Cin, P]

    # --- 1x1 Conv (no bias): [Cout, Cin] @ [Cin, P] on the MXU, f32 operands. ---
    w_copy.wait()
    z = jnp.dot(w_vmem[...], y, preferred_element_type=jnp.float32)         # [Cout, P]

    # --- BatchNorm #2 + ReLU, same one-pass / folded-affine / MXU-reduction scheme. ---
    s2 = jnp.dot(z, ones_p, preferred_element_type=jnp.float32)[:, :1]      # [Cout, 1]
    q2 = jnp.dot(z * z, ones_p, preferred_element_type=jnp.float32)[:, :1]  # [Cout, 1]
    mean2 = s2 * inv_p
    var2 = jnp.maximum(q2 * inv_p - mean2 * mean2, 0.0)
    g2 = gb2_ref[:, 0:1]
    b2 = gb2_ref[:, 1:2]
    a2 = g2 * jax.lax.rsqrt(var2 + EPS)
    d2 = b2 - mean2 * a2
    o_ref[...] = jnp.maximum(z * a2 + d2, 0.0)


def fused_forward(x_nchw, w_oi, gamma1, beta1, gamma2, beta2):
    """x_nchw: [N, Cin, H, W]; w_oi: [Cout, Cin] (PyTorch 1x1 conv weight squeezed)."""
    N, Cin, H, W = x_nchw.shape
    Cout = w_oi.shape[0]
    P = N * H * W

    # Channels-on-rows layout.  Free reshape for N == 1 (the module's shape).
    if N == 1:
        x2d = x_nchw.reshape(Cin, P).astype(jnp.float32)
    else:
        x2d = jnp.transpose(x_nchw, (1, 0, 2, 3)).reshape(Cin, P).astype(jnp.float32)

    w = w_oi.astype(jnp.float32)                                   # [Cout, Cin], used as-is
    gb1 = jnp.stack([gamma1, beta1], axis=1).astype(jnp.float32)   # [Cin, 2]
    gb2 = jnp.stack([gamma2, beta2], axis=1).astype(jnp.float32)   # [Cout, 2]

    full = lambda shape: pl.BlockSpec(shape, lambda: tuple(0 for _ in shape))

    # Advisory cost hint: conv matmul + 4 ones-reduction matmuls; f32 bytes in/out.
    flops = 2 * Cout * Cin * P + 2 * 128 * P * (2 * Cin + 2 * Cout)
    bytes_accessed = 4 * (Cin * P + Cout * Cin + 2 * Cin + 2 * Cout + Cout * P)

    out2d = pl.pallas_call(
        _fused_bn_relu_conv_bn_relu_kernel,
        out_shape=jax.ShapeDtypeStruct((Cout, P), jnp.float32),
        grid=(),
        in_specs=[
            full((Cin, P)),                       # x: auto-copied to VMEM
            pl.BlockSpec(memory_space=pl.ANY),    # w: stays in HBM, DMA'd manually (overlap)
            full((Cin, 2)),                       # packed (gamma1, beta1)
            full((Cout, 2)),                      # packed (gamma2, beta2)
        ],
        out_specs=full((Cout, P)),
        scratch_shapes=[
            pltpu.VMEM((Cout, Cin), jnp.float32),     # conv weight landing buffer
            pltpu.SemaphoreType.DMA(()),              # its completion semaphore
        ],
        cost_estimate=pl.CostEstimate(
            flops=flops, bytes_accessed=bytes_accessed, transcendentals=0),
    )(x2d, w, gb1, gb2)

    # [Cout, P] -> NCHW (free for N == 1).
    if N == 1:
        return out2d.reshape(1, Cout, H, W)
    return jnp.transpose(out2d.reshape(Cout, N, H, W), (1, 0, 2, 3))


def _reference(x_nchw, w_oi, gamma1, beta1, gamma2, beta2):
    """Pure-JAX reference mirroring PyTorch training-mode BN semantics."""
    N, Cin, H, W = x_nchw.shape
    Cout = w_oi.shape[0]
    x = jnp.transpose(x_nchw, (0, 2, 3, 1)).reshape(-1, Cin)
    m1 = x.mean(0)
    v1 = ((x - m1) ** 2).mean(0)
    y = jnp.maximum((x - m1) / jnp.sqrt(v1 + EPS) * gamma1 + beta1, 0.0)
    z = y @ w_oi.T
    m2 = z.mean(0)
    v2 = ((z - m2) ** 2).mean(0)
    o = jnp.maximum((z - m2) / jnp.sqrt(v2 + EPS) * gamma2 + beta2, 0.0)
    return jnp.transpose(o.reshape(N, H, W, Cout), (0, 3, 1, 2))


if __name__ == "__main__":
    # Shapes implied by the module's forward: x190 = [1, 480, 14, 14]
    N, Cin, H, W = 1, 480, 14, 14
    Cout = 128

    key = jax.random.PRNGKey(0)
    kx, kw, kg1, kb1, kg2, kb2 = jax.random.split(key, 6)

    x = jax.random.normal(kx, (N, Cin, H, W), dtype=jnp.float32)
    # Conv2d(480, 128, kernel_size=1, bias=False) weight: [Cout, Cin, 1, 1] -> squeezed [Cout, Cin]
    w = jax.random.normal(kw, (Cout, Cin), dtype=jnp.float32) * 0.05
    # BatchNorm affine params (deterministic, non-trivial)
    gamma1 = 1.0 + 0.1 * jax.random.normal(kg1, (Cin,), dtype=jnp.float32)
    beta1 = 0.1 * jax.random.normal(kb1, (Cin,), dtype=jnp.float32)
    gamma2 = 1.0 + 0.1 * jax.random.normal(kg2, (Cout,), dtype=jnp.float32)
    beta2 = 0.1 * jax.random.normal(kb2, (Cout,), dtype=jnp.float32)

    out = jax.jit(fused_forward)(x, w, gamma1, beta1, gamma2, beta2)
    out = jax.block_until_ready(out)

    ref = _reference(x, w, gamma1, beta1, gamma2, beta2)
    assert out.shape == (N, Cout, H, W), out.shape
    assert jnp.allclose(out, ref, atol=1e-3, rtol=1e-3), float(jnp.max(jnp.abs(out - ref)))

    print("KERNEL_OK")
</pallas_src>

<mosaic_0001>
module attributes {stable_mosaic.version = 11 : i64} {
  func.func @_fused_bn_relu_conv_bn_relu_kernel(%arg0: memref<480x196xf32, #tpu.memory_space<vmem>>, %arg1: memref<128x480xf32, #tpu.memory_space<any>>, %arg2: memref<480x2xf32, #tpu.memory_space<vmem>>, %arg3: memref<128x2xf32, #tpu.memory_space<vmem>>, %arg4: memref<128x196xf32, #tpu.memory_space<vmem>>, %arg5: memref<128x480xf32, #tpu.memory_space<vmem>>, %arg6: memref<!tpu.dma_semaphore, #tpu.memory_space<semaphore_mem>>) attributes {dimension_semantics = [], scalar_prefetch = 0 : i64, scratch_operands = 2 : i64, tpu.core_type = #tpu.core_type<tc>} {
    tpu.enqueue_dma source(%arg1 : memref<128x480xf32, #tpu.memory_space<any>>) target(%arg5 : memref<128x480xf32, #tpu.memory_space<vmem>>) target_semaphore(%arg6 : memref<!tpu.dma_semaphore, #tpu.memory_space<semaphore_mem>>)
    %c0 = arith.constant 0 : index
    %c0_0 = arith.constant 0 : index
    %0 = vector.load %arg0[%c0, %c0_0] : memref<480x196xf32, #tpu.memory_space<vmem>>, vector<480x196xf32>
    %cst = arith.constant 1.000000e+00 : f32
    %1 = vector.broadcast %cst : f32 to vector<196x128xf32>
    %cst_1 = arith.constant dense<0.000000e+00> : vector<480x128xf32>
    %2 = tpu.matmul %0, %1, %cst_1 {dimension_numbers = #tpu.dot_dimension_numbers<[1], [0], [0], [1], [0, 0, 1, 1], [], []>} : vector<480x196xf32>, vector<196x128xf32>, vector<480x128xf32> -> vector<480x128xf32>
    %3 = vector.extract_strided_slice %2 {offsets = [0, 0], sizes = [480, 1], strides = [1, 1]} : vector<480x128xf32> to vector<480x1xf32>
    %4 = arith.mulf %0, %0 : vector<480x196xf32>
    %cst_2 = arith.constant dense<0.000000e+00> : vector<480x128xf32>
    %5 = tpu.matmul %4, %1, %cst_2 {dimension_numbers = #tpu.dot_dimension_numbers<[1], [0], [0], [1], [0, 0, 1, 1], [], []>} : vector<480x196xf32>, vector<196x128xf32>, vector<480x128xf32> -> vector<480x128xf32>
    %6 = vector.extract_strided_slice %5 {offsets = [0, 0], sizes = [480, 1], strides = [1, 1]} : vector<480x128xf32> to vector<480x1xf32>
    %cst_3 = arith.constant 0.00510204071 : f32
    %7 = vector.broadcast %cst_3 : f32 to vector<480x1xf32>
    %8 = arith.mulf %3, %7 : vector<480x1xf32>
    %cst_4 = arith.constant 0.00510204071 : f32
    %9 = vector.broadcast %cst_4 : f32 to vector<480x1xf32>
    %10 = arith.mulf %6, %9 : vector<480x1xf32>
    %11 = arith.mulf %8, %8 : vector<480x1xf32>
    %12 = arith.subf %10, %11 : vector<480x1xf32>
    %cst_5 = arith.constant 0.000000e+00 : f32
    %13 = vector.broadcast %cst_5 : f32 to vector<480x1xf32>
    %14 = arith.maximumf %12, %13 : vector<480x1xf32>
    %c0_6 = arith.constant 0 : index
    %c0_7 = arith.constant 0 : index
    %15 = vector.load %arg2[%c0_6, %c0_7] : memref<480x2xf32, #tpu.memory_space<vmem>>, vector<480x1xf32>
    %c0_8 = arith.constant 0 : index
    %c1 = arith.constant 1 : index
    %16 = vector.load %arg2[%c0_8, %c1] : memref<480x2xf32, #tpu.memory_space<vmem>>, vector<480x1xf32>
    %cst_9 = arith.constant 9.99999974E-6 : f32
    %17 = vector.broadcast %cst_9 : f32 to vector<480x1xf32>
    %18 = arith.addf %14, %17 : vector<480x1xf32>
    %19 = math.rsqrt %18 : vector<480x1xf32>
    %20 = arith.mulf %15, %19 : vector<480x1xf32>
    %21 = arith.mulf %8, %20 : vector<480x1xf32>
    %22 = arith.subf %16, %21 : vector<480x1xf32>
    %23 = vector.broadcast %20 : vector<480x1xf32> to vector<480x196xf32>
    %24 = arith.mulf %0, %23 : vector<480x196xf32>
    %25 = vector.broadcast %22 : vector<480x1xf32> to vector<480x196xf32>
    %26 = arith.addf %24, %25 : vector<480x196xf32>
    %cst_10 = arith.constant 0.000000e+00 : f32
    %27 = vector.broadcast %cst_10 : f32 to vector<480x196xf32>
    %28 = arith.maximumf %26, %27 : vector<480x196xf32>
    tpu.wait_dma2 semaphore(%arg6 : memref<!tpu.dma_semaphore, #tpu.memory_space<semaphore_mem>>) src(%arg1 : memref<128x480xf32, #tpu.memory_space<any>>) dst(%arg5 : memref<128x480xf32, #tpu.memory_space<vmem>>)
    %c0_11 = arith.constant 0 : index
    %c0_12 = arith.constant 0 : index
    %29 = vector.load %arg5[%c0_11, %c0_12] : memref<128x480xf32, #tpu.memory_space<vmem>>, vector<128x480xf32>
    %cst_13 = arith.constant dense<0.000000e+00> : vector<128x196xf32>
    %30 = tpu.matmul %29, %28, %cst_13 {dimension_numbers = #tpu.dot_dimension_numbers<[1], [0], [0], [1], [0, 0, 1, 1], [], []>} : vector<128x480xf32>, vector<480x196xf32>, vector<128x196xf32> -> vector<128x196xf32>
    %cst_14 = arith.constant dense<0.000000e+00> : vector<128x128xf32>
    %31 = tpu.matmul %30, %1, %cst_14 {dimension_numbers = #tpu.dot_dimension_numbers<[1], [0], [0], [1], [0, 0, 1, 1], [], []>} : vector<128x196xf32>, vector<196x128xf32>, vector<128x128xf32> -> vector<128x128xf32>
    %32 = vector.extract_strided_slice %31 {offsets = [0, 0], sizes = [128, 1], strides = [1, 1]} : vector<128x128xf32> to vector<128x1xf32>
    %33 = arith.mulf %30, %30 : vector<128x196xf32>
    %cst_15 = arith.constant dense<0.000000e+00> : vector<128x128xf32>
    %34 = tpu.matmul %33, %1, %cst_15 {dimension_numbers = #tpu.dot_dimension_numbers<[1], [0], [0], [1], [0, 0, 1, 1], [], []>} : vector<128x196xf32>, vector<196x128xf32>, vector<128x128xf32> -> vector<128x128xf32>
    %35 = vector.extract_strided_slice %34 {offsets = [0, 0], sizes = [128, 1], strides = [1, 1]} : vector<128x128xf32> to vector<128x1xf32>
    %cst_16 = arith.constant 0.00510204071 : f32
    %36 = vector.broadcast %cst_16 : f32 to vector<128x1xf32>
    %37 = arith.mulf %32, %36 : vector<128x1xf32>
    %cst_17 = arith.constant 0.00510204071 : f32
    %38 = vector.broadcast %cst_17 : f32 to vector<128x1xf32>
    %39 = arith.mulf %35, %38 : vector<128x1xf32>
    %40 = arith.mulf %37, %37 : vector<128x1xf32>
    %41 = arith.subf %39, %40 : vector<128x1xf32>
    %cst_18 = arith.constant 0.000000e+00 : f32
    %42 = vector.broadcast %cst_18 : f32 to vector<128x1xf32>
    %43 = arith.maximumf %41, %42 : vector<128x1xf32>
    %c0_19 = arith.constant 0 : index
    %c0_20 = arith.constant 0 : index
    %44 = vector.load %arg3[%c0_19, %c0_20] : memref<128x2xf32, #tpu.memory_space<vmem>>, vector<128x1xf32>
    %c0_21 = arith.constant 0 : index
    %c1_22 = arith.constant 1 : index
    %45 = vector.load %arg3[%c0_21, %c1_22] : memref<128x2xf32, #tpu.memory_space<vmem>>, vector<128x1xf32>
    %cst_23 = arith.constant 9.99999974E-6 : f32
    %46 = vector.broadcast %cst_23 : f32 to vector<128x1xf32>
    %47 = arith.addf %43, %46 : vector<128x1xf32>
    %48 = math.rsqrt %47 : vector<128x1xf32>
    %49 = arith.mulf %44, %48 : vector<128x1xf32>
    %50 = arith.mulf %37, %49 : vector<128x1xf32>
    %51 = arith.subf %45, %50 : vector<128x1xf32>
    %52 = vector.broadcast %49 : vector<128x1xf32> to vector<128x196xf32>
    %53 = arith.mulf %30, %52 : vector<128x196xf32>
    %54 = vector.broadcast %51 : vector<128x1xf32> to vector<128x196xf32>
    %55 = arith.addf %53, %54 : vector<128x196xf32>
    %cst_24 = arith.constant 0.000000e+00 : f32
    %56 = vector.broadcast %cst_24 : f32 to vector<128x196xf32>
    %57 = arith.maximumf %55, %56 : vector<128x196xf32>
    %c0_25 = arith.constant 0 : index
    %c0_26 = arith.constant 0 : index
    %58 = vector.load %arg4[%c0_25, %c0_26] : memref<128x196xf32, #tpu.memory_space<vmem>>, vector<128x196xf32>
    tpu.vector_store %arg4[%c0_25, %c0_26], %57 {strides = array<i32>} : memref<128x196xf32, #tpu.memory_space<vmem>>, vector<128x196xf32>,
    return
  }
}

</mosaic_0001>

<bundles_post_ra>
// kernel: fused_forward.1
= control target key start
LH: loop header
LB: loop body
LE: loop exit
PB: predicated region body
PF: predicated region fallthrough
CT: control target
= control target key end

     0   :  { %s11491_s0 = inlined_call_operand.vmem [shape: f32[480,196], index: 0, kind: input, shape index: {}]   ;;  %s11492_s1 = inlined_call_operand.vmem [shape: f32[128,480], index: 1, kind: input, shape index: {}]   ;;  %s11493_s2 = inlined_call_operand.vmem [shape: f32[480,2], index: 2, kind: input, shape index: {}]   ;;  %s11494_s3 = inlined_call_operand.vmem [shape: f32[128,2], index: 3, kind: input, shape index: {}]   ;;  %s11495_s4 = inlined_call_operand.vmem [shape: f32[128,196], index: 4, kind: output, shape index: {}]  }
   0x1   :  { %v6304_v0 = vld [vmem:[%s11492_s1] sm:$0xff]  ;;  %v6309_v1 = vld [vmem:[%s11492_s1 + $0x8] sm:$0xff]  ;;  %v6314_v2 = vld [vmem:[%s11492_s1 + $0x10] sm:$0xff] }
   0x2   :  { %11645 = vst [vmem:[#allocation6_spill] sm:$0xff] %v6304_v0  ;;  %v6319_v3 = vld [vmem:[%s11492_s1 + $0x18] sm:$0xff]  ;;  %v6324_v4 = vld [vmem:[%s11492_s1 + $0x20] sm:$0xff]  ;;  %v6329_v5 = vld [vmem:[%s11492_s1 + $0x28] sm:$0xff] }
   0x3   :  { %11646 = vst [vmem:[#allocation7_spill] sm:$0xff] %v6309_v1  ;;  %v6334_v6 = vld [vmem:[%s11492_s1 + $0x30] sm:$0xff]  ;;  %v6339_v7 = vld [vmem:[%s11492_s1 + $0x38] sm:$0xff]  ;;  %v6344_v8 = vld [vmem:[%s11492_s1 + $0x40] sm:$0xff] }
   0x4   :  { %11647 = vst [vmem:[#allocation8_spill] sm:$0xff] %v6314_v2  ;;  %v6349_v9 = vld [vmem:[%s11492_s1 + $0x48] sm:$0xff]  ;;  %v6354_v10 = vld [vmem:[%s11492_s1 + $0x50] sm:$0xff]  ;;  %v6359_v11 = vld [vmem:[%s11492_s1 + $0x58] sm:$0xff] }
   0x5   :  { %11648 = vst [vmem:[#allocation9_spill] sm:$0xff] %v6319_v3  ;;  %v6364_v12 = vld [vmem:[%s11492_s1 + $0x60] sm:$0xff]  ;;  %v6369_v13 = vld [vmem:[%s11492_s1 + $0x68] sm:$0xff]  ;;  %v6374_v14 = vld [vmem:[%s11492_s1 + $0x70] sm:$0xff] }
   0x6   :  { %11649 = vst [vmem:[#allocation10_spill] sm:$0xff] %v6324_v4  ;;  %v6379_v15 = vld [vmem:[%s11492_s1 + $0x78] sm:$0xff]  ;;  %v6384_v16 = vld [vmem:[%s11492_s1 + $0x80] sm:$0xff]  ;;  %v6389_v17 = vld [vmem:[%s11492_s1 + $0x88] sm:$0xff] }
   0x7   :  { %11650 = vst [vmem:[#allocation11_spill] sm:$0xff] %v6329_v5  ;;  %v6394_v18 = vld [vmem:[%s11492_s1 + $0x90] sm:$0xff]  ;;  %v6399_v19 = vld [vmem:[%s11492_s1 + $0x98] sm:$0xff]  ;;  %v6404_v20 = vld [vmem:[%s11492_s1 + $0xa0] sm:$0xff] }
   0x8   :  { %11651 = vst [vmem:[#allocation12_spill] sm:$0xff] %v6334_v6  ;;  %v6409_v21 = vld [vmem:[%s11492_s1 + $0xa8] sm:$0xff]  ;;  %v6414_v22 = vld [vmem:[%s11492_s1 + $0xb0] sm:$0xff]  ;;  %v6419_v23 = vld [vmem:[%s11492_s1 + $0xb8] sm:$0xff] }
   0x9   :  { %11652 = vst [vmem:[#allocation13_spill] sm:$0xff] %v6339_v7  ;;  %v6424_v24 = vld [vmem:[%s11492_s1 + $0xc0] sm:$0xff]  ;;  %v6429_v25 = vld [vmem:[%s11492_s1 + $0xc8] sm:$0xff]  ;;  %v6434_v26 = vld [vmem:[%s11492_s1 + $0xd0] sm:$0xff] }
   0xa   :  { %11653 = vst [vmem:[#allocation14_spill] sm:$0xff] %v6344_v8  ;;  %v6439_v27 = vld [vmem:[%s11492_s1 + $0xd8] sm:$0xff]  ;;  %v6444_v28 = vld [vmem:[%s11492_s1 + $0xe0] sm:$0xff]  ;;  %v6449_v29 = vld [vmem:[%s11492_s1 + $0xe8] sm:$0xff] }
   0xb   :  { %11654 = vst [vmem:[#allocation15_spill] sm:$0xff] %v6349_v9  ;;  %v6454_v30 = vld [vmem:[%s11492_s1 + $0xf0] sm:$0xff]  ;;  %v6459_v31 = vld [vmem:[%s11492_s1 + $0xf8] sm:$0xff]  ;;  %v6464_v32 = vld [vmem:[%s11492_s1 + $0x100] sm:$0xff] }
   0xc   :  { %11655 = vst [vmem:[#allocation16_spill] sm:$0xff] %v6354_v10  ;;  %v6469_v33 = vld [vmem:[%s11492_s1 + $0x108] sm:$0xff]  ;;  %v6474_v34 = vld [vmem:[%s11492_s1 + $0x110] sm:$0xff]  ;;  %v6479_v35 = vld [vmem:[%s11492_s1 + $0x118] sm:$0xff] }
   0xd   :  { %11656 = vst [vmem:[#allocation17_spill] sm:$0xff] %v6359_v11  ;;  %v6484_v36 = vld [vmem:[%s11492_s1 + $0x120] sm:$0xff]  ;;  %v6489_v37 = vld [vmem:[%s11492_s1 + $0x128] sm:$0xff]  ;;  %v6494_v38 = vld [vmem:[%s11492_s1 + $0x130] sm:$0xff] }
   0xe   :  { %11657 = vst [vmem:[#allocation18_spill] sm:$0xff] %v6364_v12  ;;  %v6499_v39 = vld [vmem:[%s11492_s1 + $0x138] sm:$0xff]  ;;  %v6504_v40 = vld [vmem:[%s11492_s1 + $0x140] sm:$0xff]  ;;  %v6509_v41 = vld [vmem:[%s11492_s1 + $0x148] sm:$0xff] }
   0xf   :  { %11658 = vst [vmem:[#allocation19_spill] sm:$0xff] %v6369_v13  ;;  %v6514_v42 = vld [vmem:[%s11492_s1 + $0x150] sm:$0xff]  ;;  %v6519_v43 = vld [vmem:[%s11492_s1 + $0x158] sm:$0xff]  ;;  %v6524_v44 = vld [vmem:[%s11492_s1 + $0x160] sm:$0xff] }
  0x10   :  { %11659 = vst [vmem:[#allocation20_spill] sm:$0xff] %v6374_v14  ;;  %v6529_v45 = vld [vmem:[%s11492_s1 + $0x168] sm:$0xff]  ;;  %v6534_v46 = vld [vmem:[%s11492_s1 + $0x170] sm:$0xff]  ;;  %v6539_v47 = vld [vmem:[%s11492_s1 + $0x178] sm:$0xff] }
  0x11   :  { %11660 = vst [vmem:[#allocation21_spill] sm:$0xff] %v6379_v15  ;;  %v6544_v48 = vld [vmem:[%s11492_s1 + $0x180] sm:$0xff]  ;;  %v6549_v49 = vld [vmem:[%s11492_s1 + $0x188] sm:$0xff]  ;;  %v6554_v50 = vld [vmem:[%s11492_s1 + $0x190] sm:$0xff] }
  0x12   :  { %11661 = vst [vmem:[#allocation22_spill] sm:$0xff] %v6384_v16  ;;  %v6559_v51 = vld [vmem:[%s11492_s1 + $0x198] sm:$0xff]  ;;  %v6564_v52 = vld [vmem:[%s11492_s1 + $0x1a0] sm:$0xff]  ;;  %v6569_v53 = vld [vmem:[%s11492_s1 + $0x1a8] sm:$0xff] }
  0x13   :  { %11662 = vst [vmem:[#allocation23_spill] sm:$0xff] %v6389_v17  ;;  %v6574_v54 = vld [vmem:[%s11492_s1 + $0x1b0] sm:$0xff]  ;;  %v6579_v55 = vld [vmem:[%s11492_s1 + $0x1b8] sm:$0xff]  ;;  %v6584_v56 = vld [vmem:[%s11492_s1 + $0x1c0] sm:$0xff] }
  0x14   :  { %11663 = vst [vmem:[#allocation24_spill] sm:$0xff] %v6394_v18  ;;  %v6589_v57 = vld [vmem:[%s11492_s1 + $0x1c8] sm:$0xff]  ;;  %v6594_v58 = vld [vmem:[%s11492_s1 + $0x1d0] sm:$0xff]  ;;  %v6599_v59 = vld [vmem:[%s11492_s1 + $0x1d8] sm:$0xff] }
  0x15   :  { %11664 = vst [vmem:[#allocation25_spill] sm:$0xff] %v6399_v19  ;;  %v6604_v60 = vld [vmem:[%s11492_s1 + $0x1e0] sm:$0xff]  ;;  %v6609_v61 = vld [vmem:[%s11492_s1 + $0x1e8] sm:$0xff]  ;;  %v6614_v62 = vld [vmem:[%s11492_s1 + $0x1f0] sm:$0xff] }
  0x16   :  { %11665 = vst [vmem:[#allocation26_spill] sm:$0xff] %v6404_v20  ;;  %v6619_v63 = vld [vmem:[%s11492_s1 + $0x1f8] sm:$0xff] }
  0x17   :  { %11666 = vst [vmem:[#allocation27_spill] sm:$0xff] %v6409_v21 }
  0x18   :  { %11667 = vst [vmem:[#allocation28_spill] sm:$0xff] %v6414_v22 }
  0x19   :  { %11668 = vst [vmem:[#allocation29_spill] sm:$0xff] %v6419_v23 }
  0x1a   :  { %11669 = vst [vmem:[#allocation30_spill] sm:$0xff] %v6424_v24 }
  0x1b   :  { %11670 = vst [vmem:[#allocation31_spill] sm:$0xff] %v6429_v25 }
  0x1c   :  { %11671 = vst [vmem:[#allocation32_spill] sm:$0xff] %v6434_v26 }
  0x1d   :  { %11672 = vst [vmem:[#allocation33_spill] sm:$0xff] %v6439_v27 }
  0x1e   :  { %11673 = vst [vmem:[#allocation34_spill] sm:$0xff] %v6444_v28 }
  0x1f   :  { %11674 = vst [vmem:[#allocation35_spill] sm:$0xff] %v6449_v29 }
  0x20   :  { %11675 = vst [vmem:[#allocation36_spill] sm:$0xff] %v6454_v30 }
  0x21   :  { %11676 = vst [vmem:[#allocation37_spill] sm:$0xff] %v6459_v31 }
  0x22   :  { %11677 = vst [vmem:[#allocation38_spill] sm:$0xff] %v6464_v32 }
  0x23   :  { %11678 = vst [vmem:[#allocation39_spill] sm:$0xff] %v6469_v33 }
  0x24   :  { %11679 = vst [vmem:[#allocation40_spill] sm:$0xff] %v6474_v34 }
  0x25   :  { %11680 = vst [vmem:[#allocation41_spill] sm:$0xff] %v6479_v35 }
  0x26   :  { %11681 = vst [vmem:[#allocation42_spill] sm:$0xff] %v6484_v36 }
  0x27   :  { %11682 = vst [vmem:[#allocation43_spill] sm:$0xff] %v6489_v37 }
  0x28   :  { %11683 = vst [vmem:[#allocation44_spill] sm:$0xff] %v6494_v38 }
  0x29   :  { %11684 = vst [vmem:[#allocation45_spill] sm:$0xff] %v6499_v39 }
  0x2a   :  { %11685 = vst [vmem:[#allocation46_spill] sm:$0xff] %v6504_v40 }
  0x2b   :  { %11686 = vst [vmem:[#allocation47_spill] sm:$0xff] %v6509_v41 }
  0x2c   :  { %11687 = vst [vmem:[#allocation48_spill] sm:$0xff] %v6514_v42 }
  0x2d   :  { %11688 = vst [vmem:[#allocation49_spill] sm:$0xff] %v6519_v43 }
  0x2e   :  { %11689 = vst [vmem:[#allocation50_spill] sm:$0xff] %v6524_v44 }
  0x2f   :  { %11690 = vst [vmem:[#allocation51_spill] sm:$0xff] %v6529_v45 }
  0x30   :  { %11691 = vst [vmem:[#allocation52_spill] sm:$0xff] %v6534_v46 }
  0x31   :  { %11692 = vst [vmem:[#allocation53_spill] sm:$0xff] %v6539_v47 }
  0x32   :  { %11693 = vst [vmem:[#allocation54_spill] sm:$0xff] %v6544_v48 }
  0x33   :  { %11694 = vst [vmem:[#allocation55_spill] sm:$0xff] %v6549_v49 }
  0x34   :  { %11695 = vst [vmem:[#allocation56_spill] sm:$0xff] %v6554_v50 }
  0x35   :  { %11696 = vst [vmem:[#allocation57_spill] sm:$0xff] %v6559_v51 }
  0x36   :  { %11697 = vst [vmem:[#allocation58_spill] sm:$0xff] %v6564_v52 }
  0x37   :  { %11698 = vst [vmem:[#allocation59_spill] sm:$0xff] %v6569_v53 }
  0x38   :  { %11699 = vst [vmem:[#allocation60_spill] sm:$0xff] %v6574_v54 }
  0x39   :  { %11700 = vst [vmem:[#allocation61_spill] sm:$0xff] %v6579_v55 }
  0x3a   :  { %11701 = vst [vmem:[#allocation62_spill] sm:$0xff] %v6584_v56 }
  0x3b   :  { %11702 = vst [vmem:[#allocation63_spill] sm:$0xff] %v6589_v57 }
  0x3c   :  { %11703 = vst [vmem:[#allocation64_spill] sm:$0xff] %v6594_v58 }
  0x3d   :  { %11704 = vst [vmem:[#allocation65_spill] sm:$0xff] %v6599_v59 }
  0x3e   :  { %11705 = vst [vmem:[#allocation66_spill] sm:$0xff] %v6604_v60 }
  0x3f   :  { %11706 = vst [vmem:[#allocation67_spill] sm:$0xff] %v6609_v61 }
  0x40   :  { %11707 = vst [vmem:[#allocation68_spill] sm:$0xff] %v6614_v62 }
  0x41   :  { %11708 = vst [vmem:[#allocation69_spill] sm:$0xff] %v6619_v63 }
  0x42   :  { %158 = vsyncadd [#allocation3], 8192  ;;  %vm460_vm0 = vcmask 1043456   ;;  %v11505_v58 = vmov 1.0   ;;  %v160_v62 = vld [vmem:[%s11491_s0 + $0x8] sm:$0xff]  ;;  %vm279_vm1 = vcmask 556032  }
  0x43   :  { %1158 = vmatpush.msra.mxu2 %v11505_v58  ;;  %464 = vmatpush.msra.mxu0 %v11505_v58  ;;  %v859_v61 = vmul.f32 %v160_v62, %v160_v62  ;;  %v162_v60 = vld [vmem:[%s11491_s0 + $0x18] sm:$0xff]  ;;  %v164_v57 = vld [vmem:[%s11491_s0 + $0x28] sm:$0xff]  ;;  %v193_v49 = vld [vmem:[%s11491_s0 + $0x110] sm:$0xff]  ;;  %s6274_s29 = smov 1  }
  0x44   :  { %5724 = vmatpush.msk.msra.mxu3 %vm460_vm0, %v11505_v58  ;;  %5663 = vmatpush.msk.msra.mxu1 %vm460_vm0, %v11505_v58  ;;  %v861_v63 = vmul.f32 %v162_v60, %v162_v60  ;;  %v863_v56 = vmul.f32 %v164_v57, %v164_v57  ;;  %v166_v59 = vld [vmem:[%s11491_s0 + $0x38] sm:$0xff]  ;;  %v201_v33 = vld [vmem:[%s11491_s0 + $0x150] sm:$0xff] }
  0x45   :  { %1159 = vmatpush.msra.mxu2 %v11505_v58  ;;  %465 = vmatpush.msra.mxu0 %v11505_v58  ;;  %v865_v54 = vmul.f32 %v166_v59, %v166_v59  ;;  %v6068_v26 = vld [vmem:[%s11493_s2 + $0x10] sm:$0xff] }
  0x46   :  { %1363 = vmatpush.msra.mxu3 %v11505_v58  ;;  %669 = vmatpush.msra.mxu1 %v11505_v58  ;;  %v1878_v14 = vld [vmem:[%s11493_s2 + $0xd0] sm:$0xff] }
  0x47   :  { %1160 = vmatpush.msra.mxu2 %v11505_v58  ;;  %466 = vmatpush.msra.mxu0 %v11505_v58 }
  0x48   :  { %1364 = vmatpush.msra.mxu3 %v11505_v58  ;;  %670 = vmatpush.msra.mxu1 %v11505_v58 }
  0x49   :  { %1161 = vmatpush.msra.mxu2 %v11505_v58  ;;  %467 = vmatpush.msra.mxu0 %v11505_v58 }
  0x4a   :  { %1365 = vmatpush.msra.mxu3 %v11505_v58  ;;  %671 = vmatpush.msra.mxu1 %v11505_v58 }
  0x4b   :  { %1162 = vmatpush.msra.mxu2 %v11505_v58  ;;  %468 = vmatpush.msra.mxu0 %v11505_v58 }
  0x4c   :  { %1366 = vmatpush.msra.mxu3 %v11505_v58  ;;  %672 = vmatpush.msra.mxu1 %v11505_v58 }
  0x4d   :  { %1163 = vmatpush.msra.mxu2 %v11505_v58  ;;  %469 = vmatpush.msra.mxu0 %v11505_v58 }
  0x4e   :  { %1367 = vmatpush.msra.mxu3 %v11505_v58  ;;  %673 = vmatpush.msra.mxu1 %v11505_v58 }
  0x4f   :  { %1164 = vmatpush.msra.mxu2 %v11505_v58  ;;  %470 = vmatpush.msra.mxu0 %v11505_v58 }
  0x50   :  { %1368 = vmatpush.msra.mxu3 %v11505_v58  ;;  %674 = vmatpush.msra.mxu1 %v11505_v58 }
  0x51   :  { %1165 = vmatpush.msra.mxu2 %v11505_v58  ;;  %471 = vmatpush.msra.mxu0 %v11505_v58 }
  0x52   :  { %1369 = vmatpush.msra.mxu3 %v11505_v58  ;;  %675 = vmatpush.msra.mxu1 %v11505_v58 }
  0x53   :  { %1166 = vmatpush.msra.mxu2 %v11505_v58  ;;  %472 = vmatpush.msra.mxu0 %v11505_v58 }
  0x54   :  { %1370 = vmatpush.msra.mxu3 %v11505_v58  ;;  %676 = vmatpush.msra.mxu1 %v11505_v58 }
  0x55   :  { %1167 = vmatpush.msra.mxu2 %v11505_v58  ;;  %473 = vmatpush.msra.mxu0 %v11505_v58 }
  0x56   :  { %5725 = vmatmul.msk.f32.vlgmr.msra.gmra.mxu3 %vm279_vm1, %v859_v61  ;;  %5664 = vmatmul.msk.f32.vlgmr.msra.gmra.mxu1 %vm279_vm1, %v160_v62  ;;  %v159_v61 = vld [vmem:[%s11491_s0] sm:$0xff] }
  0x57   :  { %1168 = vmatpush.msra.mxu2 %v11505_v58  ;;  %474 = vmatpush.msra.mxu0 %v11505_v58  ;;  %v858_v62 = vmul.f32 %v159_v61, %v159_v61 }
  0x59   :  { %1169 = vmatpush.msra.mxu2 %v11505_v58  ;;  %475 = vmatpush.msra.mxu0 %v11505_v58 }
  0x5b   :  { %1170 = vmatpush.msra.mxu2 %v11505_v58  ;;  %476 = vmatpush.msra.mxu0 %v11505_v58 }
  0x5d   :  { %1171 = vmatpush.msra.mxu2 %v11505_v58  ;;  %477 = vmatpush.msra.mxu0 %v11505_v58 }
  0x5e   :  { %5726 = vmatmul.msk.f32.gmra.mxu3 %vm279_vm1, %v861_v63  ;;  %5665 = vmatmul.msk.f32.gmra.mxu1 %vm279_vm1, %v162_v60  ;;  %v161_v63 = vld [vmem:[%s11491_s0 + $0x10] sm:$0xff] }
  0x5f   :  { %1172 = vmatpush.msra.mxu2 %v11505_v58  ;;  %478 = vmatpush.msra.mxu0 %v11505_v58  ;;  %v860_v60 = vmul.f32 %v161_v63, %v161_v63 }
  0x61   :  { %1173 = vmatpush.msra.mxu2 %v11505_v58  ;;  %479 = vmatpush.msra.mxu0 %v11505_v58 }
  0x62   :  { %1174 = vmatmul.f32.vlgmr.msra.gmra.mxu2 %v858_v62  ;;  %480 = vmatmul.f32.vlgmr.msra.gmra.mxu0 %v159_v61  ;;  %v163_v61 = vld [vmem:[%s11491_s0 + $0x20] sm:$0xff] }
  0x63   :  { %v862_v62 = vmul.f32 %v163_v61, %v163_v61 }
  0x66   :  { %5727 = vmatmul.msk.f32.gmra.mxu3 %vm279_vm1, %v863_v56  ;;  %5666 = vmatmul.msk.f32.gmra.mxu1 %vm279_vm1, %v164_v57  ;;  %v168_v56 = vld [vmem:[%s11491_s0 + $0x48] sm:$0xff] }
  0x67   :  { %v867_v57 = vmul.f32 %v168_v56, %v168_v56 }
  0x6a   :  { %1177 = vmatmul.f32.gmra.mxu2 %v860_v60  ;;  %483 = vmatmul.f32.gmra.mxu0 %v161_v63  ;;  %v165_v63 = vld [vmem:[%s11491_s0 + $0x30] sm:$0xff] }
  0x6b   :  { %v864_v60 = vmul.f32 %v165_v63, %v165_v63 }
  0x6e   :  { %5728 = vmatmul.msk.f32.gmra.mxu3 %vm279_vm1, %v865_v54  ;;  %5667 = vmatmul.msk.f32.gmra.mxu1 %vm279_vm1, %v166_v59  ;;  %v170_v54 = vld [vmem:[%s11491_s0 + $0x58] sm:$0xff] }
  0x6f   :  { %v869_v59 = vmul.f32 %v170_v54, %v170_v54 }
  0x72   :  { %1180 = vmatmul.f32.gmra.mxu2 %v862_v62  ;;  %486 = vmatmul.f32.gmra.mxu0 %v163_v61  ;;  %v167_v61 = vld [vmem:[%s11491_s0 + $0x40] sm:$0xff] }
  0x73   :  { %v866_v62 = vmul.f32 %v167_v61, %v167_v61 }
  0x76   :  { %5729 = vmatmul.msk.f32.gmra.mxu3 %vm279_vm1, %v867_v57  ;;  %5668 = vmatmul.msk.f32.gmra.mxu1 %vm279_vm1, %v168_v56  ;;  %v172_v56 = vld [vmem:[%s11491_s0 + $0x68] sm:$0xff] }
  0x77   :  { %v871_v57 = vmul.f32 %v172_v56, %v172_v56 }
  0x7a   :  { %1183 = vmatmul.f32.gmra.mxu2 %v864_v60  ;;  %489 = vmatmul.f32.gmra.mxu0 %v165_v63  ;;  %v169_v63 = vld [vmem:[%s11491_s0 + $0x50] sm:$0xff] }
  0x7b   :  { %v868_v60 = vmul.f32 %v169_v63, %v169_v63 }
  0x7e   :  { %5730 = vmatmul.msk.f32.gmra.mxu3 %vm279_vm1, %v869_v59  ;;  %5669 = vmatmul.msk.f32.gmra.mxu1 %vm279_vm1, %v170_v54  ;;  %v174_v54 = vld [vmem:[%s11491_s0 + $0x78] sm:$0xff] }
  0x7f   :  { %v873_v59 = vmul.f32 %v174_v54, %v174_v54 }
  0x82   :  { %1186 = vmatmul.f32.gmra.mxu2 %v866_v62  ;;  %492 = vmatmul.f32.gmra.mxu0 %v167_v61  ;;  %v171_v61 = vld [vmem:[%s11491_s0 + $0x60] sm:$0xff] }
  0x83   :  { %v870_v62 = vmul.f32 %v171_v61, %v171_v61 }
  0x86   :  { %5731 = vmatmul.msk.f32.gmra.mxu3 %vm279_vm1, %v871_v57  ;;  %5670 = vmatmul.msk.f32.gmra.mxu1 %vm279_vm1, %v172_v56  ;;  %v176_v56 = vld [vmem:[%s11491_s0 + $0x88] sm:$0xff] }
  0x87   :  { %v875_v57 = vmul.f32 %v176_v56, %v176_v56 }
  0x8a   :  { %1189 = vmatmul.f32.gmra.mxu2 %v868_v60  ;;  %495 = vmatmul.f32.gmra.mxu0 %v169_v63  ;;  %v173_v63 = vld [vmem:[%s11491_s0 + $0x70] sm:$0xff] }
  0x8b   :  { %v872_v60 = vmul.f32 %v173_v63, %v173_v63 }
  0x8e   :  { %5732 = vmatmul.msk.f32.gmra.mxu3 %vm279_vm1, %v873_v59  ;;  %5671 = vmatmul.msk.f32.gmra.mxu1 %vm279_vm1, %v174_v54  ;;  %v178_v54 = vld [vmem:[%s11491_s0 + $0x98] sm:$0xff] }
  0x8f   :  { %v877_v59 = vmul.f32 %v178_v54, %v178_v54 }
  0x92   :  { %1192 = vmatmul.f32.gmra.mxu2 %v870_v62  ;;  %498 = vmatmul.f32.gmra.mxu0 %v171_v61  ;;  %v175_v61 = vld [vmem:[%s11491_s0 + $0x80] sm:$0xff] }
  0x93   :  { %v874_v62 = vmul.f32 %v175_v61, %v175_v61 }
  0x96   :  { %5733 = vmatmul.msk.f32.gmra.mxu3 %vm279_vm1, %v875_v57  ;;  %5672 = vmatmul.msk.f32.gmra.mxu1 %vm279_vm1, %v176_v56  ;;  %v180_v56 = vld [vmem:[%s11491_s0 + $0xa8] sm:$0xff] }
  0x97   :  { %v879_v57 = vmul.f32 %v180_v56, %v180_v56 }
  0x9a   :  { %1195 = vmatmul.f32.gmra.mxu2 %v872_v60  ;;  %501 = vmatmul.f32.gmra.mxu0 %v173_v63  ;;  %v177_v63 = vld [vmem:[%s11491_s0 + $0x90] sm:$0xff] }
  0x9b   :  { %v876_v60 = vmul.f32 %v177_v63, %v177_v63 }
  0x9e   :  { %5734 = vmatmul.msk.f32.gmra.mxu3 %vm279_vm1, %v877_v59  ;;  %5673 = vmatmul.msk.f32.gmra.mxu1 %vm279_vm1, %v178_v54  ;;  %v182_v54 = vld [vmem:[%s11491_s0 + $0xb8] sm:$0xff] }
  0x9f   :  { %v881_v59 = vmul.f32 %v182_v54, %v182_v54 }
  0xa2   :  { %1198 = vmatmul.f32.gmra.mxu2 %v874_v62  ;;  %504 = vmatmul.f32.gmra.mxu0 %v175_v61  ;;  %v179_v61 = vld [vmem:[%s11491_s0 + $0xa0] sm:$0xff] }
  0xa3   :  { %v878_v62 = vmul.f32 %v179_v61, %v179_v61 }
  0xa6   :  { %5735 = vmatmul.msk.f32.gmra.mxu3 %vm279_vm1, %v879_v57  ;;  %5674 = vmatmul.msk.f32.gmra.mxu1 %vm279_vm1, %v180_v56  ;;  %v184_v56 = vld [vmem:[%s11491_s0 + $0xc8] sm:$0xff] }
  0xa7   :  { %v883_v57 = vmul.f32 %v184_v56, %v184_v56 }
  0xaa   :  { %1201 = vmatmul.f32.gmra.mxu2 %v876_v60  ;;  %507 = vmatmul.f32.gmra.mxu0 %v177_v63  ;;  %v181_v63 = vld [vmem:[%s11491_s0 + $0xb0] sm:$0xff] }
  0xab   :  { %v880_v60 = vmul.f32 %v181_v63, %v181_v63 }
  0xae   :  { %5736 = vmatmul.msk.f32.gmra.mxu3 %vm279_vm1, %v881_v59  ;;  %5675 = vmatmul.msk.f32.gmra.mxu1 %vm279_vm1, %v182_v54  ;;  %v186_v54 = vld [vmem:[%s11491_s0 + $0xd8] sm:$0xff] }
  0xaf   :  { %v885_v59 = vmul.f32 %v186_v54, %v186_v54 }
  0xb2   :  { %1204 = vmatmul.f32.gmra.mxu2 %v878_v62  ;;  %510 = vmatmul.f32.gmra.mxu0 %v179_v61  ;;  %v183_v61 = vld [vmem:[%s11491_s0 + $0xc0] sm:$0xff] }
  0xb3   :  { %v882_v62 = vmul.f32 %v183_v61, %v183_v61 }
  0xb6   :  { %5737 = vmatmul.msk.f32.gmra.mxu3 %vm279_vm1, %v883_v57  ;;  %5676 = vmatmul.msk.f32.gmra.mxu1 %vm279_vm1, %v184_v56  ;;  %v188_v56 = vld [vmem:[%s11491_s0 + $0xe8] sm:$0xff] }
  0xb7   :  { %v887_v57 = vmul.f32 %v188_v56, %v188_v56 }
  0xba   :  { %1207 = vmatmul.f32.gmra.mxu2 %v880_v60  ;;  %513 = vmatmul.f32.gmra.mxu0 %v181_v63  ;;  %v185_v63 = vld [vmem:[%s11491_s0 + $0xd0] sm:$0xff] }
  0xbb   :  { %v884_v60 = vmul.f32 %v185_v63, %v185_v63 }
  0xbe   :  { %5738 = vmatmul.msk.f32.gmra.mxu3 %vm279_vm1, %v885_v59  ;;  %5677 = vmatmul.msk.f32.gmra.mxu1 %vm279_vm1, %v186_v54  ;;  %v190_v54 = vld [vmem:[%s11491_s0 + $0xf8] sm:$0xff] }
  0xbf   :  { %v889_v59 = vmul.f32 %v190_v54, %v190_v54 }
  0xc2   :  { %1210 = vmatmul.f32.gmra.mxu2 %v882_v62  ;;  %516 = vmatmul.f32.gmra.mxu0 %v183_v61  ;;  %v187_v61 = vld [vmem:[%s11491_s0 + $0xe0] sm:$0xff] }
  0xc3   :  { %v886_v62 = vmul.f32 %v187_v61, %v187_v61 }
  0xc6   :  { %5739 = vmatmul.msk.f32.gmra.mxu3 %vm279_vm1, %v887_v57  ;;  %5678 = vmatmul.msk.f32.gmra.mxu1 %vm279_vm1, %v188_v56  ;;  %v192_v56 = vld [vmem:[%s11491_s0 + $0x108] sm:$0xff] }
  0xc7   :  { %v891_v57 = vmul.f32 %v192_v56, %v192_v56 }
  0xca   :  { %1213 = vmatmul.f32.gmra.mxu2 %v884_v60  ;;  %519 = vmatmul.f32.gmra.mxu0 %v185_v63  ;;  %v189_v63 = vld [vmem:[%s11491_s0 + $0xf0] sm:$0xff] }
  0xcb   :  { %v888_v58 = vmul.f32 %v189_v63, %v189_v63 }
  0xce   :  { %5740 = vmatmul.msk.f32.gmra.mxu3 %vm279_vm1, %v889_v59  ;;  %5679 = vmatmul.msk.f32.gmra.mxu1 %vm279_vm1, %v190_v54  ;;  %v194_v54 = vld [vmem:[%s11491_s0 + $0x118] sm:$0xff] }
  0xd2   :  { %1216 = vmatmul.f32.gmra.mxu2 %v886_v62  ;;  %522 = vmatmul.f32.gmra.mxu0 %v187_v61  ;;  %v893_v62 = vmul.f32 %v194_v54, %v194_v54  ;;  %v191_v61 = vld [vmem:[%s11491_s0 + $0x100] sm:$0xff] }
  0xd3   :  { %v678_v60 = vpop.f32.mrf.mxu1  ;;  %v890_v52 = vmul.f32 %v191_v61, %v191_v61 }
  0xd6   :  { %5741 = vmatmul.msk.f32.gmra.mxu3 %vm279_vm1, %v891_v57  ;;  %5680 = vmatmul.msk.f32.gmra.mxu1 %vm279_vm1, %v192_v56  ;;  %v196_v56 = vld [vmem:[%s11491_s0 + $0x128] sm:$0xff] }
  0xd9   :  { %v1372_v59 = vpop.f32.mrf.mxu3 }
  0xda   :  { %1219 = vmatmul.f32.gmra.mxu2 %v888_v58  ;;  %525 = vmatmul.f32.gmra.mxu0 %v189_v63  ;;  %v895_v63 = vmul.f32 %v196_v56, %v196_v56 }
  0xdb   :  { %v681_v53 = vpop.f32.mrf.mxu1 }
  0xde   :  { %5742 = vmatmul.msk.f32.gmra.mxu3 %vm279_vm1, %v893_v62  ;;  %5681 = vmatmul.msk.f32.gmra.mxu1 %vm279_vm1, %v194_v54  ;;  %v11517_v62 = vmov 0  }
  0xdf   :  { %v481_v57 = vpop.f32.mrf.mxu0  ;;  %5856 = vset.pattern.permute.xlu0 %v11517_v62  ;;  %5857 = vset.pattern.permute.xlu1 %v11517_v62 }
  0xe0   :  { %v679_v55 = vadd.f32 %v678_v60, %v481_v57  ;;  %5858 = vset.pattern.permute.xlu2 %v11517_v62  ;;  %v892_v60 = vmul.f32 %v193_v49, %v193_v49  ;;  %v198_v57 = vld [vmem:[%s11491_s0 + $0x138] sm:$0xff] }
  0xe1   :  { %v1375_v50 = vpop.f32.mrf.mxu3  ;;  %v897_v47 = vmul.f32 %v198_v57, %v198_v57 }
  0xe2   :  { %1222 = vmatmul.f32.gmra.mxu2 %v890_v52  ;;  %v6817_v58 = vmul.f32 0.0051020407, %v679_v55  ;;  %528 = vmatmul.f32.gmra.mxu0 %v191_v61 }
  0xe3   :  { %v684_v48 = vpop.f32.mrf.mxu1 }
  0xe4   :  { %v1672_v52 = vmul.f32 %v6817_v58, %v6817_v58 }
  0xe5   :  { %v1175_v54 = vpop.f32.mrf.mxu2 }
  0xe6   :  { %v1373_v55 = vadd.f32 %v1372_v59, %v1175_v54  ;;  %5743 = vmatmul.msk.f32.gmra.mxu3 %vm279_vm1, %v895_v63  ;;  %5682 = vmatmul.msk.f32.gmra.mxu1 %vm279_vm1, %v196_v56  ;;  %v195_v59 = vld [vmem:[%s11491_s0 + $0x120] sm:$0xff] }
  0xe7   :  { %v484_v61 = vpop.f32.mrf.mxu0 }
  0xe8   :  { %v1612_v51 = vmul.f32 0.0051020407, %v1373_v55  ;;  %v682_v46 = vadd.f32 %v681_v53, %v484_v61  ;;  %v894_v61 = vmul.f32 %v195_v59, %v195_v59 }
  0xe9   :  { %v1378_v45 = vpop.f32.mrf.mxu3 }
  0xea   :  { %v1732_v44 = vsub.f32 %v1612_v51, %v1672_v52  ;;  %1225 = vmatmul.f32.gmra.mxu2 %v892_v60  ;;  %v6832_v62 = vmul.f32 0.0051020407, %v682_v46  ;;  %531 = vmatmul.f32.gmra.mxu0 %v193_v49  ;;  %v200_v49 = vld [vmem:[%s11491_s0 + $0x148] sm:$0xff] }
  0xeb   :  { %v687_v63 = vpop.f32.mrf.mxu1 }
  0xec   :  { %v1792_v56 = vmax.f32 %v1732_v44, 0.0  ;;  %v1673_v55 = vmul.f32 %v6832_v62, %v6832_v62 }
  0xed   :  { %v1178_v54 = vpop.f32.mrf.mxu2 }
  0xee   :  { %v6837_v42 = vadd.f32 1e-05, %v1792_v56  ;;  %v1376_v53 = vadd.f32 %v1375_v50, %v1178_v54  ;;  %5744 = vmatmul.msk.f32.gmra.mxu3 %vm279_vm1, %v897_v47  ;;  %5683 = vmatmul.msk.f32.gmra.mxu1 %vm279_vm1, %v198_v57  ;;  %v899_v50 = vmul.f32 %v200_v49, %v200_v49  ;;  %v197_v47 = vld [vmem:[%s11491_s0 + $0x130] sm:$0xff] }
  0xef   :  { %v487_v46 = vpop.f32.mrf.mxu0 }
  0xf0   :  { %5946 = vrsqrt.f32 %v6837_v42  ;;  %v1613_v44 = vmul.f32 0.0051020407, %v1376_v53  ;;  %v685_v51 = vadd.f32 %v684_v48, %v487_v46  ;;  %v202_v46 = vld [vmem:[%s11491_s0 + $0x158] sm:$0xff]  ;;  %vm1978_vm3 = vweird.f32 %v6837_v42 }
  0xf1   :  { %v1381_v52 = vpop.f32.mrf.mxu3 }
  0xf2   :  { %v1733_v60 = vsub.f32 %v1613_v44, %v1673_v55  ;;  %1228 = vmatmul.f32.gmra.mxu2 %v894_v61  ;;  %v6847_v56 = vmul.f32 0.0051020407, %v685_v51  ;;  %534 = vmatmul.f32.gmra.mxu0 %v195_v59  ;;  %v896_v55 = vmul.f32 %v197_v47, %v197_v47 }
  0xf3   :  { %v690_v57 = vpop.f32.mrf.mxu1 }
  0xf4   :  { %v1793_v54 = vmax.f32 %v1733_v60, 0.0  ;;  %v1674_v48 = vmul.f32 %v6847_v56, %v6847_v56 }
  0xf5   :  { %v1181_v41 = vpop.f32.mrf.mxu2 }
  0xf6   :  { %v5947_v40 = vpop.eup %5946  ;;  %v6852_v43 = vadd.f32 1e-05, %v1793_v54  ;;  %v1379_v53 = vadd.f32 %v1378_v45, %v1181_v41  ;;  %5745 = vmatmul.msk.f32.gmra.mxu3 %vm279_vm1, %v899_v50  ;;  %5684 = vmatmul.msk.f32.gmra.mxu1 %vm279_vm1, %v200_v49  ;;  %v901_v45 = vmul.f32 %v202_v46, %v202_v46  ;;  %v199_v49 = vld [vmem:[%s11491_s0 + $0x140] sm:$0xff] }
  0xf7   :  { %v1973_v59 = vmul.f32 %v5947_v40, %v6837_v42  ;;  %v490_v61 = vpop.f32.mrf.mxu0  ;;  %vm1979_vm2 = vweird.f32 %v5947_v40 }
  0xf8   :  { %5948 = vrsqrt.f32 %v6852_v43  ;;  %v1614_v44 = vmul.f32 0.0051020407, %v1379_v53  ;;  %v688_v51 = vadd.f32 %v687_v63, %v490_v61  ;;  %vm1980_vm4 = vmor %vm1978_vm3, %vm1979_vm2  ;;  %vm1988_vm6 = vweird.f32 %v6852_v43 }
  0xf9   :  { %v1974_v60 = vmul.f32 %v5947_v40, %v1973_v59  ;;  %v1384_v54 = vpop.f32.mrf.mxu3  ;;  %v898_v59 = vmul.f32 %v199_v49, %v199_v49 }
  0xfa   :  { %v1734_v38 = vsub.f32 %v1614_v44, %v1674_v48  ;;  %1231 = vmatmul.f32.gmra.mxu2 %v896_v55  ;;  %v6863_v41 = vmul.f32 0.0051020407, %v688_v51  ;;  %537 = vmatmul.f32.gmra.mxu0 %v197_v47 }
  0xfb   :  { %v1975_v50 = vmul.f32 0.5, %v1974_v60  ;;  %v693_v37 = vpop.f32.mrf.mxu1 }
  0xfc   :  { %v1794_v36 = vmax.f32 %v1734_v38, 0.0  ;;  %v1675_v48 = vmul.f32 %v6863_v41, %v6863_v41  ;;  %v1852_v38 = vld [vmem:[%s11493_s2] sm:$0xff] }
  0xfd   :  { %v1184_v39 = vpop.f32.mrf.mxu2  ;;  %v1976_v34 = vsub.f32 1.5, %v1975_v50 }
  0xfe   :  { %v5949_v53 = vpop.eup %5948  ;;  %v6868_v63 = vadd.f32 1e-05, %v1794_v36  ;;  %v1382_v55 = vadd.f32 %v1381_v52, %v1184_v39  ;;  %5746 = vmatmul.msk.f32.gmra.mxu3 %vm279_vm1, %v901_v45  ;;  %5685 = vmatmul.msk.f32.gmra.mxu1 %vm279_vm1, %v202_v46  ;;  %v204_v36 = vld [vmem:[%s11491_s0 + $0x168] sm:$0xff] }
  0xff   :  { %v1983_v47 = vmul.f32 %v5949_v53, %v6852_v43  ;;  %v493_v61 = vpop.f32.mrf.mxu0  ;;  %v1977_v44 = vmul.f32 %v5947_v40, %v1976_v34  ;;  %v903_v42 = vmul.f32 %v204_v36, %v204_v36  ;;  %vm1989_vm5 = vweird.f32 %v5949_v53  ;;  %v203_v43 = vld [vmem:[%s11491_s0 + $0x160] sm:$0xff] }
 0x100   :  { %5950 = vrsqrt.f32 %v6868_v63  ;;  %v1615_v39 = vmul.f32 0.0051020407, %v1382_v55  ;;  %v691_v52 = vadd.f32 %v690_v57, %v493_v61  ;;  %vm1990_vm7 = vmor %vm1988_vm6, %vm1989_vm5  ;;  %vm1998_vm9 = vweird.f32 %v6868_v63 }
 0x101   :  { %v1981_v46 = vsel %vm1980_vm4, %v5947_v40, %v1977_v44  ;;  %v1984_v51 = vmul.f32 %v5949_v53, %v1983_v47  ;;  %v1387_v60 = vpop.f32.mrf.mxu3  ;;  %v900_v47 = vmul.f32 %v201_v33, %v201_v33 }
 0x102   :  { %v1735_v45 = vsub.f32 %v1615_v39, %v1675_v48  ;;  %1234 = vmatmul.f32.gmra.mxu2 %v898_v59  ;;  %v6884_v50 = vmul.f32 0.0051020407, %v691_v52  ;;  %v2572_v34 = vmul.f32 %v1981_v46, %v1852_v38  ;;  %540 = vmatmul.f32.gmra.mxu0 %v199_v49  ;;  %v206_v38 = vld [vmem:[%s11491_s0 + $0x178] sm:$0xff]  ;;  %v1853_v39 = vld [vmem:[%s11493_s2 + $0x8] sm:$0xff] }
 0x103   :  { %v1985_v32 = vmul.f32 0.5, %v1984_v51  ;;  %v696_v35 = vpop.f32.mrf.mxu1 }
 0x104   :  { %v1795_v55 = vmax.f32 %v1735_v45, 0.0  ;;  %2994 = vperm.xlu0 %5856, %v2572_v34   ;;  %v1676_v59 = vmul.f32 %v6884_v50, %v6884_v50 }
 0x105   :  { %v1187_v57 = vpop.f32.mrf.mxu2  ;;  %v1986_v61 = vsub.f32 1.5, %v1985_v32 }
 0x106   :  { %v6889_v40 = vpop.eup %5950  ;;  %v6891_v48 = vadd.f32 1e-05, %v1795_v55  ;;  %v1385_v49 = vadd.f32 %v1384_v54, %v1187_v57  ;;  %5747 = vmatmul.msk.f32.gmra.mxu3 %vm279_vm1, %v903_v42  ;;  %5686 = vmatmul.msk.f32.gmra.mxu1 %vm279_vm1, %v204_v36  ;;  %v905_v42 = vmul.f32 %v206_v38, %v206_v38  ;;  %v2632_v55 = vmul.f32 %v2572_v34, %v6817_v58 }
 0x107   :  { %v1993_v32 = vmul.f32 %v6889_v40, %v6868_v63  ;;  %v496_v44 = vpop.f32.mrf.mxu0  ;;  %v1987_v52 = vmul.f32 %v5949_v53, %v1986_v61  ;;  %vm1999_vm8 = vweird.f32 %v6889_v40 }
 0x108   :  { %5952 = vrsqrt.f32 %v6891_v48  ;;  %v1616_v54 = vmul.f32 0.0051020407, %v1385_v49  ;;  %v694_v46 = vadd.f32 %v693_v37, %v496_v44  ;;  %vm2000_vm10 = vmor %vm1998_vm9, %vm1999_vm8  ;;  %vm2008_vm12 = vweird.f32 %v6891_v48 }
 0x109   :  { %v1991_v36 = vsel %vm1990_vm7, %v5949_v53, %v1987_v52  ;;  %v1994_v51 = vmul.f32 %v6889_v40, %v1993_v32  ;;  %v1390_v45 = vpop.f32.mrf.mxu3 }
 0x10a   :  { %v1736_v57 = vsub.f32 %v1616_v54, %v1676_v59  ;;  %1237 = vmatmul.f32.gmra.mxu2 %v900_v47  ;;  %v6910_v30 = vmul.f32 0.0051020407, %v694_v46  ;;  %v2573_v61 = vmul.f32 %v1991_v36, %v1853_v39  ;;  %543 = vmatmul.f32.gmra.mxu0 %v201_v33  ;;  %v902_v47 = vmul.f32 %v203_v43, %v203_v43  ;;  %v208_v39 = vld [vmem:[%s11491_s0 + $0x188] sm:$0xff]  ;;  %v1854_v46 = vld [vmem:[%s11493_s2 + $0x10] sm:$0xff] }
 0x10b   :  { %v1995_v37 = vmul.f32 0.5, %v1994_v51  ;;  %v699_v49 = vpop.f32.mrf.mxu1 }
 0x10c   :  { %v1796_v44 = vmax.f32 %v1736_v57, 0.0  ;;  %2752 = vrot.lane.b32.xlu0 %v2632_v55, %s6274_s29  ;;  %2999 = vperm.xlu1 %5857, %v2573_v61   ;;  %v1677_v33 = vmul.f32 %v6910_v30, %v6910_v30  ;;  %v907_v57 = vmul.f32 %v208_v39, %v208_v39 }
 0x10d   :  { %v1190_v53 = vpop.f32.mrf.mxu2  ;;  %v1996_v32 = vsub.f32 1.5, %v1995_v37  ;;  %v2633_v37 = vmul.f32 %v2573_v61, %v6832_v62 }
 0x10e   :  { %v6917_v58 = vpop.eup %5952  ;;  %v6919_v34 = vadd.f32 1e-05, %v1796_v44  ;;  %v1388_v59 = vadd.f32 %v1387_v60, %v1190_v53  ;;  %5748 = vmatmul.msk.f32.gmra.mxu3 %vm279_vm1, %v905_v42  ;;  %5687 = vmatmul.msk.f32.gmra.mxu1 %vm279_vm1, %v206_v38 }
 0x10f   :  { %v2003_v52 = vmul.f32 %v6917_v58, %v6891_v48  ;;  %v499_v54 = vpop.f32.mrf.mxu0  ;;  %v1997_v36 = vmul.f32 %v6889_v40, %v1996_v32  ;;  %vm2009_vm11 = vweird.f32 %v6917_v58 }
 0x110   :  { %5954 = vrsqrt.f32 %v6919_v34  ;;  %v1617_v60 = vmul.f32 0.0051020407, %v1388_v59  ;;  %v697_v38 = vadd.f32 %v696_v35, %v499_v54  ;;  %v205_v35 = vld [vmem:[%s11491_s0 + $0x170] sm:$0xff]  ;;  %vm2010_vm13 = vmor %vm2008_vm12, %vm2009_vm11  ;;  %vm2018_vm14 = vweird.f32 %v6919_v34 }
 0x111   :  { %v2004_v51 = vmul.f32 %v6917_v58, %v2003_v52  ;;  %v2001_v42 = vsel %vm2000_vm10, %v6889_v40, %v1997_v36  ;;  %v1393_v55 = vpop.f32.mrf.mxu3 }
 0x112   :  { %v1737_v44 = vsub.f32 %v1617_v60, %v1677_v33  ;;  %1240 = vmatmul.f32.gmra.mxu2 %v902_v47  ;;  %v6941_v53 = vmul.f32 0.0051020407, %v697_v38  ;;  %v2574_v63 = vmul.f32 %v2001_v42, %v1854_v46  ;;  %546 = vmatmul.f32.gmra.mxu0 %v203_v43  ;;  %v904_v46 = vmul.f32 %v205_v35, %v205_v35  ;;  %v210_v38 = vld [vmem:[%s11491_s0 + $0x198] sm:$0xff] }
 0x113   :  { %v2005_v32 = vmul.f32 0.5, %v2004_v51  ;;  %v702_v59 = vpop.f32.mrf.mxu1 }
 0x114   :  { %v1797_v54 = vmax.f32 %v1737_v44, 0.0  ;;  %2754 = vrot.lane.b32.xlu0 %v2633_v37, %s6274_s29  ;;  %3004 = vperm.xlu2 %5858, %v2574_v63   ;;  %v2634_v40 = vmul.f32 %v2574_v63, %v6847_v56  ;;  %v1678_v43 = vmul.f32 %v6941_v53, %v6941_v53  ;;  %v909_v63 = vmul.f32 %v210_v38, %v210_v38 }
 0x115   :  { %v1193_v52 = vpop.f32.mrf.mxu2  ;;  %v2006_v62 = vsub.f32 1.5, %v2005_v32 }
 0x116   :  { %v5955_v61 = vpop.eup %5954  ;;  %v6949_v33 = vadd.f32 1e-05, %v1797_v54  ;;  %v1391_v47 = vadd.f32 %v1390_v45, %v1193_v52  ;;  %2756 = vrot.lane.b32.xlu1 %v2634_v40, %s6274_s29  ;;  %5749 = vmatmul.msk.f32.gmra.mxu3 %vm279_vm1, %v907_v57  ;;  %v1855_v57 = vld [vmem:[%s11493_s2 + $0x18] sm:$0xff] }
 0x117   :  { %v2013_v36 = vmul.f32 %v5955_v61, %v6919_v34  ;;  %v502_v60 = vpop.f32.mrf.mxu0  ;;  %v2007_v56 = vmul.f32 %v6917_v58, %v2006_v62  ;;  %5688 = vmatmul.msk.f32.gmra.mxu1 %vm279_vm1, %v208_v39  ;;  %vm2019_vm15 = vweird.f32 %v5955_v61 }
 0x118   :  { %5956 = vrsqrt.f32 %v6949_v33  ;;  %v1618_v45 = vmul.f32 0.0051020407, %v1391_v47  ;;  %v700_v51 = vadd.f32 %v699_v49, %v502_v60  ;;  %v207_v49 = vld [vmem:[%s11491_s0 + $0x180] sm:$0xff]  ;;  %vm2020_vm2 = vmor %vm2018_vm14, %vm2019_vm15  ;;  %vm2028_vm3 = vweird.f32 %v6949_v33 }
 0x119   :  { %v2014_v42 = vmul.f32 %v5955_v61, %v2013_v36  ;;  %v2011_v48 = vsel %vm2010_vm13, %v6917_v58, %v2007_v56  ;;  %v1396_v37 = vpop.f32.mrf.mxu3  ;;  %v906_v36 = vmul.f32 %v207_v49, %v207_v49 }
 0x11a   :  { %v1738_v39 = vsub.f32 %v1618_v45, %v1678_v43  ;;  %1243 = vmatmul.f32.gmra.mxu2 %v904_v46  ;;  %v6969_v44 = vmul.f32 0.0051020407, %v700_v51  ;;  %549 = vmatmul.f32.gmra.mxu0 %v205_v35  ;;  %v2575_v52 = vmul.f32 %v2011_v48, %v1855_v57  ;;  %v1856_v45 = vld [vmem:[%s11493_s2 + $0x20] sm:$0xff] }
 0x11b   :  { %v2015_v32 = vmul.f32 0.5, %v2014_v42  ;;  %v705_v54 = vpop.f32.mrf.mxu1  ;;  %v212_v42 = vld [vmem:[%s11491_s0 + $0x1a8] sm:$0xff] }
 0x11c   :  { %v1798_v40 = vmax.f32 %v1738_v39, 0.0  ;;  %v1679_v35 = vmul.f32 %v6969_v44, %v6969_v44  ;;  %v2635_v34 = vmul.f32 %v2575_v52, %v6863_v41  ;;  %v214_v41 = vld [vmem:[%s11491_s0 + $0x1b8] sm:$0xff] }
 0x11d   :  { %v1196_v62 = vpop.f32.mrf.mxu2  ;;  %v2016_v47 = vsub.f32 1.5, %v2015_v32 }
 0x11e   :  { %v5957_v58 = vpop.eup %5956  ;;  %v6975_v43 = vadd.f32 1e-05, %v1798_v40  ;;  %v1394_v46 = vadd.f32 %v1393_v55, %v1196_v62  ;;  %3009 = vperm.xlu1 %5857, %v2575_v52   ;;  %5750 = vmatmul.msk.f32.gmra.mxu3 %vm279_vm1, %v909_v63  ;;  %v911_v62 = vmul.f32 %v212_v42, %v212_v42 }
 0x11f   :  { %v2023_v60 = vmul.f32 %v5957_v58, %v6949_v33  ;;  %v505_v56 = vpop.f32.mrf.mxu0  ;;  %v2017_v51 = vmul.f32 %v5955_v61, %v2016_v47  ;;  %5689 = vmatmul.msk.f32.gmra.mxu1 %vm279_vm1, %v210_v38  ;;  %v209_v47 = vld [vmem:[%s11491_s0 + $0x190] sm:$0xff]  ;;  %vm2029_vm4 = vweird.f32 %v5957_v58 }
 0x120   :  { %5958 = vrsqrt.f32 %v6975_v43  ;;  %v1619_v55 = vmul.f32 0.0051020407, %v1394_v46  ;;  %v703_v57 = vadd.f32 %v702_v59, %v505_v56  ;;  %vm2030_vm5 = vmor %vm2028_vm3, %vm2029_vm4  ;;  %vm2038_vm6 = vweird.f32 %v6975_v43 }
 0x121   :  { %v2024_v48 = vmul.f32 %v5957_v58, %v2023_v60  ;;  %v2021_v39 = vsel %vm2020_vm2, %v5955_v61, %v2017_v51  ;;  %v1399_v63 = vpop.f32.mrf.mxu3  ;;  %v908_v51 = vmul.f32 %v209_v47, %v209_v47 }
 0x122   :  { %v1739_v32 = vsub.f32 %v1619_v55, %v1679_v35  ;;  %1246 = vmatmul.f32.gmra.mxu2 %v906_v36  ;;  %v6992_v40 = vmul.f32 0.0051020407, %v703_v57  ;;  %v2576_v38 = vmul.f32 %v2021_v39, %v1856_v45  ;;  %552 = vmatmul.f32.gmra.mxu0 %v207_v49  ;;  %v1857_v57 = vld [vmem:[%s11493_s2 + $0x28] sm:$0xff] }
 0x123   :  { %v2025_v46 = vmul.f32 0.5, %v2024_v48  ;;  %v708_v59 = vpop.f32.mrf.mxu1 }
 0x124   :  { %v1799_v56 = vmax.f32 %v1739_v32, 0.0  ;;  %3014 = vperm.xlu2 %5858, %v2576_v38   ;;  %v1680_v49 = vmul.f32 %v6992_v40, %v6992_v40 }
 0x125   :  { %v1199_v60 = vpop.f32.mrf.mxu2  ;;  %v2026_v61 = vsub.f32 1.5, %v2025_v46 }
 0x126   :  { %v5959_v35 = vpop.eup %5958  ;;  %v6999_v36 = vadd.f32 1e-05, %v1799_v56  ;;  %v1397_v45 = vadd.f32 %v1396_v37, %v1199_v60  ;;  %2758 = vrot.lane.b32.xlu1 %v2635_v34, %s6274_s29  ;;  %5751 = vmatmul.msk.f32.gmra.mxu3 %vm279_vm1, %v911_v62  ;;  %v913_v56 = vmul.f32 %v214_v41, %v214_v41 }
 0x127   :  { %v2033_v52 = vmul.f32 %v5959_v35, %v6975_v43  ;;  %v508_v55 = vpop.f32.mrf.mxu0  ;;  %v2027_v48 = vmul.f32 %v5957_v58, %v2026_v61  ;;  %5690 = vmatmul.msk.f32.gmra.mxu1 %vm279_vm1, %v212_v42  ;;  %v2636_v61 = vmul.f32 %v2576_v38, %v6884_v50  ;;  %vm2039_vm7 = vweird.f32 %v5959_v35 }
 0x128   :  { %5960 = vrsqrt.f32 %v6999_v36  ;;  %v1620_v37 = vmul.f32 0.0051020407, %v1397_v45  ;;  %v706_v39 = vadd.f32 %v705_v54, %v508_v55  ;;  %v211_v54 = vld [vmem:[%s11491_s0 + $0x1a0] sm:$0xff]  ;;  %v216_v55 = vld [vmem:[%s11491_s0 + $0x1c8] sm:$0xff]  ;;  %vm2040_vm8 = vmor %vm2038_vm6, %vm2039_vm7  ;;  %vm2048_vm9 = vweird.f32 %v6999_v36 }
 0x129   :  { %v2034_v32 = vmul.f32 %v5959_v35, %v2033_v52  ;;  %v2031_v62 = vsel %vm2030_vm5, %v5957_v58, %v2027_v48  ;;  %v1402_v46 = vpop.f32.mrf.mxu3 }
 0x12a   :  { %v1740_v34 = vsub.f32 %v1620_v37, %v1680_v49  ;;  %1249 = vmatmul.f32.gmra.mxu2 %v908_v51  ;;  %v7017_v60 = vmul.f32 0.0051020407, %v706_v39  ;;  %v2577_v29 = vmul.f32 %v2031_v62, %v1857_v57  ;;  %555 = vmatmul.f32.gmra.mxu0 %v209_v47  ;;  %v910_v47 = vmul.f32 %v211_v54, %v211_v54  ;;  %v1858_v37 = vld [vmem:[%s11493_s2 + $0x30] sm:$0xff] }
 0x12b   :  { %v2035_v42 = vmul.f32 0.5, %v2034_v32  ;;  %v711_v45 = vpop.f32.mrf.mxu1 }
 0x12c   :  { %v1800_v33 = vmax.f32 %v1740_v34, 0.0  ;;  %2760 = vrot.lane.b32.xlu2 %v2636_v61, %s6274_s29  ;;  %3019 = vperm.xlu0 %5856, %v2577_v29   ;;  %v1681_v50 = vmul.f32 %v7017_v60, %v7017_v60  ;;  %v915_v61 = vmul.f32 %v216_v55, %v216_v55 }
 0x12d   :  { %v1202_v58 = vpop.f32.mrf.mxu2  ;;  %v2036_v52 = vsub.f32 1.5, %v2035_v42 }
 0x12e   :  { %v5961_v49 = vpop.eup %5960  ;;  %v7025_v51 = vadd.f32 1e-05, %v1800_v33  ;;  %v1400_v38 = vadd.f32 %v1399_v63, %v1202_v58  ;;  %5752 = vmatmul.msk.f32.gmra.mxu3 %vm279_vm1, %v913_v56  ;;  %v2637_v58 = vmul.f32 %v2577_v29, %v6910_v30 }
 0x12f   :  { %v2043_v57 = vmul.f32 %v5961_v49, %v6999_v36  ;;  %v511_v48 = vpop.f32.mrf.mxu0  ;;  %v2037_v39 = vmul.f32 %v5959_v35, %v2036_v52  ;;  %5691 = vmatmul.msk.f32.gmra.mxu1 %vm279_vm1, %v214_v41  ;;  %vm2049_vm10 = vweird.f32 %v5961_v49 }
 0x130   :  { %5962 = vrsqrt.f32 %v7025_v51  ;;  %v1621_v63 = vmul.f32 0.0051020407, %v1400_v38  ;;  %v709_v32 = vadd.f32 %v708_v59, %v511_v48  ;;  %v213_v59 = vld [vmem:[%s11491_s0 + $0x1b0] sm:$0xff]  ;;  %vm2050_vm11 = vmor %vm2048_vm9, %vm2049_vm10  ;;  %vm2058_vm12 = vweird.f32 %v7025_v51 }
 0x131   :  { %v2044_v62 = vmul.f32 %v5961_v49, %v2043_v57  ;;  %v2041_v56 = vsel %vm2040_vm8, %v5959_v35, %v2037_v39  ;;  %v1405_v34 = vpop.f32.mrf.mxu3  ;;  %v912_v48 = vmul.f32 %v213_v59, %v213_v59  ;;  %v1859_v39 = vld [vmem:[%s11493_s2 + $0x38] sm:$0xff] }
 0x132   :  { %v1741_v42 = vsub.f32 %v1621_v63, %v1681_v50  ;;  %1252 = vmatmul.f32.gmra.mxu2 %v910_v47  ;;  %v7042_v33 = vmul.f32 0.0051020407, %v709_v32  ;;  %v2578_v52 = vmul.f32 %v2041_v56, %v1858_v37  ;;  %558 = vmatmul.f32.gmra.mxu0 %v211_v54  ;;  %v218_v32 = vld [vmem:[%s11491_s0 + $0x1d8] sm:$0xff] }
 0x133   :  { %v2045_v41 = vmul.f32 0.5, %v2044_v62  ;;  %v714_v38 = vpop.f32.mrf.mxu1 }
 0x134   :  { %v1801_v43 = vmax.f32 %v1741_v42, 0.0  ;;  %2762 = vrot.lane.b32.xlu2 %v2637_v58, %s6274_s29  ;;  %3024 = vperm.xlu1 %5857, %v2578_v52   ;;  %v2638_v35 = vmul.f32 %v2578_v52, %v6941_v53  ;;  %v1682_v54 = vmul.f32 %v7042_v33, %v7042_v33 }
 0x135   :  { %v1205_v50 = vpop.f32.mrf.mxu2  ;;  %v2046_v47 = vsub.f32 1.5, %v2045_v41  ;;  %v917_v41 = vmul.f32 %v218_v32, %v218_v32 }
 0x136   :  { %v5963_v29 = vpop.eup %5962  ;;  %v7051_v30 = vadd.f32 1e-05, %v1801_v43  ;;  %v1403_v57 = vadd.f32 %v1402_v46, %v1205_v50  ;;  %2764 = vrot.lane.b32.xlu0 %v2638_v35, %s6274_s29  ;;  %5753 = vmatmul.msk.f32.gmra.mxu3 %vm279_vm1, %v915_v61  ;;  %v215_v43 = vld [vmem:[%s11491_s0 + $0x1c0] sm:$0xff] }
 0x137   :  { %v2053_v37 = vmul.f32 %v5963_v29, %v7025_v51  ;;  %v514_v53 = vpop.f32.mrf.mxu0  ;;  %v2047_v63 = vmul.f32 %v5961_v49, %v2046_v47  ;;  %5692 = vmatmul.msk.f32.gmra.mxu1 %vm279_vm1, %v216_v55  ;;  %vm2059_vm13 = vweird.f32 %v5963_v29 }
 0x138   :  { %5964 = vrsqrt.f32 %v7051_v30  ;;  %v1622_v46 = vmul.f32 0.0051020407, %v1403_v57  ;;  %v712_v62 = vadd.f32 %v711_v45, %v514_v53  ;;  %vm2060_vm14 = vmor %vm2058_vm12, %vm2059_vm13  ;;  %vm2068_vm15 = vweird.f32 %v7051_v30 }
 0x139   :  { %v2054_v56 = vmul.f32 %v5963_v29, %v2053_v37  ;;  %v2051_v61 = vsel %vm2050_vm11, %v5961_v49, %v2047_v63  ;;  %v1408_v42 = vpop.f32.mrf.mxu3  ;;  %v914_v37 = vmul.f32 %v215_v43, %v215_v43 }
 0x13a   :  { %v1742_v58 = vsub.f32 %v1622_v46, %v1682_v54  ;;  %1255 = vmatmul.f32.gmra.mxu2 %v912_v48  ;;  %v7069_v52 = vmul.f32 0.0051020407, %v712_v62  ;;  %v2579_v55 = vmul.f32 %v2051_v61, %v1859_v39  ;;  %561 = vmatmul.f32.gmra.mxu0 %v213_v59  ;;  %v1860_v39 = vld [vmem:[%s11493_s2 + $0x40] sm:$0xff]  ;;  %v220_v46 = vld [vmem:[%s11491_s0 + $0x1e8] sm:$0xff] }
 0x13b   :  { %v2055_v35 = vmul.f32 0.5, %v2054_v56  ;;  %v717_v45 = vpop.f32.mrf.mxu1 }
 0x13c   :  { %v1802_v50 = vmax.f32 %v1742_v58, 0.0  ;;  %3029 = vperm.xlu2 %5858, %v2579_v55   ;;  %v2639_v36 = vmul.f32 %v2579_v55, %v6969_v44  ;;  %v1683_v59 = vmul.f32 %v7069_v52, %v7069_v52 }
 0x13d   :  { %v1208_v47 = vpop.f32.mrf.mxu2  ;;  %v2056_v49 = vsub.f32 1.5, %v2055_v35  ;;  %v919_v35 = vmul.f32 %v220_v46, %v220_v46 }
 0x13e   :  { %v5965_v54 = vpop.eup %5964  ;;  %v7076_v57 = vadd.f32 1e-05, %v1802_v50  ;;  %v1406_v48 = vadd.f32 %v1405_v34, %v1208_v47  ;;  %2766 = vrot.lane.b32.xlu1 %v2639_v36, %s6274_s29  ;;  %5754 = vmatmul.msk.f32.gmra.mxu3 %vm279_vm1, %v917_v41  ;;  %v217_v50 = vld [vmem:[%s11491_s0 + $0x1d0] sm:$0xff] }
 0x13f   :  { %v2063_v53 = vmul.f32 %v5965_v54, %v7051_v30  ;;  %v517_v44 = vpop.f32.mrf.mxu0  ;;  %v2057_v63 = vmul.f32 %v5963_v29, %v2056_v49  ;;  %5693 = vmatmul.msk.f32.gmra.mxu1 %vm279_vm1, %v218_v32  ;;  %vm2069_vm2 = vweird.f32 %v5965_v54 }
 0x140   :  { %5966 = vrsqrt.f32 %v7076_v57  ;;  %v1623_v34 = vmul.f32 0.0051020407, %v1406_v48  ;;  %v715_v62 = vadd.f32 %v714_v38, %v517_v44  ;;  %vm2070_vm3 = vmor %vm2068_vm15, %vm2069_vm2  ;;  %vm2078_vm4 = vweird.f32 %v7076_v57 }
 0x141   :  { %v2064_v56 = vmul.f32 %v5965_v54, %v2063_v53  ;;  %v2061_v61 = vsel %vm2060_vm14, %v5963_v29, %v2057_v63  ;;  %v1411_v58 = vpop.f32.mrf.mxu3  ;;  %v916_v53 = vmul.f32 %v217_v50, %v217_v50 }
 0x142   :  { %v1743_v55 = vsub.f32 %v1623_v34, %v1683_v59  ;;  %1258 = vmatmul.f32.gmra.mxu2 %v914_v37  ;;  %v7094_v41 = vmul.f32 0.0051020407, %v715_v62  ;;  %v2580_v32 = vmul.f32 %v2061_v61, %v1860_v39  ;;  %564 = vmatmul.f32.gmra.mxu0 %v215_v43  ;;  %v1861_v39 = vld [vmem:[%s11493_s2 + $0x48] sm:$0xff]  ;;  %v222_v34 = vld [vmem:[%s11491_s0 + $0x1f8] sm:$0xff] }
 0x143   :  { %v2065_v36 = vmul.f32 0.5, %v2064_v56  ;;  %v720_v38 = vpop.f32.mrf.mxu1 }
 0x144   :  { %v1803_v47 = vmax.f32 %v1743_v55, 0.0  ;;  %3034 = vperm.xlu0 %5856, %v2580_v32   ;;  %v2640_v51 = vmul.f32 %v2580_v32, %v6992_v40  ;;  %v1684_v43 = vmul.f32 %v7094_v41, %v7094_v41 }
 0x145   :  { %v1211_v49 = vpop.f32.mrf.mxu2  ;;  %v2066_v29 = vsub.f32 1.5, %v2065_v36  ;;  %v921_v36 = vmul.f32 %v222_v34, %v222_v34 }
 0x146   :  { %v5967_v59 = vpop.eup %5966  ;;  %v7101_v48 = vadd.f32 1e-05, %v1803_v47  ;;  %v1409_v37 = vadd.f32 %v1408_v42, %v1211_v49  ;;  %2768 = vrot.lane.b32.xlu2 %v2640_v51, %s6274_s29  ;;  %5755 = vmatmul.msk.f32.gmra.mxu3 %vm279_vm1, %v919_v35  ;;  %v219_v47 = vld [vmem:[%s11491_s0 + $0x1e0] sm:$0xff] }
 0x147   :  { %v2073_v44 = vmul.f32 %v5967_v59, %v7076_v57  ;;  %v520_v40 = vpop.f32.mrf.mxu0  ;;  %v2067_v63 = vmul.f32 %v5965_v54, %v2066_v29  ;;  %5694 = vmatmul.msk.f32.gmra.mxu1 %vm279_vm1, %v220_v46  ;;  %vm2079_vm5 = vweird.f32 %v5967_v59 }
 0x148   :  { %5968 = vrsqrt.f32 %v7101_v48  ;;  %v1624_v42 = vmul.f32 0.0051020407, %v1409_v37  ;;  %v718_v62 = vadd.f32 %v717_v45, %v520_v40  ;;  %vm2080_vm6 = vmor %vm2078_vm4, %vm2079_vm5  ;;  %vm2088_vm7 = vweird.f32 %v7101_v48 }
 0x149   :  { %v2074_v56 = vmul.f32 %v5967_v59, %v2073_v44  ;;  %v2071_v61 = vsel %vm2070_vm3, %v5965_v54, %v2067_v63  ;;  %v1414_v55 = vpop.f32.mrf.mxu3  ;;  %v918_v44 = vmul.f32 %v219_v47, %v219_v47 }
 0x14a   :  { %v1744_v32 = vsub.f32 %v1624_v42, %v1684_v43  ;;  %1261 = vmatmul.f32.gmra.mxu2 %v916_v53  ;;  %v7119_v35 = vmul.f32 0.0051020407, %v718_v62  ;;  %v2581_v46 = vmul.f32 %v2071_v61, %v1861_v39  ;;  %567 = vmatmul.f32.gmra.mxu0 %v217_v50  ;;  %v1862_v39 = vld [vmem:[%s11493_s2 + $0x50] sm:$0xff]  ;;  %v224_v42 = vld [vmem:[%s11491_s0 + $0x208] sm:$0xff] }
 0x14b   :  { %v2075_v51 = vmul.f32 0.5, %v2074_v56  ;;  %v723_v45 = vpop.f32.mrf.mxu1 }
 0x14c   :  { %v1804_v49 = vmax.f32 %v1744_v32, 0.0  ;;  %3039 = vperm.xlu1 %5857, %v2581_v46   ;;  %v2641_v30 = vmul.f32 %v2581_v46, %v7017_v60  ;;  %v1685_v50 = vmul.f32 %v7119_v35, %v7119_v35 }
 0x14d   :  { %v1214_v29 = vpop.f32.mrf.mxu2  ;;  %v2076_v54 = vsub.f32 1.5, %v2075_v51  ;;  %v923_v51 = vmul.f32 %v224_v42, %v224_v42 }
 0x14e   :  { %v5969_v43 = vpop.eup %5968  ;;  %v7126_v37 = vadd.f32 1e-05, %v1804_v49  ;;  %v1412_v53 = vadd.f32 %v1411_v58, %v1214_v29  ;;  %2770 = vrot.lane.b32.xlu0 %v2641_v30, %s6274_s29  ;;  %5756 = vmatmul.msk.f32.gmra.mxu3 %vm279_vm1, %v921_v36  ;;  %v221_v49 = vld [vmem:[%s11491_s0 + $0x1f0] sm:$0xff] }
 0x14f   :  { %v2083_v40 = vmul.f32 %v5969_v43, %v7101_v48  ;;  %v523_v60 = vpop.f32.mrf.mxu0  ;;  %v2077_v63 = vmul.f32 %v5967_v59, %v2076_v54  ;;  %5695 = vmatmul.msk.f32.gmra.mxu1 %vm279_vm1, %v222_v34  ;;  %vm2089_vm8 = vweird.f32 %v5969_v43 }
 0x150   :  { %5970 = vrsqrt.f32 %v7126_v37  ;;  %v1625_v58 = vmul.f32 0.0051020407, %v1412_v53  ;;  %v721_v62 = vadd.f32 %v720_v38, %v523_v60  ;;  %vm2090_vm9 = vmor %vm2088_vm7, %vm2089_vm8  ;;  %vm2098_vm10 = vweird.f32 %v7126_v37 }
 0x151   :  { %v2084_v56 = vmul.f32 %v5969_v43, %v2083_v40  ;;  %v2081_v61 = vsel %vm2080_vm6, %v5967_v59, %v2077_v63  ;;  %v1417_v32 = vpop.f32.mrf.mxu3  ;;  %v920_v40 = vmul.f32 %v221_v49, %v221_v49 }
 0x152   :  { %v1745_v46 = vsub.f32 %v1625_v58, %v1685_v50  ;;  %1264 = vmatmul.f32.gmra.mxu2 %v918_v44  ;;  %v7144_v36 = vmul.f32 0.0051020407, %v721_v62  ;;  %v2582_v34 = vmul.f32 %v2081_v61, %v1862_v39  ;;  %570 = vmatmul.f32.gmra.mxu0 %v219_v47  ;;  %v1863_v39 = vld [vmem:[%s11493_s2 + $0x58] sm:$0xff] }
 0x153   :  { %v2085_v30 = vmul.f32 0.5, %v2084_v56  ;;  %v726_v38 = vpop.f32.mrf.mxu1  ;;  %v226_v58 = vld [vmem:[%s11491_s0 + $0x218] sm:$0xff] }
 0x154   :  { %v1805_v29 = vmax.f32 %v1745_v46, 0.0  ;;  %3044 = vperm.xlu2 %5858, %v2582_v34   ;;  %v2642_v57 = vmul.f32 %v2582_v34, %v7042_v33  ;;  %v1686_v47 = vmul.f32 %v7144_v36, %v7144_v36 }
 0x155   :  { %v1217_v54 = vpop.f32.mrf.mxu2  ;;  %v2086_v59 = vsub.f32 1.5, %v2085_v30  ;;  %v925_v30 = vmul.f32 %v226_v58, %v226_v58 }
 0x156   :  { %v5971_v50 = vpop.eup %5970  ;;  %v7151_v53 = vadd.f32 1e-05, %v1805_v29  ;;  %v1415_v44 = vadd.f32 %v1414_v55, %v1217_v54  ;;  %2772 = vrot.lane.b32.xlu1 %v2642_v57, %s6274_s29  ;;  %5757 = vmatmul.msk.f32.gmra.mxu3 %vm279_vm1, %v923_v51  ;;  %v223_v29 = vld [vmem:[%s11491_s0 + $0x200] sm:$0xff] }
 0x157   :  { %v2093_v60 = vmul.f32 %v5971_v50, %v7126_v37  ;;  %v526_v33 = vpop.f32.mrf.mxu0  ;;  %v2087_v63 = vmul.f32 %v5969_v43, %v2086_v59  ;;  %5696 = vmatmul.msk.f32.gmra.mxu1 %vm279_vm1, %v224_v42  ;;  %vm2099_vm11 = vweird.f32 %v5971_v50 }
 0x158   :  { %5972 = vrsqrt.f32 %v7151_v53  ;;  %v1626_v55 = vmul.f32 0.0051020407, %v1415_v44  ;;  %v724_v62 = vadd.f32 %v723_v45, %v526_v33  ;;  %vm2100_vm12 = vmor %vm2098_vm10, %vm2099_vm11  ;;  %vm2108_vm13 = vweird.f32 %v7151_v53 }
 0x159   :  { %v2094_v56 = vmul.f32 %v5971_v50, %v2093_v60  ;;  %v2091_v61 = vsel %vm2090_vm9, %v5969_v43, %v2087_v63  ;;  %v1420_v46 = vpop.f32.mrf.mxu3  ;;  %v922_v60 = vmul.f32 %v223_v29, %v223_v29 }
 0x15a   :  { %v1746_v34 = vsub.f32 %v1626_v55, %v1686_v47  ;;  %1267 = vmatmul.f32.gmra.mxu2 %v920_v40  ;;  %v7169_v51 = vmul.f32 0.0051020407, %v724_v62  ;;  %v2583_v42 = vmul.f32 %v2091_v61, %v1863_v39  ;;  %573 = vmatmul.f32.gmra.mxu0 %v221_v49  ;;  %v1864_v39 = vld [vmem:[%s11493_s2 + $0x60] sm:$0xff]  ;;  %v228_v55 = vld [vmem:[%s11491_s0 + $0x228] sm:$0xff] }
 0x15b   :  { %v2095_v57 = vmul.f32 0.5, %v2094_v56  ;;  %v729_v45 = vpop.f32.mrf.mxu1 }
 0x15c   :  { %v1806_v54 = vmax.f32 %v1746_v34, 0.0  ;;  %3049 = vperm.xlu0 %5856, %v2583_v42   ;;  %v2643_v48 = vmul.f32 %v2583_v42, %v7069_v52  ;;  %v1687_v49 = vmul.f32 %v7169_v51, %v7169_v51 }
 0x15d   :  { %v1220_v59 = vpop.f32.mrf.mxu2  ;;  %v2096_v43 = vsub.f32 1.5, %v2095_v57  ;;  %v927_v57 = vmul.f32 %v228_v55, %v228_v55 }
 0x15e   :  { %v5973_v47 = vpop.eup %5972  ;;  %v7176_v44 = vadd.f32 1e-05, %v1806_v54  ;;  %v1418_v40 = vadd.f32 %v1417_v32, %v1220_v59  ;;  %2774 = vrot.lane.b32.xlu2 %v2643_v48, %s6274_s29  ;;  %5758 = vmatmul.msk.f32.gmra.mxu3 %vm279_vm1, %v925_v30  ;;  %v225_v54 = vld [vmem:[%s11491_s0 + $0x210] sm:$0xff] }
 0x15f   :  { %v2103_v33 = vmul.f32 %v5973_v47, %v7151_v53  ;;  %v529_v52 = vpop.f32.mrf.mxu0  ;;  %v2097_v63 = vmul.f32 %v5971_v50, %v2096_v43  ;;  %5697 = vmatmul.msk.f32.gmra.mxu1 %vm279_vm1, %v226_v58  ;;  %vm2109_vm14 = vweird.f32 %v5973_v47 }
 0x160   :  { %5974 = vrsqrt.f32 %v7176_v44  ;;  %v1627_v32 = vmul.f32 0.0051020407, %v1418_v40  ;;  %v727_v62 = vadd.f32 %v726_v38, %v529_v52  ;;  %vm2110_vm15 = vmor %vm2108_vm13, %vm2109_vm14  ;;  %vm2118_vm2 = vweird.f32 %v7176_v44 }
 0x161   :  { %v2104_v56 = vmul.f32 %v5973_v47, %v2103_v33  ;;  %v2101_v61 = vsel %vm2100_vm12, %v5971_v50, %v2097_v63  ;;  %v1423_v34 = vpop.f32.mrf.mxu3  ;;  %v924_v33 = vmul.f32 %v225_v54, %v225_v54 }
 0x162   :  { %v1747_v42 = vsub.f32 %v1627_v32, %v1687_v49  ;;  %1270 = vmatmul.f32.gmra.mxu2 %v922_v60  ;;  %v7194_v30 = vmul.f32 0.0051020407, %v727_v62  ;;  %v2584_v58 = vmul.f32 %v2101_v61, %v1864_v39  ;;  %576 = vmatmul.f32.gmra.mxu0 %v223_v29  ;;  %v1865_v39 = vld [vmem:[%s11493_s2 + $0x68] sm:$0xff]  ;;  %v230_v32 = vld [vmem:[%s11491_s0 + $0x238] sm:$0xff] }
 0x163   :  { %v2105_v48 = vmul.f32 0.5, %v2104_v56  ;;  %v732_v38 = vpop.f32.mrf.mxu1 }
 0x164   :  { %v1807_v59 = vmax.f32 %v1747_v42, 0.0  ;;  %3054 = vperm.xlu1 %5857, %v2584_v58   ;;  %v2644_v37 = vmul.f32 %v2584_v58, %v7094_v41  ;;  %v1688_v29 = vmul.f32 %v7194_v30, %v7194_v30 }
 0x165   :  { %v1223_v43 = vpop.f32.mrf.mxu2  ;;  %v2106_v50 = vsub.f32 1.5, %v2105_v48  ;;  %v929_v48 = vmul.f32 %v230_v32, %v230_v32 }
 0x166   :  { %v5975_v49 = vpop.eup %5974  ;;  %v7201_v40 = vadd.f32 1e-05, %v1807_v59  ;;  %v1421_v60 = vadd.f32 %v1420_v46, %v1223_v43  ;;  %2776 = vrot.lane.b32.xlu0 %v2644_v37, %s6274_s29  ;;  %5759 = vmatmul.msk.f32.gmra.mxu3 %vm279_vm1, %v927_v57  ;;  %v227_v59 = vld [vmem:[%s11491_s0 + $0x220] sm:$0xff] }
 0x167   :  { %v2113_v52 = vmul.f32 %v5975_v49, %v7176_v44  ;;  %v532_v41 = vpop.f32.mrf.mxu0  ;;  %v2107_v63 = vmul.f32 %v5973_v47, %v2106_v50  ;;  %5698 = vmatmul.msk.f32.gmra.mxu1 %vm279_vm1, %v228_v55  ;;  %vm2119_vm3 = vweird.f32 %v5975_v49 }
 0x168   :  { %5976 = vrsqrt.f32 %v7201_v40  ;;  %v1628_v46 = vmul.f32 0.0051020407, %v1421_v60  ;;  %v730_v62 = vadd.f32 %v729_v45, %v532_v41  ;;  %v926_v41 = vmul.f32 %v227_v59, %v227_v59  ;;  %vm2120_vm4 = vmor %vm2118_vm2, %vm2119_vm3 }
 0x169   :  { %v2114_v56 = vmul.f32 %v5975_v49, %v2113_v52  ;;  %v2111_v61 = vsel %vm2110_vm15, %v5973_v47, %v2107_v63  ;;  %v1426_v42 = vpop.f32.mrf.mxu3  ;;  %v11534_v47 = vmov 1   ;;  %v1866_v63 = vld [vmem:[%s11493_s2 + $0x70] sm:$0xff]  ;;  %vm2128_vm5 = vweird.f32 %v7201_v40 }
 0x16a   :  { %v1748_v58 = vsub.f32 %v1628_v46, %v1688_v29  ;;  %1273 = vmatmul.f32.gmra.mxu2 %v924_v33  ;;  %v7219_v57 = vmul.f32 0.0051020407, %v730_v62  ;;  %v2585_v55 = vmul.f32 %v2111_v61, %v1865_v39  ;;  %579 = vmatmul.f32.gmra.mxu0 %v225_v54 }
 0x16b   :  { %v2115_v37 = vmul.f32 0.5, %v2114_v56  ;;  %v7224_v45 = vpop.f32.mrf.mxu1 }
 0x16c   :  { %v1808_v43 = vmax.f32 %v1748_v58, 0.0  ;;  %3059 = vperm.xlu2 %5858, %v2585_v55   ;;  %v2645_v53 = vmul.f32 %v2585_v55, %v7119_v35  ;;  %5859 = vset.pattern.permute.xlu1 %v11534_v47  ;;  %v1689_v33 = vmul.f32 %v7219_v57, %v7219_v57 }
 0x16d   :  { %v1226_v50 = vpop.f32.mrf.mxu2  ;;  %v2116_v29 = vsub.f32 1.5, %v2115_v37 }
 0x16e   :  { %v7229_v54 = vpop.eup %5976  ;;  %v7231_v60 = vadd.f32 1e-05, %v1808_v43  ;;  %v1424_v52 = vadd.f32 %v1423_v34, %v1226_v50  ;;  %2778 = vrot.lane.b32.xlu1 %v2645_v53, %s6274_s29  ;;  %5760 = vmatmul.msk.f32.gmra.mxu3 %vm279_vm1, %v929_v48  ;;  %v232_v34 = vld [vmem:[%s11491_s0 + $0x248] sm:$0xff] }
 0x16f   :  { %v2123_v35 = vmul.f32 %v7229_v54, %v7201_v40  ;;  %v535_v39 = vpop.f32.mrf.mxu0  ;;  %v2117_v46 = vmul.f32 %v5975_v49, %v2116_v29  ;;  %5699 = vmatmul.msk.f32.gmra.mxu1 %vm279_vm1, %v230_v32  ;;  %v931_v43 = vmul.f32 %v232_v34, %v232_v34  ;;  %vm2129_vm6 = vweird.f32 %v7229_v54 }
 0x170   :  { %5978 = vrsqrt.f32 %v7231_v60  ;;  %v1629_v62 = vmul.f32 0.0051020407, %v1424_v52  ;;  %v733_v56 = vadd.f32 %v732_v38, %v535_v39  ;;  %v229_v38 = vld [vmem:[%s11491_s0 + $0x230] sm:$0xff]  ;;  %vm2130_vm7 = vmor %vm2128_vm5, %vm2129_vm6  ;;  %vm2138_vm8 = vweird.f32 %v7231_v60 }
 0x171   :  { %v2124_v61 = vmul.f32 %v7229_v54, %v2123_v35  ;;  %v2121_v58 = vsel %vm2120_vm4, %v5975_v49, %v2117_v46  ;;  %v1429_v55 = vpop.f32.mrf.mxu3 }
 0x172   :  { %v1749_v48 = vsub.f32 %v1629_v62, %v1689_v33  ;;  %1276 = vmatmul.f32.gmra.mxu2 %v926_v41  ;;  %v7251_v37 = vmul.f32 0.0051020407, %v733_v56  ;;  %v2586_v32 = vmul.f32 %v2121_v58, %v1866_v63  ;;  %582 = vmatmul.f32.gmra.mxu0 %v227_v59  ;;  %v234_v63 = vld [vmem:[%s11491_s0 + $0x258] sm:$0xff] }
 0x173   :  { %v2125_v53 = vmul.f32 0.5, %v2124_v61  ;;  %v738_v50 = vpop.f32.mrf.mxu1  ;;  %v1867_v56 = vld [vmem:[%s11493_s2 + $0x78] sm:$0xff] }
 0x174   :  { %v1809_v29 = vmax.f32 %v1749_v48, 0.0  ;;  %3064 = vperm.xlu0 %5856, %v2586_v32   ;;  %v2646_v44 = vmul.f32 %v2586_v32, %v7144_v36  ;;  %5861 = vset.pattern.permute.xlu2 %v11534_v47  ;;  %v1690_v41 = vmul.f32 %v7251_v37, %v7251_v37  ;;  %v928_v36 = vmul.f32 %v229_v38, %v229_v38 }
 0x175   :  { %v2126_v49 = vsub.f32 1.5, %v2125_v53  ;;  %v1229_v33 = vpop.f32.mrf.mxu2 }
 0x176   :  { %v7260_v59 = vpop.eup %5978  ;;  %v7262_v52 = vadd.f32 1e-05, %v1809_v29  ;;  %v1427_v35 = vadd.f32 %v1426_v42, %v1229_v33  ;;  %v7266_v39 = vpop.permute.xlu0 %2994  ;;  %2780 = vrot.lane.b32.xlu2 %v2646_v44, %s6274_s29  ;;  %5761 = vmatmul.msk.f32.gmra.mxu3 %vm279_vm1, %v931_v43  ;;  %v933_v43 = vmul.f32 %v234_v63, %v234_v63 }
 0x177   :  { %v2133_v46 = vmul.f32 %v7260_v59, %v7231_v60  ;;  %v538_v62 = vpop.f32.mrf.mxu0  ;;  %v2127_v42 = vmul.f32 %v7229_v54, %v2126_v49  ;;  %5700 = vmatmul.msk.f32.gmra.mxu1 %vm279_vm1, %v232_v34  ;;  %vm2139_vm9 = vweird.f32 %v7260_v59  ;;  %v1868_v60 = vld [vmem:[%s11493_s2 + $0x80] sm:$0xff] }
 0x178   :  { %5980 = vrsqrt.f32 %v7262_v52  ;;  %v1630_v61 = vmul.f32 0.0051020407, %v1427_v35  ;;  %v736_v58 = vadd.f32 %v7224_v45, %v538_v62  ;;  %v231_v45 = vld [vmem:[%s11491_s0 + $0x240] sm:$0xff]  ;;  %vm7357_vm10 = vmor %vm2138_vm8, %vm2139_vm9  ;;  %vm2148_vm11 = vweird.f32 %v7262_v52 }
 0x179   :  { %v2131_v48 = vsel %vm2130_vm7, %v7229_v54, %v2127_v42  ;;  %v1432_v32 = vpop.f32.mrf.mxu3  ;;  %v2134_v53 = vmul.f32 %v7260_v59, %v2133_v46  ;;  %v930_v35 = vmul.f32 %v231_v45, %v231_v45  ;;  %v6066_v42 = vld [vmem:[%s11493_s2] sm:$0xff] }
 0x17a   :  { %v1750_v29 = vsub.f32 %v1630_v61, %v1690_v41  ;;  %1279 = vmatmul.f32.gmra.mxu2 %v928_v36  ;;  %v7288_v44 = vmul.f32 0.0051020407, %v736_v58  ;;  %585 = vmatmul.f32.gmra.mxu0 %v229_v38  ;;  %v7290_v34 = vmul.f32 %v2131_v48, %v1867_v56 }
 0x17b   :  { %v741_v49 = vpop.f32.mrf.mxu1  ;;  %v2135_v56 = vmul.f32 0.5, %v2134_v53 }
 0x17c   :  { %v1810_v40 = vmax.f32 %v1750_v29, 0.0  ;;  %v2647_v54 = vmul.f32 %v7290_v34, %v7169_v51  ;;  %5863 = vset.pattern.permute.xlu0 %v11534_v47  ;;  %v1691_v38 = vmul.f32 %v7288_v44, %v7288_v44 }
 0x17d   :  { %v1232_v33 = vpop.f32.mrf.mxu2 }
 0x17e   :  { %v7298_v41 = vpop.eup %5980  ;;  %v7300_v36 = vadd.f32 1e-05, %v1810_v40  ;;  %v1430_v46 = vadd.f32 %v1429_v55, %v1232_v33  ;;  %v2753_v62 = vpop.permute.xlu0 %2752  ;;  %2782 = vrot.lane.b32.xlu0 %v2647_v54, %s6274_s29  ;;  %5762 = vmatmul.msk.f32.gmra.mxu3 %vm279_vm1, %v933_v43  ;;  %v236_v55 = vld [vmem:[%s11491_s0 + $0x268] sm:$0xff] }
 0x17f   :  { %v2143_v51 = vmul.f32 %v7298_v41, %v7262_v52  ;;  %v2932_v61 = vsub.f32 %v6066_v42, %v2753_v62  ;;  %v541_v58 = vpop.f32.mrf.mxu0  ;;  %5701 = vmatmul.msk.f32.gmra.mxu1 %vm279_vm1, %v234_v63  ;;  %v7316_v43 = vpop.permute.xlu1 %2999  ;;  %v233_v63 = vld [vmem:[%s11491_s0 + $0x250] sm:$0xff]  ;;  %v935_v33 = vmul.f32 %v236_v55, %v236_v55  ;;  %v2136_v62 = vsub.f32 1.5, %v2135_v56 }
 0x180   :  { %5982 = vrsqrt.f32 %v7300_v36  ;;  %v1631_v48 = vmul.f32 0.0051020407, %v1430_v46  ;;  %v739_v29 = vadd.f32 %v738_v50, %v541_v58  ;;  %vm2149_vm12 = vweird.f32 %v7298_v41 }
 0x181   :  { %v2144_v53 = vmul.f32 %v7298_v41, %v2143_v51  ;;  %3414 = vperm.xlu1 %5859, %v2932_v61   ;;  %v7319_v40 = vpop.f32.mrf.mxu3  ;;  %v932_v61 = vmul.f32 %v233_v63, %v233_v63  ;;  %v2137_v58 = vmul.f32 %v7260_v59, %v2136_v62  ;;  %vm7386_vm13 = vmor %vm2148_vm11, %vm2149_vm12  ;;  %vm2158_vm14 = vweird.f32 %v7300_v36 }
 0x182   :  { %v1751_v54 = vsub.f32 %v1631_v48, %v1691_v38  ;;  %1282 = vmatmul.f32.gmra.mxu2 %v930_v35  ;;  %588 = vmatmul.f32.gmra.mxu0 %v231_v45  ;;  %v7324_v42 = vmul.f32 0.0051020407, %v739_v29 }
 0x183   :  { %v7326_v46 = vpop.f32.mrf.mxu1  ;;  %v2145_v47 = vmul.f32 0.5, %v2144_v53  ;;  %v6067_v53 = vld [vmem:[%s11493_s2 + $0x8] sm:$0xff] }
 0x184   :  { %v1811_v28 = vmax.f32 %v1751_v54, 0.0  ;;  %v1692_v35 = vmul.f32 %v7324_v42, %v7324_v42 }
 0x185   :  { %v1235_v51 = vpop.f32.mrf.mxu2 }
 0x186   :  { %v7330_v50 = vpop.eup %5982  ;;  %v7332_v45 = vadd.f32 1e-05, %v1811_v28  ;;  %v1433_v38 = vadd.f32 %v1432_v32, %v1235_v51  ;;  %v2755_v56 = vpop.permute.xlu0 %2754  ;;  %5763 = vmatmul.msk.f32.gmra.mxu3 %vm279_vm1, %v935_v33  ;;  %v2146_v28 = vsub.f32 1.5, %v2145_v47  ;;  %v238_v32 = vld [vmem:[%s11491_s0 + $0x278] sm:$0xff] }
 0x187   :  { %v2153_v48 = vmul.f32 %v7330_v50, %v7300_v36  ;;  %v2933_v29 = vsub.f32 %v6067_v53, %v2755_v56  ;;  %v544_v54 = vpop.f32.mrf.mxu0  ;;  %5702 = vmatmul.msk.f32.gmra.mxu1 %vm279_vm1, %v236_v55  ;;  %v11709_v53 = vmov 0   ;;  %vm2159_vm15 = vweird.f32 %v7330_v50  ;;  %v237_v36 = vld [vmem:[%s11491_s0 + $0x270] sm:$0xff] }
 0x188   :  { %5984 = vrsqrt.f32 %v7332_v45  ;;  %v1632_v33 = vmul.f32 0.0051020407, %v1433_v38  ;;  %v2757_v62 = vpop.permute.xlu1 %2756  ;;  %v742_v51 = vadd.f32 %v741_v49, %v544_v54  ;;  %v2141_v38 = vsel %vm7357_vm10, %v7260_v59, %v2137_v58  ;;  %vm7421_vm2 = vmor %vm2158_vm14, %vm2159_vm15 }
 0x189   :  { %v2154_v31 = vmul.f32 %v7330_v50, %v2153_v48  ;;  %v2934_v56 = vsub.f32 %v6068_v26, %v2757_v62  ;;  %5860 = vset.pattern.permute.xlu1 %v11709_v53  ;;  %3419 = vperm.xlu2 %5861, %v2933_v29   ;;  %v7363_v49 = vpop.f32.mrf.mxu3  ;;  %v937_v48 = vmul.f32 %v238_v32, %v238_v32  ;;  %v7374_v29 = vpop.permute.xlu2 %3004  ;;  %vm2168_vm5 = vweird.f32 %v7332_v45 }
 0x18a   :  { %v1752_v55 = vsub.f32 %v1632_v33, %v1692_v35  ;;  %1285 = vmatmul.f32.gmra.mxu2 %v932_v61  ;;  %3069 = vperm.xlu1 %5860, %v7290_v34   ;;  %v7366_v26 = vmul.f32 0.0051020407, %v742_v51  ;;  %v235_v34 = vld [vmem:[%s11491_s0 + $0x260] sm:$0xff]  ;;  %v2147_v61 = vmul.f32 %v7298_v41, %v2146_v28  ;;  %v2588_v58 = vmul.f32 %v2141_v38, %v1868_v60  ;;  %v1869_v60 = vld [vmem:[%s11493_s2 + $0x88] sm:$0xff] }
 0x18b   :  { %v2155_v54 = vmul.f32 0.5, %v2154_v31  ;;  %3424 = vperm.xlu0 %5863, %v2934_v56   ;;  %591 = vmatmul.f32.gmra.mxu0 %v233_v63  ;;  %v7380_v35 = vpop.f32.mrf.mxu1  ;;  %v934_v56 = vmul.f32 %v235_v34, %v235_v34 }
 0x18c   :  { %v1812_v33 = vmax.f32 %v1752_v55, 0.0  ;;  %v1693_v51 = vmul.f32 %v7366_v26, %v7366_v26  ;;  %v2151_v38 = vsel %vm7386_vm13, %v7298_v41, %v2147_v61 }
 0x18d   :  { %v2156_v31 = vsub.f32 1.5, %v2155_v54  ;;  %v1238_v63 = vpop.f32.mrf.mxu2 }
 0x18e   :  { %v7392_v62 = vpop.eup %5984  ;;  %v7394_v28 = vadd.f32 1e-05, %v1812_v33  ;;  %v1436_v52 = vadd.f32 %v7319_v40, %v1238_v63  ;;  %5764 = vmatmul.msk.f32.gmra.mxu3 %vm279_vm1, %v937_v48  ;;  %v240_v40 = vld [vmem:[%s11491_s0 + $0x288] sm:$0xff] }
 0x18f   :  { %v2163_v47 = vmul.f32 %v7392_v62, %v7332_v45  ;;  %v547_v55 = vpop.f32.mrf.mxu0  ;;  %v2157_v54 = vmul.f32 %v7330_v50, %v2156_v31  ;;  %5703 = vmatmul.msk.f32.gmra.mxu1 %vm279_vm1, %v238_v32  ;;  %v2648_v32 = vmul.f32 %v2588_v58, %v7194_v30  ;;  %v1870_v30 = vld [vmem:[%s11493_s2 + $0x90] sm:$0xff]  ;;  %vm2169_vm6 = vweird.f32 %v7392_v62 }
 0x190   :  { %5986 = vrsqrt.f32 %v7394_v28  ;;  %v1633_v48 = vmul.f32 0.0051020407, %v1436_v52  ;;  %v7414_v33 = vpop.permute.xlu1 %3009  ;;  %v745_v63 = vadd.f32 %v7326_v46, %v547_v55  ;;  %v2589_v46 = vmul.f32 %v2151_v38, %v1869_v60  ;;  %vm7525_vm8 = vmor %vm2168_vm5, %vm2169_vm6  ;;  %v241_v45 = vld [vmem:[%s11491_s0 + $0x290] sm:$0xff] }
 0x191   :  { %5862 = vset.pattern.permute.xlu2 %v11709_v53  ;;  %v7427_v61 = vpop.f32.mrf.mxu3  ;;  %v939_v52 = vmul.f32 %v240_v40, %v240_v40  ;;  %v2164_v55 = vmul.f32 %v7392_v62, %v2163_v47  ;;  %v7435_v25 = vpop.permute.xlu2 %3014  ;;  %v936_v60 = vmul.f32 %v237_v36, %v237_v36  ;;  %v11716_v38 = vmov 1  }
 0x192   :  { %v1753_v59 = vsub.f32 %v1633_v48, %v1693_v51  ;;  %1288 = vmatmul.f32.gmra.mxu2 %v934_v56  ;;  %3074 = vperm.xlu2 %5862, %v2588_v58   ;;  %v7429_v31 = vmul.f32 0.0051020407, %v745_v63  ;;  %v2161_v58 = vsel %vm7421_vm2, %v7330_v50, %v2157_v54  ;;  %v242_v54 = vld [vmem:[%s11491_s0 + $0x298] sm:$0xff]  ;;  %vm2178_vm3 = vweird.f32 %v7394_v28 }
 0x193   :  { %2784 = vrot.lane.b32.xlu1 %v2648_v32, %s6274_s29  ;;  %5864 = vset.pattern.permute.xlu0 %v11709_v53  ;;  %v7455_v41 = vmul.f32 %v2161_v58, %v1870_v30 }
 0x194   :  { %v1813_v51 = vmax.f32 %v1753_v59, 0.0  ;;  %3079 = vperm.xlu0 %5864, %v2589_v46   ;;  %594 = vmatmul.f32.gmra.mxu0 %v235_v34  ;;  %v7445_v56 = vpop.f32.mrf.mxu1  ;;  %v1694_v32 = vmul.f32 %v7429_v31, %v7429_v31  ;;  %v2165_v59 = vmul.f32 0.5, %v2164_v55 }
 0x195   :  { %v1241_v47 = vpop.f32.mrf.mxu2  ;;  %5865 = vset.pattern.permute.xlu1 %v11716_v38 }
 0x196   :  { %v7448_v48 = vpop.eup %5986  ;;  %v7450_v63 = vadd.f32 1e-05, %v1813_v51  ;;  %v1439_v24 = vadd.f32 %v7363_v49, %v1241_v47  ;;  %5765 = vmatmul.msk.f32.gmra.mxu3 %vm279_vm1, %v939_v52  ;;  %v2649_v49 = vmul.f32 %v2589_v46, %v7219_v57  ;;  %v6069_v52 = vld [vmem:[%s11493_s2 + $0x18] sm:$0xff]  ;;  %v941_v57 = vmul.f32 %v242_v54, %v242_v54 }
 0x197   :  { %v2173_v50 = vmul.f32 %v7448_v48, %v7394_v28  ;;  %v550_v34 = vpop.f32.mrf.mxu0  ;;  %5704 = vmatmul.msk.f32.gmra.mxu1 %vm279_vm1, %v240_v40  ;;  %vm2179_vm4 = vweird.f32 %v7448_v48  ;;  %v2166_v55 = vsub.f32 1.5, %v2165_v59  ;;  %v244_v28 = vld [vmem:[%s11491_s0 + $0x2a8] sm:$0xff] }
 0x198   :  { %5988 = vrsqrt.f32 %v7450_v63  ;;  %v1634_v51 = vmul.f32 0.0051020407, %v1439_v24  ;;  %v2759_v27 = vpop.permute.xlu1 %2758  ;;  %v748_v40 = vadd.f32 %v7380_v35, %v550_v34  ;;  %v2650_v24 = vmul.f32 %v7455_v41, %v7251_v37  ;;  %vm7500_vm7 = vmor %vm2178_vm3, %vm2179_vm4 }
 0x199   :  { %v2174_v30 = vmul.f32 %v7448_v48, %v2173_v50  ;;  %v2935_v58 = vsub.f32 %v6069_v52, %v2759_v27  ;;  %v7471_v47 = vpop.f32.mrf.mxu3  ;;  %v239_v27 = vld [vmem:[%s11491_s0 + $0x280] sm:$0xff]  ;;  %vm2188_vm9 = vweird.f32 %v7450_v63 }
 0x19a   :  { %v1754_v22 = vsub.f32 %v1634_v51, %v1694_v32  ;;  %1291 = vmatmul.f32.gmra.mxu2 %v936_v60  ;;  %2786 = vrot.lane.b32.xlu2 %v2649_v49, %s6274_s29  ;;  %v7477_v46 = vmul.f32 0.0051020407, %v748_v40  ;;  %v2761_v32 = vpop.permute.xlu2 %2760  ;;  %v1872_v40 = vld [vmem:[%s11493_s2 + $0xa0] sm:$0xff] }
 0x19b   :  { %3429 = vperm.xlu1 %5865, %v2935_v58   ;;  %5867 = vset.pattern.permute.xlu2 %v11716_v38  ;;  %v2175_v35 = vmul.f32 0.5, %v2174_v30  ;;  %v938_v30 = vmul.f32 %v239_v27, %v239_v27 }
 0x19c   :  { %v1814_v60 = vmax.f32 %v1754_v22, 0.0  ;;  %2788 = vrot.lane.b32.xlu0 %v2650_v24, %s6274_s29  ;;  %597 = vmatmul.f32.gmra.mxu0 %v237_v36  ;;  %v7485_v37 = vpop.f32.mrf.mxu1  ;;  %v1695_v59 = vmul.f32 %v7477_v46, %v7477_v46  ;;  %v2167_v24 = vmul.f32 %v7392_v62, %v2166_v55 }
 0x19d   :  { %v1244_v50 = vpop.f32.mrf.mxu2  ;;  %v2176_v34 = vsub.f32 1.5, %v2175_v35 }
 0x19e   :  { %v7489_v51 = vpop.eup %5988  ;;  %v7491_v49 = vadd.f32 1e-05, %v1814_v60  ;;  %v1442_v22 = vadd.f32 %v7427_v61, %v1244_v50  ;;  %5766 = vmatmul.msk.f32.gmra.mxu3 %vm279_vm1, %v941_v57  ;;  %v6070_v57 = vld [vmem:[%s11493_s2 + $0x20] sm:$0xff] }
 0x19f   :  { %v2183_v52 = vmul.f32 %v7489_v51, %v7450_v63  ;;  %v553_v58 = vpop.f32.mrf.mxu0  ;;  %v2177_v61 = vmul.f32 %v7448_v48, %v2176_v34  ;;  %5705 = vmatmul.msk.f32.gmra.mxu1 %vm279_vm1, %v242_v54  ;;  %v2936_v35 = vsub.f32 %v6070_v57, %v2761_v32  ;;  %vm2189_vm10 = vweird.f32 %v7489_v51  ;;  %v1873_v54 = vld [vmem:[%s11493_s2 + $0xa8] sm:$0xff] }
 0x1a0   :  { %5990 = vrsqrt.f32 %v7491_v49  ;;  %v1635_v60 = vmul.f32 0.0051020407, %v1442_v22  ;;  %v751_v50 = vadd.f32 %v7445_v56, %v553_v58  ;;  %v943_v58 = vmul.f32 %v244_v28, %v244_v28  ;;  %vm7562_vm11 = vmor %vm2188_vm9, %vm2189_vm10 }
 0x1a1   :  { %v2184_v55 = vmul.f32 %v7489_v51, %v2183_v52  ;;  %v2181_v34 = vsel %vm7500_vm7, %v7448_v48, %v2177_v61  ;;  %v7533_v32 = vpop.f32.mrf.mxu3  ;;  %v1871_v48 = vld [vmem:[%s11493_s2 + $0x98] sm:$0xff]  ;;  %v940_v61 = vmul.f32 %v241_v45, %v241_v45  ;;  %vm2198_vm14 = vweird.f32 %v7491_v49 }
 0x1a2   :  { %v1755_v57 = vsub.f32 %v1635_v60, %v1695_v59  ;;  %1294 = vmatmul.f32.gmra.mxu2 %v938_v30  ;;  %3434 = vperm.xlu2 %5867, %v2936_v35   ;;  %v7535_v56 = vmul.f32 0.0051020407, %v751_v50  ;;  %v7537_v22 = vmul.f32 %v2181_v34, %v1872_v40  ;;  %v2171_v59 = vsel %vm7525_vm8, %v7392_v62, %v2167_v24  ;;  %v2763_v63 = vpop.permute.xlu2 %2762 }
 0x1a3   :  { %v2185_v21 = vmul.f32 0.5, %v2184_v55  ;;  %5866 = vset.pattern.permute.xlu1 %v11709_v53  ;;  %v2591_v24 = vmul.f32 %v2171_v59, %v1871_v48 }
 0x1a4   :  { %v1815_v30 = vmax.f32 %v1755_v57, 0.0  ;;  %3084 = vperm.xlu1 %5866, %v7455_v41   ;;  %3094 = vperm.xlu0 %5864, %v7537_v22   ;;  %v756_v36 = vpop.f32.mrf.mxu1  ;;  %v1696_v50 = vmul.f32 %v7535_v56, %v7535_v56 }
 0x1a5   :  { %v2186_v52 = vsub.f32 1.5, %v2185_v21  ;;  %v1247_v40 = vpop.f32.mrf.mxu2  ;;  %600 = vmatmul.f32.gmra.mxu0 %v239_v27  ;;  %v246_v21 = vld [vmem:[%s11491_s0 + $0x2b8] sm:$0xff] }
 0x1a6   :  { %v7553_v35 = vpop.eup %5990  ;;  %v7555_v60 = vadd.f32 1e-05, %v1815_v30  ;;  %v1445_v62 = vadd.f32 %v7471_v47, %v1247_v40  ;;  %5767 = vmatmul.msk.f32.gmra.mxu3 %vm279_vm1, %v943_v58  ;;  %v7579_v58 = vpop.permute.xlu1 %3024  ;;  %v945_v30 = vmul.f32 %v246_v21, %v246_v21  ;;  %v2651_v40 = vmul.f32 %v2591_v24, %v7288_v44 }
 0x1a7   :  { %v556_v27 = vpop.f32.mrf.mxu0  ;;  %v2187_v47 = vmul.f32 %v7489_v51, %v2186_v52  ;;  %5706 = vmatmul.msk.f32.gmra.mxu1 %vm279_vm1, %v244_v28  ;;  %v2193_v55 = vmul.f32 %v7553_v35, %v7491_v49  ;;  %vm2199_vm15 = vweird.f32 %v7553_v35 }
 0x1a8   :  { %5992 = vrsqrt.f32 %v7555_v60  ;;  %v1636_v34 = vmul.f32 0.0051020407, %v1445_v62  ;;  %v754_v57 = vadd.f32 %v7485_v37, %v556_v27  ;;  %v243_v37 = vld [vmem:[%s11491_s0 + $0x2a0] sm:$0xff]  ;;  %v7605_v27 = vpop.permute.xlu0 %3019  ;;  %vm2208_vm12 = vweird.f32 %v7555_v60  ;;  %vm7679_vm3 = vmor %vm2198_vm14, %vm2199_vm15 }
 0x1a9   :  { %v2191_v48 = vsel %vm7562_vm11, %v7489_v51, %v2187_v47  ;;  %v7584_v59 = vpop.f32.mrf.mxu3  ;;  %v2194_v51 = vmul.f32 %v7553_v35, %v2193_v55 }
 0x1aa   :  { %v1756_v52 = vsub.f32 %v1636_v34, %v1696_v50  ;;  %1297 = vmatmul.f32.gmra.mxu2 %v940_v61  ;;  %5868 = vset.pattern.permute.xlu2 %v11709_v53  ;;  %v7587_v28 = vmul.f32 0.0051020407, %v754_v57  ;;  %v7590_v62 = vmul.f32 %v2191_v48, %v1873_v54  ;;  %v248_v57 = vld [vmem:[%s11491_s0 + $0x2c8] sm:$0xff] }
 0x1ab   :  { %3089 = vperm.xlu2 %5868, %v2591_v24  }
 0x1ac   :  { %v1816_v41 = vmax.f32 %v1756_v52, 0.0  ;;  %2790 = vrot.lane.b32.xlu1 %v2651_v40, %s6274_s29  ;;  %v2653_v61 = vmul.f32 %v7590_v62, %v7366_v26  ;;  %5872 = vset.pattern.permute.xlu0 %v11716_v38  ;;  %v7600_v50 = vpop.f32.mrf.mxu1  ;;  %v1697_v47 = vmul.f32 %v7587_v28, %v7587_v28  ;;  %v942_v26 = vmul.f32 %v243_v37, %v243_v37 }
 0x1ad   :  { %v1250_v44 = vpop.f32.mrf.mxu2  ;;  %603 = vmatmul.f32.gmra.mxu0 %v241_v45  ;;  %5869 = vset.pattern.permute.xlu1 %v11716_v38 }
 0x1ae   :  { %v7603_v24 = vpop.eup %5992  ;;  %v7607_v54 = vadd.f32 1e-05, %v1816_v41  ;;  %v1448_v55 = vadd.f32 %v7533_v32, %v1250_v44  ;;  %2794 = vrot.lane.b32.xlu0 %v2653_v61, %s6274_s29  ;;  %5768 = vmatmul.msk.f32.gmra.mxu3 %vm279_vm1, %v945_v30  ;;  %v2195_v32 = vmul.f32 0.5, %v2194_v51  ;;  %v2652_v30 = vmul.f32 %v7537_v22, %v7324_v42 }
 0x1af   :  { %v2203_v45 = vmul.f32 %v7603_v24, %v7555_v60  ;;  %v559_v34 = vpop.f32.mrf.mxu0  ;;  %5707 = vmatmul.msk.f32.gmra.mxu1 %vm279_vm1, %v246_v21  ;;  %v6071_v21 = vld [vmem:[%s11493_s2 + $0x28] sm:$0xff]  ;;  %v947_v51 = vmul.f32 %v248_v57, %v248_v57  ;;  %vm2209_vm13 = vweird.f32 %v7603_v24  ;;  %v6073_v60 = vld [vmem:[%s11493_s2 + $0x30] sm:$0xff] }
 0x1b0   :  { %5994 = vrsqrt.f32 %v7607_v54  ;;  %v1637_v48 = vmul.f32 0.0051020407, %v1448_v55  ;;  %v757_v52 = vadd.f32 %v756_v36, %v559_v34  ;;  %v2767_v41 = vpop.permute.xlu1 %2766  ;;  %v2937_v44 = vsub.f32 %v6071_v21, %v2763_v63  ;;  %v245_v36 = vld [vmem:[%s11491_s0 + $0x2b0] sm:$0xff]  ;;  %v7634_v55 = vpop.permute.xlu2 %3029  ;;  %v6072_v63 = vld [vmem:[%s11493_s2 + $0x38] sm:$0xff]  ;;  %vm7662_vm2 = vmor %vm2208_vm12, %vm2209_vm13 }
 0x1b1   :  { %v2204_v40 = vmul.f32 %v7603_v24, %v2203_v45  ;;  %v7624_v61 = vpop.f32.mrf.mxu3  ;;  %v2196_v45 = vsub.f32 1.5, %v2195_v32  ;;  %vm2218_vm4 = vweird.f32 %v7607_v54 }
 0x1b2   :  { %v1757_v20 = vsub.f32 %v1637_v48, %v1697_v47  ;;  %1300 = vmatmul.f32.gmra.mxu2 %v942_v26  ;;  %v7629_v23 = vmul.f32 0.0051020407, %v757_v52  ;;  %v2939_v47 = vsub.f32 %v6072_v63, %v2767_v41  ;;  %v944_v48 = vmul.f32 %v245_v36, %v245_v36 }
 0x1b3   :  { %2792 = vrot.lane.b32.xlu2 %v2652_v30, %s6274_s29  ;;  %v2205_v42 = vmul.f32 0.5, %v2204_v40  ;;  %v2765_v40 = vpop.permute.xlu0 %2764  ;;  %v2197_v63 = vmul.f32 %v7553_v35, %v2196_v45  ;;  %v1875_v45 = vld [vmem:[%s11493_s2 + $0xb8] sm:$0xff] }
 0x1b4   :  { %v1817_v22 = vmax.f32 %v1757_v20, 0.0  ;;  %3439 = vperm.xlu1 %5869, %v2937_v44   ;;  %5870 = vset.pattern.permute.xlu2 %v11716_v38  ;;  %v7643_v26 = vpop.f32.mrf.mxu1  ;;  %v1698_v41 = vmul.f32 %v7629_v23, %v7629_v23 }
 0x1b5   :  { %v1253_v34 = vpop.f32.mrf.mxu2  ;;  %606 = vmatmul.f32.gmra.mxu0 %v243_v37  ;;  %v2206_v52 = vsub.f32 1.5, %v2205_v42 }
 0x1b6   :  { %v7646_v20 = vpop.eup %5994  ;;  %v7648_v30 = vadd.f32 1e-05, %v1817_v22  ;;  %v1451_v21 = vadd.f32 %v7584_v59, %v1253_v34  ;;  %3449 = vperm.xlu0 %5872, %v2939_v47   ;;  %5769 = vmatmul.msk.f32.gmra.mxu3 %vm279_vm1, %v947_v51  ;;  %v250_v59 = vld [vmem:[%s11491_s0 + $0x2d8] sm:$0xff]  ;;  %v2938_v34 = vsub.f32 %v6073_v60, %v2765_v40 }
 0x1b7   :  { %v2213_v37 = vmul.f32 %v7646_v20, %v7607_v54  ;;  %v562_v32 = vpop.f32.mrf.mxu0  ;;  %v2207_v44 = vmul.f32 %v7603_v24, %v2206_v52  ;;  %5708 = vmatmul.msk.f32.gmra.mxu1 %vm279_vm1, %v248_v57  ;;  %vm2219_vm5 = vweird.f32 %v7646_v20  ;;  %v252_v54 = vld [vmem:[%s11491_s0 + $0x2e8] sm:$0xff] }
 0x1b8   :  { %5996 = vrsqrt.f32 %v7648_v30  ;;  %v1638_v51 = vmul.f32 0.0051020407, %v1451_v21  ;;  %v760_v22 = vadd.f32 %v7600_v50, %v562_v32  ;;  %v7693_v49 = vpop.permute.xlu2 %2768  ;;  %vm7722_vm6 = vmor %vm2218_vm4, %vm2219_vm5  ;;  %v951_v17 = vmul.f32 %v252_v54, %v252_v54 }
 0x1b9   :  { %v2214_v47 = vmul.f32 %v7646_v20, %v2213_v37  ;;  %v7683_v52 = vpop.f32.mrf.mxu3  ;;  %v2211_v40 = vsel %vm7662_vm2, %v7603_v24, %v2207_v44  ;;  %v949_v37 = vmul.f32 %v250_v59, %v250_v59  ;;  %v1874_v24 = vld [vmem:[%s11493_s2 + $0xb0] sm:$0xff]  ;;  %v2201_v44 = vsel %vm7679_vm3, %v7553_v35, %v2197_v63 }
 0x1ba   :  { %v1758_v21 = vsub.f32 %v1638_v51, %v1698_v41  ;;  %1303 = vmatmul.f32.gmra.mxu2 %v944_v48  ;;  %v7685_v50 = vmul.f32 0.0051020407, %v760_v22  ;;  %v247_v48 = vld [vmem:[%s11491_s0 + $0x2c0] sm:$0xff]  ;;  %v2594_v63 = vmul.f32 %v2201_v44, %v1874_v24  ;;  %vm2228_vm7 = vweird.f32 %v7648_v30 }
 0x1bb   :  { %v2215_v32 = vmul.f32 0.5, %v2214_v47  ;;  %3444 = vperm.xlu2 %5870, %v2938_v34   ;;  %v7708_v47 = vmul.f32 %v2211_v40, %v1875_v45  ;;  %v946_v35 = vmul.f32 %v247_v48, %v247_v48 }
 0x1bc   :  { %v1818_v41 = vmax.f32 %v1758_v21, 0.0  ;;  %5871 = vset.pattern.permute.xlu1 %v11709_v53  ;;  %v765_v42 = vpop.f32.mrf.mxu1  ;;  %v1699_v21 = vmul.f32 %v7685_v50, %v7685_v50 }
 0x1bd   :  { %v2216_v51 = vsub.f32 1.5, %v2215_v32  ;;  %v1256_v22 = vpop.f32.mrf.mxu2  ;;  %3099 = vperm.xlu1 %5871, %v7590_v62   ;;  %609 = vmatmul.f32.gmra.mxu0 %v245_v36 }
 0x1be   :  { %v7710_v60 = vpop.eup %5996  ;;  %v7712_v34 = vadd.f32 1e-05, %v1818_v41  ;;  %v1454_v18 = vadd.f32 %v7624_v61, %v1256_v22  ;;  %5875 = vset.pattern.permute.xlu0 %v11709_v53  ;;  %5770 = vmatmul.msk.f32.gmra.mxu3 %vm279_vm1, %v949_v37  ;;  %v1876_v61 = vld [vmem:[%s11493_s2 + $0xc0] sm:$0xff]  ;;  %v7745_v44 = vpop.permute.xlu1 %3039 }
 0x1bf   :  { %3109 = vperm.xlu0 %5875, %v7708_v47   ;;  %v565_v36 = vpop.f32.mrf.mxu0  ;;  %v2217_v57 = vmul.f32 %v7646_v20, %v2216_v51  ;;  %v2223_v45 = vmul.f32 %v7710_v60, %v7648_v30  ;;  %5709 = vmatmul.msk.f32.gmra.mxu1 %vm279_vm1, %v250_v59  ;;  %vm2229_vm10 = vweird.f32 %v7710_v60 }
 0x1c0   :  { %5998 = vrsqrt.f32 %v7712_v34  ;;  %v1639_v40 = vmul.f32 0.0051020407, %v1454_v18  ;;  %v763_v37 = vadd.f32 %v7643_v26, %v565_v36  ;;  %v7751_v18 = vpop.permute.xlu2 %3044  ;;  %v2654_v26 = vmul.f32 %v2594_v63, %v7429_v31  ;;  %vm7848_vm12 = vmor %vm2228_vm7, %vm2229_vm10 }
 0x1c1   :  { %v2221_v32 = vsel %vm7722_vm6, %v7646_v20, %v2217_v57  ;;  %v7743_v41 = vpop.f32.mrf.mxu3  ;;  %v249_v20 = vld [vmem:[%s11491_s0 + $0x2d0] sm:$0xff]  ;;  %v2224_v59 = vmul.f32 %v7710_v60, %v2223_v45  ;;  %vm2238_vm8 = vweird.f32 %v7712_v34 }
 0x1c2   :  { %v1759_v24 = vsub.f32 %v1639_v40, %v1699_v21  ;;  %1306 = vmatmul.f32.gmra.mxu2 %v946_v35  ;;  %v7747_v51 = vmul.f32 0.0051020407, %v763_v37  ;;  %v7749_v22 = vmul.f32 %v2221_v32, %v1876_v61  ;;  %v948_v40 = vmul.f32 %v249_v20, %v249_v20  ;;  %v254_v37 = vld [vmem:[%s11491_s0 + $0x2f8] sm:$0xff] }
 0x1c3   :  { %5873 = vset.pattern.permute.xlu2 %v11709_v53 }
 0x1c4   :  { %v1819_v21 = vmax.f32 %v1759_v24, 0.0  ;;  %3104 = vperm.xlu2 %5873, %v2594_v63   ;;  %v2656_v35 = vmul.f32 %v7749_v22, %v7535_v56  ;;  %v7761_v62 = vpop.f32.mrf.mxu1  ;;  %v1700_v57 = vmul.f32 %v7747_v51, %v7747_v51  ;;  %v7775_v63 = vpop.permute.xlu0 %3034 }
 0x1c5   :  { %v1259_v36 = vpop.f32.mrf.mxu2  ;;  %2796 = vrot.lane.b32.xlu1 %v2654_v26, %s6274_s29  ;;  %612 = vmatmul.f32.gmra.mxu0 %v247_v48  ;;  %v7788_v26 = vld [vmem:[%s11491_s0 + $0x2e0] sm:$0xff] }
 0x1c6   :  { %v7764_v61 = vpop.eup %5998  ;;  %v7766_v31 = vadd.f32 1e-05, %v1819_v21  ;;  %v1457_v45 = vadd.f32 %v7683_v52, %v1259_v36  ;;  %5874 = vset.pattern.permute.xlu1 %v11716_v38  ;;  %5771 = vmatmul.msk.f32.gmra.mxu3 %vm279_vm1, %v951_v17  ;;  %v2225_v17 = vmul.f32 0.5, %v2224_v59 }
 0x1c7   :  { %v2233_v56 = vmul.f32 %v7764_v61, %v7712_v34  ;;  %2800 = vrot.lane.b32.xlu0 %v2656_v35, %s6274_s29  ;;  %v568_v48 = vpop.f32.mrf.mxu0  ;;  %5710 = vmatmul.msk.f32.gmra.mxu1 %vm279_vm1, %v252_v54  ;;  %v6074_v54 = vld [vmem:[%s11493_s2 + $0x40] sm:$0xff]  ;;  %vm2239_vm9 = vweird.f32 %v7764_v61  ;;  %v6076_v34 = vld [vmem:[%s11493_s2 + $0x48] sm:$0xff] }
 0x1c8   :  { %6000 = vrsqrt.f32 %v7766_v31  ;;  %v1640_v52 = vmul.f32 0.0051020407, %v1457_v45  ;;  %v766_v32 = vadd.f32 %v765_v42, %v568_v48  ;;  %5878 = vset.pattern.permute.xlu0 %v11716_v38  ;;  %v2773_v36 = vpop.permute.xlu1 %2772  ;;  %v2655_v42 = vmul.f32 %v7708_v47, %v7477_v46  ;;  %v6075_v46 = vld [vmem:[%s11493_s2 + $0x50] sm:$0xff]  ;;  %vm7835_vm11 = vmor %vm2238_vm8, %vm2239_vm9 }
 0x1c9   :  { %v2234_v24 = vmul.f32 %v7764_v61, %v2233_v56  ;;  %v7790_v21 = vpop.f32.mrf.mxu3  ;;  %v953_v45 = vmul.f32 %v254_v37, %v254_v37  ;;  %v2940_v59 = vsub.f32 %v6074_v54, %v7693_v49  ;;  %v7800_v56 = vpop.permute.xlu2 %2774  ;;  %v2942_v47 = vsub.f32 %v6075_v46, %v2773_v36 }
 0x1ca   :  { %v1760_v35 = vsub.f32 %v1640_v52, %v1700_v57  ;;  %1309 = vmatmul.f32.gmra.mxu2 %v948_v40  ;;  %v7792_v16 = vmul.f32 0.0051020407, %v766_v32  ;;  %v950_v57 = vmul.f32 %v7788_v26, %v7788_v26  ;;  %v2226_v52 = vsub.f32 1.5, %v2225_v17 }
 0x1cb   :  { %v2235_v48 = vmul.f32 0.5, %v2234_v24  ;;  %vm2248_vm13 = vweird.f32 %v7766_v31 }
 0x1cc   :  { %v1820_v19 = vmax.f32 %v1760_v35, 0.0  ;;  %2798 = vrot.lane.b32.xlu2 %v2655_v42, %s6274_s29  ;;  %v7805_v40 = vpop.f32.mrf.mxu1  ;;  %v1701_v17 = vmul.f32 %v7792_v16, %v7792_v16  ;;  %v2771_v36 = vpop.permute.xlu0 %2770  ;;  %v2227_v46 = vmul.f32 %v7710_v60, %v2226_v52 }
 0x1cd   :  { %v1262_v49 = vpop.f32.mrf.mxu2  ;;  %3454 = vperm.xlu1 %5874, %v2940_v59   ;;  %615 = vmatmul.f32.gmra.mxu0 %v249_v20  ;;  %v2236_v32 = vsub.f32 1.5, %v2235_v48  ;;  %v256_v59 = vld [vmem:[%s11491_s0 + $0x308] sm:$0xff] }
 0x1ce   :  { %v7813_v24 = vpop.eup %6000  ;;  %v7815_v35 = vadd.f32 1e-05, %v1820_v19  ;;  %v1460_v42 = vadd.f32 %v7743_v41, %v1262_v49  ;;  %5876 = vset.pattern.permute.xlu2 %v11716_v38  ;;  %5772 = vmatmul.msk.f32.gmra.mxu3 %vm279_vm1, %v953_v45 }
 0x1cf   :  { %v2243_v20 = vmul.f32 %v7813_v24, %v7766_v31  ;;  %3464 = vperm.xlu0 %5878, %v2942_v47   ;;  %v571_v54 = vpop.f32.mrf.mxu0  ;;  %v2237_v19 = vmul.f32 %v7764_v61, %v2236_v32  ;;  %5711 = vmatmul.msk.f32.gmra.mxu1 %vm279_vm1, %v254_v37  ;;  %v2941_v32 = vsub.f32 %v6076_v34, %v2771_v36  ;;  %vm2249_vm14 = vweird.f32 %v7813_v24  ;;  %v1877_v36 = vld [vmem:[%s11493_s2 + $0xc8] sm:$0xff]  ;;  %v258_v31 = vld [vmem:[%s11491_s0 + $0x318] sm:$0xff] }
 0x1d0   :  { %6002 = vrsqrt.f32 %v7815_v35  ;;  %v1641_v41 = vmul.f32 0.0051020407, %v1460_v42  ;;  %v769_v48 = vadd.f32 %v7761_v62, %v571_v54  ;;  %v253_v42 = vld [vmem:[%s11491_s0 + $0x2f0] sm:$0xff]  ;;  %vm7892_vm15 = vmor %vm2248_vm13, %vm2249_vm14  ;;  %vm2258_vm4 = vweird.f32 %v7815_v35 }
 0x1d1   :  { %v2244_v47 = vmul.f32 %v7813_v24, %v2243_v20  ;;  %v7842_v49 = vpop.f32.mrf.mxu3  ;;  %v955_v20 = vmul.f32 %v256_v59, %v256_v59  ;;  %v7861_v30 = vpop.permute.xlu2 %3059 }
 0x1d2   :  { %v1761_v52 = vsub.f32 %v1641_v41, %v1701_v17  ;;  %1312 = vmatmul.f32.gmra.mxu2 %v950_v57  ;;  %v7855_v37 = vmul.f32 0.0051020407, %v769_v48  ;;  %v2241_v57 = vsel %vm7835_vm11, %v7764_v61, %v2237_v19  ;;  %v2231_v41 = vsel %vm7848_vm12, %v7710_v60, %v2227_v46 }
 0x1d3   :  { %v2245_v54 = vmul.f32 0.5, %v2244_v47  ;;  %v952_v61 = vmul.f32 %v253_v42, %v253_v42  ;;  %v7886_v60 = vmul.f32 %v2241_v57, %v1878_v14  ;;  %v2597_v62 = vmul.f32 %v2231_v41, %v1877_v36 }
 0x1d4   :  { %v1821_v17 = vmax.f32 %v1761_v52, 0.0  ;;  %3459 = vperm.xlu2 %5876, %v2941_v32   ;;  %v774_v48 = vpop.f32.mrf.mxu1  ;;  %v1702_v32 = vmul.f32 %v7855_v37, %v7855_v37 }
 0x1d5   :  { %v2246_v47 = vsub.f32 1.5, %v2245_v54  ;;  %v1265_v34 = vpop.f32.mrf.mxu2  ;;  %5877 = vset.pattern.permute.xlu1 %v11709_v53  ;;  %618 = vmatmul.f32.gmra.mxu0 %v7788_v26 }
 0x1d6   :  { %v7878_v19 = vpop.eup %6002  ;;  %v7880_v45 = vadd.f32 1e-05, %v1821_v17  ;;  %v1463_v52 = vadd.f32 %v7790_v21, %v1265_v34  ;;  %3114 = vperm.xlu1 %5877, %v7749_v22   ;;  %5773 = vmatmul.msk.f32.gmra.mxu3 %vm279_vm1, %v955_v20  ;;  %v1879_v22 = vld [vmem:[%s11493_s2 + $0xd8] sm:$0xff]  ;;  %v7916_v41 = vpop.permute.xlu1 %3054 }
 0x1d7   :  { %5881 = vset.pattern.permute.xlu0 %v11709_v53  ;;  %v574_v46 = vpop.f32.mrf.mxu0  ;;  %v2247_v14 = vmul.f32 %v7813_v24, %v2246_v47  ;;  %v2253_v21 = vmul.f32 %v7878_v19, %v7815_v35  ;;  %5712 = vmatmul.msk.f32.gmra.mxu1 %vm279_vm1, %v256_v59  ;;  %vm2259_vm5 = vweird.f32 %v7878_v19 }
 0x1d8   :  { %6004 = vrsqrt.f32 %v7880_v45  ;;  %v1642_v20 = vmul.f32 0.0051020407, %v1463_v52  ;;  %3124 = vperm.xlu0 %5881, %v7886_v60   ;;  %v772_v54 = vadd.f32 %v7805_v40, %v574_v46  ;;  %v255_v40 = vld [vmem:[%s11491_s0 + $0x300] sm:$0xff]  ;;  %v957_v52 = vmul.f32 %v258_v31, %v258_v31  ;;  %vm8045_vm8 = vmor %vm2258_vm4, %vm2259_vm5 }
 0x1d9   :  { %v2251_v57 = vsel %vm7892_vm15, %v7813_v24, %v2247_v14  ;;  %v7914_v17 = vpop.f32.mrf.mxu3  ;;  %v7925_v59 = vpop.permute.xlu2 %2780  ;;  %v2254_v26 = vmul.f32 %v7878_v19, %v2253_v21  ;;  %v954_v14 = vmul.f32 %v255_v40, %v255_v40  ;;  %vm2268_vm2 = vweird.f32 %v7880_v45 }
 0x1da   :  { %v1762_v36 = vsub.f32 %v1642_v20, %v1702_v32  ;;  %1315 = vmatmul.f32.gmra.mxu2 %v952_v61  ;;  %v7918_v47 = vmul.f32 0.0051020407, %v772_v54  ;;  %v7920_v34 = vmul.f32 %v2251_v57, %v1879_v22  ;;  %v2657_v32 = vmul.f32 %v2597_v62, %v7587_v28  ;;  %v7932_v61 = vpop.permute.xlu0 %3049 }
 0x1dc   :  { %v1822_v24 = vmax.f32 %v1762_v36, 0.0  ;;  %5879 = vset.pattern.permute.xlu2 %v11709_v53  ;;  %v7930_v46 = vpop.f32.mrf.mxu1  ;;  %v1703_v21 = vmul.f32 %v7918_v47, %v7918_v47  ;;  %v2659_v28 = vmul.f32 %v7920_v34, %v7685_v50  ;;  %v7951_v36 = vld [vmem:[%s11491_s0 + $0x310] sm:$0xff]  ;;  %v260_v50 = vld [vmem:[%s11491_s0 + $0x328] sm:$0xff] }
 0x1dd   :  { %v1268_v22 = vpop.f32.mrf.mxu2  ;;  %3119 = vperm.xlu2 %5879, %v2597_v62   ;;  %621 = vmatmul.f32.gmra.mxu0 %v253_v42  ;;  %v959_v10 = vmul.f32 %v260_v50, %v260_v50 }
 0x1de   :  { %v7934_v20 = vpop.eup %6004  ;;  %v7936_v54 = vadd.f32 1e-05, %v1822_v24  ;;  %v1466_v57 = vadd.f32 %v7842_v49, %v1268_v22  ;;  %2802 = vrot.lane.b32.xlu1 %v2657_v32, %s6274_s29  ;;  %5774 = vmatmul.msk.f32.gmra.mxu3 %vm279_vm1, %v957_v52  ;;  %v7959_v52 = vmul.f32 0.5, %v2254_v26  ;;  %v6077_v32 = vld [vmem:[%s11491_s0 + $0x10] sm:$0xff]  ;;  %v6079_v26 = vld [vmem:[%s11493_s2 + $0x58] sm:$0xff] }
 0x1df   :  { %v2263_v42 = vmul.f32 %v7934_v20, %v7880_v45  ;;  %v577_v62 = vpop.f32.mrf.mxu0  ;;  %5880 = vset.pattern.permute.xlu1 %v11716_v38  ;;  %5713 = vmatmul.msk.f32.gmra.mxu1 %vm279_vm1, %v258_v31  ;;  %v3294_v22 = vmul.f32 %v6077_v32, %v7316_v43  ;;  %vm2269_vm3 = vweird.f32 %v7934_v20 }
 0x1e0   :  { %6006 = vrsqrt.f32 %v7936_v54  ;;  %v1643_v49 = vmul.f32 0.0051020407, %v1466_v57  ;;  %2806 = vrot.lane.b32.xlu0 %v2659_v28, %s6274_s29  ;;  %v775_v24 = vadd.f32 %v774_v48, %v577_v62  ;;  %v6078_v57 = vld [vmem:[%s11491_s0 + $0x18] sm:$0xff]  ;;  %v2943_v62 = vsub.f32 %v6079_v26, %v7800_v56  ;;  %v2779_v32 = vpop.permute.xlu1 %2778  ;;  %vm8023_vm6 = vmor %vm2268_vm2, %vm2269_vm3 }
 0x1e1   :  { %v3295_v48 = vmul.f32 %v6078_v57, %v7316_v43  ;;  %v2264_v31 = vmul.f32 %v7934_v20, %v2263_v42  ;;  %5884 = vset.pattern.permute.xlu0 %v11716_v38  ;;  %v7971_v28 = vpop.f32.mrf.mxu3  ;;  %v956_v43 = vmul.f32 %v7951_v36, %v7951_v36  ;;  %v2658_v42 = vmul.f32 %v7886_v60, %v7629_v23 }
 0x1e2   :  { %v1763_v13 = vsub.f32 %v1643_v49, %v1703_v21  ;;  %1318 = vmatmul.f32.gmra.mxu2 %v954_v14  ;;  %v7977_v12 = vmul.f32 0.0051020407, %v775_v24  ;;  %v2256_v14 = vsub.f32 1.5, %v7959_v52  ;;  %v2777_v49 = vpop.permute.xlu0 %2776  ;;  %v6080_v24 = vld [vmem:[%s11493_s2 + $0x68] sm:$0xff]  ;;  %vm2278_vm7 = vweird.f32 %v7936_v54 }
 0x1e3   :  { %v3420_v57 = vpop.permute.xlu2 %3419  ;;  %v2265_v15 = vmul.f32 0.5, %v2264_v31  ;;  %v2945_v26 = vsub.f32 %v6080_v24, %v2779_v32 }
 0x1e4   :  { %v1823_v9 = vmax.f32 %v1763_v13, 0.0  ;;  %v7984_v8 = vadd.f32 %v3420_v57, %v3294_v22  ;;  %v7986_v56 = vadd.f32 %v3420_v57, %v3295_v48  ;;  %v7988_v21 = vpop.f32.mrf.mxu1  ;;  %v1704_v23 = vmul.f32 %v7977_v12, %v7977_v12 }
 0x1e5   :  { %v1271_v60 = vpop.f32.mrf.mxu2  ;;  %2804 = vrot.lane.b32.xlu2 %v2658_v42, %s6274_s29  ;;  %624 = vmatmul.f32.gmra.mxu0 %v255_v40  ;;  %v2266_v13 = vsub.f32 1.5, %v2265_v15  ;;  %v2257_v45 = vmul.f32 %v7878_v19, %v2256_v14  ;;  %v1881_v14 = vld [vmem:[%s11493_s2 + $0xe8] sm:$0xff] }
 0x1e6   :  { %11735 = vst [vmem:[#allocation70_spill] sm:$0xff] %v7984_v8  ;;  %v7998_v22 = vpop.eup %6006  ;;  %v8000_v48 = vadd.f32 1e-05, %v1823_v9  ;;  %v1469_v32 = vadd.f32 %v7914_v17, %v1271_v60  ;;  %3469 = vperm.xlu1 %5880, %v2943_v62   ;;  %5882 = vset.pattern.permute.xlu2 %v11716_v38  ;;  %v262_v62 = vld [vmem:[%s11491_s0 + $0x338] sm:$0xff] }
 0x1e7   :  { %11736 = vst [vmem:[#allocation71_spill] sm:$0xff] %v7986_v56  ;;  %v2273_v57 = vmul.f32 %v7998_v22, %v7936_v54  ;;  %v580_v40 = vpop.f32.mrf.mxu0  ;;  %5775 = vmatmul.msk.f32.gmra.mxu3 %vm279_vm1, %v959_v10  ;;  %v2267_v17 = vmul.f32 %v7934_v20, %v2266_v13  ;;  %5714 = vmatmul.msk.f32.gmra.mxu1 %vm279_vm1, %v260_v50  ;;  %v8037_v13 = vld [vmem:[%s11491_s0 + $0x320] sm:$0xff]  ;;  %vm2279_vm9 = vweird.f32 %v7998_v22 }
 0x1e8   :  { %6008 = vrsqrt.f32 %v8000_v48  ;;  %v1644_v9 = vmul.f32 0.0051020407, %v1469_v32  ;;  %3479 = vperm.xlu0 %5884, %v2945_v26   ;;  %v778_v15 = vadd.f32 %v7930_v46, %v580_v40  ;;  %v6081_v46 = vld [vmem:[%s11493_s2 + $0x60] sm:$0xff]  ;;  %vm8083_vm10 = vmor %vm2278_vm7, %vm2279_vm9  ;;  %vm2288_vm11 = vweird.f32 %v8000_v48 }
 0x1e9   :  { %v2274_v10 = vmul.f32 %v7998_v22, %v2273_v57  ;;  %v8027_v24 = vpop.f32.mrf.mxu3  ;;  %v2944_v50 = vsub.f32 %v6081_v46, %v2777_v49  ;;  %v2271_v40 = vsel %vm8023_vm6, %v7934_v20, %v2267_v17  ;;  %v958_v46 = vmul.f32 %v8037_v13, %v8037_v13  ;;  %v1880_v17 = vld [vmem:[%s11493_s2 + $0xe0] sm:$0xff] }
 0x1ea   :  { %v1764_v26 = vsub.f32 %v1644_v9, %v1704_v23  ;;  %1321 = vmatmul.f32.gmra.mxu2 %v956_v43  ;;  %v8032_v60 = vmul.f32 0.0051020407, %v778_v15  ;;  %v961_v43 = vmul.f32 %v262_v62, %v262_v62  ;;  %v8060_v15 = vpop.permute.xlu0 %3064 }
 0x1eb   :  { %v2275_v32 = vmul.f32 0.5, %v2274_v10 }
 0x1ec   :  { %v1824_v23 = vmax.f32 %v1764_v26, 0.0  ;;  %v8050_v57 = vpop.permute.xlu2 %3074  ;;  %v8058_v9 = vpop.f32.mrf.mxu1  ;;  %v1705_v42 = vmul.f32 %v8032_v60, %v8032_v60 }
 0x1ed   :  { %v2276_v35 = vsub.f32 1.5, %v2275_v32  ;;  %v1274_v10 = vpop.f32.mrf.mxu2  ;;  %3474 = vperm.xlu2 %5882, %v2944_v50   ;;  %627 = vmatmul.f32.gmra.mxu0 %v7951_v36  ;;  %v2261_v36 = vsel %vm8045_vm8, %v7878_v19, %v2257_v45  ;;  %v1882_v45 = vld [vmem:[%s11493_s2 + $0xf0] sm:$0xff] }
 0x1ee   :  { %v8065_v26 = vpop.eup %6008  ;;  %v8067_v31 = vadd.f32 1e-05, %v1824_v23  ;;  %v1472_v20 = vadd.f32 %v7971_v28, %v1274_v10  ;;  %5883 = vset.pattern.permute.xlu1 %v11709_v53  ;;  %v8088_v28 = vmul.f32 %v2271_v40, %v1881_v14  ;;  %v8111_v14 = vld [vmem:[%s11491_s0 + $0x330] sm:$0xff]  ;;  %v6082_v40 = vld [vmem:[%s11491_s0] sm:$0xff]  ;;  %v6083_v10 = vld [vmem:[%s11491_s0 + $0x8] sm:$0xff] }
 0x1ef   :  { %3129 = vperm.xlu1 %5883, %v7920_v34   ;;  %v583_v32 = vpop.f32.mrf.mxu0  ;;  %v2277_v23 = vmul.f32 %v7998_v22, %v2276_v35  ;;  %5776 = vmatmul.msk.f32.gmra.mxu3 %vm279_vm1, %v961_v43  ;;  %v264_v34 = vld [vmem:[%s11491_s0 + $0x348] sm:$0xff]  ;;  %v2283_v49 = vmul.f32 %v8065_v26, %v8000_v48  ;;  %v2600_v43 = vmul.f32 %v2261_v36, %v1880_v17  ;;  %vm2289_vm12 = vweird.f32 %v8065_v26 }
 0x1f0   :  { %6010 = vrsqrt.f32 %v8067_v31  ;;  %v1645_v19 = vmul.f32 0.0051020407, %v1472_v20  ;;  %5887 = vset.pattern.permute.xlu0 %v11709_v53  ;;  %v781_v54 = vadd.f32 %v7988_v21, %v583_v32  ;;  %5715 = vmatmul.msk.f32.gmra.mxu1 %vm279_vm1, %v262_v62  ;;  %v3292_v35 = vmul.f32 %v6082_v40, %v7266_v39  ;;  %vm8246_vm13 = vmor %vm2288_vm11, %vm2289_vm12 }
 0x1f1   :  { %3139 = vperm.xlu0 %5887, %v8088_v28   ;;  %v2281_v21 = vsel %vm8083_vm10, %v7998_v22, %v2277_v23  ;;  %v8113_v62 = vpop.f32.mrf.mxu3  ;;  %v3293_v20 = vmul.f32 %v6083_v10, %v7266_v39  ;;  %v963_v32 = vmul.f32 %v264_v34, %v264_v34  ;;  %v960_v11 = vmul.f32 %v8111_v14, %v8111_v14 }
 0x1f2   :  { %v1765_v22 = vsub.f32 %v1645_v19, %v1705_v42  ;;  %1324 = vmatmul.f32.gmra.mxu2 %v958_v46  ;;  %v8123_v17 = vmul.f32 0.0051020407, %v781_v54  ;;  %v8125_v50 = vmul.f32 %v2281_v21, %v1882_v45  ;;  %v2284_v39 = vmul.f32 %v8065_v26, %v2283_v49  ;;  %v8138_v46 = vpop.permute.xlu0 %2782 }
 0x1f3   :  { %v3415_v36 = vpop.permute.xlu1 %3414  ;;  %v2660_v54 = vmul.f32 %v2600_v43, %v7747_v51  ;;  %vm2298_vm14 = vweird.f32 %v8067_v31 }
 0x1f4   :  { %v1825_v23 = vmax.f32 %v1765_v22, 0.0  ;;  %v8127_v52 = vadd.f32 %v3415_v36, %v3292_v35  ;;  %v8129_v56 = vadd.f32 %v3415_v36, %v3293_v20  ;;  %v8131_v40 = vpop.permute.xlu2 %2786  ;;  %v8135_v6 = vpop.f32.mrf.mxu1  ;;  %v1706_v42 = vmul.f32 %v8123_v17, %v8123_v17 }
 0x1f5   :  { %v1277_v19 = vpop.f32.mrf.mxu2  ;;  %5885 = vset.pattern.permute.xlu2 %v11709_v53  ;;  %630 = vmatmul.f32.gmra.mxu0 %v8037_v13  ;;  %v2662_v13 = vmul.f32 %v8125_v50, %v7855_v37  ;;  %v6084_v37 = vld [vmem:[%s11491_s0 + $0x20] sm:$0xff] }
 0x1f6   :  { %11743 = vst [vmem:[#allocation72_spill] sm:$0xff] %v8127_v52  ;;  %v8145_v45 = vpop.eup %6010  ;;  %v8147_v21 = vadd.f32 1e-05, %v1825_v23  ;;  %v1475_v10 = vadd.f32 %v8027_v24, %v1277_v19  ;;  %3134 = vperm.xlu2 %5885, %v2600_v43   ;;  %v8164_v24 = vld [vmem:[%s11491_s0 + $0x340] sm:$0xff]  ;;  %v3296_v43 = vmul.f32 %v6084_v37, %v7374_v29  ;;  %v2285_v19 = vmul.f32 0.5, %v2284_v39  ;;  %v6088_v39 = vld [vmem:[%s11493_s2 + $0x70] sm:$0xff] }
 0x1f7   :  { %11744 = vst [vmem:[#allocation73_spill] sm:$0xff] %v8129_v56  ;;  %v2293_v20 = vmul.f32 %v8145_v45, %v8067_v31  ;;  %2808 = vrot.lane.b32.xlu1 %v2660_v54, %s6274_s29  ;;  %v586_v51 = vpop.f32.mrf.mxu0  ;;  %5777 = vmatmul.msk.f32.gmra.mxu3 %vm279_vm1, %v963_v32  ;;  %v6085_v32 = vld [vmem:[%s11491_s0 + $0x28] sm:$0xff]  ;;  %v6086_v54 = vld [vmem:[%s11491_s0 + $0x40] sm:$0xff]  ;;  %v962_v49 = vmul.f32 %v8164_v24, %v8164_v24  ;;  %vm2299_vm15 = vweird.f32 %v8145_v45  ;;  %v270_v31 = vld [vmem:[%s11491_s0 + $0x378] sm:$0xff] }
 0x1f8   :  { %6012 = vrsqrt.f32 %v8147_v21  ;;  %v1646_v22 = vmul.f32 0.0051020407, %v1475_v10  ;;  %v784_v36 = vadd.f32 %v8058_v9, %v586_v51  ;;  %5886 = vset.pattern.permute.xlu1 %v11716_v38  ;;  %5716 = vmatmul.msk.f32.gmra.mxu1 %vm279_vm1, %v264_v34  ;;  %v3297_v9 = vmul.f32 %v6085_v32, %v7374_v29  ;;  %v266_v34 = vld [vmem:[%s11491_s0 + $0x358] sm:$0xff]  ;;  %v6087_v51 = vld [vmem:[%s11491_s0 + $0x48] sm:$0xff]  ;;  %vm8297_vm3 = vmor %vm2298_vm14, %vm2299_vm15 }
 0x1f9   :  { %2812 = vrot.lane.b32.xlu0 %v2662_v13, %s6274_s29  ;;  %v8176_v23 = vpop.f32.mrf.mxu3  ;;  %v3300_v10 = vmul.f32 %v6086_v54, %v7435_v25  ;;  %v3301_v29 = vmul.f32 %v6087_v51, %v7435_v25  ;;  %v2946_v32 = vsub.f32 %v6088_v39, %v7925_v59  ;;  %v2294_v54 = vmul.f32 %v8145_v45, %v2293_v20 }
 0x1fa   :  { %v1766_v13 = vsub.f32 %v1646_v22, %v1706_v42  ;;  %1327 = vmatmul.f32.gmra.mxu2 %v960_v11  ;;  %v8189_v37 = vmul.f32 0.0051020407, %v784_v36  ;;  %5890 = vset.pattern.permute.xlu0 %v11716_v38  ;;  %v2661_v22 = vmul.f32 %v8088_v28, %v7792_v16  ;;  %v965_v36 = vmul.f32 %v266_v34, %v266_v34 }
 0x1fb   :  { %vm2308_vm2 = vweird.f32 %v8147_v21 }
 0x1fc   :  { %v1826_v25 = vmax.f32 %v1766_v13, 0.0  ;;  %v8200_v42 = vpop.permute.xlu1 %3069  ;;  %v3435_v11 = vpop.permute.xlu2 %3434  ;;  %v1707_v59 = vmul.f32 %v8189_v37, %v8189_v37  ;;  %v2286_v13 = vsub.f32 1.5, %v2285_v19 }
 0x1fd   :  { %v8207_v51 = vadd.f32 %v3435_v11, %v3300_v10  ;;  %v8209_v20 = vadd.f32 %v3435_v11, %v3301_v29  ;;  %v1280_v39 = vpop.f32.mrf.mxu2  ;;  %v3425_v35 = vpop.permute.xlu0 %3424  ;;  %633 = vmatmul.f32.gmra.mxu0 %v8111_v14  ;;  %v969_v11 = vmul.f32 %v270_v31, %v270_v31 }
 0x1fe   :  { %v8212_v56 = vpop.eup %6012  ;;  %v8214_v5 = vadd.f32 1e-05, %v1826_v25  ;;  %v1478_v16 = vadd.f32 %v8113_v62, %v1280_v39  ;;  %v8217_v28 = vadd.f32 %v3425_v35, %v3296_v43  ;;  %v8219_v4 = vadd.f32 %v3425_v35, %v3297_v9  ;;  %2810 = vrot.lane.b32.xlu2 %v2661_v22, %s6274_s29  ;;  %v789_v10 = vpop.f32.mrf.mxu1 }
 0x1ff   :  { %11745 = vst [vmem:[#allocation74_spill] sm:$0xff] %v8207_v51  ;;  %v2303_v29 = vmul.f32 %v8212_v56, %v8147_v21  ;;  %3484 = vperm.xlu1 %5886, %v2946_v32   ;;  %v589_v19 = vpop.f32.mrf.mxu0  ;;  %5888 = vset.pattern.permute.xlu2 %v11716_v38  ;;  %v2295_v25 = vmul.f32 0.5, %v2294_v54  ;;  %v8237_v32 = vld [vmem:[%s11491_s0 + $0x350] sm:$0xff]  ;;  %v2287_v39 = vmul.f32 %v8065_v26, %v2286_v13  ;;  %vm2309_vm4 = vweird.f32 %v8212_v56 }
 0x200   :  { %11746 = vst [vmem:[#allocation75_spill] sm:$0xff] %v8209_v20  ;;  %6014 = vrsqrt.f32 %v8214_v5  ;;  %v1647_v62 = vmul.f32 0.0051020407, %v1478_v16  ;;  %5778 = vmatmul.msk.f32.gmra.mxu3 %vm279_vm1, %v965_v36  ;;  %5717 = vmatmul.msk.f32.gmra.mxu1 %vm279_vm1, %v266_v34  ;;  %v787_v22 = vadd.f32 %v8135_v6, %v589_v19  ;;  %v268_v6 = vld [vmem:[%s11491_s0 + $0x368] sm:$0xff]  ;;  %v964_v48 = vmul.f32 %v8237_v32, %v8237_v32  ;;  %vm8335_vm5 = vmor %vm2308_vm2, %vm2309_vm4 }
 0x201   :  { %11747 = vst [vmem:[#allocation76_spill] sm:$0xff] %v8217_v28  ;;  %v2304_v9 = vmul.f32 %v8212_v56, %v2303_v29  ;;  %v8239_v54 = vpop.f32.mrf.mxu3  ;;  %v2296_v19 = vsub.f32 1.5, %v2295_v25  ;;  %vm2318_vm6 = vweird.f32 %v8214_v5 }
 0x202   :  { %11748 = vst [vmem:[#allocation77_spill] sm:$0xff] %v8219_v4  ;;  %v1767_v16 = vsub.f32 %v1647_v62, %v1707_v59  ;;  %1330 = vmatmul.f32.gmra.mxu2 %v962_v49  ;;  %v8253_v29 = vmul.f32 0.0051020407, %v787_v22  ;;  %v6089_v59 = vld [vmem:[%s11493_s2 + $0x78] sm:$0xff]  ;;  %v967_v22 = vmul.f32 %v268_v6, %v268_v6 }
 0x203   :  { %v2305_v36 = vmul.f32 0.5, %v2304_v9  ;;  %v2947_v49 = vsub.f32 %v6089_v59, %v8138_v46  ;;  %v2291_v9 = vsel %vm8246_vm13, %v8065_v26, %v2287_v39  ;;  %v1883_v59 = vld [vmem:[%s11493_s2 + $0xf8] sm:$0xff] }
 0x204   :  { %v1827_v13 = vmax.f32 %v1767_v16, 0.0  ;;  %v1708_v25 = vmul.f32 %v8253_v29, %v8253_v29 }
 0x205   :  { %v2785_v62 = vpop.permute.xlu1 %2784  ;;  %v1283_v43 = vpop.f32.mrf.mxu2  ;;  %636 = vmatmul.f32.gmra.mxu0 %v8164_v24  ;;  %v6090_v24 = vld [vmem:[%s11493_s2 + $0x80] sm:$0xff] }
 0x206   :  { %v8267_v14 = vpop.eup %6014  ;;  %v8269_v46 = vadd.f32 1e-05, %v1827_v13  ;;  %v2948_v16 = vsub.f32 %v6090_v24, %v2785_v62  ;;  %v1481_v34 = vadd.f32 %v8176_v23, %v1283_v43  ;;  %v8277_v26 = vpop.permute.xlu2 %3089  ;;  %3489 = vperm.xlu2 %5888, %v2947_v49   ;;  %v2306_v13 = vsub.f32 1.5, %v2305_v36 }
 0x207   :  { %v8279_v39 = vpop.permute.xlu0 %3079  ;;  %5889 = vset.pattern.permute.xlu1 %v11709_v53  ;;  %v8285_v35 = vpop.f32.mrf.mxu1  ;;  %v2297_v43 = vmul.f32 %v8145_v45, %v2296_v19  ;;  %v2313_v49 = vmul.f32 %v8267_v14, %v8214_v5  ;;  %v2603_v36 = vmul.f32 %v2291_v9, %v1883_v59  ;;  %v6091_v9 = vld [vmem:[%s11491_s0 + $0x30] sm:$0xff]  ;;  %v1884_v59 = vld [vmem:[%s11493_s2 + $0x100] sm:$0xff]  ;;  %vm2319_vm7 = vweird.f32 %v8267_v14 }
 0x208   :  { %6016 = vrsqrt.f32 %v8269_v46  ;;  %v1648_v62 = vmul.f32 0.0051020407, %v1481_v34  ;;  %3494 = vperm.xlu0 %5890, %v2948_v16   ;;  %3144 = vperm.xlu1 %5889, %v8125_v50   ;;  %v592_v23 = vpop.f32.mrf.mxu0  ;;  %v8304_v50 = vld [vmem:[%s11491_s0 + $0x360] sm:$0xff]  ;;  %v3298_v16 = vmul.f32 %v6091_v9, %v7414_v33  ;;  %vm8452_vm8 = vmor %vm2318_vm6, %vm2319_vm7  ;;  %vm2328_vm9 = vweird.f32 %v8269_v46 }
 0x209   :  { %v790_v24 = vadd.f32 %v789_v10, %v592_v23  ;;  %5779 = vmatmul.msk.f32.gmra.mxu3 %vm279_vm1, %v967_v22  ;;  %v8307_v19 = vpop.f32.mrf.mxu3  ;;  %5718 = vmatmul.msk.f32.gmra.mxu1 %vm279_vm1, %v268_v6  ;;  %v2307_v22 = vmul.f32 %v8212_v56, %v2306_v13  ;;  %v6092_v6 = vld [vmem:[%s11491_s0 + $0x38] sm:$0xff]  ;;  %v966_v23 = vmul.f32 %v8304_v50, %v8304_v50 }
 0x20a   :  { %v1768_v10 = vsub.f32 %v1648_v62, %v1708_v25  ;;  %1333 = vmatmul.f32.gmra.mxu2 %v964_v48  ;;  %v3299_v48 = vmul.f32 %v6092_v6, %v7414_v33  ;;  %v2301_v62 = vsel %vm8297_vm3, %v8145_v45, %v2297_v43  ;;  %v2314_v33 = vmul.f32 %v8267_v14, %v2313_v49 }
 0x20b   :  { %v8318_v34 = vmul.f32 0.0051020407, %v790_v24  ;;  %v2663_v45 = vmul.f32 %v2603_v36, %v7918_v47  ;;  %v1885_v47 = vld [vmem:[%s11493_s2 + $0x108] sm:$0xff] }
 0x20c   :  { %v1828_v25 = vmax.f32 %v1768_v10, 0.0 }
 0x20d   :  { %v1709_v24 = vmul.f32 %v8318_v34, %v8318_v34  ;;  %v1286_v10 = vpop.f32.mrf.mxu2  ;;  %v3430_v9 = vpop.permute.xlu1 %3429  ;;  %639 = vmatmul.f32.gmra.mxu0 %v8237_v32  ;;  %v2604_v32 = vmul.f32 %v2301_v62, %v1884_v59 }
 0x20e   :  { %v8344_v43 = vpop.eup %6016  ;;  %v8346_v6 = vadd.f32 1e-05, %v1828_v25  ;;  %v1484_v21 = vadd.f32 %v8239_v54, %v1286_v10  ;;  %v8349_v4 = vadd.f32 %v3430_v9, %v3298_v16  ;;  %v8351_v20 = vadd.f32 %v3430_v9, %v3299_v48  ;;  %v8353_v49 = vpop.permute.xlu2 %2792  ;;  %5891 = vset.pattern.permute.xlu2 %v11709_v53  ;;  %v269_v9 = vld [vmem:[%s11491_s0 + $0x370] sm:$0xff] }
 0x20f   :  { %v8355_v7 = vpop.permute.xlu0 %2788  ;;  %3149 = vperm.xlu2 %5891, %v2603_v36   ;;  %v2311_v54 = vsel %vm8335_vm5, %v8212_v56, %v2307_v22  ;;  %v8364_v16 = vpop.f32.mrf.mxu1  ;;  %v2323_v36 = vmul.f32 %v8344_v43, %v8269_v46  ;;  %v968_v59 = vmul.f32 %v269_v9, %v269_v9  ;;  %vm2329_vm10 = vweird.f32 %v8344_v43  ;;  %v6099_v46 = vld [vmem:[%s11491_s0 + $0x78] sm:$0xff] }
 0x210   :  { %11755 = vst [vmem:[#allocation78_spill] sm:$0xff] %v8349_v4  ;;  %6018 = vrsqrt.f32 %v8346_v6  ;;  %v1649_v48 = vmul.f32 0.0051020407, %v1484_v21  ;;  %5893 = vset.pattern.permute.xlu0 %v11709_v53  ;;  %2814 = vrot.lane.b32.xlu1 %v2663_v45, %s6274_s29  ;;  %v8377_v10 = vmul.f32 %v2311_v54, %v1885_v47  ;;  %v272_v45 = vld [vmem:[%s11491_s0 + $0x388] sm:$0xff]  ;;  %v2315_v21 = vmul.f32 0.5, %v2314_v33  ;;  %vm8499_vm11 = vmor %vm2328_vm9, %vm2329_vm10 }
 0x211   :  { %11756 = vst [vmem:[#allocation79_spill] sm:$0xff] %v8351_v20  ;;  %3154 = vperm.xlu0 %5893, %v2604_v32   ;;  %v595_v62 = vpop.f32.mrf.mxu0  ;;  %5892 = vset.pattern.permute.xlu1 %v11716_v38  ;;  %v8374_v56 = vpop.f32.mrf.mxu3  ;;  %v971_v25 = vmul.f32 %v272_v45, %v272_v45  ;;  %vm2338_vm12 = vweird.f32 %v8346_v6 }
 0x212   :  { %v1769_v22 = vsub.f32 %v1649_v48, %v1709_v24  ;;  %1336 = vmatmul.f32.gmra.mxu2 %v966_v23  ;;  %v793_v13 = vadd.f32 %v8285_v35, %v595_v62  ;;  %5780 = vmatmul.msk.f32.gmra.mxu3 %vm279_vm1, %v969_v11  ;;  %v6093_v24 = vld [vmem:[%s11491_s0 + $0x60] sm:$0xff]  ;;  %v6094_v35 = vld [vmem:[%s11491_s0 + $0x68] sm:$0xff]  ;;  %v2324_v62 = vmul.f32 %v8344_v43, %v2323_v36 }
 0x213   :  { %v3304_v23 = vmul.f32 %v6093_v24, %v7579_v58  ;;  %5719 = vmatmul.msk.f32.gmra.mxu1 %vm279_vm1, %v270_v31  ;;  %v3305_v47 = vmul.f32 %v6094_v35, %v7579_v58  ;;  %v6095_v11 = vld [vmem:[%s11493_s2 + $0x88] sm:$0xff]  ;;  %v2664_v31 = vmul.f32 %v2604_v32, %v7977_v12  ;;  %v2665_v36 = vmul.f32 %v8377_v10, %v8032_v60 }
 0x214   :  { %v2949_v33 = vsub.f32 %v6095_v11, %v8131_v40  ;;  %v1829_v54 = vmax.f32 %v1769_v22, 0.0  ;;  %v8399_v48 = vmul.f32 0.0051020407, %v793_v13  ;;  %v2316_v13 = vsub.f32 1.5, %v2315_v21 }
 0x215   :  { %v1289_v24 = vpop.f32.mrf.mxu2  ;;  %642 = vmatmul.f32.gmra.mxu0 %v8304_v50 }
 0x216   :  { %v8404_v20 = vpop.eup %6018  ;;  %v1710_v58 = vmul.f32 %v8399_v48, %v8399_v48  ;;  %v1487_v35 = vadd.f32 %v8307_v19, %v1289_v24  ;;  %v3445_v40 = vpop.permute.xlu2 %3444  ;;  %v8415_v12 = vadd.f32 1e-05, %v1829_v54 }
 0x217   :  { %v8409_v22 = vpop.permute.xlu1 %3084  ;;  %v2333_v50 = vmul.f32 %v8404_v20, %v8346_v6  ;;  %v8417_v32 = vadd.f32 %v3445_v40, %v3304_v23  ;;  %v8419_v11 = vadd.f32 %v3445_v40, %v3305_v47  ;;  %2816 = vrot.lane.b32.xlu2 %v2664_v31, %s6274_s29  ;;  %v8422_v2 = vpop.f32.mrf.mxu1  ;;  %v2325_v31 = vmul.f32 0.5, %v2324_v62  ;;  %v8440_v40 = vld [vmem:[%s11491_s0 + $0x380] sm:$0xff] }
 0x218   :  { %v1650_v19 = vmul.f32 0.0051020407, %v1487_v35  ;;  %v8424_v24 = vpop.permute.xlu0 %3094  ;;  %3499 = vperm.xlu1 %5892, %v2949_v33   ;;  %5894 = vset.pattern.permute.xlu2 %v11716_v38  ;;  %6020 = vrsqrt.f32 %v8415_v12  ;;  %v970_v5 = vmul.f32 %v8440_v40, %v8440_v40  ;;  %vm2339_vm13 = vweird.f32 %v8404_v20 }
 0x219   :  { %11757 = vst [vmem:[#allocation80_spill] sm:$0xff] %v8417_v32  ;;  %v2334_v60 = vmul.f32 %v8404_v20, %v2333_v50  ;;  %2818 = vrot.lane.b32.xlu0 %v2665_v36, %s6274_s29  ;;  %v598_v47 = vpop.f32.mrf.mxu0  ;;  %v8433_v54 = vpop.f32.mrf.mxu3  ;;  %v2317_v36 = vmul.f32 %v8267_v14, %v2316_v13  ;;  %vm8556_vm14 = vmor %vm2338_vm12, %vm2339_vm13  ;;  %vm2348_vm15 = vweird.f32 %v8415_v12 }
 0x21a   :  { %11758 = vst [vmem:[#allocation81_spill] sm:$0xff] %v8419_v11  ;;  %v1770_v35 = vsub.f32 %v1650_v19, %v1710_v58  ;;  %1339 = vmatmul.f32.gmra.mxu2 %v968_v59  ;;  %v796_v33 = vadd.f32 %v8364_v16, %v598_v47  ;;  %5896 = vset.pattern.permute.xlu0 %v11716_v38  ;;  %v274_v59 = vld [vmem:[%s11491_s0 + $0x398] sm:$0xff]  ;;  %v2326_v19 = vsub.f32 1.5, %v2325_v31  ;;  %v1886_v31 = vld [vmem:[%s11493_s2 + $0x110] sm:$0xff] }
 0x21b   :  { %5781 = vmatmul.msk.f32.gmra.mxu3 %vm279_vm1, %v971_v25  ;;  %5720 = vmatmul.msk.f32.gmra.mxu1 %vm279_vm1, %v272_v45  ;;  %v2335_v25 = vmul.f32 0.5, %v2334_v60  ;;  %v6096_v45 = vld [vmem:[%s11493_s2 + $0x90] sm:$0xff] }
 0x21c   :  { %v1830_v62 = vmax.f32 %v1770_v35, 0.0  ;;  %v8446_v58 = vmul.f32 0.0051020407, %v796_v33  ;;  %v2950_v13 = vsub.f32 %v6096_v45, %v8355_v7  ;;  %v6097_v7 = vld [vmem:[%s11493_s2 + $0x98] sm:$0xff] }
 0x21d   :  { %v1292_v50 = vpop.f32.mrf.mxu2  ;;  %645 = vmatmul.f32.gmra.mxu0 %v269_v9 }
 0x21e   :  { %v8465_v47 = vadd.f32 1e-05, %v1830_v62  ;;  %v1711_v35 = vmul.f32 %v8446_v58, %v8446_v58  ;;  %v1490_v33 = vadd.f32 %v8374_v56, %v1292_v50  ;;  %v8470_v23 = vpop.permute.xlu2 %3104  ;;  %v2321_v62 = vsel %vm8452_vm8, %v8267_v14, %v2317_v36 }
 0x21f   :  { %v2791_v60 = vpop.permute.xlu1 %2790  ;;  %3504 = vperm.xlu2 %5894, %v2950_v13   ;;  %v973_v56 = vmul.f32 %v274_v59, %v274_v59  ;;  %v8483_v45 = vpop.f32.mrf.mxu1  ;;  %v2336_v13 = vsub.f32 1.5, %v2335_v25  ;;  %v2327_v14 = vmul.f32 %v8344_v43, %v2326_v19  ;;  %v8512_v19 = vld [vmem:[%s11491_s0 + $0x390] sm:$0xff] }
 0x220   :  { %v2951_v9 = vsub.f32 %v6097_v7, %v2791_v60  ;;  %v1651_v50 = vmul.f32 0.0051020407, %v1490_v33  ;;  %v8485_v21 = vpop.permute.xlu0 %2794  ;;  %5895 = vset.pattern.permute.xlu1 %v11709_v53  ;;  %v8488_v60 = vpop.eup %6020  ;;  %6022 = vrsqrt.f32 %v8465_v47  ;;  %v2606_v33 = vmul.f32 %v2321_v62, %v1886_v31 }
 0x221   :  { %3159 = vperm.xlu1 %5895, %v8377_v10   ;;  %v8493_v36 = vpop.f32.mrf.mxu3  ;;  %v6098_v10 = vld [vmem:[%s11491_s0 + $0x70] sm:$0xff]  ;;  %v2343_v31 = vmul.f32 %v8488_v60, %v8415_v12  ;;  %vm2349_vm2 = vweird.f32 %v8488_v60  ;;  %vm2358_vm4 = vweird.f32 %v8465_v47 }
 0x222   :  { %3509 = vperm.xlu0 %5896, %v2951_v9   ;;  %v1771_v16 = vsub.f32 %v1651_v50, %v1711_v35  ;;  %1342 = vmatmul.f32.gmra.mxu2 %v970_v5  ;;  %v601_v7 = vpop.f32.mrf.mxu0  ;;  %v3306_v25 = vmul.f32 %v6098_v10, %v7634_v55  ;;  %v3307_v35 = vmul.f32 %v6099_v46, %v7634_v55  ;;  %v1887_v10 = vld [vmem:[%s11493_s2 + $0x118] sm:$0xff]  ;;  %vm8675_vm3 = vmor %vm2348_vm15, %vm2349_vm2 }
 0x223   :  { %v799_v5 = vadd.f32 %v8422_v2, %v601_v7  ;;  %5782 = vmatmul.msk.f32.gmra.mxu3 %vm279_vm1, %v973_v56  ;;  %5721 = vmatmul.msk.f32.gmra.mxu1 %vm279_vm1, %v274_v59  ;;  %v6100_v2 = vld [vmem:[%s11491_s0 + $0x50] sm:$0xff]  ;;  %v276_v59 = vld [vmem:[%s11491_s0 + $0x3a8] sm:$0xff]  ;;  %v6101_v56 = vld [vmem:[%s11491_s0 + $0x58] sm:$0xff]  ;;  %v2337_v46 = vmul.f32 %v8404_v20, %v2336_v13  ;;  %v2344_v6 = vmul.f32 %v8488_v60, %v2343_v31 }
 0x224   :  { %v3302_v9 = vmul.f32 %v6100_v2, %v7605_v27  ;;  %v1831_v62 = vmax.f32 %v1771_v16, 0.0  ;;  %v3303_v55 = vmul.f32 %v6101_v56, %v7605_v27  ;;  %v2331_v16 = vsel %vm8499_vm11, %v8344_v43, %v2327_v14  ;;  %v1888_v31 = vld [vmem:[%s11493_s2 + $0x120] sm:$0xff] }
 0x225   :  { %v8534_v50 = vmul.f32 0.0051020407, %v799_v5  ;;  %v1295_v7 = vpop.f32.mrf.mxu2  ;;  %648 = vmatmul.f32.gmra.mxu0 %v8440_v40  ;;  %v2666_v56 = vmul.f32 %v2606_v33, %v8123_v17  ;;  %v972_v40 = vmul.f32 %v8512_v19, %v8512_v19  ;;  %v975_v17 = vmul.f32 %v276_v59, %v276_v59 }
 0x226   :  { %v8544_v2 = vadd.f32 1e-05, %v1831_v62  ;;  %v1493_v1 = vadd.f32 %v8433_v54, %v1295_v7  ;;  %v8547_v5 = vpop.permute.xlu2 %2798  ;;  %v8560_v11 = vpop.eup %6022  ;;  %v2607_v52 = vmul.f32 %v2331_v16, %v1887_v10 }
 0x227   :  { %v3440_v27 = vpop.permute.xlu1 %3439  ;;  %v1712_v54 = vmul.f32 %v8534_v50, %v8534_v50  ;;  %5897 = vset.pattern.permute.xlu2 %v11709_v53  ;;  %v8569_v62 = vpop.f32.mrf.mxu1  ;;  %vm2359_vm5 = vweird.f32 %v8560_v11 }
 0x228   :  { %v8564_v13 = vadd.f32 %v3440_v27, %v3302_v9  ;;  %v8566_v14 = vadd.f32 %v3440_v27, %v3303_v55  ;;  %6024 = vrsqrt.f32 %v8544_v2  ;;  %v1652_v7 = vmul.f32 0.0051020407, %v1493_v1  ;;  %v3450_v0 = vpop.permute.xlu0 %3449  ;;  %3164 = vperm.xlu2 %5897, %v2606_v33   ;;  %v275_v27 = vld [vmem:[%s11491_s0 + $0x3a0] sm:$0xff]  ;;  %vm8712_vm7 = vmor %vm2358_vm4, %vm2359_vm5 }
 0x229   :  { %v8575_v28 = vadd.f32 %v3450_v0, %v3306_v25  ;;  %2820 = vrot.lane.b32.xlu1 %v2666_v56, %s6274_s29  ;;  %v2341_v1 = vsel %vm8556_vm14, %v8404_v20, %v2337_v46  ;;  %v8585_v33 = vpop.f32.mrf.mxu3  ;;  %v2353_v55 = vmul.f32 %v8560_v11, %v8465_v47  ;;  %v8589_v25 = vadd.f32 %v3450_v0, %v3307_v35  ;;  %v6102_v56 = vld [vmem:[%s11491_s0 + $0x90] sm:$0xff]  ;;  %v278_v0 = vld [vmem:[%s11491_s0 + $0x3b8] sm:$0xff]  ;;  %v6107_v47 = vld [vmem:[%s11491_s0 + $0x80] sm:$0xff] }
 0x22a   :  { %11765 = vst [vmem:[#allocation82_spill] sm:$0xff] %v8564_v13  ;;  %5899 = vset.pattern.permute.xlu0 %v11709_v53  ;;  %v1772_v10 = vsub.f32 %v1652_v7, %v1712_v54  ;;  %1345 = vmatmul.f32.gmra.mxu2 %v972_v40  ;;  %v604_v16 = vpop.f32.mrf.mxu0  ;;  %v3310_v20 = vmul.f32 %v6102_v56, %v7745_v44  ;;  %v6103_v35 = vld [vmem:[%s11491_s0 + $0x98] sm:$0xff]  ;;  %vm2368_vm6 = vweird.f32 %v8544_v2 }
 0x22b   :  { %11766 = vst [vmem:[#allocation83_spill] sm:$0xff] %v8566_v14  ;;  %3169 = vperm.xlu0 %5899, %v2607_v52   ;;  %v802_v43 = vadd.f32 %v8483_v45, %v604_v16  ;;  %5898 = vset.pattern.permute.xlu1 %v11716_v38  ;;  %v3311_v40 = vmul.f32 %v6103_v35, %v7745_v44  ;;  %v2345_v45 = vmul.f32 0.5, %v2344_v6 }
 0x22c   :  { %11767 = vst [vmem:[#allocation84_spill] sm:$0xff] %v8575_v28  ;;  %5783 = vmatmul.msk.f32.gmra.mxu3 %vm279_vm1, %v975_v17  ;;  %v1832_v54 = vmax.f32 %v1772_v10, 0.0  ;;  %v8610_v56 = vmul.f32 %v2341_v1, %v1888_v31  ;;  %5722 = vmatmul.msk.f32.gmra.mxu1 %vm279_vm1, %v276_v59  ;;  %v6104_v17 = vld [vmem:[%s11493_s2 + $0xa0] sm:$0xff]  ;;  %v974_v44 = vmul.f32 %v275_v27, %v275_v27 }
 0x22d   :  { %11768 = vst [vmem:[#allocation85_spill] sm:$0xff] %v8589_v25  ;;  %v2952_v16 = vsub.f32 %v6104_v17, %v8353_v49  ;;  %v8617_v9 = vmul.f32 0.0051020407, %v802_v43  ;;  %v1298_v8 = vpop.f32.mrf.mxu2  ;;  %651 = vmatmul.f32.gmra.mxu0 %v8512_v19  ;;  %v2354_v31 = vmul.f32 %v8560_v11, %v2353_v55  ;;  %v2667_v6 = vmul.f32 %v2607_v52, %v8189_v37 }
 0x22e   :  { %v8620_v10 = vpop.eup %6024  ;;  %v1496_v1 = vadd.f32 %v8493_v36, %v1298_v8  ;;  %v3460_v59 = vpop.permute.xlu2 %3459  ;;  %v977_v35 = vmul.f32 %v278_v0, %v278_v0  ;;  %v8637_v55 = vadd.f32 1e-05, %v1832_v54  ;;  %v2668_v52 = vmul.f32 %v8610_v56, %v8253_v29 }
 0x22f   :  { %v2363_v7 = vmul.f32 %v8620_v10, %v8544_v2  ;;  %v1713_v49 = vmul.f32 %v8617_v9, %v8617_v9  ;;  %v8629_v43 = vadd.f32 %v3460_v59, %v3310_v20  ;;  %v8631_v19 = vadd.f32 %v3460_v59, %v3311_v40  ;;  %v8633_v17 = vpop.permute.xlu1 %3099  ;;  %v8635_v46 = vpop.f32.mrf.mxu1  ;;  %v6110_v2 = vld [vmem:[%s11491_s0 + $0x88] sm:$0xff] }
 0x230   :  { %v1653_v8 = vmul.f32 0.0051020407, %v1496_v1  ;;  %2822 = vrot.lane.b32.xlu2 %v2667_v6, %s6274_s29  ;;  %v2346_v54 = vsub.f32 1.5, %v2345_v45  ;;  %v2355_v1 = vmul.f32 0.5, %v2354_v31  ;;  %6026 = vrsqrt.f32 %v8637_v55  ;;  %v277_v45 = vld [vmem:[%s11491_s0 + $0x3b0] sm:$0xff] }
 0x231   :  { %11769 = vst [vmem:[#allocation86_spill] sm:$0xff] %v8629_v43  ;;  %v2364_v37 = vmul.f32 %v8620_v10, %v2363_v7  ;;  %v8645_v40 = vpop.permute.xlu0 %3109  ;;  %3514 = vperm.xlu1 %5898, %v2952_v16   ;;  %5900 = vset.pattern.permute.xlu2 %v11716_v38  ;;  %v8648_v59 = vpop.f32.mrf.mxu3  ;;  %vm2369_vm8 = vweird.f32 %v8620_v10  ;;  %vm2378_vm10 = vweird.f32 %v8637_v55 }
 0x232   :  { %11770 = vst [vmem:[#allocation87_spill] sm:$0xff] %v8631_v19  ;;  %v1773_v14 = vsub.f32 %v1653_v8, %v1713_v49  ;;  %1348 = vmatmul.f32.gmra.mxu2 %v974_v44  ;;  %v607_v29 = vpop.f32.mrf.mxu0  ;;  %v2347_v6 = vmul.f32 %v8488_v60, %v2346_v54  ;;  %vm8737_vm9 = vmor %vm2368_vm6, %vm2369_vm8 }
 0x233   :  { %2824 = vrot.lane.b32.xlu0 %v2668_v52, %s6274_s29  ;;  %v805_v7 = vadd.f32 %v8569_v62, %v607_v29  ;;  %v2365_v44 = vmul.f32 0.5, %v2364_v37 }
 0x234   :  { %5902 = vset.pattern.permute.xlu0 %v11716_v38  ;;  %5784 = vmatmul.msk.f32.gmra.mxu3 %vm279_vm1, %v977_v35  ;;  %v1833_v16 = vmax.f32 %v1773_v14, 0.0  ;;  %v6105_v35 = vld [vmem:[%s11493_s2 + $0xa8] sm:$0xff] }
 0x235   :  { %5723 = vmatmul.msk.f32.gmra.mxu1 %vm279_vm1, %v278_v0  ;;  %v8661_v31 = vmul.f32 0.0051020407, %v805_v7  ;;  %v1301_v62 = vpop.f32.mrf.mxu2  ;;  %654 = vmatmul.f32.gmra.mxu0 %v275_v27  ;;  %v2953_v49 = vsub.f32 %v6105_v35, %v8485_v21  ;;  %v2356_v27 = vsub.f32 1.5, %v2355_v1  ;;  %v976_v21 = vmul.f32 %v277_v45, %v277_v45 }
 0x236   :  { %v8668_v14 = vadd.f32 1e-05, %v1833_v16  ;;  %v1499_v8 = vadd.f32 %v8585_v33, %v1301_v62  ;;  %v6106_v33 = vld [vmem:[%s11493_s2 + $0xb0] sm:$0xff]  ;;  %v2366_v1 = vsub.f32 1.5, %v2365_v44  ;;  %v1889_v62 = vld [vmem:[%s11493_s2 + $0x128] sm:$0xff]  ;;  %v2351_v35 = vsel %vm8675_vm3, %v8488_v60, %v2347_v6 }
 0x237   :  { %v1714_v52 = vmul.f32 %v8661_v31, %v8661_v31  ;;  %v2797_v37 = vpop.permute.xlu1 %2796  ;;  %v8681_v54 = vpop.permute.xlu2 %3119  ;;  %v2609_v6 = vmul.f32 %v2351_v35, %v1889_v62  ;;  %v1890_v62 = vld [vmem:[%s11493_s2 + $0x130] sm:$0xff]  ;;  %v6109_v35 = vld [vmem:[%s11491_s0 + $0xa8] sm:$0xff] }
 0x238   :  { %v1654_v29 = vmul.f32 0.0051020407, %v1499_v8  ;;  %v2954_v7 = vsub.f32 %v6106_v33, %v2797_v37  ;;  %3519 = vperm.xlu2 %5900, %v2953_v49   ;;  %v8686_v12 = vpop.f32.mrf.mxu1  ;;  %v8701_v8 = vpop.eup %6026  ;;  %6028 = vrsqrt.f32 %v8668_v14  ;;  %v2357_v33 = vmul.f32 %v8560_v11, %v2356_v27 }
 0x239   :  { %v8690_v16 = vpop.permute.xlu0 %2800  ;;  %5901 = vset.pattern.permute.xlu1 %v11709_v53  ;;  %v8699_v49 = vpop.f32.mrf.mxu3  ;;  %v2373_v0 = vmul.f32 %v8701_v8, %v8637_v55  ;;  %vm2379_vm11 = vweird.f32 %v8701_v8  ;;  %vm2388_vm13 = vweird.f32 %v8668_v14 }
 0x23a   :  { %v1774_v37 = vsub.f32 %v1654_v29, %v1714_v52  ;;  %3174 = vperm.xlu1 %5901, %v8610_v56   ;;  %v610_v44 = vpop.f32.mrf.mxu0  ;;  %1351 = vmatmul.f32.gmra.mxu2 %v976_v21  ;;  %v3308_v29 = vmul.f32 %v6107_v47, %v7775_v63  ;;  %vm8848_vm12 = vmor %vm2378_vm10, %vm2379_vm11 }
 0x23b   :  { %3524 = vperm.xlu0 %5902, %v2954_v7   ;;  %v808_v20 = vadd.f32 %v8635_v46, %v610_v44  ;;  %v2367_v46 = vmul.f32 %v8620_v10, %v2366_v1  ;;  %v6108_v1 = vld [vmem:[%s11491_s0 + $0xa0] sm:$0xff] }
 0x23c   :  { %v1834_v56 = vmax.f32 %v1774_v37, 0.0  ;;  %v3313_v37 = vmul.f32 %v6109_v35, %v7751_v18 }
 0x23d   :  { %v8719_v27 = vmul.f32 0.0051020407, %v808_v20  ;;  %v1304_v52 = vpop.f32.mrf.mxu2  ;;  %657 = vmatmul.f32.gmra.mxu0 %v277_v45  ;;  %v2361_v20 = vsel %vm8712_vm7, %v8560_v11, %v2357_v33  ;;  %v3309_v11 = vmul.f32 %v6110_v2, %v7775_v63  ;;  %v2374_v63 = vmul.f32 %v8701_v8, %v2373_v0 }
 0x23e   :  { %v8726_v21 = vadd.f32 1e-05, %v1834_v56  ;;  %v1502_v7 = vadd.f32 %v8648_v59, %v1304_v52  ;;  %v3312_v59 = vmul.f32 %v6108_v1, %v7751_v18  ;;  %v8757_v56 = vpop.eup %6028  ;;  %v2669_v18 = vmul.f32 %v2609_v6, %v8318_v34 }
 0x23f   :  { %v1715_v44 = vmul.f32 %v8719_v27, %v8719_v27  ;;  %v3455_v33 = vpop.permute.xlu1 %3454  ;;  %v8755_v60 = vpop.permute.xlu2 %2804  ;;  %v2610_v36 = vmul.f32 %v2361_v20, %v1890_v62  ;;  %v2371_v25 = vsel %vm8737_vm9, %v8620_v10, %v2367_v46  ;;  %v2383_v10 = vmul.f32 %v8757_v56, %v8668_v14 }
 0x240   :  { %6030 = vrsqrt.f32 %v8726_v21  ;;  %v1655_v52 = vmul.f32 0.0051020407, %v1502_v7  ;;  %v8760_v47 = vadd.f32 %v3455_v33, %v3308_v29  ;;  %5903 = vset.pattern.permute.xlu2 %v11709_v53  ;;  %v813_v1 = vpop.f32.mrf.mxu1  ;;  %v8765_v35 = vadd.f32 %v3455_v33, %v3309_v11 }
 0x241   :  { %v3465_v2 = vpop.permute.xlu0 %3464  ;;  %3179 = vperm.xlu2 %5903, %v2609_v6   ;;  %v8770_v19 = vpop.f32.mrf.mxu3  ;;  %v1891_v6 = vld [vmem:[%s11493_s2 + $0x138] sm:$0xff]  ;;  %v2670_v46 = vmul.f32 %v2610_v36, %v8399_v48  ;;  %vm2389_vm14 = vweird.f32 %v8757_v56  ;;  %vm2398_vm15 = vweird.f32 %v8726_v21 }
 0x242   :  { %11777 = vst [vmem:[#allocation88_spill] sm:$0xff] %v8760_v47  ;;  %v1775_v29 = vsub.f32 %v1655_v52, %v1715_v44  ;;  %v8773_v3 = vadd.f32 %v3465_v2, %v3312_v59  ;;  %v8775_v34 = vadd.f32 %v3465_v2, %v3313_v37  ;;  %2826 = vrot.lane.b32.xlu1 %v2669_v18, %s6274_s29  ;;  %v613_v0 = vpop.f32.mrf.mxu0  ;;  %v2375_v59 = vmul.f32 0.5, %v2374_v63  ;;  %v6111_v18 = vld [vmem:[%s11491_s0 + $0xc0] sm:$0xff]  ;;  %v6112_v2 = vld [vmem:[%s11491_s0 + $0xc8] sm:$0xff]  ;;  %vm8882_vm2 = vmor %vm2388_vm13, %vm2389_vm14 }
 0x243   :  { %11778 = vst [vmem:[#allocation89_spill] sm:$0xff] %v8765_v35  ;;  %5905 = vset.pattern.permute.xlu0 %v11709_v53  ;;  %v811_v62 = vadd.f32 %v8686_v12, %v613_v0  ;;  %5904 = vset.pattern.permute.xlu1 %v11716_v38  ;;  %v8791_v33 = vmul.f32 %v2371_v25, %v1891_v6 }
 0x244   :  { %11779 = vst [vmem:[#allocation90_spill] sm:$0xff] %v8773_v3  ;;  %3184 = vperm.xlu0 %5905, %v2610_v36   ;;  %v1835_v37 = vmax.f32 %v1775_v29, 0.0  ;;  %v3316_v12 = vmul.f32 %v6111_v18, %v7916_v41  ;;  %v3317_v63 = vmul.f32 %v6112_v2, %v7916_v41  ;;  %v2384_v0 = vmul.f32 %v8757_v56, %v2383_v10  ;;  %v6113_v18 = vld [vmem:[%s11493_s2 + $0xb8] sm:$0xff] }
 0x245   :  { %11780 = vst [vmem:[#allocation91_spill] sm:$0xff] %v8775_v34  ;;  %v8789_v11 = vmul.f32 0.0051020407, %v811_v62  ;;  %v1307_v44 = vpop.f32.mrf.mxu2  ;;  %v2955_v45 = vsub.f32 %v6113_v18, %v8547_v5  ;;  %v2671_v48 = vmul.f32 %v8791_v33, %v8446_v58  ;;  %v2376_v20 = vsub.f32 1.5, %v2375_v59  ;;  %v6119_v34 = vld [vmem:[%s11491_s0 + $0xd8] sm:$0xff] }
 0x246   :  { %v8793_v52 = vpop.eup %6030  ;;  %v1505_v29 = vadd.f32 %v8699_v49, %v1307_v44  ;;  %v8820_v7 = vadd.f32 1e-05, %v1835_v37  ;;  %v2385_v37 = vmul.f32 0.5, %v2384_v0 }
 0x247   :  { %v2393_v25 = vmul.f32 %v8793_v52, %v8726_v21  ;;  %v1716_v6 = vmul.f32 %v8789_v11, %v8789_v11  ;;  %v3475_v62 = vpop.permute.xlu2 %3474  ;;  %v2377_v0 = vmul.f32 %v8701_v8, %v2376_v20  ;;  %v6115_v20 = vld [vmem:[%s11493_s2 + $0xc8] sm:$0xff]  ;;  %vm2399_vm3 = vweird.f32 %v8793_v52 }
 0x248   :  { %v1656_v41 = vmul.f32 0.0051020407, %v1505_v29  ;;  %v8814_v2 = vadd.f32 %v3475_v62, %v3316_v12  ;;  %v8816_v49 = vadd.f32 %v3475_v62, %v3317_v63  ;;  %v8818_v10 = vpop.permute.xlu1 %3114  ;;  %v816_v44 = vpop.f32.mrf.mxu1  ;;  %6032 = vrsqrt.f32 %v8820_v7  ;;  %vm8914_vm4 = vmor %vm2398_vm15, %vm2399_vm3 }
 0x249   :  { %2828 = vrot.lane.b32.xlu2 %v2670_v46, %s6274_s29  ;;  %v1510_v36 = vpop.f32.mrf.mxu3  ;;  %v2394_v35 = vmul.f32 %v8793_v52, %v2393_v25  ;;  %vm2408_vm5 = vweird.f32 %v8820_v7 }
 0x24a   :  { %11781 = vst [vmem:[#allocation92_spill] sm:$0xff] %v8814_v2  ;;  %v1776_v5 = vsub.f32 %v1656_v41, %v1716_v6  ;;  %v8828_v29 = vpop.permute.xlu0 %3124  ;;  %3529 = vperm.xlu1 %5904, %v2955_v45   ;;  %v616_v62 = vpop.f32.mrf.mxu0  ;;  %5906 = vset.pattern.permute.xlu2 %v11716_v38 }
 0x24b   :  { %11782 = vst [vmem:[#allocation93_spill] sm:$0xff] %v8816_v49  ;;  %v814_v46 = vadd.f32 %v813_v1, %v616_v62  ;;  %v2395_v6 = vmul.f32 0.5, %v2394_v35  ;;  %v6114_v1 = vld [vmem:[%s11493_s2 + $0xc0] sm:$0xff]  ;;  %v2386_v35 = vsub.f32 1.5, %v2385_v37  ;;  %v3319_v49 = vmul.f32 %v6119_v34, %v7861_v30 }
 0x24c   :  { %2830 = vrot.lane.b32.xlu0 %v2671_v48, %s6274_s29  ;;  %v1836_v58 = vmax.f32 %v1776_v5, 0.0  ;;  %v2956_v18 = vsub.f32 %v6114_v1, %v8690_v16 }
 0x24d   :  { %5908 = vset.pattern.permute.xlu0 %v11716_v38  ;;  %v8835_v59 = vmul.f32 0.0051020407, %v814_v46  ;;  %v1310_v25 = vpop.f32.mrf.mxu2 }
 0x24e   :  { %v1508_v45 = vadd.f32 %v8770_v19, %v1310_v25  ;;  %v8844_v41 = vadd.f32 1e-05, %v1836_v58  ;;  %v2396_v25 = vsub.f32 1.5, %v2395_v6 }
 0x24f   :  { %v1717_v55 = vmul.f32 %v8835_v59, %v8835_v59 }
 0x250   :  { %v1657_v5 = vmul.f32 0.0051020407, %v1508_v45  ;;  %v2803_v19 = vpop.permute.xlu1 %2802  ;;  %v8852_v62 = vpop.permute.xlu2 %3134  ;;  %6034 = vrsqrt.f32 %v8844_v41  ;;  %v2397_v14 = vmul.f32 %v8793_v52, %v2396_v25  ;;  %vm2418_vm8 = vweird.f32 %v8844_v41 }
 0x251   :  { %v2957_v46 = vsub.f32 %v6115_v20, %v2803_v19  ;;  %3534 = vperm.xlu2 %5906, %v2956_v18   ;;  %v8857_v16 = vpop.f32.mrf.mxu1  ;;  %v8861_v58 = vpop.f32.mrf.mxu3  ;;  %v1892_v19 = vld [vmem:[%s11493_s2 + $0x140] sm:$0xff]  ;;  %v2381_v18 = vsel %vm8848_vm12, %v8701_v8, %v2377_v0  ;;  %v6116_v0 = vld [vmem:[%s11491_s0 + $0xb0] sm:$0xff] }
 0x252   :  { %v1777_v37 = vsub.f32 %v1657_v5, %v1717_v55  ;;  %v8863_v45 = vpop.permute.xlu0 %2806  ;;  %5907 = vset.pattern.permute.xlu1 %v11709_v53  ;;  %v619_v1 = vpop.f32.mrf.mxu0  ;;  %v2387_v55 = vmul.f32 %v8757_v56, %v2386_v35  ;;  %v3314_v35 = vmul.f32 %v6116_v0, %v7932_v61 }
 0x253   :  { %3189 = vperm.xlu1 %5907, %v8791_v33   ;;  %v817_v6 = vadd.f32 %v816_v44, %v619_v1  ;;  %v8875_v5 = vpop.eup %6032  ;;  %v2612_v44 = vmul.f32 %v2381_v18, %v1892_v19  ;;  %v6117_v1 = vld [vmem:[%s11491_s0 + $0xb8] sm:$0xff] }
 0x254   :  { %3539 = vperm.xlu0 %5908, %v2957_v46   ;;  %v1837_v20 = vmax.f32 %v1777_v37, 0.0  ;;  %v2403_v19 = vmul.f32 %v8875_v5, %v8820_v7  ;;  %vm2409_vm6 = vweird.f32 %v8875_v5 }
 0x255   :  { %v8887_v8 = vmul.f32 0.0051020407, %v817_v6  ;;  %v1313_v33 = vpop.f32.mrf.mxu2  ;;  %v3315_v6 = vmul.f32 %v6117_v1, %v7932_v61  ;;  %v2672_v63 = vmul.f32 %v2612_v44, %v8534_v50  ;;  %v2401_v50 = vsel %vm8914_vm4, %v8793_v52, %v2397_v14  ;;  %vm9019_vm7 = vmor %vm2408_vm5, %vm2409_vm6 }
 0x256   :  { %v8893_v46 = vadd.f32 1e-05, %v1837_v20  ;;  %v1511_v37 = vadd.f32 %v1510_v36, %v1313_v33  ;;  %v1893_v20 = vld [vmem:[%s11493_s2 + $0x148] sm:$0xff]  ;;  %v2391_v36 = vsel %vm8882_vm2, %v8757_v56, %v2387_v55  ;;  %v8921_v1 = vpop.eup %6034  ;;  %v6118_v56 = vld [vmem:[%s11491_s0 + $0xd0] sm:$0xff] }
 0x257   :  { %v1718_v18 = vmul.f32 %v8887_v8, %v8887_v8  ;;  %v3318_v55 = vmul.f32 %v6118_v56, %v7861_v30  ;;  %v2613_v56 = vmul.f32 %v2391_v36, %v1893_v20  ;;  %v2413_v34 = vmul.f32 %v8921_v1, %v8844_v41  ;;  %v6126_v41 = vld [vmem:[%s11491_s0 + $0xe8] sm:$0xff] }
 0x258   :  { %6036 = vrsqrt.f32 %v8893_v46  ;;  %v1658_v25 = vmul.f32 0.0051020407, %v1511_v37  ;;  %v3470_v33 = vpop.permute.xlu1 %3469  ;;  %v8919_v0 = vpop.permute.xlu2 %2810  ;;  %vm2419_vm9 = vweird.f32 %v8921_v1  ;;  %vm2428_vm10 = vweird.f32 %v8893_v46 }
 0x259   :  { %v8927_v48 = vadd.f32 %v3470_v33, %v3314_v35  ;;  %v8929_v21 = vadd.f32 %v3470_v33, %v3315_v6  ;;  %5909 = vset.pattern.permute.xlu2 %v11709_v53  ;;  %v822_v37 = vpop.f32.mrf.mxu1  ;;  %v8933_v12 = vpop.f32.mrf.mxu3  ;;  %v1894_v6 = vld [vmem:[%s11493_s2 + $0x150] sm:$0xff]  ;;  %v2404_v33 = vmul.f32 %v8875_v5, %v2403_v19  ;;  %vm9049_vm11 = vmor %vm2418_vm8, %vm2419_vm9 }
 0x25a   :  { %v1778_v4 = vsub.f32 %v1658_v25, %v1718_v18  ;;  %v3480_v51 = vpop.permute.xlu0 %3479  ;;  %3194 = vperm.xlu2 %5909, %v2612_v44   ;;  %v622_v35 = vpop.f32.mrf.mxu0  ;;  %v8959_v19 = vmul.f32 %v2401_v50, %v1894_v6  ;;  %v6121_v25 = vld [vmem:[%s11491_s0 + $0xf8] sm:$0xff]  ;;  %v2414_v6 = vmul.f32 %v8921_v1, %v2413_v34 }
 0x25b   :  { %11789 = vst [vmem:[#allocation94_spill] sm:$0xff] %v8927_v48  ;;  %v8948_v30 = vadd.f32 %v3480_v51, %v3318_v55  ;;  %2832 = vrot.lane.b32.xlu1 %v2672_v63, %s6274_s29  ;;  %v8954_v44 = vadd.f32 %v3480_v51, %v3319_v49  ;;  %v820_v18 = vadd.f32 %v8857_v16, %v622_v35  ;;  %v6120_v49 = vld [vmem:[%s11491_s0 + $0xf0] sm:$0xff]  ;;  %v2405_v35 = vmul.f32 0.5, %v2404_v33 }
 0x25c   :  { %11790 = vst [vmem:[#allocation95_spill] sm:$0xff] %v8929_v21  ;;  %5911 = vset.pattern.permute.xlu0 %v11709_v53  ;;  %5910 = vset.pattern.permute.xlu1 %v11716_v38  ;;  %v1838_v36 = vmax.f32 %v1778_v4, 0.0  ;;  %v3322_v16 = vmul.f32 %v6120_v49, %v8200_v42  ;;  %v3323_v55 = vmul.f32 %v6121_v25, %v8200_v42  ;;  %v6122_v49 = vld [vmem:[%s11493_s2 + $0xd0] sm:$0xff] }
 0x25d   :  { %11791 = vst [vmem:[#allocation96_spill] sm:$0xff] %v8948_v30  ;;  %3199 = vperm.xlu0 %5911, %v2613_v56   ;;  %v1316_v14 = vpop.f32.mrf.mxu2  ;;  %v8964_v61 = vmul.f32 0.0051020407, %v820_v18  ;;  %v2673_v4 = vmul.f32 %v2613_v56, %v8617_v9  ;;  %v2958_v32 = vsub.f32 %v6122_v49, %v8755_v60  ;;  %v2674_v63 = vmul.f32 %v8959_v19, %v8661_v31 }
 0x25e   :  { %11792 = vst [vmem:[#allocation97_spill] sm:$0xff] %v8954_v44  ;;  %v8961_v20 = vpop.eup %6036  ;;  %v1514_v51 = vadd.f32 %v8861_v58, %v1316_v14  ;;  %v8991_v34 = vadd.f32 1e-05, %v1838_v36 }
 0x25f   :  { %v2423_v58 = vmul.f32 %v8961_v20, %v8893_v46  ;;  %v1719_v50 = vmul.f32 %v8964_v61, %v8964_v61  ;;  %vm2429_vm12 = vweird.f32 %v8961_v20 }
 0x260   :  { %v1659_v18 = vmul.f32 0.0051020407, %v1514_v51  ;;  %v3490_v14 = vpop.permute.xlu2 %3489  ;;  %6038 = vrsqrt.f32 %v8991_v34  ;;  %vm9084_vm13 = vmor %vm2428_vm10, %vm2429_vm12  ;;  %vm2438_vm14 = vweird.f32 %v8991_v34 }
 0x261   :  { %v8985_v42 = vadd.f32 %v3490_v14, %v3322_v16  ;;  %v8987_v33 = vadd.f32 %v3490_v14, %v3323_v55  ;;  %v8989_v9 = vpop.permute.xlu1 %3129  ;;  %v825_v56 = vpop.f32.mrf.mxu1  ;;  %v2406_v55 = vsub.f32 1.5, %v2405_v35  ;;  %v2415_v14 = vmul.f32 0.5, %v2414_v6 }
 0x262   :  { %v1779_v25 = vsub.f32 %v1659_v18, %v1719_v50  ;;  %2834 = vrot.lane.b32.xlu2 %v2673_v4, %s6274_s29  ;;  %v625_v51 = vpop.f32.mrf.mxu0  ;;  %v1519_v13 = vpop.f32.mrf.mxu3  ;;  %v2424_v36 = vmul.f32 %v8961_v20, %v2423_v58 }
 0x263   :  { %11793 = vst [vmem:[#allocation98_spill] sm:$0xff] %v8987_v33  ;;  %3544 = vperm.xlu1 %5910, %v2958_v32   ;;  %v823_v16 = vadd.f32 %v822_v37, %v625_v51  ;;  %5912 = vset.pattern.permute.xlu2 %v11716_v38  ;;  %v9007_v32 = vpop.permute.xlu0 %3139  ;;  %v6123_v37 = vld [vmem:[%s11493_s2 + $0xd8] sm:$0xff]  ;;  %v2407_v6 = vmul.f32 %v8875_v5, %v2406_v55 }
 0x264   :  { %v1839_v50 = vmax.f32 %v1779_v25, 0.0  ;;  %v2425_v7 = vmul.f32 0.5, %v2424_v36  ;;  %v6125_v25 = vld [vmem:[%s11491_s0 + $0xe0] sm:$0xff] }
 0x265   :  { %2836 = vrot.lane.b32.xlu0 %v2674_v63, %s6274_s29  ;;  %v9001_v4 = vmul.f32 0.0051020407, %v823_v16  ;;  %v1319_v18 = vpop.f32.mrf.mxu2  ;;  %v2959_v63 = vsub.f32 %v6123_v37, %v8863_v45  ;;  %v6124_v45 = vld [vmem:[%s11493_s2 + $0xe0] sm:$0xff] }
 0x266   :  { %5914 = vset.pattern.permute.xlu0 %v11716_v38  ;;  %v1517_v31 = vadd.f32 %v8933_v12, %v1319_v18  ;;  %v9017_v58 = vadd.f32 1e-05, %v1839_v50  ;;  %v2416_v12 = vsub.f32 1.5, %v2415_v14  ;;  %v1895_v14 = vld [vmem:[%s11493_s2 + $0x158] sm:$0xff] }
 0x267   :  { %v1720_v35 = vmul.f32 %v9001_v4, %v9001_v4 }
 0x268   :  { %v1660_v49 = vmul.f32 0.0051020407, %v1517_v31  ;;  %v2411_v31 = vsel %vm9019_vm7, %v8875_v5, %v2407_v6  ;;  %6040 = vrsqrt.f32 %v9017_v58  ;;  %vm2448_vm3 = vweird.f32 %v9017_v58 }
 0x269   :  { %v2809_v51 = vpop.permute.xlu1 %2808  ;;  %v9023_v16 = vpop.permute.xlu2 %3149 }
 0x26a   :  { %v1780_v18 = vsub.f32 %v1660_v49, %v1720_v35  ;;  %v2960_v37 = vsub.f32 %v6124_v45, %v2809_v51  ;;  %3549 = vperm.xlu2 %5912, %v2959_v63   ;;  %v628_v55 = vpop.f32.mrf.mxu0  ;;  %v828_v36 = vpop.f32.mrf.mxu1  ;;  %v2426_v63 = vsub.f32 1.5, %v2425_v7 }
 0x26b   :  { %5913 = vset.pattern.permute.xlu1 %v11709_v53  ;;  %v826_v50 = vadd.f32 %v825_v56, %v628_v55  ;;  %v1522_v35 = vpop.f32.mrf.mxu3  ;;  %v9037_v49 = vpop.eup %6038  ;;  %v2417_v56 = vmul.f32 %v8921_v1, %v2416_v12  ;;  %v3320_v12 = vmul.f32 %v6125_v25, %v8060_v15 }
 0x26c   :  { %v1840_v51 = vmax.f32 %v1780_v18, 0.0  ;;  %3204 = vperm.xlu1 %5913, %v8959_v19   ;;  %v2615_v19 = vmul.f32 %v2411_v31, %v1895_v14  ;;  %v3321_v18 = vmul.f32 %v6126_v41, %v8060_v15  ;;  %v1896_v31 = vld [vmem:[%s11493_s2 + $0x160] sm:$0xff]  ;;  %v2427_v15 = vmul.f32 %v8961_v20, %v2426_v63 }
 0x26d   :  { %3554 = vperm.xlu0 %5914, %v2960_v37   ;;  %v9043_v45 = vmul.f32 0.0051020407, %v826_v50  ;;  %v1322_v55 = vpop.f32.mrf.mxu2  ;;  %v2433_v37 = vmul.f32 %v9037_v49, %v8991_v34  ;;  %v9069_v50 = vpop.permute.xlu0 %2812  ;;  %v6129_v41 = vld [vmem:[%s11491_s0 + $0x120] sm:$0xff]  ;;  %vm2439_vm15 = vweird.f32 %v9037_v49 }
 0x26e   :  { %v9053_v6 = vadd.f32 1e-05, %v1840_v51  ;;  %v1520_v7 = vadd.f32 %v1519_v13, %v1322_v55  ;;  %v2421_v51 = vsel %vm9049_vm11, %v8921_v1, %v2417_v56  ;;  %v2675_v63 = vmul.f32 %v2615_v19, %v8719_v27  ;;  %v1897_v27 = vld [vmem:[%s11493_s2 + $0x168] sm:$0xff]  ;;  %vm9183_vm2 = vmor %vm2438_vm14, %vm2439_vm15 }
 0x26f   :  { %v1721_v13 = vmul.f32 %v9043_v45, %v9043_v45  ;;  %v2434_v46 = vmul.f32 %v9037_v49, %v2433_v37  ;;  %v2616_v44 = vmul.f32 %v2421_v51, %v1896_v31  ;;  %v6127_v31 = vld [vmem:[%s11491_s0 + $0x100] sm:$0xff] }
 0x270   :  { %6042 = vrsqrt.f32 %v9053_v6  ;;  %v1661_v14 = vmul.f32 0.0051020407, %v1520_v7  ;;  %v9088_v7 = vpop.eup %6040  ;;  %v3324_v51 = vmul.f32 %v6127_v31, %v8050_v57  ;;  %v6130_v31 = vld [vmem:[%s11491_s0 + $0x128] sm:$0xff]  ;;  %vm2458_vm5 = vweird.f32 %v9053_v6 }
 0x271   :  { %v3485_v55 = vpop.permute.xlu1 %3484  ;;  %v9078_v25 = vpop.permute.xlu2 %2816  ;;  %vm2449_vm4 = vweird.f32 %v9088_v7 }
 0x272   :  { %v1781_v60 = vsub.f32 %v1661_v14, %v1721_v13  ;;  %v9090_v52 = vadd.f32 %v3485_v55, %v3320_v12  ;;  %v9092_v5 = vadd.f32 %v3485_v55, %v3321_v18  ;;  %5915 = vset.pattern.permute.xlu2 %v11709_v53  ;;  %v631_v1 = vpop.f32.mrf.mxu0  ;;  %v9096_v56 = vpop.f32.mrf.mxu1  ;;  %vm9224_vm6 = vmor %vm2448_vm3, %vm2449_vm4 }
 0x273   :  { %3209 = vperm.xlu2 %5915, %v2615_v19   ;;  %v829_v21 = vadd.f32 %v828_v36, %v631_v1  ;;  %v9099_v33 = vpop.f32.mrf.mxu3  ;;  %v2431_v19 = vsel %vm9084_vm13, %v8961_v20, %v2427_v15  ;;  %v2443_v36 = vmul.f32 %v9088_v7, %v9017_v58  ;;  %v6128_v20 = vld [vmem:[%s11491_s0 + $0x108] sm:$0xff]  ;;  %v3328_v1 = vmul.f32 %v6129_v41, %v8409_v22  ;;  %v6134_v58 = vld [vmem:[%s11491_s0 + $0x110] sm:$0xff] }
 0x274   :  { %11800 = vst [vmem:[#allocation99_spill] sm:$0xff] %v9092_v5  ;;  %2838 = vrot.lane.b32.xlu1 %v2675_v63, %s6274_s29  ;;  %v3325_v15 = vmul.f32 %v6128_v20, %v8050_v57  ;;  %v2435_v63 = vmul.f32 0.5, %v2434_v46  ;;  %v9132_v13 = vmul.f32 %v2431_v19, %v1897_v27  ;;  %v3329_v57 = vmul.f32 %v6130_v31, %v8409_v22 }
 0x275   :  { %5917 = vset.pattern.permute.xlu0 %v11709_v53  ;;  %v9113_v18 = vmul.f32 0.0051020407, %v829_v21  ;;  %v1325_v37 = vpop.f32.mrf.mxu2  ;;  %5916 = vset.pattern.permute.xlu1 %v11716_v38  ;;  %v1841_v21 = vmax.f32 %v1781_v60, 0.0  ;;  %v6131_v60 = vld [vmem:[%s11493_s2 + $0xe8] sm:$0xff]  ;;  %v2444_v20 = vmul.f32 %v9088_v7, %v2443_v36  ;;  %v2676_v19 = vmul.f32 %v2616_v44, %v8789_v11 }
 0x276   :  { %3214 = vperm.xlu0 %5917, %v2616_v44   ;;  %v9116_v14 = vpop.eup %6042  ;;  %v1523_v55 = vadd.f32 %v1522_v35, %v1325_v37  ;;  %v2961_v35 = vsub.f32 %v6131_v60, %v8919_v0  ;;  %v2677_v44 = vmul.f32 %v9132_v13, %v8835_v59  ;;  %v2436_v28 = vsub.f32 1.5, %v2435_v63 }
 0x277   :  { %v1722_v12 = vmul.f32 %v9113_v18, %v9113_v18  ;;  %v2453_v46 = vmul.f32 %v9116_v14, %v9053_v6  ;;  %v9148_v22 = vadd.f32 1e-05, %v1841_v21  ;;  %vm2459_vm7 = vweird.f32 %v9116_v14 }
 0x278   :  { %v1662_v37 = vmul.f32 0.0051020407, %v1523_v55  ;;  %vm9257_vm8 = vmor %vm2458_vm5, %vm2459_vm7 }
 0x279   :  { %v3505_v27 = vpop.permute.xlu2 %3504  ;;  %6044 = vrsqrt.f32 %v9148_v22  ;;  %vm2468_vm9 = vweird.f32 %v9148_v22 }
 0x27a   :  { %v1782_v41 = vsub.f32 %v1662_v37, %v1722_v12  ;;  %v3495_v31 = vpop.permute.xlu0 %3494  ;;  %v9150_v5 = vadd.f32 %v3505_v27, %v3328_v1  ;;  %v9152_v0 = vadd.f32 %v3505_v27, %v3329_v57  ;;  %v9154_v60 = vpop.permute.xlu1 %3144  ;;  %v2454_v12 = vmul.f32 %v9116_v14, %v2453_v46 }
 0x27b   :  { %v9156_v55 = vadd.f32 %v3495_v31, %v3324_v51  ;;  %v9158_v36 = vadd.f32 %v3495_v31, %v3325_v15  ;;  %2840 = vrot.lane.b32.xlu2 %v2676_v19, %s6274_s29  ;;  %v634_v11 = vpop.f32.mrf.mxu0  ;;  %v834_v21 = vpop.f32.mrf.mxu1  ;;  %v2445_v15 = vmul.f32 0.5, %v2444_v20  ;;  %v2437_v20 = vmul.f32 %v9037_v49, %v2436_v28 }
 0x27c   :  { %11801 = vst [vmem:[#allocation100_spill] sm:$0xff] %v9150_v5  ;;  %v1842_v1 = vmax.f32 %v1782_v41, 0.0  ;;  %3559 = vperm.xlu1 %5916, %v2961_v35   ;;  %5918 = vset.pattern.permute.xlu2 %v11716_v38  ;;  %v1528_v51 = vpop.f32.mrf.mxu3  ;;  %v832_v59 = vadd.f32 %v9096_v56, %v634_v11  ;;  %v2455_v41 = vmul.f32 0.5, %v2454_v12 }
 0x27d   :  { %11802 = vst [vmem:[#allocation101_spill] sm:$0xff] %v9152_v0  ;;  %v1328_v31 = vpop.f32.mrf.mxu2  ;;  %v2446_v28 = vsub.f32 1.5, %v2445_v15  ;;  %v9205_v15 = vld [vmem:[%s11493_s2 + $0x170] sm:$0xff] }
 0x27e   :  { %11803 = vst [vmem:[#allocation102_spill] sm:$0xff] %v9156_v55  ;;  %2842 = vrot.lane.b32.xlu0 %v2677_v44, %s6274_s29  ;;  %v9172_v63 = vadd.f32 1e-05, %v1842_v1  ;;  %v1526_v46 = vadd.f32 %v9099_v33, %v1328_v31  ;;  %v9176_v35 = vmul.f32 0.0051020407, %v832_v59  ;;  %v6132_v33 = vld [vmem:[%s11493_s2 + $0xf0] sm:$0xff] }
 0x27f   :  { %11804 = vst [vmem:[#allocation103_spill] sm:$0xff] %v9158_v36  ;;  %5920 = vset.pattern.permute.xlu0 %v11716_v38  ;;  %v2962_v11 = vsub.f32 %v6132_v33, %v9069_v50  ;;  %v6133_v59 = vld [vmem:[%s11493_s2 + $0xf8] sm:$0xff]  ;;  %v2441_v33 = vsel %vm9183_vm2, %v9037_v49, %v2437_v20  ;;  %v2447_v56 = vmul.f32 %v9088_v7, %v2446_v28 }
 0x280   :  { %v1663_v37 = vmul.f32 0.0051020407, %v1526_v46  ;;  %v1723_v44 = vmul.f32 %v9176_v35, %v9176_v35  ;;  %6046 = vrsqrt.f32 %v9172_v63  ;;  %v2618_v57 = vmul.f32 %v2441_v33, %v9205_v15  ;;  %v9250_v33 = vld [vmem:[%s11493_s2 + $0x178] sm:$0xff] }
 0x281   :  { %vm2478_vm12 = vweird.f32 %v9172_v63 }
 0x282   :  { %v2815_v12 = vpop.permute.xlu1 %2814  ;;  %v9194_v1 = vpop.permute.xlu2 %3164  ;;  %v1783_v34 = vsub.f32 %v1663_v37, %v1723_v44  ;;  %v2456_v44 = vsub.f32 1.5, %v2455_v41 }
 0x283   :  { %v2963_v31 = vsub.f32 %v6133_v59, %v2815_v12  ;;  %v9200_v46 = vpop.permute.xlu0 %3154  ;;  %3564 = vperm.xlu2 %5918, %v2962_v11   ;;  %v637_v50 = vpop.f32.mrf.mxu0 }
 0x284   :  { %v9211_v37 = vpop.eup %6044  ;;  %v835_v19 = vadd.f32 %v834_v21, %v637_v50  ;;  %5919 = vset.pattern.permute.xlu1 %v11709_v53  ;;  %v837_v12 = vpop.f32.mrf.mxu1  ;;  %v1843_v59 = vmax.f32 %v1783_v34, 0.0  ;;  %v2457_v28 = vmul.f32 %v9116_v14, %v2456_v44  ;;  %v3326_v34 = vmul.f32 %v6134_v58, %v8279_v39 }
 0x285   :  { %v1531_v11 = vpop.f32.mrf.mxu3  ;;  %v1331_v27 = vpop.f32.mrf.mxu2  ;;  %3219 = vperm.xlu1 %5919, %v9132_v13   ;;  %v2463_v13 = vmul.f32 %v9211_v37, %v9148_v22  ;;  %v2451_v44 = vsel %vm9224_vm6, %v9088_v7, %v2447_v56  ;;  %vm2469_vm10 = vweird.f32 %v9211_v37 }
 0x286   :  { %3569 = vperm.xlu0 %5920, %v2963_v31   ;;  %v9217_v49 = vmul.f32 0.0051020407, %v835_v19  ;;  %v1529_v20 = vadd.f32 %v1528_v51, %v1331_v27  ;;  %v9231_v41 = vadd.f32 1e-05, %v1843_v59  ;;  %v9233_v19 = vpop.eup %6046  ;;  %v6135_v31 = vld [vmem:[%s11491_s0 + $0x118] sm:$0xff]  ;;  %v2619_v5 = vmul.f32 %v2451_v44, %v9250_v33  ;;  %vm9358_vm11 = vmor %vm2468_vm9, %vm2469_vm10 }
 0x287   :  { %v3327_v50 = vmul.f32 %v6135_v31, %v8279_v39  ;;  %v2678_v39 = vmul.f32 %v2618_v57, %v8887_v8  ;;  %v2464_v31 = vmul.f32 %v9211_v37, %v2463_v13  ;;  %v2473_v36 = vmul.f32 %v9233_v19, %v9172_v63  ;;  %v9278_v13 = vld [vmem:[%s11493_s2 + $0x180] sm:$0xff] }
 0x288   :  { %v1724_v51 = vmul.f32 %v9217_v49, %v9217_v49  ;;  %v1664_v27 = vmul.f32 0.0051020407, %v1529_v20  ;;  %6048 = vrsqrt.f32 %v9231_v41  ;;  %vm2479_vm13 = vweird.f32 %v9233_v19 }
 0x289   :  { %v2465_v44 = vmul.f32 0.5, %v2464_v31  ;;  %vm9386_vm14 = vmor %vm2478_vm12, %vm2479_vm13  ;;  %vm2488_vm15 = vweird.f32 %v9231_v41 }
 0x28a   :  { %v3500_v20 = vpop.permute.xlu1 %3499  ;;  %v9261_v58 = vpop.permute.xlu2 %2822  ;;  %v1784_v56 = vsub.f32 %v1664_v27, %v1724_v51 }
 0x28b   :  { %v9267_v0 = vadd.f32 %v3500_v20, %v3326_v34  ;;  %v9269_v21 = vadd.f32 %v3500_v20, %v3327_v50  ;;  %v9271_v7 = vpop.permute.xlu0 %2818  ;;  %5921 = vset.pattern.permute.xlu2 %v11709_v53  ;;  %v640_v6 = vpop.f32.mrf.mxu0  ;;  %v2461_v34 = vsel %vm9257_vm8, %v9116_v14, %v2457_v28  ;;  %v2474_v14 = vmul.f32 %v9233_v19, %v2473_v36  ;;  %v6137_v36 = vld [vmem:[%s11491_s0 + $0x150] sm:$0xff] }
 0x28c   :  { %v838_v55 = vadd.f32 %v837_v12, %v640_v6  ;;  %3224 = vperm.xlu2 %5921, %v2618_v57   ;;  %v840_v8 = vpop.f32.mrf.mxu1  ;;  %v9294_v28 = vmul.f32 %v2461_v34, %v9278_v13  ;;  %v1844_v6 = vmax.f32 %v1784_v56, 0.0  ;;  %v3334_v31 = vmul.f32 %v6137_v36, %v8633_v17  ;;  %v6138_v56 = vld [vmem:[%s11491_s0 + $0x158] sm:$0xff] }
 0x28d   :  { %11811 = vst [vmem:[#allocation104_spill] sm:$0xff] %v9267_v0  ;;  %v1534_v47 = vpop.f32.mrf.mxu3  ;;  %v1334_v51 = vpop.f32.mrf.mxu2  ;;  %2844 = vrot.lane.b32.xlu1 %v2678_v39, %s6274_s29  ;;  %v3335_v34 = vmul.f32 %v6138_v56, %v8633_v17  ;;  %v2679_v0 = vmul.f32 %v2619_v5, %v8964_v61  ;;  %v2475_v48 = vmul.f32 0.5, %v2474_v14 }
 0x28e   :  { %11812 = vst [vmem:[#allocation105_spill] sm:$0xff] %v9269_v21  ;;  %5923 = vset.pattern.permute.xlu0 %v11709_v53  ;;  %v9287_v57 = vmul.f32 0.0051020407, %v838_v55  ;;  %v1532_v12 = vadd.f32 %v1531_v11, %v1334_v51  ;;  %5922 = vset.pattern.permute.xlu1 %v11716_v38  ;;  %v9290_v27 = vpop.eup %6048  ;;  %v6136_v11 = vld [vmem:[%s11491_s0 + $0x130] sm:$0xff]  ;;  %v9330_v30 = vadd.f32 1e-05, %v1844_v6 }
 0x28f   :  { %3229 = vperm.xlu0 %5923, %v2619_v5   ;;  %v2483_v59 = vmul.f32 %v9290_v27, %v9231_v41  ;;  %v3330_v51 = vmul.f32 %v6136_v11, %v8277_v26  ;;  %v6140_v11 = vld [vmem:[%s11493_s2 + $0x100] sm:$0xff]  ;;  %v2476_v6 = vsub.f32 1.5, %v2475_v48  ;;  %vm2489_vm2 = vweird.f32 %v9290_v27 }
 0x290   :  { %v1725_v55 = vmul.f32 %v9287_v57, %v9287_v57  ;;  %v1665_v39 = vmul.f32 0.0051020407, %v1532_v12  ;;  %v6139_v12 = vld [vmem:[%s11491_s0 + $0x138] sm:$0xff]  ;;  %v2964_v50 = vsub.f32 %v6140_v11, %v9078_v25  ;;  %6050 = vrsqrt.f32 %v9330_v30  ;;  %v6141_v11 = vld [vmem:[%s11493_s2 + $0x108] sm:$0xff]  ;;  %vm9424_vm3 = vmor %vm2488_vm15, %vm2489_vm2 }
 0x291   :  { %v3331_v20 = vmul.f32 %v6139_v12, %v8277_v26  ;;  %v2680_v26 = vmul.f32 %v9294_v28, %v9001_v4  ;;  %v2466_v12 = vsub.f32 1.5, %v2465_v44  ;;  %v2484_v2 = vmul.f32 %v9290_v27, %v2483_v59 }
 0x292   :  { %v1785_v21 = vsub.f32 %v1665_v39, %v1725_v55  ;;  %v3520_v36 = vpop.permute.xlu2 %3519  ;;  %vm2498_vm4 = vweird.f32 %v9330_v30 }
 0x293   :  { %v9321_v43 = vadd.f32 %v3520_v36, %v3334_v31  ;;  %v9323_v3 = vadd.f32 %v3520_v36, %v3335_v34  ;;  %v9325_v17 = vpop.permute.xlu1 %3159  ;;  %v643_v55 = vpop.f32.mrf.mxu0  ;;  %v2965_v36 = vsub.f32 %v6141_v11, %v9271_v7 }
 0x294   :  { %v3510_v56 = vpop.permute.xlu0 %3509  ;;  %v1845_v25 = vmax.f32 %v1785_v21, 0.0  ;;  %2846 = vrot.lane.b32.xlu2 %v2679_v0, %s6274_s29  ;;  %v843_v61 = vpop.f32.mrf.mxu1  ;;  %v841_v14 = vadd.f32 %v840_v8, %v643_v55  ;;  %v2485_v8 = vmul.f32 0.5, %v2484_v2 }
 0x295   :  { %11813 = vst [vmem:[#allocation106_spill] sm:$0xff] %v9321_v43  ;;  %v9335_v31 = vadd.f32 %v3510_v56, %v3330_v51  ;;  %v9337_v34 = vadd.f32 %v3510_v56, %v3331_v20  ;;  %v1337_v4 = vpop.f32.mrf.mxu2  ;;  %3574 = vperm.xlu1 %5922, %v2964_v50   ;;  %5924 = vset.pattern.permute.xlu2 %v11716_v38  ;;  %v1537_v44 = vpop.f32.mrf.mxu3 }
 0x296   :  { %11814 = vst [vmem:[#allocation107_spill] sm:$0xff] %v9323_v3  ;;  %v1535_v59 = vadd.f32 %v1534_v47, %v1337_v4  ;;  %v9347_v50 = vmul.f32 0.0051020407, %v841_v14  ;;  %v9349_v47 = vadd.f32 1e-05, %v1845_v25  ;;  %v2467_v51 = vmul.f32 %v9211_v37, %v2466_v12  ;;  %v6142_v12 = vld [vmem:[%s11493_s2 + $0x110] sm:$0xff] }
 0x297   :  { %11815 = vst [vmem:[#allocation108_spill] sm:$0xff] %v9335_v31  ;;  %2848 = vrot.lane.b32.xlu0 %v2680_v26, %s6274_s29  ;;  %v2477_v4 = vmul.f32 %v9233_v19, %v2476_v6  ;;  %v2486_v14 = vsub.f32 1.5, %v2485_v8  ;;  %v6149_v3 = vld [vmem:[%s11493_s2 + $0x118] sm:$0xff] }
 0x298   :  { %11816 = vst [vmem:[#allocation109_spill] sm:$0xff] %v9337_v34  ;;  %5926 = vset.pattern.permute.xlu0 %v11716_v38  ;;  %v1666_v20 = vmul.f32 0.0051020407, %v1535_v59  ;;  %v1726_v22 = vmul.f32 %v9347_v50, %v9347_v50  ;;  %6052 = vrsqrt.f32 %v9349_v47  ;;  %vm2508_vm7 = vweird.f32 %v9349_v47 }
 0x29a   :  { %v1786_v26 = vsub.f32 %v1666_v20, %v1726_v22  ;;  %v9377_v20 = vld [vmem:[%s11493_s2 + $0x188] sm:$0xff]  ;;  %v2471_v22 = vsel %vm9358_vm11, %v9211_v37, %v2467_v51 }
 0x29b   :  { %v2821_v2 = vpop.permute.xlu1 %2820  ;;  %v9364_v48 = vpop.permute.xlu2 %3179  ;;  %v2621_v51 = vmul.f32 %v2471_v22, %v9377_v20  ;;  %v6146_v22 = vld [vmem:[%s11491_s0 + $0x168] sm:$0xff] }
 0x29c   :  { %v2966_v7 = vsub.f32 %v6142_v12, %v2821_v2  ;;  %v646_v25 = vpop.f32.mrf.mxu0  ;;  %3579 = vperm.xlu2 %5924, %v2965_v36   ;;  %v1846_v8 = vmax.f32 %v1786_v26, 0.0  ;;  %v846_v2 = vpop.f32.mrf.mxu1  ;;  %v2481_v26 = vsel %vm9386_vm14, %v9233_v19, %v2477_v4  ;;  %v6144_v4 = vld [vmem:[%s11491_s0 + $0x148] sm:$0xff] }
 0x29d   :  { %v9369_v55 = vpop.permute.xlu0 %3169  ;;  %v844_v59 = vadd.f32 %v843_v61, %v646_v25  ;;  %v1340_v11 = vpop.f32.mrf.mxu2  ;;  %5925 = vset.pattern.permute.xlu1 %v11709_v53  ;;  %v2487_v25 = vmul.f32 %v9290_v27, %v2486_v14 }
 0x29e   :  { %v9390_v61 = vpop.eup %6050  ;;  %v1538_v36 = vadd.f32 %v1537_v44, %v1340_v11  ;;  %3234 = vperm.xlu1 %5925, %v9294_v28   ;;  %v1540_v37 = vpop.f32.mrf.mxu3  ;;  %v9397_v63 = vadd.f32 1e-05, %v1846_v8  ;;  %v3333_v11 = vmul.f32 %v6144_v4, %v8424_v24 }
 0x29f   :  { %3584 = vperm.xlu0 %5926, %v2966_v7   ;;  %v9394_v56 = vmul.f32 0.0051020407, %v844_v59  ;;  %v2493_v28 = vmul.f32 %v9390_v61, %v9330_v30  ;;  %v9410_v7 = vld [vmem:[%s11493_s2 + $0x190] sm:$0xff]  ;;  %v6143_v59 = vld [vmem:[%s11491_s0 + $0x140] sm:$0xff]  ;;  %v9428_v14 = vpop.eup %6052  ;;  %vm2499_vm5 = vweird.f32 %v9390_v61 }
 0x2a0   :  { %v1667_v12 = vmul.f32 0.0051020407, %v1538_v36  ;;  %v3332_v19 = vmul.f32 %v6143_v59, %v8424_v24  ;;  %6054 = vrsqrt.f32 %v9397_v63  ;;  %v2681_v24 = vmul.f32 %v2621_v51, %v9043_v45  ;;  %vm9525_vm6 = vmor %vm2498_vm4, %vm2499_vm5 }
 0x2a1   :  { %v1727_v44 = vmul.f32 %v9394_v56, %v9394_v56  ;;  %v2622_v41 = vmul.f32 %v2481_v26, %v9410_v7  ;;  %v2494_v4 = vmul.f32 %v9390_v61, %v2493_v28  ;;  %vm2509_vm8 = vweird.f32 %v9428_v14 }
 0x2a2   :  { %vm9565_vm9 = vmor %vm2508_vm7, %vm2509_vm8  ;;  %vm2518_vm10 = vweird.f32 %v9397_v63 }
 0x2a3   :  { %v3515_v6 = vpop.permute.xlu1 %3514  ;;  %v9430_v8 = vpop.permute.xlu2 %2828  ;;  %v1787_v0 = vsub.f32 %v1667_v12, %v1727_v44  ;;  %v2495_v28 = vmul.f32 0.5, %v2494_v4 }
 0x2a4   :  { %v9432_v36 = vadd.f32 %v3515_v6, %v3332_v19  ;;  %v9434_v59 = vadd.f32 %v3515_v6, %v3333_v11  ;;  %v649_v21 = vpop.f32.mrf.mxu0  ;;  %5927 = vset.pattern.permute.xlu2 %v11709_v53  ;;  %v2491_v19 = vsel %vm9424_vm3, %v9290_v27, %v2487_v25  ;;  %v2503_v11 = vmul.f32 %v9428_v14, %v9349_v47  ;;  %v849_v26 = vpop.f32.mrf.mxu1  ;;  %v6153_v47 = vld [vmem:[%s11491_s0 + $0x178] sm:$0xff] }
 0x2a5   :  { %v9436_v39 = vpop.permute.xlu0 %2824  ;;  %v847_v5 = vadd.f32 %v846_v2, %v649_v21  ;;  %v1343_v34 = vpop.f32.mrf.mxu2  ;;  %3239 = vperm.xlu2 %5927, %v2621_v51   ;;  %v9454_v21 = vld [vmem:[%s11493_s2 + $0x198] sm:$0xff]  ;;  %v1847_v44 = vmax.f32 %v1787_v0, 0.0  ;;  %v6148_v0 = vld [vmem:[%s11491_s0 + $0x188] sm:$0xff] }
 0x2a6   :  { %11823 = vst [vmem:[#allocation110_spill] sm:$0xff] %v9432_v36  ;;  %v1541_v45 = vadd.f32 %v1540_v37, %v1343_v34  ;;  %2850 = vrot.lane.b32.xlu1 %v2681_v24, %s6274_s29  ;;  %v9459_v27 = vpop.eup %6054  ;;  %v6145_v34 = vld [vmem:[%s11491_s0 + $0x160] sm:$0xff]  ;;  %v9468_v25 = vmul.f32 %v2491_v19, %v9454_v21  ;;  %v3337_v24 = vmul.f32 %v6146_v22, %v8470_v23 }
 0x2a7   :  { %11824 = vst [vmem:[#allocation111_spill] sm:$0xff] %v9434_v59  ;;  %5929 = vset.pattern.permute.xlu0 %v11709_v53  ;;  %v9456_v2 = vmul.f32 0.0051020407, %v847_v5  ;;  %5928 = vset.pattern.permute.xlu1 %v11716_v38  ;;  %v3336_v37 = vmul.f32 %v6145_v34, %v8470_v23  ;;  %v1543_v5 = vpop.f32.mrf.mxu3  ;;  %v3341_v34 = vmul.f32 %v6148_v0, %v8818_v10  ;;  %vm2519_vm11 = vweird.f32 %v9459_v27 }
 0x2a8   :  { %3244 = vperm.xlu0 %5929, %v2622_v41   ;;  %v1668_v51 = vmul.f32 0.0051020407, %v1541_v45  ;;  %v6147_v45 = vld [vmem:[%s11491_s0 + $0x180] sm:$0xff]  ;;  %v2504_v19 = vmul.f32 %v9428_v14, %v2503_v11  ;;  %v2967_v23 = vsub.f32 %v6149_v3, %v9261_v58  ;;  %v2513_v22 = vmul.f32 %v9459_v27, %v9397_v63  ;;  %vm9596_vm12 = vmor %vm2518_vm10, %vm2519_vm11 }
 0x2a9   :  { %v1728_v12 = vmul.f32 %v9456_v2, %v9456_v2  ;;  %v3340_v4 = vmul.f32 %v6147_v45, %v8818_v10  ;;  %v2682_v45 = vmul.f32 %v2622_v41, %v9113_v18  ;;  %v9498_v11 = vadd.f32 1e-05, %v1847_v44 }
 0x2aa   :  { %v2683_v18 = vmul.f32 %v9468_v25, %v9176_v35  ;;  %v2496_v41 = vsub.f32 1.5, %v2495_v28 }
 0x2ab   :  { %v1788_v6 = vsub.f32 %v1668_v51, %v1728_v12  ;;  %v3535_v59 = vpop.permute.xlu2 %3534  ;;  %6056 = vrsqrt.f32 %v9498_v11  ;;  %vm2528_vm13 = vweird.f32 %v9498_v11 }
 0x2ac   :  { %v9490_v31 = vadd.f32 %v3535_v59, %v3340_v4  ;;  %v9492_v36 = vadd.f32 %v3535_v59, %v3341_v34  ;;  %v652_v10 = vpop.f32.mrf.mxu0  ;;  %v9494_v0 = vpop.permute.xlu1 %3174  ;;  %v2505_v59 = vmul.f32 0.5, %v2504_v19 }
 0x2ad   :  { %v850_v3 = vadd.f32 %v849_v26, %v652_v10  ;;  %v3525_v58 = vpop.permute.xlu0 %3524  ;;  %v1346_v43 = vpop.f32.mrf.mxu2  ;;  %2852 = vrot.lane.b32.xlu2 %v2682_v45, %s6274_s29  ;;  %v2514_v26 = vmul.f32 %v9459_v27, %v2513_v22  ;;  %v1848_v44 = vmax.f32 %v1788_v6, 0.0  ;;  %v2497_v6 = vmul.f32 %v9390_v61, %v2496_v41  ;;  %v6150_v10 = vld [vmem:[%s11493_s2 + $0x120] sm:$0xff] }
 0x2ae   :  { %11825 = vst [vmem:[#allocation112_spill] sm:$0xff] %v9492_v36  ;;  %v9505_v4 = vadd.f32 %v3525_v58, %v3336_v37  ;;  %3589 = vperm.xlu1 %5928, %v2967_v23   ;;  %5930 = vset.pattern.permute.xlu2 %v11716_v38  ;;  %v9511_v45 = vadd.f32 %v3525_v58, %v3337_v24  ;;  %v852_v22 = vpop.f32.mrf.mxu1 }
 0x2af   :  { %v9509_v34 = vmul.f32 0.0051020407, %v850_v3  ;;  %v1544_v28 = vadd.f32 %v1543_v5, %v1346_v43  ;;  %v2506_v43 = vsub.f32 1.5, %v2505_v59  ;;  %v2515_v5 = vmul.f32 0.5, %v2514_v26  ;;  %v6151_v59 = vld [vmem:[%s11493_s2 + $0x128] sm:$0xff] }
 0x2b0   :  { %11826 = vst [vmem:[#allocation113_spill] sm:$0xff] %v9505_v4  ;;  %2854 = vrot.lane.b32.xlu0 %v2683_v18, %s6274_s29  ;;  %v2968_v3 = vsub.f32 %v6150_v10, %v9436_v39  ;;  %v9533_v58 = vadd.f32 1e-05, %v1848_v44  ;;  %v1546_v18 = vpop.f32.mrf.mxu3  ;;  %v9544_v39 = vld [vmem:[%s11493_s2 + $0x1a0] sm:$0xff]  ;;  %v2501_v44 = vsel %vm9525_vm6, %v9390_v61, %v2497_v6 }
 0x2b1   :  { %11827 = vst [vmem:[#allocation114_spill] sm:$0xff] %v9511_v45  ;;  %5932 = vset.pattern.permute.xlu0 %v11716_v38  ;;  %v1729_v37 = vmul.f32 %v9509_v34, %v9509_v34  ;;  %v1669_v23 = vmul.f32 0.0051020407, %v1544_v28  ;;  %v2516_v10 = vsub.f32 1.5, %v2515_v5  ;;  %v2624_v6 = vmul.f32 %v2501_v44, %v9544_v39 }
 0x2b2   :  { %6058 = vrsqrt.f32 %v9533_v58  ;;  %vm2538_vm2 = vweird.f32 %v9533_v58 }
 0x2b3   :  { %v1789_v41 = vsub.f32 %v1669_v23, %v1729_v37 }
 0x2b4   :  { %v655_v28 = vpop.f32.mrf.mxu0  ;;  %v2827_v19 = vpop.permute.xlu1 %2826 }
 0x2b5   :  { %v853_v30 = vadd.f32 %v852_v22, %v655_v28  ;;  %v2969_v26 = vsub.f32 %v6151_v59, %v2827_v19  ;;  %v9539_v12 = vpop.permute.xlu2 %3194  ;;  %v1349_v35 = vpop.f32.mrf.mxu2  ;;  %3594 = vperm.xlu2 %5930, %v2968_v3   ;;  %v1849_v37 = vmax.f32 %v1789_v41, 0.0  ;;  %v2507_v19 = vmul.f32 %v9428_v14, %v2506_v43 }
 0x2b6   :  { %v9550_v23 = vpop.permute.xlu0 %3184  ;;  %5931 = vset.pattern.permute.xlu1 %v11709_v53  ;;  %v9554_v22 = vpop.eup %6056  ;;  %v1547_v28 = vadd.f32 %v1546_v18, %v1349_v35  ;;  %v3339_v18 = vmul.f32 %v6153_v47, %v8645_v40 }
 0x2b7   :  { %v9557_v3 = vmul.f32 0.0051020407, %v853_v30  ;;  %3249 = vperm.xlu1 %5931, %v9468_v25   ;;  %v9560_v61 = vadd.f32 1e-05, %v1849_v37  ;;  %v6152_v25 = vld [vmem:[%s11491_s0 + $0x170] sm:$0xff]  ;;  %v2523_v41 = vmul.f32 %v9554_v22, %v9498_v11  ;;  %v855_v30 = vpop.f32.mrf.mxu1  ;;  %v2511_v44 = vsel %vm9565_vm9, %v9428_v14, %v2507_v19 }
 0x2b8   :  { %3599 = vperm.xlu0 %5932, %v2969_v26   ;;  %v1670_v5 = vmul.f32 0.0051020407, %v1547_v28  ;;  %v3338_v35 = vmul.f32 %v6152_v25, %v8645_v40  ;;  %v9587_v26 = vld [vmem:[%s11493_s2 + $0x1a8] sm:$0xff]  ;;  %v2517_v37 = vmul.f32 %v9459_v27, %v2516_v10  ;;  %v2684_v40 = vmul.f32 %v2624_v6, %v9217_v49  ;;  %v1549_v49 = vpop.f32.mrf.mxu3 }
 0x2b9   :  { %v1730_v43 = vmul.f32 %v9557_v3, %v9557_v3  ;;  %6060 = vrsqrt.f32 %v9560_v61  ;;  %v2524_v63 = vmul.f32 %v9554_v22, %v2523_v41  ;;  %v2625_v24 = vmul.f32 %v2511_v44, %v9587_v26 }
 0x2ba   :  { %vm2529_vm14 = vweird.f32 %v9554_v22  ;;  %vm2548_vm5 = vweird.f32 %v9560_v61 }
 0x2bb   :  { %v1790_v59 = vsub.f32 %v1670_v5, %v1730_v43  ;;  %v9600_v5 = vpop.eup %6058  ;;  %vm9693_vm15 = vmor %vm2528_vm13, %vm2529_vm14 }
 0x2bc   :  { %v3530_v28 = vpop.permute.xlu1 %3529  ;;  %v658_v43 = vpop.f32.mrf.mxu0  ;;  %v2533_v41 = vmul.f32 %v9600_v5, %v9533_v58  ;;  %vm2539_vm3 = vweird.f32 %v9600_v5 }
 0x2bd   :  { %v1850_v47 = vmax.f32 %v1790_v59, 0.0  ;;  %v9602_v51 = vadd.f32 %v3530_v28, %v3338_v35  ;;  %v9604_v45 = vadd.f32 %v3530_v28, %v3339_v18  ;;  %v9606_v14 = vpop.permute.xlu2 %2834  ;;  %5933 = vset.pattern.permute.xlu2 %v11709_v53  ;;  %v856_v19 = vadd.f32 %v855_v30, %v658_v43  ;;  %v1352_v36 = vpop.f32.mrf.mxu2  ;;  %v9620_v18 = vld [vmem:[%s11493_s2 + $0x1b0] sm:$0xff]  ;;  %vm9727_vm4 = vmor %vm2538_vm2, %vm2539_vm3 }
 0x2be   :  { %v9610_v10 = vpop.permute.xlu0 %2830  ;;  %3254 = vperm.xlu2 %5933, %v2624_v6   ;;  %v2521_v6 = vsel %vm9596_vm12, %v9459_v27, %v2517_v37  ;;  %v1550_v44 = vadd.f32 %v1549_v49, %v1352_v36  ;;  %v2525_v43 = vmul.f32 0.5, %v2524_v63  ;;  %v6154_v37 = vld [vmem:[%s11491_s0 + $0x190] sm:$0xff]  ;;  %v2534_v63 = vmul.f32 %v9600_v5, %v2533_v41 }
 0x2bf   :  { %11834 = vst [vmem:[#allocation115_spill] sm:$0xff] %v9604_v45  ;;  %2856 = vrot.lane.b32.xlu1 %v2684_v40, %s6274_s29  ;;  %v9628_v30 = vmul.f32 0.0051020407, %v856_v19  ;;  %v9630_v28 = vpop.eup %6060  ;;  %v9632_v40 = vadd.f32 1e-05, %v1850_v47  ;;  %v2626_v35 = vmul.f32 %v2521_v6, %v9620_v18  ;;  %v3342_v59 = vmul.f32 %v6154_v37, %v8681_v54  ;;  %v6155_v36 = vld [vmem:[%s11491_s0 + $0x1b0] sm:$0xff] }
 0x2c0   :  { %5935 = vset.pattern.permute.xlu0 %v11709_v53  ;;  %5934 = vset.pattern.permute.xlu1 %v11716_v38  ;;  %v1671_v27 = vmul.f32 0.0051020407, %v1550_v44  ;;  %v3346_v47 = vmul.f32 %v6155_v36, %v8989_v9  ;;  %v6156_v19 = vld [vmem:[%s11491_s0 + $0x1b8] sm:$0xff]  ;;  %v2543_v6 = vmul.f32 %v9630_v28, %v9560_v61  ;;  %v2685_v44 = vmul.f32 %v2625_v24, %v9287_v57 }
 0x2c1   :  { %3259 = vperm.xlu0 %5935, %v2625_v24   ;;  %v1731_v25 = vmul.f32 %v9628_v30, %v9628_v30  ;;  %v3347_v49 = vmul.f32 %v6156_v19, %v8989_v9  ;;  %v6157_v45 = vld [vmem:[%s11491_s0 + $0x198] sm:$0xff]  ;;  %v6158_v9 = vld [vmem:[%s11493_s2 + $0x130] sm:$0xff]  ;;  %6062 = vrsqrt.f32 %v9632_v40  ;;  %v2526_v57 = vsub.f32 1.5, %v2525_v43 }
 0x2c2   :  { %v3343_v36 = vmul.f32 %v6157_v45, %v8681_v54  ;;  %v2970_v41 = vsub.f32 %v6158_v9, %v9430_v8  ;;  %v2686_v54 = vmul.f32 %v2626_v35, %v9347_v50  ;;  %v2535_v43 = vmul.f32 0.5, %v2534_v63  ;;  %v6162_v63 = vld [vmem:[%s11491_s0 + $0x1a8] sm:$0xff] }
 0x2c3   :  { %v1791_v37 = vsub.f32 %v1671_v27, %v1731_v25  ;;  %vm2549_vm6 = vweird.f32 %v9630_v28  ;;  %vm2558_vm8 = vweird.f32 %v9632_v40 }
 0x2c4   :  { %vm9755_vm7 = vmor %vm2548_vm5, %vm2549_vm6 }
 0x2c5   :  { %v3550_v19 = vpop.permute.xlu2 %3549  ;;  %v9663_v4 = vpop.permute.xlu1 %3189  ;;  %v1851_v9 = vmax.f32 %v1791_v37, 0.0  ;;  %v2527_v37 = vmul.f32 %v9554_v22, %v2526_v57 }
 0x2c6   :  { %v9665_v24 = vadd.f32 %v3550_v19, %v3346_v47  ;;  %v9667_v25 = vadd.f32 %v3550_v19, %v3347_v49  ;;  %v3540_v27 = vpop.permute.xlu0 %3539  ;;  %2858 = vrot.lane.b32.xlu2 %v2685_v44, %s6274_s29  ;;  %v2544_v47 = vmul.f32 %v9630_v28, %v2543_v6  ;;  %v2536_v6 = vsub.f32 1.5, %v2535_v43  ;;  %v6160_v43 = vld [vmem:[%s11493_s2 + $0x140] sm:$0xff] }
 0x2c7   :  { %v9672_v45 = vadd.f32 %v3540_v27, %v3342_v59  ;;  %v9674_v8 = vadd.f32 %v3540_v27, %v3343_v36  ;;  %3604 = vperm.xlu1 %5934, %v2970_v41   ;;  %5936 = vset.pattern.permute.xlu2 %v11716_v38  ;;  %v9683_v44 = vadd.f32 1e-05, %v1851_v9  ;;  %v9687_v36 = vpop.eup %6062  ;;  %v6159_v27 = vld [vmem:[%s11493_s2 + $0x138] sm:$0xff] }
 0x2c8   :  { %11835 = vst [vmem:[#allocation116_spill] sm:$0xff] %v9667_v25  ;;  %v2545_v41 = vmul.f32 0.5, %v2544_v47  ;;  %v2971_v57 = vsub.f32 %v6159_v27, %v9610_v10  ;;  %v2553_v11 = vmul.f32 %v9687_v36, %v9632_v40  ;;  %v9716_v10 = vld [vmem:[%s11493_s2 + $0x1b8] sm:$0xff]  ;;  %v2531_v27 = vsel %vm9693_vm15, %v9554_v22, %v2527_v37  ;;  %v6161_v37 = vld [vmem:[%s11491_s0 + $0x1a0] sm:$0xff] }
 0x2c9   :  { %11836 = vst [vmem:[#allocation117_spill] sm:$0xff] %v9674_v8  ;;  %2860 = vrot.lane.b32.xlu0 %v2686_v54, %s6274_s29  ;;  %6064 = vrsqrt.f32 %v9683_v44  ;;  %v2537_v50 = vmul.f32 %v9600_v5, %v2536_v6  ;;  %v3344_v58 = vmul.f32 %v6161_v37, %v8828_v29  ;;  %v3345_v6 = vmul.f32 %v6162_v63, %v8828_v29 }
 0x2ca   :  { %5938 = vset.pattern.permute.xlu0 %v11716_v38  ;;  %v2546_v19 = vsub.f32 1.5, %v2545_v41  ;;  %v2554_v22 = vmul.f32 %v9687_v36, %v2553_v11  ;;  %v9750_v11 = vld [vmem:[%s11493_s2 + $0x1c0] sm:$0xff]  ;;  %vm2559_vm9 = vweird.f32 %v9687_v36  ;;  %vm2568_vm10 = vweird.f32 %v9683_v44 }
 0x2cb   :  { %vm9813_vm12 = vmor %vm2558_vm8, %vm2559_vm9 }
 0x2cc   :  { %v2547_v61 = vmul.f32 %v9630_v28, %v2546_v19  ;;  %v2555_v19 = vmul.f32 0.5, %v2554_v22 }
 0x2cd   :  { %v2833_v54 = vpop.permute.xlu1 %2832  ;;  %v9703_v9 = vpop.permute.xlu2 %3209 }
 0x2ce   :  { %v2972_v47 = vsub.f32 %v6160_v43, %v2833_v54  ;;  %3609 = vperm.xlu2 %5936, %v2971_v57   ;;  %v2627_v43 = vmul.f32 %v2531_v27, %v9716_v10  ;;  %v2551_v22 = vsel %vm9755_vm7, %v9630_v28, %v2547_v61  ;;  %v6164_v28 = vld [vmem:[%s11491_s0 + $0x1e8] sm:$0xff]  ;;  %v6165_v27 = vld [vmem:[%s11491_s0 + $0x1c0] sm:$0xff] }
 0x2cf   :  { %v9711_v59 = vpop.permute.xlu0 %3199  ;;  %5937 = vset.pattern.permute.xlu1 %v11709_v53  ;;  %v9723_v54 = vpop.eup %6064  ;;  %v3353_v61 = vmul.f32 %v6164_v28, %v9154_v60  ;;  %v6169_v28 = vld [vmem:[%s11491_s0 + $0x1d8] sm:$0xff] }
 0x2d0   :  { %3264 = vperm.xlu1 %5937, %v2626_v35   ;;  %v2563_v35 = vmul.f32 %v9723_v54, %v9683_v44  ;;  %v2687_v29 = vmul.f32 %v2627_v43, %v9394_v56  ;;  %v9777_v56 = vld [vmem:[%s11493_s2 + $0x1c8] sm:$0xff]  ;;  %vm2569_vm11 = vweird.f32 %v9723_v54 }
 0x2d1   :  { %3614 = vperm.xlu0 %5938, %v2972_v47   ;;  %v2541_v47 = vsel %vm9727_vm4, %v9600_v5, %v2537_v50  ;;  %vm9829_vm13 = vmor %vm2568_vm10, %vm2569_vm11 }
 0x2d2   :  { %v2564_v41 = vmul.f32 %v9723_v54, %v2563_v35  ;;  %v2628_v5 = vmul.f32 %v2541_v47, %v9750_v11 }
 0x2d4   :  { %v2565_v35 = vmul.f32 0.5, %v2564_v41  ;;  %v6163_v41 = vld [vmem:[%s11491_s0 + $0x1e0] sm:$0xff] }
 0x2d5   :  { %v3545_v37 = vpop.permute.xlu1 %3544  ;;  %v9759_v49 = vpop.permute.xlu2 %2840  ;;  %v3352_v47 = vmul.f32 %v6163_v41, %v9154_v60  ;;  %v6167_v60 = vld [vmem:[%s11493_s2 + $0x148] sm:$0xff]  ;;  %v2688_v41 = vmul.f32 %v2628_v5, %v9456_v2 }
 0x2d6   :  { %v9762_v63 = vadd.f32 %v3545_v37, %v3344_v58  ;;  %v9764_v8 = vadd.f32 %v3545_v37, %v3345_v6  ;;  %5939 = vset.pattern.permute.xlu2 %v11709_v53  ;;  %v2566_v58 = vsub.f32 1.5, %v2565_v35  ;;  %v2629_v6 = vmul.f32 %v2551_v22, %v9777_v56 }
 0x2d7   :  { %v9766_v25 = vpop.permute.xlu0 %2836  ;;  %3269 = vperm.xlu2 %5939, %v2627_v43   ;;  %v2556_v43 = vsub.f32 1.5, %v2555_v19  ;;  %v3348_v37 = vmul.f32 %v6165_v27, %v8852_v62  ;;  %v2973_v35 = vsub.f32 %v6167_v60, %v9606_v14 }
 0x2d8   :  { %11843 = vst [vmem:[#allocation118_spill] sm:$0xff] %v9764_v8  ;;  %2862 = vrot.lane.b32.xlu1 %v2687_v29, %s6274_s29  ;;  %v6166_v29 = vld [vmem:[%s11491_s0 + $0x1c8] sm:$0xff]  ;;  %v2567_v60 = vmul.f32 %v9723_v54, %v2566_v58  ;;  %v6230_v8 = vld [vmem:[%s11491_s0 + $0x3a0] sm:$0xff] }
 0x2d9   :  { %5941 = vset.pattern.permute.xlu0 %v11709_v53  ;;  %5940 = vset.pattern.permute.xlu1 %v11716_v38  ;;  %v3349_v19 = vmul.f32 %v6166_v29, %v8852_v62  ;;  %v2557_v14 = vmul.f32 %v9687_v36, %v2556_v43 }
 0x2da   :  { %3274 = vperm.xlu0 %5941, %v2628_v5  }
 0x2dd   :  { %v3565_v22 = vpop.permute.xlu2 %3564 }
 0x2de   :  { %v9817_v27 = vadd.f32 %v3565_v22, %v3352_v47  ;;  %v9819_v62 = vadd.f32 %v3565_v22, %v3353_v61  ;;  %v9821_v29 = vpop.permute.xlu1 %3204  ;;  %v2689_v47 = vmul.f32 %v2629_v6, %v9509_v34  ;;  %v2561_v34 = vsel %vm9813_vm12, %v9687_v36, %v2557_v14  ;;  %v6168_v36 = vld [vmem:[%s11491_s0 + $0x1d0] sm:$0xff] }
 0x2df   :  { %v3555_v57 = vpop.permute.xlu0 %3554  ;;  %2864 = vrot.lane.b32.xlu2 %v2688_v41, %s6274_s29  ;;  %v3351_v14 = vmul.f32 %v6169_v28, %v9007_v32 }
 0x2e0   :  { %v9833_v40 = vadd.f32 %v3555_v57, %v3348_v37  ;;  %v9835_v5 = vadd.f32 %v3555_v57, %v3349_v19  ;;  %3619 = vperm.xlu1 %5940, %v2973_v35   ;;  %v9847_v57 = vld [vmem:[%s11493_s2 + $0x1d0] sm:$0xff]  ;;  %v9855_v37 = vld [vmem:[%s11493_s2 + $0x1d8] sm:$0xff]  ;;  %v2571_v19 = vsel %vm9829_vm13, %v9723_v54, %v2567_v60  ;;  %v3350_v54 = vmul.f32 %v6168_v36, %v9007_v32 }
 0x2e1   :  { %v2630_v35 = vmul.f32 %v2561_v34, %v9847_v57  ;;  %v2631_v22 = vmul.f32 %v2571_v19, %v9855_v37  ;;  %v6170_v36 = vld [vmem:[%s11493_s2 + $0x158] sm:$0xff] }
 0x2e2   :  { %2866 = vrot.lane.b32.xlu0 %v2689_v47, %s6274_s29 }
 0x2e3   :  { %v2691_v60 = vmul.f32 %v2631_v22, %v9628_v30  ;;  %v2690_v50 = vmul.f32 %v2630_v35, %v9557_v3  ;;  %v6171_v3 = vld [vmem:[%s11491_s0 + $0x210] sm:$0xff] }
 0x2e6   :  { %v2839_v41 = vpop.permute.xlu1 %2838  ;;  %v9862_v47 = vpop.permute.xlu2 %3224 }
 0x2e7   :  { %3284 = vperm.xlu2 %5939, %v2630_v35   ;;  %v2975_v61 = vsub.f32 %v6170_v36, %v2839_v41  ;;  %v3358_v35 = vmul.f32 %v6171_v3, %v9325_v17 }
 0x2e8   :  { %v9864_v44 = vpop.permute.xlu0 %3214  ;;  %5942 = vset.pattern.permute.xlu1 %v11709_v53 }
 0x2e9   :  { %3279 = vperm.xlu1 %5942, %v2629_v6  }
 0x2ea   :  { %3289 = vperm.xlu0 %5941, %v2631_v22   ;;  %v6172_v22 = vld [vmem:[%s11491_s0 + $0x218] sm:$0xff] }
 0x2eb   :  { %v3359_v41 = vmul.f32 %v6172_v22, %v9325_v17  ;;  %v6176_v17 = vld [vmem:[%s11493_s2 + $0x160] sm:$0xff] }
 0x2ec   :  { %v2976_v36 = vsub.f32 %v6176_v17, %v9759_v49 }
 0x2ee   :  { %v3560_v2 = vpop.permute.xlu1 %3559  ;;  %v2847_v34 = vpop.permute.xlu2 %2846 }
 0x2ef   :  { %v9876_v19 = vadd.f32 %v3560_v2, %v3350_v54  ;;  %v9878_v6 = vadd.f32 %v3560_v2, %v3351_v14  ;;  %2870 = vrot.lane.b32.xlu2 %v2691_v60, %s6274_s29  ;;  %v6174_v54 = vld [vmem:[%s11491_s0 + $0x1f0] sm:$0xff]  ;;  %v6175_v14 = vld [vmem:[%s11491_s0 + $0x1f8] sm:$0xff] }
 0x2f0   :  { %v2843_v58 = vpop.permute.xlu0 %2842  ;;  %5943 = vset.pattern.permute.xlu2 %v11716_v38  ;;  %v3354_v28 = vmul.f32 %v6174_v54, %v9023_v16  ;;  %v3355_v60 = vmul.f32 %v6175_v14, %v9023_v16 }
 0x2f1   :  { %2868 = vrot.lane.b32.xlu1 %v2690_v50, %s6274_s29  ;;  %v6173_v50 = vld [vmem:[%s11493_s2 + $0x150] sm:$0xff] }
 0x2f2   :  { %5944 = vset.pattern.permute.xlu0 %v11716_v38  ;;  %5945 = vset.pattern.permute.xlu1 %v11716_v38 }
 0x2f3   :  { %3629 = vperm.xlu0 %5944, %v2975_v61   ;;  %v2974_v61 = vsub.f32 %v6173_v50, %v9766_v25 }
 0x2f6   :  { %v3580_v2 = vpop.permute.xlu2 %3579 }
 0x2f7   :  { %v9915_v25 = vadd.f32 %v3580_v2, %v3358_v35  ;;  %v9917_v3 = vadd.f32 %v3580_v2, %v3359_v41  ;;  %v9919_v22 = vpop.permute.xlu1 %3219  ;;  %3624 = vperm.xlu2 %5943, %v2974_v61   ;;  %v6177_v35 = vld [vmem:[%s11493_s2 + $0x168] sm:$0xff]  ;;  %v2979_v61 = vsub.f32 %v9250_v33, %v2847_v34 }
 0x2f8   :  { %v3570_v50 = vpop.permute.xlu0 %3569  ;;  %v2977_v41 = vsub.f32 %v6177_v35, %v2843_v58  ;;  %v6179_v33 = vld [vmem:[%s11491_s0 + $0x208] sm:$0xff] }
 0x2f9   :  { %11848 = vst [vmem:[#allocation119_spill] sm:$0xff] %v9917_v3  ;;  %v9921_v54 = vadd.f32 %v3570_v50, %v3354_v28  ;;  %v9923_v30 = vadd.f32 %v3570_v50, %v3355_v60  ;;  %3634 = vperm.xlu1 %5945, %v2976_v36   ;;  %v6178_v36 = vld [vmem:[%s11491_s0 + $0x200] sm:$0xff]  ;;  %v3357_v58 = vmul.f32 %v6179_v33, %v9200_v46  ;;  %v6181_v33 = vld [vmem:[%s11491_s0 + $0x248] sm:$0xff] }
 0x2fa   :  { %v3356_v50 = vmul.f32 %v6178_v36, %v9200_v46  ;;  %v6180_v46 = vld [vmem:[%s11491_s0 + $0x240] sm:$0xff] }
 0x2ff   :  { %v2845_v28 = vpop.permute.xlu1 %2844  ;;  %v9933_v2 = vpop.permute.xlu2 %3239  ;;  %3639 = vperm.xlu2 %5943, %v2977_v41  }
 0x300   :  { %v2978_v60 = vsub.f32 %v9205_v15, %v2845_v28 }
 0x301   :  { %v9936_v17 = vpop.permute.xlu0 %3229  ;;  %3649 = vperm.xlu1 %5945, %v2979_v61  }
 0x302   :  { %3644 = vperm.xlu0 %5944, %v2978_v60  }
 0x307   :  { %v3575_v34 = vpop.permute.xlu1 %3574  ;;  %v2853_v35 = vpop.permute.xlu2 %2852 }
 0x308   :  { %v9946_v41 = vadd.f32 %v3575_v34, %v3356_v50  ;;  %v9948_v15 = vadd.f32 %v3575_v34, %v3357_v58  ;;  %v2982_v61 = vsub.f32 %v9410_v7, %v2853_v35  ;;  %v3364_v50 = vmul.f32 %v6180_v46, %v9494_v0  ;;  %v6183_v34 = vld [vmem:[%s11491_s0 + $0x228] sm:$0xff] }
 0x309   :  { %v2849_v28 = vpop.permute.xlu0 %2848  ;;  %v3365_v7 = vmul.f32 %v6181_v33, %v9494_v0  ;;  %v3361_v35 = vmul.f32 %v6183_v34, %v9194_v1 }
 0x30a   :  { %11849 = vst [vmem:[#allocation120_spill] sm:$0xff] %v9948_v15  ;;  %v2980_v60 = vsub.f32 %v9278_v13, %v2849_v28  ;;  %3664 = vperm.xlu1 %5945, %v2982_v61   ;;  %v6182_v13 = vld [vmem:[%s11491_s0 + $0x220] sm:$0xff] }
 0x30b   :  { %v3360_v58 = vmul.f32 %v6182_v13, %v9194_v1 }
 0x30c   :  { %3654 = vperm.xlu2 %5943, %v2980_v60  }
 0x30f   :  { %v3595_v61 = vpop.permute.xlu2 %3594 }
 0x310   :  { %v9970_v28 = vadd.f32 %v3595_v61, %v3364_v50  ;;  %v9972_v60 = vadd.f32 %v3595_v61, %v3365_v7  ;;  %v9974_v46 = vpop.permute.xlu1 %3234 }
 0x311   :  { %v3585_v0 = vpop.permute.xlu0 %3584 }
 0x312   :  { %11850 = vst [vmem:[#allocation121_spill] sm:$0xff] %v9972_v60  ;;  %v9976_v33 = vadd.f32 %v3585_v0, %v3360_v58  ;;  %v9978_v36 = vadd.f32 %v3585_v0, %v3361_v35  ;;  %v6184_v58 = vld [vmem:[%s11491_s0 + $0x230] sm:$0xff]  ;;  %v6185_v0 = vld [vmem:[%s11491_s0 + $0x238] sm:$0xff] }
 0x313   :  { %v3362_v35 = vmul.f32 %v6184_v58, %v9369_v55  ;;  %v3363_v1 = vmul.f32 %v6185_v0, %v9369_v55  ;;  %v6186_v55 = vld [vmem:[%s11491_s0 + $0x270] sm:$0xff] }
 0x314   :  { %11851 = vst [vmem:[#allocation122_spill] sm:$0xff] %v9978_v36 }
 0x318   :  { %v2851_v34 = vpop.permute.xlu1 %2850  ;;  %v9984_v50 = vpop.permute.xlu2 %3254 }
 0x319   :  { %v2981_v7 = vsub.f32 %v9377_v20, %v2851_v34 }
 0x31a   :  { %v9987_v61 = vpop.permute.xlu0 %3244 }
 0x31b   :  { %3659 = vperm.xlu0 %5944, %v2981_v7  }
 0x320   :  { %v3590_v49 = vpop.permute.xlu1 %3589  ;;  %v2859_v16 = vpop.permute.xlu2 %2858 }
 0x321   :  { %v9997_v14 = vadd.f32 %v3590_v49, %v3362_v35  ;;  %v9999_v20 = vadd.f32 %v3590_v49, %v3363_v1  ;;  %v2985_v34 = vsub.f32 %v9587_v26, %v2859_v16  ;;  %v3370_v35 = vmul.f32 %v6186_v55, %v9663_v4  ;;  %v6187_v49 = vld [vmem:[%s11491_s0 + $0x278] sm:$0xff] }
 0x322   :  { %v2855_v7 = vpop.permute.xlu0 %2854  ;;  %v3371_v26 = vmul.f32 %v6187_v49, %v9663_v4 }
 0x323   :  { %11852 = vst [vmem:[#allocation123_spill] sm:$0xff] %v9999_v20  ;;  %v2983_v13 = vsub.f32 %v9454_v21, %v2855_v7  ;;  %3679 = vperm.xlu1 %5945, %v2985_v34   ;;  %v6188_v21 = vld [vmem:[%s11491_s0 + $0x250] sm:$0xff] }
 0x324   :  { %v3366_v16 = vmul.f32 %v6188_v21, %v9364_v48 }
 0x325   :  { %3669 = vperm.xlu2 %5943, %v2983_v13   ;;  %v6189_v13 = vld [vmem:[%s11491_s0 + $0x258] sm:$0xff] }
 0x326   :  { %v3367_v1 = vmul.f32 %v6189_v13, %v9364_v48 }
 0x328   :  { %v3610_v0 = vpop.permute.xlu2 %3609 }
 0x329   :  { %v10021_v34 = vadd.f32 %v3610_v0, %v3370_v35  ;;  %v10023_v7 = vadd.f32 %v3610_v0, %v3371_v26  ;;  %v10025_v55 = vpop.permute.xlu1 %3249 }
 0x32a   :  { %v3600_v4 = vpop.permute.xlu0 %3599 }
 0x32b   :  { %11853 = vst [vmem:[#allocation124_spill] sm:$0xff] %v10023_v7  ;;  %v10027_v49 = vadd.f32 %v3600_v4, %v3366_v16  ;;  %v10029_v58 = vadd.f32 %v3600_v4, %v3367_v1  ;;  %v6190_v16 = vld [vmem:[%s11491_s0 + $0x260] sm:$0xff]  ;;  %v6191_v4 = vld [vmem:[%s11491_s0 + $0x268] sm:$0xff] }
 0x32c   :  { %v3368_v1 = vmul.f32 %v6190_v16, %v9550_v23  ;;  %v3369_v48 = vmul.f32 %v6191_v4, %v9550_v23  ;;  %v6192_v23 = vld [vmem:[%s11491_s0 + $0x280] sm:$0xff] }
 0x32d   :  { %11854 = vst [vmem:[#allocation125_spill] sm:$0xff] %v10029_v58 }
 0x331   :  { %v2857_v13 = vpop.permute.xlu1 %2856  ;;  %v10035_v35 = vpop.permute.xlu2 %3269 }
 0x332   :  { %v2984_v26 = vsub.f32 %v9544_v39, %v2857_v13 }
 0x333   :  { %v10038_v0 = vpop.permute.xlu0 %3259 }
 0x334   :  { %3674 = vperm.xlu0 %5944, %v2984_v26  }
 0x339   :  { %v3605_v43 = vpop.permute.xlu1 %3604  ;;  %v2865_v32 = vpop.permute.xlu2 %2864 }
 0x33a   :  { %v10048_v21 = vadd.f32 %v3605_v43, %v3368_v1  ;;  %v10050_v39 = vadd.f32 %v3605_v43, %v3369_v48  ;;  %v2988_v13 = vsub.f32 %v9750_v11, %v2865_v32  ;;  %v3372_v1 = vmul.f32 %v6192_v23, %v9539_v12  ;;  %v6193_v43 = vld [vmem:[%s11491_s0 + $0x288] sm:$0xff] }
 0x33b   :  { %v2861_v26 = vpop.permute.xlu0 %2860  ;;  %v3373_v11 = vmul.f32 %v6193_v43, %v9539_v12 }
 0x33c   :  { %11855 = vst [vmem:[#allocation126_spill] sm:$0xff] %v10050_v39  ;;  %v2986_v38 = vsub.f32 %v9620_v18, %v2861_v26  ;;  %3694 = vperm.xlu1 %5945, %v2988_v13  }
 0x33e   :  { %3684 = vperm.xlu2 %5943, %v2986_v38  }
 0x341   :  { %v10064_v32 = vpop.permute.xlu2 %3284 }
 0x342   :  { %v10066_v18 = vpop.permute.xlu1 %3264 }
 0x343   :  { %v3615_v48 = vpop.permute.xlu0 %3614 }
 0x344   :  { %v10068_v4 = vadd.f32 %v3615_v48, %v3372_v1  ;;  %v10070_v38 = vadd.f32 %v3615_v48, %v3373_v11  ;;  %v6194_v1 = vld [vmem:[%s11491_s0 + $0x2a0] sm:$0xff]  ;;  %v6195_v11 = vld [vmem:[%s11491_s0 + $0x2a8] sm:$0xff] }
 0x345   :  { %v3376_v43 = vmul.f32 %v6194_v1, %v9821_v29  ;;  %v3377_v48 = vmul.f32 %v6195_v11, %v9821_v29 }
 0x346   :  { %11856 = vst [vmem:[#allocation127_spill] sm:$0xff] %v10070_v38 }
 0x349   :  { %v2871_v23 = vpop.permute.xlu2 %2870 }
 0x34a   :  { %v2991_v16 = vsub.f32 %v9855_v37, %v2871_v23  ;;  %v2863_v53 = vpop.permute.xlu1 %2862  ;;  %v6197_v37 = vld [vmem:[%s11491_s0 + $0x298] sm:$0xff] }
 0x34b   :  { %v2987_v15 = vsub.f32 %v9716_v10, %v2863_v53  ;;  %v6196_v53 = vld [vmem:[%s11491_s0 + $0x290] sm:$0xff] }
 0x34c   :  { %v10076_v12 = vpop.permute.xlu0 %3274  ;;  %3709 = vperm.xlu1 %5945, %v2991_v16   ;;  %v3374_v10 = vmul.f32 %v6196_v53, %v9711_v59 }
 0x34d   :  { %3689 = vperm.xlu0 %5944, %v2987_v15   ;;  %v3375_v15 = vmul.f32 %v6197_v37, %v9711_v59  ;;  %v6203_v59 = vld [vmem:[%s11491_s0 + $0x308] sm:$0xff] }
 0x34e   :  { %v3389_v20 = vmul.f32 %v6203_v59, %v9974_v46 }
 0x351   :  { %v3625_v16 = vpop.permute.xlu2 %3624 }
 0x352   :  { %v10094_v23 = vadd.f32 %v3625_v16, %v3376_v43  ;;  %v10096_v1 = vadd.f32 %v3625_v16, %v3377_v48  ;;  %v3620_v26 = vpop.permute.xlu1 %3619  ;;  %v6198_v43 = vld [vmem:[%s11491_s0 + $0x2d0] sm:$0xff] }
 0x353   :  { %v10098_v13 = vadd.f32 %v3620_v26, %v3374_v10  ;;  %v10100_v29 = vadd.f32 %v3620_v26, %v3375_v15  ;;  %v3382_v48 = vmul.f32 %v6198_v43, %v9919_v22  ;;  %v6199_v26 = vld [vmem:[%s11491_s0 + $0x2d8] sm:$0xff]  ;;  %v6200_v43 = vld [vmem:[%s11491_s0 + $0x2b0] sm:$0xff] }
 0x354   :  { %11857 = vst [vmem:[#allocation128_spill] sm:$0xff] %v10096_v1  ;;  %v2867_v11 = vpop.permute.xlu0 %2866  ;;  %v3383_v10 = vmul.f32 %v6199_v26, %v9919_v22  ;;  %v3378_v53 = vmul.f32 %v6200_v43, %v9703_v9  ;;  %v6201_v22 = vld [vmem:[%s11491_s0 + $0x2b8] sm:$0xff] }
 0x355   :  { %11858 = vst [vmem:[#allocation129_spill] sm:$0xff] %v10100_v29  ;;  %v2989_v36 = vsub.f32 %v9777_v56, %v2867_v11  ;;  %v6216_v29 = vld [vmem:[%s11491_s0 + $0x350] sm:$0xff] }
 0x357   :  { %3699 = vperm.xlu2 %5943, %v2989_v36  }
 0x359   :  { %v3640_v37 = vpop.permute.xlu2 %3639 }
 0x35a   :  { %v10115_v15 = vadd.f32 %v3640_v37, %v3382_v48  ;;  %v10117_v56 = vadd.f32 %v3640_v37, %v3383_v10  ;;  %v3379_v48 = vmul.f32 %v6201_v22, %v9703_v9  ;;  %v6202_v10 = vld [vmem:[%s11491_s0 + $0x300] sm:$0xff] }
 0x35b   :  { %v10119_v16 = vpop.permute.xlu1 %3279  ;;  %v3388_v37 = vmul.f32 %v6202_v10, %v9974_v46  ;;  %v6207_v46 = vld [vmem:[%s11491_s0 + $0x2f8] sm:$0xff] }
 0x35c   :  { %v10121_v36 = vpop.permute.xlu0 %3289 }
 0x363   :  { %v2869_v26 = vpop.permute.xlu1 %2868 }
 0x364   :  { %v2990_v43 = vsub.f32 %v9847_v57, %v2869_v26  ;;  %v6204_v57 = vld [vmem:[%s11491_s0 + $0x2c0] sm:$0xff] }
 0x365   :  { %v3630_v3 = vpop.permute.xlu0 %3629 }
 0x366   :  { %v10142_v11 = vadd.f32 %v3630_v3, %v3378_v53  ;;  %v10144_v60 = vadd.f32 %v3630_v3, %v3379_v48  ;;  %v3655_v9 = vpop.permute.xlu2 %3654  ;;  %3704 = vperm.xlu0 %5944, %v2990_v43   ;;  %v3380_v3 = vmul.f32 %v6204_v57, %v9864_v44 }
 0x367   :  { %v10146_v22 = vadd.f32 %v3655_v9, %v3388_v37  ;;  %v10148_v58 = vadd.f32 %v3655_v9, %v3389_v20  ;;  %v6205_v20 = vld [vmem:[%s11491_s0 + $0x2c8] sm:$0xff]  ;;  %v6206_v9 = vld [vmem:[%s11491_s0 + $0x2f0] sm:$0xff] }
 0x368   :  { %11859 = vst [vmem:[#allocation130_spill] sm:$0xff] %v10144_v60  ;;  %v3381_v53 = vmul.f32 %v6205_v20, %v9864_v44  ;;  %v3386_v57 = vmul.f32 %v6206_v9, %v9936_v17  ;;  %v3387_v44 = vmul.f32 %v6207_v46, %v9936_v17 }
 0x369   :  { %11860 = vst [vmem:[#allocation131_spill] sm:$0xff] %v10148_v58 }
 0x36b   :  { %v3635_v59 = vpop.permute.xlu1 %3634 }
 0x36c   :  { %v10162_v48 = vadd.f32 %v3635_v59, %v3380_v3  ;;  %v10164_v26 = vadd.f32 %v3635_v59, %v3381_v53  ;;  %v6208_v3 = vld [vmem:[%s11491_s0 + $0x2e0] sm:$0xff]  ;;  %v6209_v53 = vld [vmem:[%s11491_s0 + $0x2e8] sm:$0xff] }
 0x36d   :  { %v3384_v20 = vmul.f32 %v6208_v3, %v9862_v47  ;;  %v3385_v59 = vmul.f32 %v6209_v53, %v9862_v47  ;;  %v6210_v47 = vld [vmem:[%s11491_s0 + $0x320] sm:$0xff] }
 0x373   :  { %v3650_v39 = vpop.permute.xlu1 %3649 }
 0x374   :  { %v10184_v9 = vadd.f32 %v3650_v39, %v3386_v57  ;;  %v10186_v43 = vadd.f32 %v3650_v39, %v3387_v44  ;;  %v3645_v7 = vpop.permute.xlu0 %3644  ;;  %v3392_v39 = vmul.f32 %v6210_v47, %v9987_v61  ;;  %v6211_v57 = vld [vmem:[%s11491_s0 + $0x328] sm:$0xff] }
 0x375   :  { %v10188_v10 = vadd.f32 %v3645_v7, %v3384_v20  ;;  %v10190_v17 = vadd.f32 %v3645_v7, %v3385_v59  ;;  %v3393_v7 = vmul.f32 %v6211_v57, %v9987_v61  ;;  %v6212_v20 = vld [vmem:[%s11491_s0 + $0x330] sm:$0xff]  ;;  %v6213_v59 = vld [vmem:[%s11491_s0 + $0x338] sm:$0xff] }
 0x376   :  { %v3394_v53 = vmul.f32 %v6212_v20, %v10025_v55  ;;  %v3395_v58 = vmul.f32 %v6213_v59, %v10025_v55  ;;  %v6214_v55 = vld [vmem:[%s11491_s0 + $0x310] sm:$0xff]  ;;  %v6217_v61 = vld [vmem:[%s11491_s0 + $0x358] sm:$0xff] }
 0x37c   :  { %v3665_v44 = vpop.permute.xlu1 %3664 }
 0x37d   :  { %v10212_v47 = vadd.f32 %v3665_v44, %v3392_v39  ;;  %v10214_v3 = vadd.f32 %v3665_v44, %v3393_v7  ;;  %v3390_v39 = vmul.f32 %v6214_v55, %v9933_v2  ;;  %v6215_v7 = vld [vmem:[%s11491_s0 + $0x318] sm:$0xff]  ;;  %v3398_v55 = vmul.f32 %v6216_v29, %v10038_v0 }
 0x37e   :  { %v3391_v44 = vmul.f32 %v6215_v7, %v9933_v2  ;;  %v3399_v2 = vmul.f32 %v6217_v61, %v10038_v0  ;;  %v6218_v7 = vld [vmem:[%s11491_s0 + $0x360] sm:$0xff]  ;;  %v6223_v0 = vld [vmem:[%s11491_s0 + $0x388] sm:$0xff] }
 0x37f   :  { %11861 = vst [vmem:[#allocation132_spill] sm:$0xff] %v10214_v3  ;;  %v3670_v37 = vpop.permute.xlu2 %3669 }
 0x380   :  { %v10218_v46 = vadd.f32 %v3670_v37, %v3394_v53  ;;  %v10220_v38 = vadd.f32 %v3670_v37, %v3395_v58 }
 0x382   :  { %11862 = vst [vmem:[#allocation133_spill] sm:$0xff] %v10220_v38  ;;  %v6222_v38 = vld [vmem:[%s11491_s0 + $0x380] sm:$0xff] }
 0x38d   :  { %v3660_v53 = vpop.permute.xlu0 %3659 }
 0x38e   :  { %v10232_v59 = vadd.f32 %v3660_v53, %v3390_v39  ;;  %v10234_v58 = vadd.f32 %v3660_v53, %v3391_v44  ;;  %v3400_v44 = vmul.f32 %v6218_v7, %v10066_v18  ;;  %v6219_v53 = vld [vmem:[%s11491_s0 + $0x368] sm:$0xff] }
 0x38f   :  { %v3401_v57 = vmul.f32 %v6219_v53, %v10066_v18  ;;  %v6220_v18 = vld [vmem:[%s11491_s0 + $0x340] sm:$0xff] }
 0x390   :  { %11863 = vst [vmem:[#allocation134_spill] sm:$0xff] %v10234_v58 }
 0x395   :  { %v3680_v39 = vpop.permute.xlu1 %3679 }
 0x396   :  { %v10254_v29 = vadd.f32 %v3680_v39, %v3398_v55  ;;  %v10256_v37 = vadd.f32 %v3680_v39, %v3399_v2  ;;  %v3396_v55 = vmul.f32 %v6220_v18, %v9984_v50  ;;  %v6221_v2 = vld [vmem:[%s11491_s0 + $0x348] sm:$0xff]  ;;  %v3404_v18 = vmul.f32 %v6222_v38, %v10076_v12 }
 0x397   :  { %v3397_v39 = vmul.f32 %v6221_v2, %v9984_v50  ;;  %v3405_v50 = vmul.f32 %v6223_v0, %v10076_v12  ;;  %v6224_v2 = vld [vmem:[%s11491_s0 + $0x390] sm:$0xff] }
 0x398   :  { %11864 = vst [vmem:[#allocation135_spill] sm:$0xff] %v10256_v37  ;;  %v3685_v20 = vpop.permute.xlu2 %3684 }
 0x399   :  { %v10260_v58 = vadd.f32 %v3685_v20, %v3400_v44  ;;  %v10262_v3 = vadd.f32 %v3685_v20, %v3401_v57 }
 0x39b   :  { %11865 = vst [vmem:[#allocation136_spill] sm:$0xff] %v10262_v3 }
 0x3a6   :  { %v3675_v44 = vpop.permute.xlu0 %3674 }
 0x3a7   :  { %v10274_v53 = vadd.f32 %v3675_v44, %v3396_v55  ;;  %v10276_v57 = vadd.f32 %v3675_v44, %v3397_v39  ;;  %v3406_v39 = vmul.f32 %v6224_v2, %v10119_v16  ;;  %v6225_v44 = vld [vmem:[%s11491_s0 + $0x398] sm:$0xff]  ;;  %v6226_v2 = vld [vmem:[%s11491_s0 + $0x3b0] sm:$0xff] }
 0x3a8   :  { %v3407_v61 = vmul.f32 %v6225_v44, %v10119_v16  ;;  %v3410_v60 = vmul.f32 %v6226_v2, %v10121_v36  ;;  %v6227_v16 = vld [vmem:[%s11491_s0 + $0x3b8] sm:$0xff] }
 0x3a9   :  { %11866 = vst [vmem:[#allocation137_spill] sm:$0xff] %v10276_v57 }
 0x3ae   :  { %v3695_v55 = vpop.permute.xlu1 %3694 }
 0x3af   :  { %v3824_v38 = vadd.f32 %v3695_v55, %v3404_v18  ;;  %v10296_v20 = vadd.f32 %v3695_v55, %v3405_v50  ;;  %v3411_v18 = vmul.f32 %v6227_v16, %v10121_v36  ;;  %v6229_v50 = vld [vmem:[%s11491_s0 + $0x378] sm:$0xff] }
 0x3b0   :  { %v3403_v55 = vmul.f32 %v6229_v50, %v10035_v35 }
 0x3b1   :  { %v3700_v7 = vpop.permute.xlu2 %3699  ;;  %v3944_v57 = vmax.f32 %v3824_v38, 0.0 }
 0x3b2   :  { %v3826_v0 = vadd.f32 %v3700_v7, %v3406_v39  ;;  %v10299_v37 = vadd.f32 %v3700_v7, %v3407_v61  ;;  %v6228_v61 = vld [vmem:[%s11491_s0 + $0x370] sm:$0xff] }
 0x3b3   :  { %v3402_v7 = vmul.f32 %v6228_v61, %v10035_v35  ;;  %v3408_v35 = vmul.f32 %v6230_v8, %v10064_v32 }
 0x3b4   :  { %v3946_v3 = vmax.f32 %v3826_v0, 0.0 }
 0x3be   :  { %v3710_v39 = vpop.permute.xlu1 %3709 }
 0x3bf   :  { %v3830_v44 = vadd.f32 %v3710_v39, %v3410_v60  ;;  %v10318_v38 = vadd.f32 %v3710_v39, %v3411_v18  ;;  %v3690_v0 = vpop.permute.xlu0 %3689  ;;  %v6231_v60 = vld [vmem:[%s11491_s0 + $0x3a8] sm:$0xff] }
 0x3c0   :  { %v3822_v2 = vadd.f32 %v3690_v0, %v3402_v7  ;;  %v10320_v12 = vadd.f32 %v3690_v0, %v3403_v55  ;;  %v3409_v18 = vmul.f32 %v6231_v60, %v10064_v32  ;;  %v11867_v0 = vmax.f32 %v8985_v42, 0.0 }
 0x3c1   :  { %v3950_v36 = vmax.f32 %v3830_v44, 0.0  ;;  %v3951_v16 = vmax.f32 %v10318_v38, 0.0 }
 0x3c2   :  { %v3942_v1 = vmax.f32 %v3822_v2, 0.0  ;;  %v3943_v61 = vmax.f32 %v10320_v12, 0.0  ;;  %4069 = vmatpush.msrb.mxu1 %v11867_v0  ;;  %v11868_v2 = vmax.f32 %v9921_v54, 0.0 }
 0x3c4   :  { %4134 = vmatpush.msrb.mxu3 %v11868_v2 }
 0x3d8   :  { %v3705_v7 = vpop.permute.xlu0 %3704 }
 0x3d9   :  { %v3828_v50 = vadd.f32 %v3705_v7, %v3408_v35  ;;  %v10332_v55 = vadd.f32 %v3705_v7, %v3409_v18 }
 0x3db   :  { %v3948_v39 = vmax.f32 %v3828_v50, 0.0  ;;  %v3949_v44 = vmax.f32 %v10332_v55, 0.0 }
 0x3dc   :  { %6270 = dma.done.wait [#allocation3], 8192 }
 0x3dd   :  { %6271 = vsyncadd [#allocation3], 4294959104  ;;  %v11869_v8 = vmax.f32 %v10184_v9, 0.0  ;;  %4268 = vmatpush.msrb.mxu2 %v3950_v36  ;;  %v11870_v32 = vmax.f32 %v9090_v52, 0.0  ;;  %v11871_v35 = vmax.f32 %v9817_v27, 0.0  ;;  %v11872_v60 = vmax.f32 %v10188_v10, 0.0 }
 0x3de   :  { %v11873_v42 = vld [vmem:[#allocation96_spill] sm:$0xff]  ;;  %v11875_v54 = vmax.f32 %v9876_v19, 0.0  ;;  %v11876_v9 = vmax.f32 %v10115_v15, 0.0  ;;  %v11879_v27 = vmax.f32 %v9833_v40, 0.0  ;;  %v11880_v10 = vmax.f32 %v10162_v48, 0.0  ;;  %v11881_v7 = vld [vmem:[#allocation94_spill] sm:$0xff] }
 0x3df   :  { %4199 = vmatpush.msrb.mxu0 %v11869_v8  ;;  %4070 = vmatpush.msrb.mxu1 %v11870_v32  ;;  %v11874_v18 = vmax.f32 %v11873_v42, 0.0  ;;  %v11877_v36 = vld [vmem:[#allocation92_spill] sm:$0xff]  ;;  %v11882_v50 = vmax.f32 %v11881_v7, 0.0  ;;  %v11883_v19 = vmax.f32 %v9665_v24, 0.0  ;;  %v11884_v15 = vmax.f32 %v10142_v11, 0.0  ;;  %v11944_v38 = vld [vmem:[#allocation6_spill] sm:$0xff] }
 0x3e0   :  { %4135 = vmatpush.msrb.mxu3 %v11871_v35  ;;  %4269 = vmatpush.msrb.mxu2 %v3948_v39  ;;  %v11878_v52 = vmax.f32 %v11877_v36, 0.0  ;;  %v11887_v40 = vmax.f32 %v9762_v63, 0.0  ;;  %v11888_v48 = vmax.f32 %v10094_v23, 0.0  ;;  %v11890_v39 = vld [vmem:[#allocation86_spill] sm:$0xff]  ;;  %v11892_v24 = vmax.f32 %v9672_v45, 0.0  ;;  %v11895_v63 = vld [vmem:[#allocation88_spill] sm:$0xff] }
 0x3e1   :  { %4200 = vmatpush.msrb.mxu0 %v11872_v60  ;;  %4071 = vmatpush.msrb.mxu1 %v11874_v18  ;;  %v11891_v0 = vmax.f32 %v11890_v39, 0.0  ;;  %v11894_v11 = vmax.f32 %v10254_v29, 0.0  ;;  %v11896_v2 = vmax.f32 %v11895_v63, 0.0  ;;  %v11897_v23 = vmax.f32 %v9490_v31, 0.0  ;;  %v11900_v45 = vld [vmem:[#allocation84_spill] sm:$0xff]  ;;  %v11941_v63 = vld [vmem:[#allocation102_spill] sm:$0xff] }
 0x3e2   :  { %4136 = vmatpush.msrb.mxu3 %v11875_v54  ;;  %4270 = vmatpush.msrb.mxu2 %v3946_v3  ;;  %v11885_v3 = vld [vmem:[#allocation90_spill] sm:$0xff]  ;;  %v11899_v8 = vmax.f32 %v10274_v53, 0.0  ;;  %v11901_v32 = vmax.f32 %v11900_v45, 0.0  ;;  %v11903_v29 = vmax.f32 %v10021_v34, 0.0  ;;  %v11904_v35 = vmax.f32 %v10218_v46, 0.0  ;;  %v11905_v31 = vld [vmem:[#allocation80_spill] sm:$0xff] }
 0x3e3   :  { %4201 = vmatpush.msrb.mxu0 %v11876_v9  ;;  %4072 = vmatpush.msrb.mxu1 %v11878_v52  ;;  %v11886_v55 = vmax.f32 %v11885_v3, 0.0  ;;  %v11906_v60 = vmax.f32 %v11905_v31, 0.0  ;;  %v11909_v53 = vmax.f32 %v10048_v21, 0.0  ;;  %v11910_v18 = vmax.f32 %v10212_v47, 0.0  ;;  %v11913_v34 = vld [vmem:[#allocation106_spill] sm:$0xff]  ;;  %v11928_v3 = vld [vmem:[#allocation9_spill] sm:$0xff] }
 0x3e4   :  { %4137 = vmatpush.msrb.mxu3 %v11879_v27  ;;  %4271 = vmatpush.msrb.mxu2 %v3944_v57  ;;  %v11889_v57 = vmax.f32 %v10260_v58, 0.0  ;;  %v11898_v58 = vmax.f32 %v10068_v4, 0.0  ;;  %v11907_v4 = vld [vmem:[#allocation113_spill] sm:$0xff]  ;;  %v11914_v9 = vmax.f32 %v11913_v34, 0.0  ;;  %v11915_v46 = vmax.f32 %v10027_v49, 0.0  ;;  %v11917_v52 = vld [vmem:[#allocation74_spill] sm:$0xff] }
 0x3e5   :  { %4202 = vmatpush.msrb.mxu0 %v11880_v10  ;;  %4073 = vmatpush.msrb.mxu1 %v11882_v50  ;;  %v11908_v42 = vmax.f32 %v11907_v4, 0.0  ;;  %v11916_v36 = vmax.f32 %v10232_v59, 0.0  ;;  %v11918_v27 = vmax.f32 %v11917_v52, 0.0  ;;  %v11919_v21 = vld [vmem:[#allocation110_spill] sm:$0xff]  ;;  %vm4020_vm14 = vcmask 785408   ;;  %v11925_v49 = vld [vmem:[#allocation108_spill] sm:$0xff] }
 0x3e6   :  { %4138 = vmatpush.msrb.mxu3 %v11883_v19  ;;  %4272 = vmatpush.msrb.mxu2 %v3942_v1  ;;  %v11893_v1 = vmax.f32 %v10098_v13, 0.0  ;;  %v11902_v13 = vmax.f32 %v9602_v51, 0.0  ;;  %v11911_v51 = vld [vmem:[#allocation82_spill] sm:$0xff]  ;;  %v11920_v10 = vmax.f32 %v11919_v21, 0.0  ;;  %v11921_v47 = vmax.f32 %v9970_v28, 0.0  ;;  %v11931_v28 = vld [vmem:[#allocation100_spill] sm:$0xff] }
 0x3e7   :  { %4203 = vmatpush.msrb.mxu0 %v11884_v15  ;;  %4074 = vmatpush.msrb.mxu1 %v11886_v55  ;;  %v11912_v54 = vmax.f32 %v11911_v51, 0.0  ;;  %v11922_v7 = vmax.f32 %v10146_v22, 0.0  ;;  %v11923_v50 = vld [vmem:[#allocation78_spill] sm:$0xff]  ;;  %v11926_v15 = vmax.f32 %v11925_v49, 0.0  ;;  %v11927_v59 = vmax.f32 %v9997_v14, 0.0  ;;  %v11929_v55 = vld [vmem:[#allocation76_spill] sm:$0xff] }
 0x3e8   :  { %4139 = vmatpush.msrb.mxu3 %v11887_v40  ;;  %4273 = vmatpush.msrb.mxu2 %v11889_v57  ;;  %v11924_v19 = vmax.f32 %v11923_v50, 0.0  ;;  %v11930_v40 = vmax.f32 %v11929_v55, 0.0  ;;  %v11933_v22 = vmax.f32 %v9976_v33, 0.0  ;;  %v11934_v57 = vld [vmem:[#allocation70_spill] sm:$0xff]  ;;  %v11936_v14 = vld [vmem:[#allocation104_spill] sm:$0xff]  ;;  %v11943_v33 = vmax.f32 %v9946_v41, 0.0 }
 0x3e9   :  { %4204 = vmatpush.msrb.mxu0 %v11888_v48  ;;  %4075 = vmatpush.msrb.mxu1 %v11891_v0  ;;  %v11932_v48 = vmax.f32 %v11931_v28, 0.0  ;;  %v11935_v39 = vmax.f32 %v11934_v57, 0.0  ;;  %v11937_v0 = vmax.f32 %v11936_v14, 0.0  ;;  %v11951_v45 = vld [vmem:[#allocation13_spill] sm:$0xff]  ;;  %v11952_v41 = vmax.f32 %v9819_v62, 0.0  ;;  %v11962_v4 = vld [vmem:[#allocation10_spill] sm:$0xff] }
 0x3ea   :  { %4140 = vmatpush.msrb.mxu3 %v11892_v24  ;;  %4274 = vmatpush.msrb.mxu2 %v11894_v11  ;;  %v11938_v24 = vmax.f32 %v9915_v25, 0.0  ;;  %v11948_v25 = vld [vmem:[#allocation98_spill] sm:$0xff]  ;;  %v11961_v62 = vmax.f32 %v10296_v20, 0.0  ;;  %v11971_v20 = vmax.f32 %v10164_v26, 0.0  ;;  %v11978_v52 = vld [vmem:[#allocation91_spill] sm:$0xff]  ;;  %v11980_v21 = vld [vmem:[#allocation117_spill] sm:$0xff] }
 0x3eb   :  { %4205 = vmatpush.msrb.mxu0 %v11893_v1  ;;  %4076 = vmatpush.msrb.mxu1 %v11896_v2  ;;  %v11939_v1 = vld [vmem:[#allocation72_spill] sm:$0xff]  ;;  %v11942_v2 = vmax.f32 %v11941_v63, 0.0  ;;  %v12004_v63 = vld [vmem:[#allocation114_spill] sm:$0xff] }
 0x3ec   :  { %4141 = vmatpush.msrb.mxu3 %v11897_v23  ;;  %4275 = vmatpush.msrb.mxu2 %v11899_v8  ;;  %v11940_v11 = vmax.f32 %v11939_v1, 0.0  ;;  %v11946_v23 = vld [vmem:[#allocation8_spill] sm:$0xff]  ;;  %v11950_v8 = vmax.f32 %v10186_v43, 0.0  ;;  %v11958_v43 = vld [vmem:[#allocation97_spill] sm:$0xff]  ;;  %v12002_v1 = vld [vmem:[#allocation135_spill] sm:$0xff] }
 0x3ed   :  { %4206 = vmatpush.msrb.mxu0 %v11898_v58  ;;  %4077 = vmatpush.msrb.mxu1 %v11901_v32  ;;  %v11947_v58 = vmax.f32 %v9923_v30, 0.0  ;;  %v11953_v32 = vld [vmem:[#allocation99_spill] sm:$0xff]  ;;  %v11956_v30 = vmax.f32 %v10299_v37, 0.0  ;;  %v11959_v31 = vmax.f32 %v11958_v43, 0.0  ;;  %v11965_v37 = vld [vmem:[#allocation12_spill] sm:$0xff] }
 0x3ee   :  { %4142 = vmatpush.msrb.mxu3 %v11902_v13  ;;  %4276 = vmatpush.msrb.mxu2 %v11904_v35  ;;  %v11954_v13 = vmax.f32 %v11953_v32, 0.0  ;;  %v11957_v35 = vmax.f32 %v9878_v6, 0.0  ;;  %v11966_v6 = vld [vmem:[#allocation93_spill] sm:$0xff]  ;;  %v11982_v26 = vld [vmem:[#allocation128_spill] sm:$0xff]  ;;  %v12012_v32 = vld [vmem:[#allocation107_spill] sm:$0xff] }
 0x3ef   :  { %4207 = vmatpush.msrb.mxu0 %v11903_v29  ;;  %4078 = vmatpush.msrb.mxu1 %v11906_v60  ;;  %v11955_v29 = vmax.f32 %v10190_v17, 0.0  ;;  %v11960_v60 = vmax.f32 %v10117_v56, 0.0  ;;  %v11963_v17 = vmax.f32 %v9835_v5, 0.0  ;;  %v11970_v56 = vld [vmem:[#allocation17_spill] sm:$0xff]  ;;  %v11974_v5 = vld [vmem:[#allocation118_spill] sm:$0xff]  ;;  %v11987_v49 = vld [vmem:[#allocation112_spill] sm:$0xff] }
 0x3f0   :  { %4143 = vmatpush.msrb.mxu3 %v11908_v42  ;;  %4277 = vmatpush.msrb.mxu2 %v11910_v18  ;;  %v11964_v42 = vld [vmem:[#allocation11_spill] sm:$0xff]  ;;  %v11968_v18 = vld [vmem:[#allocation116_spill] sm:$0xff] }
 0x3f1   :  { %4208 = vmatpush.msrb.mxu0 %v11909_v53  ;;  %4079 = vmatpush.msrb.mxu1 %v11912_v54  ;;  %v11967_v53 = vmax.f32 %v11966_v6, 0.0  ;;  %v11969_v51 = vmax.f32 %v11968_v18, 0.0  ;;  %v11972_v54 = vld [vmem:[#allocation95_spill] sm:$0xff]  ;;  %v11990_v12 = vld [vmem:[#allocation16_spill] sm:$0xff]  ;;  %v12024_v18 = vld [vmem:[#allocation125_spill] sm:$0xff] }
 0x3f2   :  { %4144 = vmatpush.msrb.mxu3 %v11914_v9  ;;  %4278 = vmatpush.msrb.mxu2 %v11916_v36  ;;  %v11973_v34 = vmax.f32 %v11972_v54, 0.0  ;;  %v11975_v9 = vmax.f32 %v11974_v5, 0.0  ;;  %v12017_v43 = vld [vmem:[#allocation19_spill] sm:$0xff] }
 0x3f3   :  { %4209 = vmatpush.msrb.mxu0 %v11915_v46  ;;  %4080 = vmatpush.msrb.mxu1 %v11918_v27  ;;  %v11976_v46 = vld [vmem:[#allocation130_spill] sm:$0xff]  ;;  %v11979_v27 = vmax.f32 %v11978_v52, 0.0 }
 0x3f4   :  { %4145 = vmatpush.msrb.mxu3 %v11920_v10  ;;  %4279 = vmatpush.msrb.mxu2 %v11922_v7  ;;  %v11977_v36 = vmax.f32 %v11976_v46, 0.0  ;;  %v11981_v10 = vmax.f32 %v11980_v21, 0.0  ;;  %v11984_v7 = vld [vmem:[#allocation136_spill] sm:$0xff] }
 0x3f5   :  { %4210 = vmatpush.msrb.mxu0 %v11921_v47  ;;  %4081 = vmatpush.msrb.mxu1 %v11924_v19  ;;  %v11983_v47 = vmax.f32 %v11982_v26, 0.0  ;;  %v11985_v50 = vmax.f32 %v11984_v7, 0.0  ;;  %v11986_v19 = vld [vmem:[#allocation14_spill] sm:$0xff] }
 0x3f6   :  { %4146 = vmatpush.msrb.mxu3 %v11926_v15  ;;  %5785 = vmatmul.msk.f32.vlgmr.msrb.gmra.mxu2 %vm4020_vm14, %v11928_v3  ;;  %v11988_v15 = vmax.f32 %v11987_v49, 0.0 }
 0x3f7   :  { %4211 = vmatpush.msrb.mxu0 %v11927_v59  ;;  %4082 = vmatpush.msrb.mxu1 %v11930_v40  ;;  %v11989_v59 = vld [vmem:[#allocation15_spill] sm:$0xff]  ;;  %v11993_v40 = vld [vmem:[#allocation129_spill] sm:$0xff] }
 0x3f8   :  { %4147 = vmatpush.msrb.mxu3 %v11932_v48  ;;  %4528 = vmatpush.msra.mxu2 %v3951_v16  ;;  %v11945_v16 = vld [vmem:[#allocation7_spill] sm:$0xff]  ;;  %v11994_v28 = vmax.f32 %v11993_v40, 0.0  ;;  %v11995_v48 = vld [vmem:[#allocation21_spill] sm:$0xff] }
 0x3f9   :  { %4212 = vmatpush.msrb.mxu0 %v11933_v22  ;;  %4083 = vmatpush.msrb.mxu1 %v11935_v39  ;;  %v11996_v22 = vld [vmem:[#allocation115_spill] sm:$0xff]  ;;  %v11998_v39 = vld [vmem:[#allocation89_spill] sm:$0xff] }
 0x3fa   :  { %4148 = vmatpush.msrb.mxu3 %v11937_v0  ;;  %4529 = vmatpush.msra.mxu2 %v3949_v44  ;;  %v11949_v44 = vmax.f32 %v11948_v25, 0.0  ;;  %v11997_v57 = vmax.f32 %v11996_v22, 0.0  ;;  %v11999_v14 = vmax.f32 %v11998_v39, 0.0  ;;  %v12000_v0 = vld [vmem:[#allocation127_spill] sm:$0xff]  ;;  %v12008_v25 = vld [vmem:[#allocation124_spill] sm:$0xff]  ;;  %v12049_v39 = vld [vmem:[#allocation105_spill] sm:$0xff] }
 0x3fb   :  { %4213 = vmatpush.msrb.mxu0 %v11938_v24  ;;  %4084 = vmatpush.msrb.mxu1 %v11940_v11  ;;  %v12001_v24 = vmax.f32 %v12000_v0, 0.0  ;;  %v12003_v11 = vmax.f32 %v12002_v1, 0.0  ;;  %v12045_v40 = vld [vmem:[#allocation23_spill] sm:$0xff]  ;;  %v12051_v0 = vld [vmem:[#allocation29_spill] sm:$0xff] }
 0x3fc   :  { %4149 = vmatpush.msrb.mxu3 %v11942_v2  ;;  %4085 = vmatmul.f32.vlgmr.msrb.gmra.mxu1 %v11944_v38  ;;  %v12005_v2 = vmax.f32 %v12004_v63, 0.0  ;;  %v12047_v22 = vld [vmem:[#allocation79_spill] sm:$0xff] }
 0x3fd   :  { %4214 = vmatpush.msrb.mxu0 %v11943_v33  ;;  %4150 = vmatmul.f32.vlgmr.msrb.gmra.mxu3 %v11945_v16  ;;  %v12006_v33 = vld [vmem:[#allocation85_spill] sm:$0xff] }
 0x3fe   :  { %4215 = vmatmul.f32.vlgmr.msrb.gmra.mxu0 %v11946_v23  ;;  %4394 = vmatpush.msra.mxu3 %v11947_v58  ;;  %v12007_v58 = vmax.f32 %v12006_v33, 0.0 }
 0x3ff   :  { %4329 = vmatpush.msra.mxu1 %v11949_v44  ;;  %4459 = vmatpush.msra.mxu0 %v11950_v8  ;;  %v12009_v44 = vmax.f32 %v12008_v25, 0.0  ;;  %v12010_v8 = vld [vmem:[#allocation137_spill] sm:$0xff] }
 0x400   :  { %5786 = vmatmul.msk.f32.gmra.mxu2 %vm4020_vm14, %v11951_v45  ;;  %4395 = vmatpush.msra.mxu3 %v11952_v41  ;;  %v12011_v41 = vmax.f32 %v12010_v8, 0.0 }
 0x401   :  { %4330 = vmatpush.msra.mxu1 %v11954_v13  ;;  %4460 = vmatpush.msra.mxu0 %v11955_v29  ;;  %v12013_v13 = vmax.f32 %v12012_v32, 0.0  ;;  %v12014_v29 = vld [vmem:[#allocation18_spill] sm:$0xff] }
 0x402   :  { %4530 = vmatpush.msra.mxu2 %v11956_v30  ;;  %4396 = vmatpush.msra.mxu3 %v11957_v35  ;;  %v12015_v30 = vld [vmem:[#allocation126_spill] sm:$0xff] }
 0x403   :  { %4331 = vmatpush.msra.mxu1 %v11959_v31  ;;  %4461 = vmatpush.msra.mxu0 %v11960_v60  ;;  %v12016_v35 = vmax.f32 %v12015_v30, 0.0  ;;  %v12018_v31 = vld [vmem:[#allocation20_spill] sm:$0xff]  ;;  %v12019_v60 = vld [vmem:[#allocation81_spill] sm:$0xff] }
 0x404   :  { %4531 = vmatpush.msra.mxu2 %v11961_v62  ;;  %4088 = vmatmul.f32.gmra.mxu1 %v11962_v4  ;;  %v12020_v62 = vmax.f32 %v12019_v60, 0.0  ;;  %v12065_v30 = vld [vmem:[#allocation120_spill] sm:$0xff]  ;;  %v12067_v60 = vld [vmem:[#allocation26_spill] sm:$0xff] }
 0x405   :  { %4397 = vmatpush.msra.mxu3 %v11963_v17  ;;  %4332 = vmatpush.msra.mxu1 %v11967_v53  ;;  %v12021_v17 = vld [vmem:[#allocation111_spill] sm:$0xff]  ;;  %v12023_v53 = vld [vmem:[#allocation25_spill] sm:$0xff] }
 0x406   :  { %4153 = vmatmul.f32.gmra.mxu3 %v11964_v42  ;;  %4218 = vmatmul.f32.gmra.mxu0 %v11965_v37  ;;  %v12022_v6 = vmax.f32 %v12021_v17, 0.0  ;;  %v12069_v17 = vld [vmem:[#allocation28_spill] sm:$0xff] }
 0x407   :  { %4398 = vmatpush.msra.mxu3 %v11969_v51  ;;  %4462 = vmatpush.msra.mxu0 %v11971_v20  ;;  %v12025_v51 = vmax.f32 %v12024_v18, 0.0  ;;  %v12026_v20 = vld [vmem:[#allocation83_spill] sm:$0xff] }
 0x408   :  { %5787 = vmatmul.msk.f32.gmra.mxu2 %vm4020_vm14, %v11970_v56  ;;  %4333 = vmatpush.msra.mxu1 %v11973_v34  ;;  %v12027_v54 = vmax.f32 %v12026_v20, 0.0  ;;  %v12028_v34 = vld [vmem:[#allocation133_spill] sm:$0xff]  ;;  %v12073_v20 = vld [vmem:[#allocation30_spill] sm:$0xff] }
 0x409   :  { %4399 = vmatpush.msra.mxu3 %v11975_v9  ;;  %4463 = vmatpush.msra.mxu0 %v11977_v36  ;;  %v12029_v5 = vmax.f32 %v12028_v34, 0.0  ;;  %v12030_v9 = vld [vmem:[#allocation109_spill] sm:$0xff]  ;;  %v12075_v34 = vld [vmem:[#allocation32_spill] sm:$0xff] }
 0x40a   :  { %4532 = vmatpush.msra.mxu2 %v3943_v61  ;;  %4334 = vmatpush.msra.mxu1 %v11979_v27  ;;  %v11991_v61 = vld [vmem:[#allocation87_spill] sm:$0xff]  ;;  %v12031_v46 = vmax.f32 %v12030_v9, 0.0  ;;  %v12032_v36 = vld [vmem:[#allocation121_spill] sm:$0xff]  ;;  %v12077_v9 = vld [vmem:[#allocation34_spill] sm:$0xff] }
 0x40b   :  { %4400 = vmatpush.msra.mxu3 %v11981_v10  ;;  %4464 = vmatpush.msra.mxu0 %v11983_v47  ;;  %v11992_v55 = vmax.f32 %v11991_v61, 0.0  ;;  %v12033_v52 = vmax.f32 %v12032_v36, 0.0  ;;  %v12034_v27 = vld [vmem:[#allocation75_spill] sm:$0xff]  ;;  %v12036_v10 = vld [vmem:[#allocation132_spill] sm:$0xff]  ;;  %v12038_v47 = vld [vmem:[#allocation101_spill] sm:$0xff] }
 0x40c   :  { %4533 = vmatpush.msra.mxu2 %v11985_v50  ;;  %4091 = vmatmul.f32.gmra.mxu1 %v11986_v19  ;;  %v12035_v21 = vmax.f32 %v12034_v27, 0.0  ;;  %v12037_v26 = vmax.f32 %v12036_v10, 0.0  ;;  %v12039_v7 = vmax.f32 %v12038_v47, 0.0  ;;  %v12040_v50 = vld [vmem:[#allocation123_spill] sm:$0xff]  ;;  %v12043_v61 = vld [vmem:[#allocation134_spill] sm:$0xff]  ;;  %v12079_v36 = vld [vmem:[#allocation36_spill] sm:$0xff] }
 0x40d   :  { %4401 = vmatpush.msra.mxu3 %v11988_v15  ;;  %4335 = vmatpush.msra.mxu1 %v11992_v55  ;;  %v12041_v49 = vmax.f32 %v12040_v50, 0.0  ;;  %v12042_v15 = vld [vmem:[#allocation22_spill] sm:$0xff]  ;;  %v12044_v55 = vmax.f32 %v12043_v61, 0.0  ;;  %v12081_v27 = vmov 0   ;;  %v12083_v10 = vld [vmem:[#allocation39_spill] sm:$0xff]  ;;  %v12085_v47 = vld [vmem:[#allocation45_spill] sm:$0xff] }
 0x40e   :  { %4156 = vmatmul.f32.gmra.mxu3 %v11989_v59  ;;  %4221 = vmatmul.f32.gmra.mxu0 %v11990_v12  ;;  %v12087_v50 = vld [vmem:[#allocation43_spill] sm:$0xff]  ;;  %v12089_v61 = vld [vmem:[#allocation49_spill] sm:$0xff] }
 0x40f   :  { %4465 = vmatpush.msra.mxu0 %v11994_v28  ;;  %4402 = vmatpush.msra.mxu3 %v11997_v57  ;;  %v12046_v28 = vld [vmem:[#allocation24_spill] sm:$0xff]  ;;  %v12048_v57 = vmax.f32 %v12047_v22, 0.0  ;;  %v12091_v22 = vld [vmem:[#allocation47_spill] sm:$0xff] }
 0x410   :  { %5788 = vmatmul.msk.f32.gmra.mxu2 %vm4020_vm14, %v11995_v48  ;;  %4336 = vmatpush.msra.mxu1 %v11999_v14  ;;  %v12050_v14 = vmax.f32 %v12049_v39, 0.0  ;;  %v12093_v39 = vld [vmem:[#allocation53_spill] sm:$0xff] }
 0x411   :  { %4466 = vmatpush.msra.mxu0 %v12001_v24  ;;  %4534 = vmatpush.msra.mxu2 %v12003_v11  ;;  %v12052_v24 = vld [vmem:[#allocation122_spill] sm:$0xff]  ;;  %v12054_v11 = vld [vmem:[#allocation77_spill] sm:$0xff] }
 0x412   :  { %4403 = vmatpush.msra.mxu3 %v12005_v2  ;;  %4337 = vmatpush.msra.mxu1 %v12007_v58  ;;  %v12053_v1 = vmax.f32 %v12052_v24, 0.0  ;;  %v12055_v63 = vmax.f32 %v12054_v11, 0.0  ;;  %v12056_v2 = vld [vmem:[#allocation103_spill] sm:$0xff]  ;;  %v12097_v11 = vld [vmem:[#allocation57_spill] sm:$0xff] }
 0x413   :  { %4467 = vmatpush.msra.mxu0 %v12009_v44  ;;  %4535 = vmatpush.msra.mxu2 %v12011_v41  ;;  %v12057_v33 = vmax.f32 %v12056_v2, 0.0  ;;  %v12058_v58 = vld [vmem:[#allocation119_spill] sm:$0xff] }
 0x414   :  { %4404 = vmatpush.msra.mxu3 %v12013_v13  ;;  %4094 = vmatmul.f32.gmra.mxu1 %v12014_v29  ;;  %v12059_v25 = vmax.f32 %v12058_v58, 0.0  ;;  %v12060_v44 = vld [vmem:[#allocation131_spill] sm:$0xff]  ;;  %v12064_v13 = vmov 1.0   ;;  %v12101_v58 = vld [vmem:[#allocation61_spill] sm:$0xff] }
 0x415   :  { %4468 = vmatpush.msra.mxu0 %v12016_v35  ;;  %4338 = vmatpush.msra.mxu1 %v12020_v62  ;;  %v12061_v8 = vmax.f32 %v12060_v44, 0.0  ;;  %v12062_v41 = vld [vmem:[#allocation71_spill] sm:$0xff]  ;;  %v12066_v35 = vmax.f32 %v12065_v30, 0.0  ;;  %v12108_v30 = vld [vmem:[#allocation64_spill] sm:$0xff] }
 0x416   :  { %4159 = vmatmul.f32.gmra.mxu3 %v12017_v43  ;;  %4224 = vmatmul.f32.gmra.mxu0 %v12018_v31  ;;  %v12063_v32 = vmax.f32 %v12062_v41, 0.0  ;;  %v12068_v62 = vld [vmem:[#allocation27_spill] sm:$0xff]  ;;  %v12105_v41 = vld [vmem:[#allocation65_spill] sm:$0xff] }
 0x417   :  { %4405 = vmatpush.msra.mxu3 %v12022_v6  ;;  %4469 = vmatpush.msra.mxu0 %v12025_v51  ;;  %v12070_v6 = vld [vmem:[#allocation73_spill] sm:$0xff]  ;;  %v12095_v24 = vld [vmem:[#allocation51_spill] sm:$0xff] }
 0x418   :  { %5789 = vmatmul.msk.f32.gmra.mxu2 %vm4020_vm14, %v12023_v53  ;;  %4339 = vmatpush.msra.mxu1 %v12027_v54  ;;  %v12071_v18 = vmax.f32 %v12070_v6, 0.0  ;;  %v12072_v51 = vld [vmem:[#allocation33_spill] sm:$0xff]  ;;  %v12074_v54 = vld [vmem:[#allocation31_spill] sm:$0xff]  ;;  %v12110_v6 = vld [vmem:[#allocation66_spill] sm:$0xff] }
 0x419   :  { %4536 = vmatpush.msra.mxu2 %v12029_v5  ;;  %4406 = vmatpush.msra.mxu3 %v12031_v46  ;;  %v12076_v5 = vld [vmem:[#allocation37_spill] sm:$0xff]  ;;  %v12078_v46 = vld [vmem:[#allocation35_spill] sm:$0xff] }
 0x41a   :  { %4470 = vmatpush.msra.mxu0 %v12033_v52  ;;  %4340 = vmatpush.msra.mxu1 %v12035_v21  ;;  %v12080_v52 = vld [vmem:[#allocation41_spill] sm:$0xff]  ;;  %v12082_v21 = vld [vmem:[#allocation38_spill] sm:$0xff]  ;;  %v12099_v2 = vld [vmem:[#allocation55_spill] sm:$0xff] }
 0x41b   :  { %4537 = vmatpush.msra.mxu2 %v12037_v26  ;;  %4407 = vmatpush.msra.mxu3 %v12039_v7  ;;  %v12084_v26 = vld [vmem:[#allocation40_spill] sm:$0xff]  ;;  %v12086_v7 = vld [vmem:[#allocation42_spill] sm:$0xff]  ;;  %v12103_v44 = vld [vmem:[#allocation59_spill] sm:$0xff] }
 0x41c   :  { %4471 = vmatpush.msra.mxu0 %v12041_v49  ;;  %4097 = vmatmul.f32.gmra.mxu1 %v12042_v15  ;;  %v12088_v49 = vld [vmem:[#allocation44_spill] sm:$0xff] }
 0x41d   :  { %4538 = vmatpush.msra.mxu2 %v12044_v55  ;;  %4341 = vmatpush.msra.mxu1 %v12048_v57  ;;  %v12090_v55 = vld [vmem:[#allocation46_spill] sm:$0xff]  ;;  %v12092_v57 = vld [vmem:[#allocation48_spill] sm:$0xff] }
 0x41e   :  { %4162 = vmatmul.f32.gmra.mxu3 %v12045_v40  ;;  %4227 = vmatmul.f32.gmra.mxu0 %v12046_v28 }
 0x41f   :  { %4408 = vmatpush.msra.mxu3 %v12050_v14  ;;  %4472 = vmatpush.msra.mxu0 %v12053_v1  ;;  %v12094_v14 = vld [vmem:[#allocation50_spill] sm:$0xff]  ;;  %v12096_v1 = vld [vmem:[#allocation52_spill] sm:$0xff] }
 0x420   :  { %5790 = vmatmul.msk.f32.gmra.mxu2 %vm4020_vm14, %v12051_v0  ;;  %4342 = vmatpush.msra.mxu1 %v12055_v63  ;;  %v12098_v63 = vld [vmem:[#allocation54_spill] sm:$0xff] }
 0x421   :  { %4409 = vmatpush.msra.mxu3 %v12057_v33  ;;  %4473 = vmatpush.msra.mxu0 %v12059_v25  ;;  %v12100_v33 = vld [vmem:[#allocation56_spill] sm:$0xff]  ;;  %v12102_v25 = vld [vmem:[#allocation58_spill] sm:$0xff] }
 0x422   :  { %4539 = vmatpush.msra.mxu2 %v12061_v8  ;;  %4343 = vmatpush.msra.mxu1 %v12063_v32  ;;  %v12104_v8 = vld [vmem:[#allocation60_spill] sm:$0xff]  ;;  %v12106_v32 = vld [vmem:[#allocation62_spill] sm:$0xff] }
 0x423   :  { %5817 = vmatpush.msk.msrb.mxu3 %vm460_vm0, %v12064_v13  ;;  %4474 = vmatpush.msra.mxu0 %v12066_v35  ;;  %v12109_v35 = vld [vmem:[#allocation69_spill] sm:$0xff] }
 0x424   :  { %5834 = vmatpush.msk.msrb.mxu2 %vm460_vm0, %v12064_v13  ;;  %4100 = vmatmul.f32.gmra.mxu1 %v12067_v60 }
 0x425   :  { %4847 = vmatpush.msrb.mxu0 %v12064_v13  ;;  %4344 = vmatpush.msra.mxu1 %v12071_v18  ;;  %v12111_v18 = vld [vmem:[#allocation67_spill] sm:$0xff] }
 0x426   :  { %4165 = vmatmul.f32.gmra.mxu3 %v12068_v62  ;;  %4230 = vmatmul.f32.gmra.mxu0 %v12069_v17 }
 0x427   :  { %4710 = vmatpush.msrb.mxu3 %v12064_v13  ;;  %4637 = vmatpush.msrb.mxu1 %v12064_v13 }
 0x428   :  { %5791 = vmatmul.msk.f32.gmra.mxu2 %vm4020_vm14, %v12072_v51  ;;  %4848 = vmatpush.msrb.mxu0 %v12064_v13 }
 0x429   :  { %4920 = vmatpush.msrb.mxu2 %v12064_v13  ;;  %4638 = vmatpush.msrb.mxu1 %v12064_v13 }
 0x42a   :  { %4711 = vmatpush.msrb.mxu3 %v12064_v13  ;;  %4849 = vmatpush.msrb.mxu0 %v12064_v13 }
 0x42b   :  { %4921 = vmatpush.msrb.mxu2 %v12064_v13  ;;  %4639 = vmatpush.msrb.mxu1 %v12064_v13 }
 0x42c   :  { %4712 = vmatpush.msrb.mxu3 %v12064_v13  ;;  %4103 = vmatmul.f32.gmra.mxu1 %v12073_v20 }
 0x42d   :  { %4850 = vmatpush.msrb.mxu0 %v12064_v13  ;;  %4640 = vmatpush.msrb.mxu1 %v12064_v13 }
 0x42e   :  { %4168 = vmatmul.f32.gmra.mxu3 %v12074_v54  ;;  %4233 = vmatmul.f32.gmra.mxu0 %v12075_v34 }
 0x42f   :  { %4851 = vmatpush.msrb.mxu0 %v12064_v13  ;;  %4713 = vmatpush.msrb.mxu3 %v12064_v13 }
 0x430   :  { %5792 = vmatmul.msk.f32.gmra.mxu2 %vm4020_vm14, %v12076_v5  ;;  %4641 = vmatpush.msrb.mxu1 %v12064_v13 }
 0x431   :  { %4922 = vmatpush.msrb.mxu2 %v12064_v13  ;;  %4852 = vmatpush.msrb.mxu0 %v12064_v13 }
 0x432   :  { %4714 = vmatpush.msrb.mxu3 %v12064_v13  ;;  %4642 = vmatpush.msrb.mxu1 %v12064_v13 }
 0x433   :  { %4923 = vmatpush.msrb.mxu2 %v12064_v13  ;;  %4853 = vmatpush.msrb.mxu0 %v12064_v13 }
 0x434   :  { %4715 = vmatpush.msrb.mxu3 %v12064_v13  ;;  %4106 = vmatmul.f32.gmra.mxu1 %v12077_v9 }
 0x435   :  { %4924 = vmatpush.msrb.mxu2 %v12064_v13  ;;  %4643 = vmatpush.msrb.mxu1 %v12064_v13 }
 0x436   :  { %4171 = vmatmul.f32.gmra.mxu3 %v12078_v46  ;;  %4236 = vmatmul.f32.gmra.mxu0 %v12079_v36 }
 0x437   :  { %4854 = vmatpush.msrb.mxu0 %v12064_v13  ;;  %4716 = vmatpush.msrb.mxu3 %v12064_v13 }
 0x438   :  { %5793 = vmatmul.msk.f32.gmra.mxu2 %vm4020_vm14, %v12080_v52  ;;  %4644 = vmatpush.msrb.mxu1 %v12064_v13 }
 0x439   :  { %4855 = vmatpush.msrb.mxu0 %v12064_v13  ;;  %4925 = vmatpush.msrb.mxu2 %v12064_v13 }
 0x43a   :  { %4717 = vmatpush.msrb.mxu3 %v12064_v13  ;;  %4645 = vmatpush.msrb.mxu1 %v12064_v13 }
 0x43b   :  { %4856 = vmatpush.msrb.mxu0 %v12064_v13  ;;  %4926 = vmatpush.msrb.mxu2 %v12064_v13 }
 0x43c   :  { %6232 = vset.pattern.permute.xlu1 %v12081_v27  ;;  %4109 = vmatmul.f32.gmra.mxu1 %v12082_v21 }
 0x43d   :  { %4857 = vmatpush.msrb.mxu0 %v12064_v13  ;;  %4646 = vmatpush.msrb.mxu1 %v12064_v13 }
 0x43e   :  { %4174 = vmatmul.f32.gmra.mxu3 %v12083_v10  ;;  %4239 = vmatmul.f32.gmra.mxu0 %v12084_v26 }
 0x43f   :  { %4858 = vmatpush.msrb.mxu0 %v12064_v13  ;;  %6233 = vset.pattern.permute.xlu2 %v12081_v27 }
 0x440   :  { %5794 = vmatmul.msk.f32.gmra.mxu2 %vm4020_vm14, %v12085_v47  ;;  %4647 = vmatpush.msrb.mxu1 %v12064_v13 }
 0x441   :  { %4859 = vmatpush.msrb.mxu0 %v12064_v13  ;;  %4927 = vmatpush.msrb.mxu2 %v12064_v13 }
 0x442   :  { %6234 = vset.pattern.permute.xlu0 %v12081_v27  ;;  %4648 = vmatpush.msrb.mxu1 %v12064_v13  ;;  %v12112_v27 = vld [vmem:[#allocation68_spill] sm:$0xff] }
 0x443   :  { %4860 = vmatpush.msrb.mxu0 %v12064_v13 }
 0x444   :  { %4112 = vmatmul.f32.gmra.mxu1 %v12086_v7 }
 0x445   :  { %4861 = vmatpush.msrb.mxu0 %v12064_v13  ;;  %4649 = vmatpush.msrb.mxu1 %v12064_v13 }
 0x446   :  { %4177 = vmatmul.f32.gmra.mxu3 %v12087_v50  ;;  %4242 = vmatmul.f32.gmra.mxu0 %v12088_v49 }
 0x447   :  { %4862 = vmatpush.msrb.mxu0 %v12064_v13  ;;  %4650 = vmatpush.msrb.mxu1 %v12064_v13 }
 0x448   :  { %5795 = vmatmul.msk.f32.gmra.mxu2 %vm4020_vm14, %v12089_v61 }
 0x449   :  { %4651 = vmatpush.msrb.mxu1 %v12064_v13 }
 0x44b   :  { %4652 = vmatpush.msrb.mxu1 %v12064_v13  ;;  %v12107_v13 = vld [vmem:[#allocation63_spill] sm:$0xff] }
 0x44c   :  { %4115 = vmatmul.f32.gmra.mxu1 %v12090_v55 }
 0x44e   :  { %4180 = vmatmul.f32.gmra.mxu3 %v12091_v22  ;;  %4245 = vmatmul.f32.gmra.mxu0 %v12092_v57 }
 0x450   :  { %5796 = vmatmul.msk.f32.gmra.mxu2 %vm4020_vm14, %v12093_v39 }
 0x454   :  { %4118 = vmatmul.f32.gmra.mxu1 %v12094_v14 }
 0x456   :  { %4183 = vmatmul.f32.gmra.mxu3 %v12095_v24  ;;  %4248 = vmatmul.f32.gmra.mxu0 %v12096_v1 }
 0x458   :  { %5797 = vmatmul.msk.f32.gmra.mxu2 %vm4020_vm14, %v12097_v11 }
 0x45c   :  { %4121 = vmatmul.f32.gmra.mxu1 %v12098_v63 }
 0x45e   :  { %4186 = vmatmul.f32.gmra.mxu3 %v12099_v2  ;;  %4251 = vmatmul.f32.gmra.mxu0 %v12100_v33 }
 0x460   :  { %5798 = vmatmul.msk.f32.gmra.mxu2 %vm4020_vm14, %v12101_v58 }
 0x464   :  { %4124 = vmatmul.f32.gmra.mxu1 %v12102_v25 }
 0x466   :  { %4189 = vmatmul.f32.gmra.mxu3 %v12103_v44  ;;  %4254 = vmatmul.f32.gmra.mxu0 %v12104_v8 }
 0x468   :  { %5799 = vmatmul.msk.f32.gmra.mxu2 %vm4020_vm14, %v12105_v41 }
 0x46c   :  { %4127 = vmatmul.f32.gmra.mxu1 %v12106_v32 }
 0x46e   :  { %4192 = vmatmul.f32.gmra.mxu3 %v12107_v13  ;;  %4257 = vmatmul.f32.gmra.mxu0 %v12108_v30 }
 0x470   :  { %5800 = vmatmul.msk.f32.gmra.mxu2 %vm4020_vm14, %v12109_v35 }
 0x474   :  { %4130 = vmatmul.f32.gmra.mxu1 %v12110_v6 }
 0x476   :  { %4195 = vmatmul.f32.gmra.mxu3 %v12111_v18  ;;  %4260 = vmatmul.f32.gmra.mxu0 %v12112_v27 }
 0x478   :  { %5801 = vmatmul.msk.f32.vlgmr.msra.gmra.mxu2 %vm4020_vm14, %v11928_v3 }
 0x479   :  { %v4086_v8 = vpop.f32.mrf.mxu1  ;;  %v4281_v41 = vpop.f32.mrf.mxu2 }
 0x47b   :  { %v4216_v44 = vpop.f32.mrf.mxu0 }
 0x47c   :  { %4345 = vmatmul.f32.vlgmr.msra.gmra.mxu1 %v11944_v38 }
 0x47e   :  { %4410 = vmatmul.f32.vlgmr.msra.gmra.mxu3 %v11945_v16  ;;  %4475 = vmatmul.f32.vlgmr.msra.gmra.mxu0 %v11946_v23 }
 0x480   :  { %5802 = vmatmul.msk.f32.gmra.mxu2 %vm4020_vm14, %v11951_v45  ;;  %v4151_v6 = vpop.f32.mrf.mxu3 }
 0x481   :  { %v4152_v35 = vadd.f32 %v4151_v6, %v4086_v8  ;;  %v4089_v18 = vpop.f32.mrf.mxu1 }
 0x483   :  { %v4219_v30 = vpop.f32.mrf.mxu0  ;;  %v4284_v27 = vpop.f32.mrf.mxu2  ;;  %v4217_v13 = vadd.f32 %v4216_v44, %v4152_v35 }
 0x484   :  { %4348 = vmatmul.f32.gmra.mxu1 %v11962_v4 }
 0x485   :  { %v10706_v3 = vadd.f32 %v4281_v41, %v4217_v13 }
 0x486   :  { %4413 = vmatmul.f32.gmra.mxu3 %v11964_v42  ;;  %4478 = vmatmul.f32.gmra.mxu0 %v11965_v37 }
 0x488   :  { %5803 = vmatmul.msk.f32.gmra.mxu2 %vm4020_vm14, %v11970_v56 }
 0x489   :  { %v4154_v38 = vpop.f32.mrf.mxu3  ;;  %v4092_v23 = vpop.f32.mrf.mxu1 }
 0x48a   :  { %v4155_v16 = vadd.f32 %v4154_v38, %v4089_v18 }
 0x48b   :  { %v4222_v45 = vpop.f32.mrf.mxu0  ;;  %v4287_v8 = vpop.f32.mrf.mxu2 }
 0x48c   :  { %v4220_v6 = vadd.f32 %v4219_v30, %v4155_v16  ;;  %4351 = vmatmul.f32.gmra.mxu1 %v11986_v19 }
 0x48e   :  { %v10713_v44 = vadd.f32 %v4284_v27, %v4220_v6  ;;  %4416 = vmatmul.f32.gmra.mxu3 %v11989_v59  ;;  %4481 = vmatmul.f32.gmra.mxu0 %v11990_v12 }
 0x490   :  { %5804 = vmatmul.msk.f32.gmra.mxu2 %vm4020_vm14, %v11995_v48 }
 0x491   :  { %v4157_v4 = vpop.f32.mrf.mxu3  ;;  %v4095_v37 = vpop.f32.mrf.mxu1 }
 0x492   :  { %v4158_v42 = vadd.f32 %v4157_v4, %v4092_v23 }
 0x493   :  { %v4225_v56 = vpop.f32.mrf.mxu0  ;;  %v4290_v41 = vpop.f32.mrf.mxu2 }
 0x494   :  { %v4223_v13 = vadd.f32 %v4222_v45, %v4158_v42  ;;  %4354 = vmatmul.f32.gmra.mxu1 %v12014_v29 }
 0x496   :  { %v10720_v30 = vadd.f32 %v4287_v8, %v4223_v13  ;;  %4419 = vmatmul.f32.gmra.mxu3 %v12017_v43  ;;  %4484 = vmatmul.f32.gmra.mxu0 %v12018_v31 }
 0x498   :  { %5805 = vmatmul.msk.f32.gmra.mxu2 %vm4020_vm14, %v12023_v53 }
 0x499   :  { %v4160_v19 = vpop.f32.mrf.mxu3  ;;  %v4098_v12 = vpop.f32.mrf.mxu1 }
 0x49a   :  { %v4161_v59 = vadd.f32 %v4160_v19, %v4095_v37 }
 0x49b   :  { %v4228_v48 = vpop.f32.mrf.mxu0  ;;  %v4293_v35 = vpop.f32.mrf.mxu2 }
 0x49c   :  { %v4226_v18 = vadd.f32 %v4225_v56, %v4161_v59  ;;  %4357 = vmatmul.f32.gmra.mxu1 %v12042_v15 }
 0x49e   :  { %v10727_v27 = vadd.f32 %v4290_v41, %v4226_v18  ;;  %4422 = vmatmul.f32.gmra.mxu3 %v12045_v40  ;;  %4487 = vmatmul.f32.gmra.mxu0 %v12046_v28 }
 0x4a0   :  { %5806 = vmatmul.msk.f32.gmra.mxu2 %vm4020_vm14, %v12051_v0 }
 0x4a1   :  { %v4163_v29 = vpop.f32.mrf.mxu3  ;;  %v4101_v31 = vpop.f32.mrf.mxu1 }
 0x4a2   :  { %v4164_v43 = vadd.f32 %v4163_v29, %v4098_v12 }
 0x4a3   :  { %v4231_v53 = vpop.f32.mrf.mxu0  ;;  %v4296_v38 = vpop.f32.mrf.mxu2 }
 0x4a4   :  { %v4229_v16 = vadd.f32 %v4228_v48, %v4164_v43  ;;  %4360 = vmatmul.f32.gmra.mxu1 %v12067_v60 }
 0x4a6   :  { %v10734_v23 = vadd.f32 %v4293_v35, %v4229_v16  ;;  %4425 = vmatmul.f32.gmra.mxu3 %v12068_v62  ;;  %4490 = vmatmul.f32.gmra.mxu0 %v12069_v17 }
 0x4a8   :  { %5807 = vmatmul.msk.f32.gmra.mxu2 %vm4020_vm14, %v12072_v51 }
 0x4a9   :  { %v4166_v15 = vpop.f32.mrf.mxu3  ;;  %v4104_v28 = vpop.f32.mrf.mxu1 }
 0x4aa   :  { %v4167_v40 = vadd.f32 %v4166_v15, %v4101_v31 }
 0x4ab   :  { %v4234_v0 = vpop.f32.mrf.mxu0  ;;  %v4299_v45 = vpop.f32.mrf.mxu2 }
 0x4ac   :  { %v4232_v8 = vadd.f32 %v4231_v53, %v4167_v40  ;;  %4363 = vmatmul.f32.gmra.mxu1 %v12073_v20 }
 0x4ae   :  { %v10741_v6 = vadd.f32 %v4296_v38, %v4232_v8  ;;  %4428 = vmatmul.f32.gmra.mxu3 %v12074_v54  ;;  %4493 = vmatmul.f32.gmra.mxu0 %v12075_v34  ;;  %v12113_v38 = vld [vmem:[#allocation59_spill] sm:$0xff] }
 0x4b0   :  { %5808 = vmatmul.msk.f32.gmra.mxu2 %vm4020_vm14, %v12076_v5 }
 0x4b1   :  { %v4169_v60 = vpop.f32.mrf.mxu3  ;;  %v4107_v17 = vpop.f32.mrf.mxu1 }
 0x4b2   :  { %v4170_v62 = vadd.f32 %v4169_v60, %v4104_v28 }
 0x4b3   :  { %v4237_v51 = vpop.f32.mrf.mxu0  ;;  %v4302_v4 = vpop.f32.mrf.mxu2 }
 0x4b4   :  { %v4235_v42 = vadd.f32 %v4234_v0, %v4170_v62  ;;  %4366 = vmatmul.f32.gmra.mxu1 %v12077_v9  ;;  %v12116_v0 = vld [vmem:[#allocation63_spill] sm:$0xff] }
 0x4b6   :  { %v10748_v37 = vadd.f32 %v4299_v45, %v4235_v42  ;;  %4431 = vmatmul.f32.gmra.mxu3 %v12078_v46  ;;  %4496 = vmatmul.f32.gmra.mxu0 %v12079_v36  ;;  %v12118_v45 = vld [vmem:[#allocation69_spill] sm:$0xff]  ;;  %v12119_v42 = vld [vmem:[#allocation66_spill] sm:$0xff] }
 0x4b8   :  { %5809 = vmatmul.msk.f32.gmra.mxu2 %vm4020_vm14, %v12080_v52 }
 0x4b9   :  { %v4172_v20 = vpop.f32.mrf.mxu3  ;;  %v4110_v34 = vpop.f32.mrf.mxu1 }
 0x4ba   :  { %v4173_v54 = vadd.f32 %v4172_v20, %v4107_v17  ;;  %v12120_v20 = vld [vmem:[#allocation67_spill] sm:$0xff] }
 0x4bb   :  { %v4240_v5 = vpop.f32.mrf.mxu0  ;;  %v10754_v56 = vpop.f32.mrf.mxu2 }
 0x4bc   :  { %v4238_v41 = vadd.f32 %v4237_v51, %v4173_v54  ;;  %4369 = vmatmul.f32.gmra.mxu1 %v12082_v21 }
 0x4be   :  { %v10757_v13 = vadd.f32 %v4302_v4, %v4238_v41  ;;  %4434 = vmatmul.f32.gmra.mxu3 %v12083_v10  ;;  %4499 = vmatmul.f32.gmra.mxu0 %v12084_v26 }
 0x4c0   :  { %5810 = vmatmul.msk.f32.gmra.mxu2 %vm4020_vm14, %v12085_v47 }
 0x4c1   :  { %v4175_v9 = vpop.f32.mrf.mxu3  ;;  %v4113_v36 = vpop.f32.mrf.mxu1 }
 0x4c2   :  { %v4176_v46 = vadd.f32 %v4175_v9, %v4110_v34 }
 0x4c3   :  { %v4243_v52 = vpop.f32.mrf.mxu0  ;;  %v10763_v19 = vpop.f32.mrf.mxu2 }
 0x4c4   :  { %v10765_v59 = vadd.f32 %v4240_v5, %v4176_v46  ;;  %4372 = vmatmul.f32.gmra.mxu1 %v12086_v7  ;;  %v4767_v46 = vmul.f32 %v10706_v3, %v10706_v3 }
 0x4c6   :  { %4437 = vmatmul.f32.gmra.mxu3 %v12087_v50  ;;  %4502 = vmatmul.f32.gmra.mxu0 %v12088_v49 }
 0x4c8   :  { %5811 = vmatmul.msk.f32.gmra.mxu2 %vm4020_vm14, %v12089_v61 }
 0x4c9   :  { %v4178_v21 = vpop.f32.mrf.mxu3  ;;  %v4116_v26 = vpop.f32.mrf.mxu1 }
 0x4ca   :  { %v4179_v10 = vadd.f32 %v4178_v21, %v4113_v36 }
 0x4cb   :  { %v4246_v47 = vpop.f32.mrf.mxu0  ;;  %v10772_v12 = vpop.f32.mrf.mxu2 }
 0x4cc   :  { %v10774_v48 = vadd.f32 %v4243_v52, %v4179_v10  ;;  %4375 = vmatmul.f32.gmra.mxu1 %v12090_v55 }
 0x4ce   :  { %4440 = vmatmul.f32.gmra.mxu3 %v12091_v22  ;;  %4505 = vmatmul.f32.gmra.mxu0 %v12092_v57 }
 0x4d0   :  { %5812 = vmatmul.msk.f32.gmra.mxu2 %vm4020_vm14, %v12093_v39 }
 0x4d1   :  { %v4181_v7 = vpop.f32.mrf.mxu3  ;;  %v4119_v49 = vpop.f32.mrf.mxu1 }
 0x4d2   :  { %v4182_v50 = vadd.f32 %v4181_v7, %v4116_v26 }
 0x4d3   :  { %v4249_v61 = vpop.f32.mrf.mxu0  ;;  %v10781_v35 = vpop.f32.mrf.mxu2 }
 0x4d4   :  { %v10783_v18 = vadd.f32 %v4246_v47, %v4182_v50  ;;  %4378 = vmatmul.f32.gmra.mxu1 %v12094_v14  ;;  %v4769_v50 = vmul.f32 %v10713_v44, %v10713_v44 }
 0x4d6   :  { %4443 = vmatmul.f32.gmra.mxu3 %v12095_v24  ;;  %4508 = vmatmul.f32.gmra.mxu0 %v12096_v1 }
 0x4d8   :  { %5813 = vmatmul.msk.f32.gmra.mxu2 %vm4020_vm14, %v12097_v11 }
 0x4d9   :  { %v4184_v55 = vpop.f32.mrf.mxu3  ;;  %v4122_v57 = vpop.f32.mrf.mxu1 }
 0x4da   :  { %v4185_v22 = vadd.f32 %v4184_v55, %v4119_v49 }
 0x4db   :  { %v4252_v39 = vpop.f32.mrf.mxu0  ;;  %v10790_v29 = vpop.f32.mrf.mxu2 }
 0x4dc   :  { %v10792_v43 = vadd.f32 %v4249_v61, %v4185_v22  ;;  %4381 = vmatmul.f32.gmra.mxu1 %v12098_v63  ;;  %v12114_v63 = vld [vmem:[#allocation60_spill] sm:$0xff] }
 0x4de   :  { %4446 = vmatmul.f32.gmra.mxu3 %v12099_v2  ;;  %4511 = vmatmul.f32.gmra.mxu0 %v12100_v33  ;;  %v12115_v2 = vld [vmem:[#allocation65_spill] sm:$0xff] }
 0x4e0   :  { %5814 = vmatmul.msk.f32.gmra.mxu2 %vm4020_vm14, %v12101_v58 }
 0x4e1   :  { %v4187_v14 = vpop.f32.mrf.mxu3  ;;  %v4125_v1 = vpop.f32.mrf.mxu1 }
 0x4e2   :  { %v4188_v24 = vadd.f32 %v4187_v14, %v4122_v57 }
 0x4e3   :  { %v4255_v11 = vpop.f32.mrf.mxu0  ;;  %v10799_v31 = vpop.f32.mrf.mxu2 }
 0x4e4   :  { %v10801_v53 = vadd.f32 %v4252_v39, %v4188_v24  ;;  %4384 = vmatmul.f32.gmra.mxu1 %v12102_v25  ;;  %v12117_v25 = vld [vmem:[#allocation64_spill] sm:$0xff] }
 0x4e6   :  { %4449 = vmatmul.f32.gmra.mxu3 %v12113_v38  ;;  %4514 = vmatmul.f32.gmra.mxu0 %v12114_v63 }
 0x4e8   :  { %5815 = vmatmul.msk.f32.gmra.mxu2 %vm4020_vm14, %v12115_v2 }
 0x4e9   :  { %v4190_v33 = vpop.f32.mrf.mxu3  ;;  %v4128_v58 = vpop.f32.mrf.mxu1 }
 0x4ea   :  { %v4191_v16 = vadd.f32 %v4190_v33, %v4125_v1  ;;  %v4771_v1 = vmul.f32 %v10720_v30, %v10720_v30 }
 0x4eb   :  { %v4258_v15 = vpop.f32.mrf.mxu0  ;;  %v10808_v40 = vpop.f32.mrf.mxu2 }
 0x4ec   :  { %v10810_v28 = vadd.f32 %v4255_v11, %v4191_v16  ;;  %4387 = vmatmul.f32.gmra.mxu1 %v12106_v32  ;;  %v12121_v32 = vld [vmem:[#allocation68_spill] sm:$0xff] }
 0x4ee   :  { %4452 = vmatmul.f32.gmra.mxu3 %v12116_v0  ;;  %4517 = vmatmul.f32.gmra.mxu0 %v12117_v25  ;;  %v4773_v0 = vmul.f32 %v10727_v27, %v10727_v27 }
 0x4f0   :  { %5816 = vmatmul.msk.f32.gmra.mxu2 %vm4020_vm14, %v12118_v45 }
 0x4f1   :  { %v4193_v8 = vpop.f32.mrf.mxu3  ;;  %v4131_v62 = vpop.f32.mrf.mxu1 }
 0x4f2   :  { %v4194_v60 = vadd.f32 %v4193_v8, %v4128_v58 }
 0x4f3   :  { %v4261_v17 = vpop.f32.mrf.mxu0  ;;  %v10817_v51 = vpop.f32.mrf.mxu2 }
 0x4f4   :  { %v10819_v4 = vadd.f32 %v4258_v15, %v4194_v60  ;;  %4390 = vmatmul.f32.gmra.mxu1 %v12119_v42 }
 0x4f6   :  { %4455 = vmatmul.f32.gmra.mxu3 %v12120_v20  ;;  %4520 = vmatmul.f32.gmra.mxu0 %v12121_v32  ;;  %v4775_v32 = vmul.f32 %v10734_v23, %v10734_v23 }
 0x4f9   :  { %v4196_v54 = vpop.f32.mrf.mxu3  ;;  %v4346_v5 = vpop.f32.mrf.mxu1 }
 0x4fa   :  { %v4197_v34 = vadd.f32 %v4196_v54, %v4131_v62 }
 0x4fb   :  { %v4476_v41 = vpop.f32.mrf.mxu0  ;;  %v4541_v9 = vpop.f32.mrf.mxu2 }
 0x4fc   :  { %v10826_v36 = vadd.f32 %v4261_v17, %v4197_v34  ;;  %4653 = vmatmul.f32.vlgmr.msrb.gmra.mxu1 %v10706_v3 }
 0x4fe   :  { %4863 = vmatmul.f32.vlgmr.msrb.gmra.mxu0 %v4767_v46 }
 0x501   :  { %v4411_v52 = vpop.f32.mrf.mxu3  ;;  %v4349_v10 = vpop.f32.mrf.mxu1 }
 0x502   :  { %v4412_v21 = vadd.f32 %v4411_v52, %v4346_v5 }
 0x503   :  { %v4479_v26 = vpop.f32.mrf.mxu0  ;;  %v4544_v47 = vpop.f32.mrf.mxu2 }
 0x504   :  { %v4477_v7 = vadd.f32 %v4476_v41, %v4412_v21  ;;  %4656 = vmatmul.f32.gmra.mxu1 %v10713_v44 }
 0x506   :  { %v10832_v49 = vadd.f32 %v4541_v9, %v4477_v7  ;;  %4866 = vmatmul.f32.gmra.mxu0 %v4769_v50 }
 0x508   :  { %v4768_v61 = vmul.f32 %v10832_v49, %v10832_v49  ;;  %5818 = vmatmul.msk.f32.vlgmr.msrb.gmra.mxu3 %vm279_vm1, %v10832_v49 }
 0x509   :  { %v4414_v55 = vpop.f32.mrf.mxu3  ;;  %v4352_v57 = vpop.f32.mrf.mxu1 }
 0x50a   :  { %v4415_v22 = vadd.f32 %v4414_v55, %v4349_v10  ;;  %5835 = vmatmul.msk.f32.vlgmr.msrb.gmra.mxu2 %vm279_vm1, %v4768_v61  ;;  %v4777_v10 = vmul.f32 %v10741_v6, %v10741_v6 }
 0x50b   :  { %v4482_v39 = vpop.f32.mrf.mxu0  ;;  %v4547_v14 = vpop.f32.mrf.mxu2 }
 0x50c   :  { %v4480_v24 = vadd.f32 %v4479_v26, %v4415_v22  ;;  %4659 = vmatmul.f32.gmra.mxu1 %v10720_v30 }
 0x50e   :  { %v10842_v11 = vadd.f32 %v4544_v47, %v4480_v24  ;;  %4869 = vmatmul.f32.gmra.mxu0 %v4771_v1 }
 0x510   :  { %5819 = vmatmul.msk.f32.gmra.mxu3 %vm279_vm1, %v10842_v11  ;;  %v4770_v38 = vmul.f32 %v10842_v11, %v10842_v11 }
 0x511   :  { %v4417_v63 = vpop.f32.mrf.mxu3  ;;  %v4355_v33 = vpop.f32.mrf.mxu1 }
 0x512   :  { %v4418_v2 = vadd.f32 %v4417_v63, %v4352_v57  ;;  %5836 = vmatmul.msk.f32.gmra.mxu2 %vm279_vm1, %v4770_v38 }
 0x513   :  { %v4485_v16 = vpop.f32.mrf.mxu0  ;;  %v4550_v58 = vpop.f32.mrf.mxu2 }
 0x514   :  { %v4483_v15 = vadd.f32 %v4482_v39, %v4418_v2  ;;  %4662 = vmatmul.f32.gmra.mxu1 %v10727_v27  ;;  %v4779_v39 = vmul.f32 %v10748_v37, %v10748_v37 }
 0x516   :  { %v10852_v25 = vadd.f32 %v4547_v14, %v4483_v15  ;;  %4872 = vmatmul.f32.gmra.mxu0 %v4773_v0  ;;  %v10896_v0 = vadd.f32 %v10754_v56, %v10765_v59  ;;  %v10910_v59 = vadd.f32 %v10763_v19, %v10774_v48  ;;  %v10924_v48 = vadd.f32 %v10772_v12, %v10783_v18 }
 0x517   :  { %v10938_v18 = vadd.f32 %v10781_v35, %v10792_v43  ;;  %v10952_v43 = vadd.f32 %v10790_v29, %v10801_v53 }
 0x518   :  { %5820 = vmatmul.msk.f32.gmra.mxu3 %vm279_vm1, %v10852_v25  ;;  %v4772_v45 = vmul.f32 %v10852_v25, %v10852_v25 }
 0x519   :  { %v4420_v8 = vpop.f32.mrf.mxu3  ;;  %v4358_v62 = vpop.f32.mrf.mxu1  ;;  %12123 = vst [vmem:[#allocation92_spill] sm:$0xff] %v10952_v43 }
 0x51a   :  { %v4421_v60 = vadd.f32 %v4420_v8, %v4355_v33  ;;  %5837 = vmatmul.msk.f32.gmra.mxu2 %vm279_vm1, %v4772_v45 }
 0x51b   :  { %v4488_v17 = vpop.f32.mrf.mxu0  ;;  %v4553_v42 = vpop.f32.mrf.mxu2 }
 0x51c   :  { %v4486_v20 = vadd.f32 %v4485_v16, %v4421_v60  ;;  %4665 = vmatmul.f32.gmra.mxu1 %v10734_v23 }
 0x51e   :  { %v10862_v54 = vadd.f32 %v4550_v58, %v4486_v20  ;;  %4875 = vmatmul.f32.gmra.mxu0 %v4775_v32  ;;  %v4781_v58 = vmul.f32 %v10757_v13, %v10757_v13  ;;  %v4783_v32 = vmul.f32 %v10896_v0, %v10896_v0 }
 0x520   :  { %5821 = vmatmul.msk.f32.gmra.mxu3 %vm279_vm1, %v10862_v54  ;;  %v4774_v34 = vmul.f32 %v10862_v54, %v10862_v54 }
 0x521   :  { %v4423_v5 = vpop.f32.mrf.mxu3  ;;  %v4361_v9 = vpop.f32.mrf.mxu1 }
 0x522   :  { %v4424_v41 = vadd.f32 %v4423_v5, %v4358_v62  ;;  %5838 = vmatmul.msk.f32.gmra.mxu2 %vm279_vm1, %v4774_v34 }
 0x523   :  { %v4491_v46 = vpop.f32.mrf.mxu0  ;;  %v4556_v52 = vpop.f32.mrf.mxu2 }
 0x524   :  { %v4489_v21 = vadd.f32 %v4488_v17, %v4424_v41  ;;  %4668 = vmatmul.f32.gmra.mxu1 %v10741_v6 }
 0x526   :  { %v10872_v26 = vadd.f32 %v4553_v42, %v4489_v21  ;;  %4878 = vmatmul.f32.gmra.mxu0 %v4777_v10  ;;  %v4785_v10 = vmul.f32 %v10910_v59, %v10910_v59 }
 0x528   :  { %5822 = vmatmul.msk.f32.gmra.mxu3 %vm279_vm1, %v10872_v26  ;;  %v4776_v47 = vmul.f32 %v10872_v26, %v10872_v26 }
 0x529   :  { %v4426_v7 = vpop.f32.mrf.mxu3  ;;  %v4364_v61 = vpop.f32.mrf.mxu1 }
 0x52a   :  { %v4427_v50 = vadd.f32 %v4426_v7, %v4361_v9  ;;  %5839 = vmatmul.msk.f32.gmra.mxu2 %vm279_vm1, %v4776_v47 }
 0x52b   :  { %v4494_v55 = vpop.f32.mrf.mxu0  ;;  %v4559_v22 = vpop.f32.mrf.mxu2 }
 0x52c   :  { %v4492_v57 = vadd.f32 %v4491_v46, %v4427_v50  ;;  %4671 = vmatmul.f32.gmra.mxu1 %v10748_v37 }
 0x52e   :  { %v10882_v14 = vadd.f32 %v4556_v52, %v4492_v57  ;;  %4881 = vmatmul.f32.gmra.mxu0 %v4779_v39  ;;  %v4787_v39 = vmul.f32 %v10924_v48, %v10924_v48 }
 0x530   :  { %5823 = vmatmul.msk.f32.gmra.mxu3 %vm279_vm1, %v10882_v14  ;;  %v4778_v24 = vmul.f32 %v10882_v14, %v10882_v14 }
 0x531   :  { %v4429_v1 = vpop.f32.mrf.mxu3  ;;  %v4367_v63 = vpop.f32.mrf.mxu1 }
 0x532   :  { %v4430_v38 = vadd.f32 %v4429_v1, %v4364_v61  ;;  %5840 = vmatmul.msk.f32.gmra.mxu2 %vm279_vm1, %v4778_v24 }
 0x533   :  { %v4497_v2 = vpop.f32.mrf.mxu0  ;;  %v4562_v33 = vpop.f32.mrf.mxu2 }
 0x534   :  { %v4495_v16 = vadd.f32 %v4494_v55, %v4430_v38  ;;  %4674 = vmatmul.f32.gmra.mxu1 %v10757_v13 }
 0x536   :  { %v10892_v15 = vadd.f32 %v4559_v22, %v4495_v16  ;;  %4884 = vmatmul.f32.gmra.mxu0 %v4781_v58  ;;  %v4789_v58 = vmul.f32 %v10938_v18, %v10938_v18 }
 0x538   :  { %5824 = vmatmul.msk.f32.gmra.mxu3 %vm279_vm1, %v10892_v15  ;;  %v4780_v45 = vmul.f32 %v10892_v15, %v10892_v15 }
 0x539   :  { %v4432_v8 = vpop.f32.mrf.mxu3  ;;  %v4370_v62 = vpop.f32.mrf.mxu1 }
 0x53a   :  { %v4433_v60 = vadd.f32 %v4432_v8, %v4367_v63  ;;  %5841 = vmatmul.msk.f32.gmra.mxu2 %vm279_vm1, %v4780_v45 }
 0x53b   :  { %v4500_v17 = vpop.f32.mrf.mxu0  ;;  %v4565_v42 = vpop.f32.mrf.mxu2 }
 0x53c   :  { %v4498_v20 = vadd.f32 %v4497_v2, %v4433_v60  ;;  %4677 = vmatmul.f32.gmra.mxu1 %v10896_v0 }
 0x53e   :  { %v10906_v56 = vadd.f32 %v4562_v33, %v4498_v20  ;;  %4887 = vmatmul.f32.gmra.mxu0 %v4783_v32  ;;  %v4791_v20 = vmul.f32 %v10952_v43, %v10952_v43  ;;  %v10966_v32 = vadd.f32 %v10799_v31, %v10810_v28 }
 0x540   :  { %5825 = vmatmul.msk.f32.gmra.mxu3 %vm279_vm1, %v10906_v56  ;;  %v4782_v34 = vmul.f32 %v10906_v56, %v10906_v56  ;;  %12124 = vst [vmem:[#allocation94_spill] sm:$0xff] %v10966_v32 }
 0x541   :  { %v4435_v5 = vpop.f32.mrf.mxu3  ;;  %v4373_v9 = vpop.f32.mrf.mxu1 }
 0x542   :  { %v4436_v41 = vadd.f32 %v4435_v5, %v4370_v62  ;;  %5842 = vmatmul.msk.f32.gmra.mxu2 %vm279_vm1, %v4782_v34 }
 0x543   :  { %v4503_v46 = vpop.f32.mrf.mxu0  ;;  %v4568_v52 = vpop.f32.mrf.mxu2 }
 0x544   :  { %v4501_v21 = vadd.f32 %v4500_v17, %v4436_v41  ;;  %4680 = vmatmul.f32.gmra.mxu1 %v10910_v59 }
 0x546   :  { %v10920_v19 = vadd.f32 %v4565_v42, %v4501_v21  ;;  %4890 = vmatmul.f32.gmra.mxu0 %v4785_v10  ;;  %v4793_v21 = vmul.f32 %v10966_v32, %v10966_v32  ;;  %v10980_v10 = vadd.f32 %v10808_v40, %v10819_v4  ;;  %v10994_v4 = vadd.f32 %v10817_v51, %v10826_v36 }
 0x548   :  { %5826 = vmatmul.msk.f32.gmra.mxu3 %vm279_vm1, %v10920_v19  ;;  %v4784_v47 = vmul.f32 %v10920_v19, %v10920_v19  ;;  %12126 = vst [vmem:[#allocation86_spill] sm:$0xff] %v10980_v10 }
 0x549   :  { %v4438_v7 = vpop.f32.mrf.mxu3  ;;  %v4376_v61 = vpop.f32.mrf.mxu1  ;;  %12128 = vst [vmem:[#allocation84_spill] sm:$0xff] %v10994_v4 }
 0x54a   :  { %v4439_v50 = vadd.f32 %v4438_v7, %v4373_v9  ;;  %5843 = vmatmul.msk.f32.gmra.mxu2 %vm279_vm1, %v4784_v47 }
 0x54b   :  { %v4506_v55 = vpop.f32.mrf.mxu0  ;;  %v4571_v22 = vpop.f32.mrf.mxu2 }
 0x54c   :  { %v4504_v57 = vadd.f32 %v4503_v46, %v4439_v50  ;;  %4683 = vmatmul.f32.gmra.mxu1 %v10924_v48 }
 0x54e   :  { %v10934_v12 = vadd.f32 %v4568_v52, %v4504_v57  ;;  %4893 = vmatmul.f32.gmra.mxu0 %v4787_v39  ;;  %v4795_v57 = vmul.f32 %v10980_v10, %v10980_v10 }
 0x550   :  { %12122 = vst [vmem:[#allocation96_spill] sm:$0xff] %v10934_v12  ;;  %5827 = vmatmul.msk.f32.gmra.mxu3 %vm279_vm1, %v10934_v12  ;;  %v4786_v24 = vmul.f32 %v10934_v12, %v10934_v12 }
 0x551   :  { %v4441_v1 = vpop.f32.mrf.mxu3  ;;  %v4379_v63 = vpop.f32.mrf.mxu1 }
 0x552   :  { %v4442_v38 = vadd.f32 %v4441_v1, %v4376_v61  ;;  %5844 = vmatmul.msk.f32.gmra.mxu2 %vm279_vm1, %v4786_v24 }
 0x553   :  { %v4509_v2 = vpop.f32.mrf.mxu0  ;;  %v4574_v33 = vpop.f32.mrf.mxu2 }
 0x554   :  { %v4507_v16 = vadd.f32 %v4506_v55, %v4442_v38  ;;  %4686 = vmatmul.f32.gmra.mxu1 %v10938_v18 }
 0x556   :  { %v10948_v35 = vadd.f32 %v4571_v22, %v4507_v16  ;;  %4896 = vmatmul.f32.gmra.mxu0 %v4789_v58  ;;  %v4797_v16 = vmul.f32 %v10994_v4, %v10994_v4 }
 0x558   :  { %5828 = vmatmul.msk.f32.gmra.mxu3 %vm279_vm1, %v10948_v35  ;;  %v4788_v45 = vmul.f32 %v10948_v35, %v10948_v35 }
 0x559   :  { %v4444_v8 = vpop.f32.mrf.mxu3  ;;  %v4382_v62 = vpop.f32.mrf.mxu1 }
 0x55a   :  { %v4445_v60 = vadd.f32 %v4444_v8, %v4379_v63  ;;  %5845 = vmatmul.msk.f32.gmra.mxu2 %vm279_vm1, %v4788_v45 }
 0x55b   :  { %v4512_v17 = vpop.f32.mrf.mxu0  ;;  %v4577_v29 = vpop.f32.mrf.mxu2 }
 0x55c   :  { %v4510_v42 = vadd.f32 %v4509_v2, %v4445_v60  ;;  %4689 = vmatmul.f32.gmra.mxu1 %v10952_v43 }
 0x55e   :  { %v10962_v53 = vadd.f32 %v4574_v33, %v4510_v42  ;;  %4899 = vmatmul.f32.gmra.mxu0 %v4791_v20 }
 0x560   :  { %5829 = vmatmul.msk.f32.gmra.mxu3 %vm279_vm1, %v10962_v53  ;;  %v4790_v34 = vmul.f32 %v10962_v53, %v10962_v53 }
 0x561   :  { %v4447_v5 = vpop.f32.mrf.mxu3  ;;  %v4385_v9 = vpop.f32.mrf.mxu1 }
 0x562   :  { %v4448_v41 = vadd.f32 %v4447_v5, %v4382_v62  ;;  %5846 = vmatmul.msk.f32.gmra.mxu2 %vm279_vm1, %v4790_v34 }
 0x563   :  { %v4515_v46 = vpop.f32.mrf.mxu0  ;;  %v4580_v28 = vpop.f32.mrf.mxu2 }
 0x564   :  { %v4513_v52 = vadd.f32 %v4512_v17, %v4448_v41  ;;  %4692 = vmatmul.f32.gmra.mxu1 %v10966_v32 }
 0x566   :  { %v10976_v31 = vadd.f32 %v4577_v29, %v4513_v52  ;;  %4902 = vmatmul.f32.gmra.mxu0 %v4793_v21 }
 0x568   :  { %12125 = vst [vmem:[#allocation90_spill] sm:$0xff] %v10976_v31  ;;  %5830 = vmatmul.msk.f32.gmra.mxu3 %vm279_vm1, %v10976_v31  ;;  %v4792_v47 = vmul.f32 %v10976_v31, %v10976_v31 }
 0x569   :  { %v4450_v7 = vpop.f32.mrf.mxu3  ;;  %v4388_v61 = vpop.f32.mrf.mxu1 }
 0x56a   :  { %v4451_v50 = vadd.f32 %v4450_v7, %v4385_v9  ;;  %5847 = vmatmul.msk.f32.gmra.mxu2 %vm279_vm1, %v4792_v47 }
 0x56b   :  { %v4518_v55 = vpop.f32.mrf.mxu0  ;;  %v4583_v1 = vpop.f32.mrf.mxu2 }
 0x56c   :  { %v4516_v22 = vadd.f32 %v4515_v46, %v4451_v50  ;;  %4695 = vmatmul.f32.gmra.mxu1 %v10980_v10 }
 0x56e   :  { %v10990_v40 = vadd.f32 %v4580_v28, %v4516_v22  ;;  %4905 = vmatmul.f32.gmra.mxu0 %v4795_v57 }
 0x570   :  { %12127 = vst [vmem:[#allocation88_spill] sm:$0xff] %v10990_v40  ;;  %5831 = vmatmul.msk.f32.gmra.mxu3 %vm279_vm1, %v10990_v40  ;;  %v4794_v39 = vmul.f32 %v10990_v40, %v10990_v40 }
 0x571   :  { %v4453_v24 = vpop.f32.mrf.mxu3  ;;  %v4391_v63 = vpop.f32.mrf.mxu1 }
 0x572   :  { %v4454_v38 = vadd.f32 %v4453_v24, %v4388_v61  ;;  %5848 = vmatmul.msk.f32.gmra.mxu2 %vm279_vm1, %v4794_v39 }
 0x573   :  { %v4521_v2 = vpop.f32.mrf.mxu0  ;;  %v4586_v62 = vpop.f32.mrf.mxu2 }
 0x574   :  { %v4519_v33 = vadd.f32 %v4518_v55, %v4454_v38  ;;  %4698 = vmatmul.f32.gmra.mxu1 %v10994_v4 }
 0x576   :  { %v11004_v51 = vadd.f32 %v4583_v1, %v4519_v33  ;;  %4908 = vmatmul.f32.gmra.mxu0 %v4797_v16 }
 0x578   :  { %12129 = vst [vmem:[#allocation80_spill] sm:$0xff] %v11004_v51  ;;  %5832 = vmatmul.msk.f32.gmra.mxu3 %vm279_vm1, %v11004_v51  ;;  %v4796_v36 = vmul.f32 %v11004_v51, %v11004_v51 }
 0x579   :  { %v4456_v58 = vpop.f32.mrf.mxu3  ;;  %v4654_v8 = vpop.f32.mrf.mxu1 }
 0x57a   :  { %v4457_v45 = vadd.f32 %v4456_v58, %v4391_v63  ;;  %5849 = vmatmul.msk.f32.gmra.mxu2 %vm279_vm1, %v4796_v36 }
 0x57b   :  { %v4864_v60 = vpop.f32.mrf.mxu0 }
 0x57c   :  { %v4522_v17 = vadd.f32 %v4521_v2, %v4457_v45 }
 0x57e   :  { %v11011_v42 = vadd.f32 %v4586_v62, %v4522_v17 }
 0x580   :  { %12130 = vst [vmem:[#allocation113_spill] sm:$0xff] %v11011_v42  ;;  %5833 = vmatmul.msk.f32.gmra.mxu3 %vm279_vm1, %v11011_v42  ;;  %v4798_v20 = vmul.f32 %v11011_v42, %v11011_v42 }
 0x581   :  { %v4657_v29 = vpop.f32.mrf.mxu1 }
 0x582   :  { %5850 = vmatmul.msk.f32.gmra.mxu2 %vm279_vm1, %v4798_v20 }
 0x583   :  { %v4867_v34 = vpop.f32.mrf.mxu0 }
 0x589   :  { %v4660_v5 = vpop.f32.mrf.mxu1 }
 0x58b   :  { %v4719_v41 = vpop.f32.mrf.mxu3  ;;  %v4870_v9 = vpop.f32.mrf.mxu0 }
 0x58c   :  { %v4720_v46 = vadd.f32 %v4719_v41, %v4654_v8 }
 0x58d   :  { %v4929_v52 = vpop.f32.mrf.mxu2 }
 0x58e   :  { %v11018_v21 = vmul.f32 0.0051020407, %v4720_v46  ;;  %v4930_v28 = vadd.f32 %v4929_v52, %v4864_v60 }
 0x590   :  { %v5009_v47 = vmul.f32 %v11018_v21, %v11018_v21  ;;  %v4993_v7 = vmul.f32 0.0051020407, %v4930_v28 }
 0x591   :  { %v4663_v61 = vpop.f32.mrf.mxu1 }
 0x592   :  { %v5025_v50 = vsub.f32 %v4993_v7, %v5009_v47 }
 0x593   :  { %v4722_v55 = vpop.f32.mrf.mxu3  ;;  %v4873_v22 = vpop.f32.mrf.mxu0 }
 0x594   :  { %v5041_v57 = vmax.f32 %v5025_v50, 0.0  ;;  %v4723_v39 = vadd.f32 %v4722_v55, %v4657_v29 }
 0x595   :  { %v4932_v24 = vpop.f32.mrf.mxu2 }
 0x596   :  { %v5073_v1 = vadd.f32 1e-05, %v5041_v57  ;;  %v11022_v38 = vmul.f32 0.0051020407, %v4723_v39  ;;  %v4933_v63 = vadd.f32 %v4932_v24, %v4867_v34 }
 0x598   :  { %6238 = vrsqrt.f32 %v5073_v1  ;;  %v5010_v2 = vmul.f32 %v11022_v38, %v11022_v38  ;;  %v4994_v33 = vmul.f32 0.0051020407, %v4933_v63  ;;  %vm5095_vm15 = vweird.f32 %v5073_v1 }
 0x599   :  { %v4666_v36 = vpop.f32.mrf.mxu1 }
 0x59a   :  { %v5026_v16 = vsub.f32 %v4994_v33, %v5010_v2 }
 0x59b   :  { %v4725_v58 = vpop.f32.mrf.mxu3  ;;  %v4876_v45 = vpop.f32.mrf.mxu0 }
 0x59c   :  { %v5042_v8 = vmax.f32 %v5026_v16, 0.0  ;;  %v4726_v60 = vadd.f32 %v4725_v58, %v4660_v5 }
 0x59d   :  { %v4935_v62 = vpop.f32.mrf.mxu2 }
 0x59e   :  { %v6239_v17 = vpop.eup %6238  ;;  %v5074_v20 = vadd.f32 1e-05, %v5042_v8  ;;  %v11026_v29 = vmul.f32 0.0051020407, %v4726_v60  ;;  %v4936_v41 = vadd.f32 %v4935_v62, %v4870_v9  ;;  %v11039_v8 = vld [vmem:[%s11494_s3] sm:$0xff] }
 0x59f   :  { %v5090_v46 = vmul.f32 %v6239_v17, %v5073_v1  ;;  %vm5096_vm0 = vweird.f32 %v6239_v17 }
 0x5a0   :  { %6240 = vrsqrt.f32 %v5074_v20  ;;  %v5011_v34 = vmul.f32 %v11026_v29, %v11026_v29  ;;  %v4995_v52 = vmul.f32 0.0051020407, %v4936_v41  ;;  %vm5097_vm2 = vmor %vm5095_vm15, %vm5096_vm0  ;;  %vm5105_vm4 = vweird.f32 %v5074_v20 }
 0x5a1   :  { %v5091_v28 = vmul.f32 %v6239_v17, %v5090_v46  ;;  %v4669_v7 = vpop.f32.mrf.mxu1 }
 0x5a2   :  { %v5027_v47 = vsub.f32 %v4995_v52, %v5011_v34 }
 0x5a3   :  { %v4728_v50 = vpop.f32.mrf.mxu3  ;;  %v11030_v55 = vpop.f32.mrf.mxu0  ;;  %v5092_v57 = vmul.f32 0.5, %v5091_v28 }
 0x5a4   :  { %v5043_v5 = vmax.f32 %v5027_v47, 0.0  ;;  %v4729_v39 = vadd.f32 %v4728_v50, %v4663_v61 }
 0x5a5   :  { %v4938_v24 = vpop.f32.mrf.mxu2  ;;  %v5093_v63 = vsub.f32 1.5, %v5092_v57 }
 0x5a6   :  { %v6241_v2 = vpop.eup %6240  ;;  %v11032_v9 = vadd.f32 1e-05, %v5043_v5  ;;  %v11034_v33 = vmul.f32 0.0051020407, %v4729_v39  ;;  %v4939_v16 = vadd.f32 %v4938_v24, %v4873_v22 }
 0x5a7   :  { %v5100_v58 = vmul.f32 %v6241_v2, %v5074_v20  ;;  %v5094_v60 = vmul.f32 %v6239_v17, %v5093_v63  ;;  %vm5106_vm3 = vweird.f32 %v6241_v2 }
 0x5a8   :  { %6242 = vrsqrt.f32 %v11032_v9  ;;  %v5012_v61 = vmul.f32 %v11034_v33, %v11034_v33  ;;  %v4996_v62 = vmul.f32 0.0051020407, %v4939_v16  ;;  %vm5107_vm5 = vmor %vm5105_vm4, %vm5106_vm3  ;;  %vm5115_vm7 = vweird.f32 %v11032_v9 }
 0x5a9   :  { %v5098_v41 = vsel %vm5097_vm2, %v6239_v17, %v5094_v60  ;;  %v5101_v46 = vmul.f32 %v6241_v2, %v5100_v58  ;;  %v4672_v52 = vpop.f32.mrf.mxu1 }
 0x5aa   :  { %v5028_v34 = vsub.f32 %v4996_v62, %v5012_v61  ;;  %v5249_v22 = vmul.f32 %v5098_v41, %v11039_v8 }
 0x5ab   :  { %v4731_v28 = vpop.f32.mrf.mxu3  ;;  %v11045_v47 = vpop.f32.mrf.mxu0  ;;  %v5102_v50 = vmul.f32 0.5, %v5101_v46 }
 0x5ac   :  { %v5044_v57 = vmax.f32 %v5028_v34, 0.0  ;;  %v4732_v5 = vadd.f32 %v4731_v28, %v4666_v36  ;;  %5363 = vperm.xlu1 %6232, %v5249_v22   ;;  %v5265_v1 = vmul.f32 %v5249_v22, %v11018_v21  ;;  %v11057_v36 = vld [vmem:[%s11494_s3 + $0x8] sm:$0xff] }
 0x5ad   :  { %v4941_v39 = vpop.f32.mrf.mxu2  ;;  %v5103_v24 = vsub.f32 1.5, %v5102_v50 }
 0x5ae   :  { %v6243_v63 = vpop.eup %6242  ;;  %v11048_v16 = vadd.f32 1e-05, %v5044_v57  ;;  %v11050_v17 = vmul.f32 0.0051020407, %v4732_v5  ;;  %v4942_v58 = vadd.f32 %v4941_v39, %v4876_v45  ;;  %5297 = vrot.lane.b32.xlu0 %v5265_v1, %s6274_s29 }
 0x5af   :  { %v5110_v60 = vmul.f32 %v6243_v63, %v11032_v9  ;;  %v5104_v61 = vmul.f32 %v6241_v2, %v5103_v24  ;;  %vm5116_vm6 = vweird.f32 %v6243_v63 }
 0x5b0   :  { %6244 = vrsqrt.f32 %v11048_v16  ;;  %v5013_v21 = vmul.f32 %v11050_v17, %v11050_v17  ;;  %v4997_v62 = vmul.f32 0.0051020407, %v4942_v58  ;;  %vm5117_vm8 = vmor %vm5115_vm7, %vm5116_vm6  ;;  %vm5125_vm10 = vweird.f32 %v11048_v16 }
 0x5b1   :  { %v5111_v41 = vmul.f32 %v6243_v63, %v5110_v60  ;;  %v5108_v45 = vsel %vm5107_vm5, %v6241_v2, %v5104_v61  ;;  %v4675_v28 = vpop.f32.mrf.mxu1 }
 0x5b2   :  { %v5029_v46 = vsub.f32 %v4997_v62, %v5013_v21  ;;  %v5250_v34 = vmul.f32 %v5108_v45, %v11057_v36 }
 0x5b3   :  { %v5112_v22 = vmul.f32 0.5, %v5111_v41  ;;  %v4734_v50 = vpop.f32.mrf.mxu3  ;;  %v4885_v1 = vpop.f32.mrf.mxu0 }
 0x5b4   :  { %v5045_v57 = vmax.f32 %v5029_v46, 0.0  ;;  %v4735_v5 = vadd.f32 %v4734_v50, %v4669_v7  ;;  %5368 = vperm.xlu2 %6233, %v5250_v34   ;;  %v5266_v20 = vmul.f32 %v5250_v34, %v11022_v38  ;;  %v11074_v7 = vld [vmem:[%s11494_s3 + $0x10] sm:$0xff] }
 0x5b5   :  { %v4944_v39 = vpop.f32.mrf.mxu2  ;;  %v5113_v24 = vsub.f32 1.5, %v5112_v22 }
 0x5b6   :  { %v6245_v42 = vpop.eup %6244  ;;  %v11064_v58 = vadd.f32 1e-05, %v5045_v57  ;;  %v11066_v60 = vmul.f32 0.0051020407, %v4735_v5  ;;  %v4945_v2 = vadd.f32 %v4944_v39, %v11030_v55  ;;  %5299 = vrot.lane.b32.xlu0 %v5266_v20, %s6274_s29 }
 0x5b7   :  { %v5120_v61 = vmul.f32 %v6245_v42, %v11048_v16  ;;  %v5114_v38 = vmul.f32 %v6243_v63, %v5113_v24  ;;  %vm5126_vm9 = vweird.f32 %v6245_v42 }
 0x5b8   :  { %6246 = vrsqrt.f32 %v11064_v58  ;;  %v5014_v21 = vmul.f32 %v11066_v60, %v11066_v60  ;;  %v4998_v62 = vmul.f32 0.0051020407, %v4945_v2  ;;  %vm5127_vm11 = vmor %vm5125_vm10, %vm5126_vm9  ;;  %vm5135_vm13 = vweird.f32 %v11064_v58 }
 0x5b9   :  { %v5121_v55 = vmul.f32 %v6245_v42, %v5120_v61  ;;  %v5118_v41 = vsel %vm5117_vm8, %v6243_v63, %v5114_v38  ;;  %v4678_v20 = vpop.f32.mrf.mxu1 }
 0x5ba   :  { %v5030_v45 = vsub.f32 %v4998_v62, %v5014_v21  ;;  %v5251_v46 = vmul.f32 %v5118_v41, %v11074_v7 }
 0x5bb   :  { %v5122_v34 = vmul.f32 0.5, %v5121_v55  ;;  %v4737_v22 = vpop.f32.mrf.mxu3  ;;  %v4888_v38 = vpop.f32.mrf.mxu0 }
 0x5bc   :  { %v5046_v50 = vmax.f32 %v5030_v45, 0.0  ;;  %v4738_v57 = vadd.f32 %v4737_v22, %v4672_v52  ;;  %v5267_v5 = vmul.f32 %v5251_v46, %v11026_v29 }
 0x5bd   :  { %v4947_v9 = vpop.f32.mrf.mxu2  ;;  %v5123_v39 = vsub.f32 1.5, %v5122_v34 }
 0x5be   :  { %v6247_v24 = vpop.eup %6246  ;;  %v11082_v4 = vadd.f32 1e-05, %v5046_v50  ;;  %v11084_v2 = vmul.f32 0.0051020407, %v4738_v57  ;;  %v4948_v63 = vadd.f32 %v4947_v9, %v11045_v47  ;;  %5301 = vrot.lane.b32.xlu1 %v5267_v5, %s6274_s29  ;;  %5373 = vperm.xlu0 %6234, %v5251_v46   ;;  %v11096_v47 = vld [vmem:[%s11494_s3 + $0x18] sm:$0xff] }
 0x5bf   :  { %v5130_v61 = vmul.f32 %v6247_v24, %v11064_v58  ;;  %v5124_v52 = vmul.f32 %v6245_v42, %v5123_v39  ;;  %vm5136_vm12 = vweird.f32 %v6247_v24 }
 0x5c0   :  { %6248 = vrsqrt.f32 %v11082_v4  ;;  %v5015_v29 = vmul.f32 %v11084_v2, %v11084_v2  ;;  %v4999_v21 = vmul.f32 0.0051020407, %v4948_v63  ;;  %vm5137_vm14 = vmor %vm5135_vm13, %vm5136_vm12  ;;  %vm5145_vm15 = vweird.f32 %v11082_v4 }
 0x5c1   :  { %v5131_v62 = vmul.f32 %v6247_v24, %v5130_v61  ;;  %v5128_v55 = vsel %vm5127_vm11, %v6245_v42, %v5124_v52  ;;  %v4681_v42 = vpop.f32.mrf.mxu1  ;;  %v11107_v52 = vld [vmem:[%s11494_s3 + $0x20] sm:$0xff] }
 0x5c2   :  { %v5031_v41 = vsub.f32 %v4999_v21, %v5015_v29  ;;  %v5252_v16 = vmul.f32 %v5128_v55, %v11096_v47 }
 0x5c3   :  { %v5132_v45 = vmul.f32 0.5, %v5131_v62  ;;  %v4740_v46 = vpop.f32.mrf.mxu3  ;;  %v4891_v62 = vpop.f32.mrf.mxu0 }
 0x5c4   :  { %v5047_v34 = vmax.f32 %v5031_v41, 0.0  ;;  %v4741_v22 = vadd.f32 %v4740_v46, %v4675_v28  ;;  %v5268_v58 = vmul.f32 %v5252_v16, %v11034_v33 }
 0x5c5   :  { %v4950_v50 = vpop.f32.mrf.mxu2  ;;  %v5133_v57 = vsub.f32 1.5, %v5132_v45 }
 0x5c6   :  { %v6249_v5 = vpop.eup %6248  ;;  %v11099_v9 = vadd.f32 1e-05, %v5047_v34  ;;  %v11101_v39 = vmul.f32 0.0051020407, %v4741_v22  ;;  %v4951_v63 = vadd.f32 %v4950_v50, %v4885_v1  ;;  %5378 = vperm.xlu1 %6232, %v5252_v16  }
 0x5c7   :  { %v5140_v61 = vmul.f32 %v6249_v5, %v11082_v4  ;;  %v5134_v28 = vmul.f32 %v6247_v24, %v5133_v57  ;;  %vm5146_vm0 = vweird.f32 %v6249_v5 }
 0x5c8   :  { %6250 = vrsqrt.f32 %v11099_v9  ;;  %v5016_v29 = vmul.f32 %v11101_v39, %v11101_v39  ;;  %v5000_v21 = vmul.f32 0.0051020407, %v4951_v63  ;;  %vm5147_vm2 = vmor %vm5145_vm15, %vm5146_vm0  ;;  %vm5155_vm4 = vweird.f32 %v11099_v9 }
 0x5c9   :  { %v5141_v1 = vmul.f32 %v6249_v5, %v5140_v61  ;;  %v5138_v55 = vsel %vm5137_vm14, %v6247_v24, %v5134_v28 }
 0x5ca   :  { %v5032_v41 = vsub.f32 %v5000_v21, %v5016_v29  ;;  %v5253_v45 = vmul.f32 %v5138_v55, %v11107_v52  ;;  %v4684_v29 = vpop.f32.mrf.mxu1 }
 0x5cb   :  { %v5142_v46 = vmul.f32 0.5, %v5141_v1  ;;  %v4743_v34 = vpop.f32.mrf.mxu3  ;;  %v4894_v4 = vpop.f32.mrf.mxu0 }
 0x5cc   :  { %v5048_v22 = vmax.f32 %v5032_v41, 0.0  ;;  %v4744_v50 = vadd.f32 %v4743_v34, %v4678_v20  ;;  %5383 = vperm.xlu2 %6233, %v5253_v45  }
 0x5cd   :  { %v4953_v57 = vpop.f32.mrf.mxu2  ;;  %v5143_v31 = vsub.f32 1.5, %v5142_v46 }
 0x5ce   :  { %v6251_v43 = vpop.eup %6250  ;;  %v11115_v51 = vadd.f32 1e-05, %v5048_v22  ;;  %v11117_v63 = vmul.f32 0.0051020407, %v4744_v50  ;;  %v4954_v61 = vadd.f32 %v4953_v57, %v4888_v38  ;;  %5303 = vrot.lane.b32.xlu1 %v5268_v58, %s6274_s29  ;;  %v11128_v38 = vld [vmem:[%s11494_s3 + $0x28] sm:$0xff] }
 0x5cf   :  { %v5150_v24 = vmul.f32 %v6251_v43, %v11099_v9  ;;  %v5144_v28 = vmul.f32 %v6249_v5, %v5143_v31  ;;  %v5269_v31 = vmul.f32 %v5253_v45, %v11050_v17  ;;  %vm5156_vm3 = vweird.f32 %v6251_v43 }
 0x5d0   :  { %6252 = vrsqrt.f32 %v11115_v51  ;;  %v5017_v33 = vmul.f32 %v11117_v63, %v11117_v63  ;;  %v5001_v20 = vmul.f32 0.0051020407, %v4954_v61  ;;  %vm5157_vm5 = vmor %vm5155_vm4, %vm5156_vm3  ;;  %vm5165_vm7 = vweird.f32 %v11115_v51 }
 0x5d1   :  { %v5151_v16 = vmul.f32 %v6251_v43, %v5150_v24  ;;  %v5148_v21 = vsel %vm5147_vm2, %v6249_v5, %v5144_v28 }
 0x5d2   :  { %v5033_v1 = vsub.f32 %v5001_v20, %v5017_v33  ;;  %v5254_v22 = vmul.f32 %v5148_v21, %v11128_v38 }
 0x5d3   :  { %v5152_v55 = vmul.f32 0.5, %v5151_v16  ;;  %v4746_v41 = vpop.f32.mrf.mxu3 }
 0x5d4   :  { %v5049_v46 = vmax.f32 %v5033_v1, 0.0  ;;  %v4747_v34 = vadd.f32 %v4746_v41, %v4681_v42  ;;  %5305 = vrot.lane.b32.xlu2 %v5269_v31, %s6274_s29  ;;  %v11141_v42 = vld [vmem:[%s11494_s3 + $0x30] sm:$0xff]  ;;  %v5270_v21 = vmul.f32 %v5254_v22, %v11066_v60 }
 0x5d5   :  { %v4956_v50 = vpop.f32.mrf.mxu2  ;;  %v5153_v58 = vsub.f32 1.5, %v5152_v55  ;;  %v4687_v55 = vpop.f32.mrf.mxu1 }
 0x5d6   :  { %v6253_v57 = vpop.eup %6252  ;;  %v11133_v61 = vadd.f32 1e-05, %v5049_v46  ;;  %v11135_v24 = vmul.f32 0.0051020407, %v4747_v34  ;;  %v4957_v5 = vadd.f32 %v4956_v50, %v4891_v62  ;;  %5388 = vperm.xlu1 %6232, %v5254_v22   ;;  %v4897_v50 = vpop.f32.mrf.mxu0 }
 0x5d7   :  { %v5160_v17 = vmul.f32 %v6253_v57, %v11115_v51  ;;  %v5154_v45 = vmul.f32 %v6251_v43, %v5153_v58  ;;  %vm5166_vm6 = vweird.f32 %v6253_v57 }
 0x5d8   :  { %6254 = vrsqrt.f32 %v11133_v61  ;;  %v5018_v28 = vmul.f32 %v11135_v24, %v11135_v24  ;;  %v5002_v33 = vmul.f32 0.0051020407, %v4957_v5  ;;  %vm5167_vm8 = vmor %vm5165_vm7, %vm5166_vm6  ;;  %vm5175_vm10 = vweird.f32 %v11133_v61 }
 0x5d9   :  { %v5161_v20 = vmul.f32 %v6253_v57, %v5160_v17  ;;  %v5158_v62 = vsel %vm5157_vm5, %v6251_v43, %v5154_v45 }
 0x5da   :  { %v5034_v16 = vsub.f32 %v5002_v33, %v5018_v28  ;;  %v5255_v1 = vmul.f32 %v5158_v62, %v11141_v42 }
 0x5db   :  { %v5162_v31 = vmul.f32 0.5, %v5161_v20  ;;  %v4749_v41 = vpop.f32.mrf.mxu3 }
 0x5dc   :  { %v5050_v46 = vmax.f32 %v5034_v16, 0.0  ;;  %v4750_v34 = vadd.f32 %v4749_v41, %v4684_v29  ;;  %5307 = vrot.lane.b32.xlu2 %v5270_v21, %s6274_s29  ;;  %v5271_v9 = vmul.f32 %v5255_v1, %v11084_v2  ;;  %v11160_v29 = vld [vmem:[%s11494_s3 + $0x38] sm:$0xff] }
 0x5dd   :  { %v4959_v58 = vpop.f32.mrf.mxu2  ;;  %v5163_v5 = vsub.f32 1.5, %v5162_v31  ;;  %v4690_v51 = vpop.f32.mrf.mxu1 }
 0x5de   :  { %v6255_v17 = vpop.eup %6254  ;;  %v11151_v43 = vadd.f32 1e-05, %v5050_v46  ;;  %v11153_v45 = vmul.f32 0.0051020407, %v4750_v34  ;;  %v4960_v60 = vadd.f32 %v4959_v58, %v4894_v4  ;;  %5309 = vrot.lane.b32.xlu0 %v5271_v9, %s6274_s29 }
 0x5df   :  { %v5170_v22 = vmul.f32 %v6255_v17, %v11133_v61  ;;  %v5164_v2 = vmul.f32 %v6253_v57, %v5163_v5  ;;  %vm5176_vm9 = vweird.f32 %v6255_v17 }
 0x5e0   :  { %6256 = vrsqrt.f32 %v11151_v43  ;;  %v5019_v28 = vmul.f32 %v11153_v45, %v11153_v45  ;;  %v5003_v33 = vmul.f32 0.0051020407, %v4960_v60  ;;  %vm5177_vm11 = vmor %vm5175_vm10, %vm5176_vm9  ;;  %vm5185_vm13 = vweird.f32 %v11151_v43 }
 0x5e1   :  { %v5171_v4 = vmul.f32 %v6255_v17, %v5170_v22  ;;  %v5168_v20 = vsel %vm5167_vm8, %v6253_v57, %v5164_v2  ;;  %v4900_v2 = vpop.f32.mrf.mxu0 }
 0x5e2   :  { %v5035_v62 = vsub.f32 %v5003_v33, %v5019_v28  ;;  %v5256_v16 = vmul.f32 %v5168_v20, %v11160_v29 }
 0x5e3   :  { %v5172_v21 = vmul.f32 0.5, %v5171_v4  ;;  %v4752_v31 = vpop.f32.mrf.mxu3 }
 0x5e4   :  { %v5051_v41 = vmax.f32 %v5035_v62, 0.0  ;;  %v4753_v46 = vadd.f32 %v4752_v31, %v4687_v55  ;;  %5393 = vperm.xlu2 %6233, %v5255_v1   ;;  %v5272_v34 = vmul.f32 %v5256_v16, %v11101_v39  ;;  %v11177_v39 = vld [vmem:[%s11494_s3 + $0x40] sm:$0xff] }
 0x5e5   :  { %v4962_v9 = vpop.f32.mrf.mxu2  ;;  %v5173_v58 = vsub.f32 1.5, %v5172_v21 }
 0x5e6   :  { %v6257_v5 = vpop.eup %6256  ;;  %v11168_v10 = vadd.f32 1e-05, %v5051_v41  ;;  %v11170_v60 = vmul.f32 0.0051020407, %v4753_v46  ;;  %v4963_v57 = vadd.f32 %v4962_v9, %v4897_v50  ;;  %5311 = vrot.lane.b32.xlu1 %v5272_v34, %s6274_s29  ;;  %5398 = vperm.xlu0 %6234, %v5256_v16  }
 0x5e7   :  { %v5180_v22 = vmul.f32 %v6257_v5, %v11151_v43  ;;  %v5174_v1 = vmul.f32 %v6255_v17, %v5173_v58  ;;  %vm5186_vm12 = vweird.f32 %v6257_v5 }
 0x5e8   :  { %6258 = vrsqrt.f32 %v11168_v10  ;;  %v5020_v55 = vmul.f32 %v11170_v60, %v11170_v60  ;;  %v5004_v50 = vmul.f32 0.0051020407, %v4963_v57  ;;  %vm5187_vm14 = vmor %vm5185_vm13, %vm5186_vm12  ;;  %vm5195_vm15 = vweird.f32 %v11168_v10 }
 0x5e9   :  { %v5181_v28 = vmul.f32 %v6257_v5, %v5180_v22  ;;  %v5178_v33 = vsel %vm5177_vm11, %v6255_v17, %v5174_v1  ;;  %v4693_v22 = vpop.f32.mrf.mxu1 }
 0x5ea   :  { %v5036_v4 = vsub.f32 %v5004_v50, %v5020_v55  ;;  %v5257_v20 = vmul.f32 %v5178_v33, %v11177_v39  ;;  %v4903_v50 = vpop.f32.mrf.mxu0 }
 0x5eb   :  { %v5182_v62 = vmul.f32 0.5, %v5181_v28  ;;  %v4755_v16 = vpop.f32.mrf.mxu3 }
 0x5ec   :  { %v5052_v21 = vmax.f32 %v5036_v4, 0.0  ;;  %v4756_v31 = vadd.f32 %v4755_v16, %v4690_v51  ;;  %v5273_v41 = vmul.f32 %v5257_v20, %v11117_v63  ;;  %v11195_v51 = vld [vmem:[%s11494_s3 + $0x48] sm:$0xff] }
 0x5ed   :  { %v4965_v61 = vpop.f32.mrf.mxu2  ;;  %v5183_v46 = vsub.f32 1.5, %v5182_v62 }
 0x5ee   :  { %v6259_v34 = vpop.eup %6258  ;;  %v11186_v9 = vadd.f32 1e-05, %v5052_v21  ;;  %v11188_v58 = vmul.f32 0.0051020407, %v4756_v31  ;;  %v4966_v57 = vadd.f32 %v4965_v61, %v4900_v2  ;;  %5313 = vrot.lane.b32.xlu2 %v5273_v41, %s6274_s29  ;;  %5403 = vperm.xlu1 %6232, %v5257_v20  }
 0x5ef   :  { %v5190_v17 = vmul.f32 %v6259_v34, %v11168_v10  ;;  %v5184_v63 = vmul.f32 %v6257_v5, %v5183_v46  ;;  %vm5196_vm0 = vweird.f32 %v6259_v34 }
 0x5f0   :  { %6260 = vrsqrt.f32 %v11186_v9  ;;  %v5021_v1 = vmul.f32 %v11188_v58, %v11188_v58  ;;  %v5005_v2 = vmul.f32 0.0051020407, %v4966_v57  ;;  %vm5197_vm2 = vmor %vm5195_vm15, %vm5196_vm0  ;;  %vm5205_vm4 = vweird.f32 %v11186_v9 }
 0x5f1   :  { %v5191_v55 = vmul.f32 %v6259_v34, %v5190_v17  ;;  %v5188_v28 = vsel %vm5187_vm14, %v6257_v5, %v5184_v63 }
 0x5f2   :  { %v5037_v33 = vsub.f32 %v5005_v2, %v5021_v1  ;;  %v5258_v4 = vmul.f32 %v5188_v28, %v11195_v51 }
 0x5f3   :  { %v5192_v20 = vmul.f32 0.5, %v5191_v55  ;;  %v4758_v62 = vpop.f32.mrf.mxu3  ;;  %v4696_v55 = vpop.f32.mrf.mxu1 }
 0x5f4   :  { %v5053_v16 = vmax.f32 %v5037_v33, 0.0  ;;  %v4759_v21 = vadd.f32 %v4758_v62, %v4693_v22  ;;  %v5274_v43 = vmul.f32 %v5258_v4, %v11135_v24  ;;  %v11213_v22 = vld [vmem:[%s11494_s3 + $0x50] sm:$0xff] }
 0x5f5   :  { %v4968_v31 = vpop.f32.mrf.mxu2  ;;  %v5193_v41 = vsub.f32 1.5, %v5192_v20  ;;  %v4906_v20 = vpop.f32.mrf.mxu0 }
 0x5f6   :  { %v6261_v61 = vpop.eup %6260  ;;  %v11204_v46 = vadd.f32 1e-05, %v5053_v16  ;;  %v11206_v57 = vmul.f32 0.0051020407, %v4759_v21  ;;  %v4969_v17 = vadd.f32 %v4968_v31, %v4903_v50  ;;  %5408 = vperm.xlu2 %6233, %v5258_v4   ;;  %5315 = vrot.lane.b32.xlu0 %v5274_v43, %s6274_s29 }
 0x5f7   :  { %v5200_v5 = vmul.f32 %v6261_v61, %v11186_v9  ;;  %v5194_v24 = vmul.f32 %v6259_v34, %v5193_v41  ;;  %vm5206_vm3 = vweird.f32 %v6261_v61 }
 0x5f8   :  { %6262 = vrsqrt.f32 %v11204_v46  ;;  %v5022_v63 = vmul.f32 %v11206_v57, %v11206_v57  ;;  %v5006_v1 = vmul.f32 0.0051020407, %v4969_v17  ;;  %vm5207_vm5 = vmor %vm5205_vm4, %vm5206_vm3  ;;  %vm5215_vm7 = vweird.f32 %v11204_v46 }
 0x5f9   :  { %v5201_v2 = vmul.f32 %v6261_v61, %v5200_v5  ;;  %v5198_v50 = vsel %vm5197_vm2, %v6259_v34, %v5194_v24  ;;  %v11228_v24 = vld [vmem:[%s11494_s3 + $0x58] sm:$0xff] }
 0x5fa   :  { %v5038_v28 = vsub.f32 %v5006_v1, %v5022_v63  ;;  %v5259_v33 = vmul.f32 %v5198_v50, %v11213_v22 }
 0x5fb   :  { %v5202_v4 = vmul.f32 0.5, %v5201_v2  ;;  %v4761_v62 = vpop.f32.mrf.mxu3 }
 0x5fc   :  { %v5054_v16 = vmax.f32 %v5038_v28, 0.0  ;;  %v4762_v21 = vadd.f32 %v4761_v62, %v4696_v55  ;;  %v5275_v10 = vmul.f32 %v5259_v33, %v11153_v45 }
 0x5fd   :  { %v4971_v43 = vpop.f32.mrf.mxu2  ;;  %v5203_v31 = vsub.f32 1.5, %v5202_v4  ;;  %v4699_v4 = vpop.f32.mrf.mxu1 }
 0x5fe   :  { %v6263_v41 = vpop.eup %6262  ;;  %v5086_v40 = vadd.f32 1e-05, %v5054_v16  ;;  %v11221_v17 = vmul.f32 0.0051020407, %v4762_v21  ;;  %v4972_v5 = vadd.f32 %v4971_v43, %v4906_v20  ;;  %5317 = vrot.lane.b32.xlu1 %v5275_v10, %s6274_s29  ;;  %5413 = vperm.xlu0 %6234, %v5259_v33   ;;  %v4909_v10 = vpop.f32.mrf.mxu0 }
 0x5ff   :  { %v5210_v34 = vmul.f32 %v6263_v41, %v11204_v46  ;;  %v5204_v63 = vmul.f32 %v6261_v61, %v5203_v31  ;;  %vm5216_vm6 = vweird.f32 %v6263_v41 }
 0x600   :  { %6264 = vrsqrt.f32 %v5086_v40  ;;  %v5023_v45 = vmul.f32 %v11221_v17, %v11221_v17  ;;  %v5007_v1 = vmul.f32 0.0051020407, %v4972_v5  ;;  %vm5217_vm8 = vmor %vm5215_vm7, %vm5216_vm6  ;;  %vm5225_vm10 = vweird.f32 %v5086_v40 }
 0x601   :  { %v5211_v2 = vmul.f32 %v6263_v41, %v5210_v34  ;;  %v5208_v55 = vsel %vm5207_vm5, %v6261_v61, %v5204_v63  ;;  %v11239_v34 = vld [vmem:[%s11494_s3 + $0x60] sm:$0xff] }
 0x602   :  { %v5039_v50 = vsub.f32 %v5007_v1, %v5023_v45  ;;  %v5260_v28 = vmul.f32 %v5208_v55, %v11228_v24 }
 0x603   :  { %v5212_v33 = vmul.f32 0.5, %v5211_v2  ;;  %v4764_v20 = vpop.f32.mrf.mxu3 }
 0x604   :  { %v5055_v62 = vmax.f32 %v5039_v50, 0.0  ;;  %v4765_v16 = vadd.f32 %v4764_v20, %v4699_v4  ;;  %v5276_v21 = vmul.f32 %v5260_v28, %v11170_v60 }
 0x605   :  { %v4974_v9 = vpop.f32.mrf.mxu2  ;;  %v5213_v43 = vsub.f32 1.5, %v5212_v33 }
 0x606   :  { %v6265_v31 = vpop.eup %6264  ;;  %v5087_v32 = vadd.f32 1e-05, %v5055_v62  ;;  %v4992_v5 = vmul.f32 0.0051020407, %v4765_v16  ;;  %v4975_v12 = vadd.f32 %v4974_v9, %v4909_v10  ;;  %5319 = vrot.lane.b32.xlu2 %v5276_v21, %s6274_s29  ;;  %5418 = vperm.xlu1 %6232, %v5260_v28  }
 0x607   :  { %v5220_v61 = vmul.f32 %v6265_v31, %v5086_v40  ;;  %v5214_v63 = vmul.f32 %v6263_v41, %v5213_v43  ;;  %vm5226_vm9 = vweird.f32 %v6265_v31 }
 0x608   :  { %6266 = vrsqrt.f32 %v5087_v32  ;;  %v5024_v60 = vmul.f32 %v4992_v5, %v4992_v5  ;;  %v5008_v45 = vmul.f32 0.0051020407, %v4975_v12  ;;  %v11248_v12 = vld [vmem:[%s11494_s3 + $0x68] sm:$0xff]  ;;  %vm5227_vm11 = vmor %vm5225_vm10, %vm5226_vm9  ;;  %vm5235_vm13 = vweird.f32 %v5087_v32 }
 0x609   :  { %v5221_v1 = vmul.f32 %v6265_v31, %v5220_v61  ;;  %v5218_v2 = vsel %vm5217_vm8, %v6263_v41, %v5214_v63 }
 0x60a   :  { %v5040_v55 = vsub.f32 %v5008_v45, %v5024_v60  ;;  %v5261_v50 = vmul.f32 %v5218_v2, %v11239_v34  ;;  %v11256_v45 = vld [vmem:[%s11494_s3 + $0x70] sm:$0xff] }
 0x60b   :  { %v5222_v33 = vmul.f32 0.5, %v5221_v1 }
 0x60c   :  { %v5056_v28 = vmax.f32 %v5040_v55, 0.0  ;;  %v5277_v4 = vmul.f32 %v5261_v50, %v11188_v58 }
 0x60d   :  { %v5223_v20 = vsub.f32 1.5, %v5222_v33 }
 0x60e   :  { %v6267_v62 = vpop.eup %6266  ;;  %v5088_v16 = vadd.f32 1e-05, %v5056_v28  ;;  %5423 = vperm.xlu2 %6233, %v5261_v50   ;;  %5321 = vrot.lane.b32.xlu0 %v5277_v4, %s6274_s29  ;;  %v11260_v33 = vpop.permute.xlu2 %5368  ;;  %v11266_v28 = vld [vmem:[%s11494_s3 + $0x78] sm:$0xff] }
 0x60f   :  { %v5230_v46 = vmul.f32 %v6267_v62, %v5087_v32  ;;  %v5224_v41 = vmul.f32 %v6265_v31, %v5223_v20  ;;  %vm5236_vm12 = vweird.f32 %v6267_v62 }
 0x610   :  { %6268 = vrsqrt.f32 %v5088_v16  ;;  %vm5237_vm14 = vmor %vm5235_vm13, %vm5236_vm12  ;;  %vm5245_vm15 = vweird.f32 %v5088_v16 }
 0x611   :  { %v5231_v21 = vmul.f32 %v6267_v62, %v5230_v46  ;;  %v5228_v10 = vsel %vm5227_vm11, %v6265_v31, %v5224_v41  ;;  %v12131_v41 = vmov 1  }
 0x612   :  { %v5262_v58 = vmul.f32 %v5228_v10, %v11248_v12 }
 0x613   :  { %v5232_v9 = vmul.f32 0.5, %v5231_v21 }
 0x614   :  { %v5278_v43 = vmul.f32 %v5262_v58, %v11206_v57 }
 0x615   :  { %v5233_v61 = vsub.f32 1.5, %v5232_v9 }
 0x616   :  { %v6269_v63 = vpop.eup %6268  ;;  %5323 = vrot.lane.b32.xlu1 %v5278_v43, %s6274_s29 }
 0x617   :  { %v5240_v60 = vmul.f32 %v6269_v63, %v5088_v16  ;;  %v5234_v40 = vmul.f32 %v6267_v62, %v5233_v61  ;;  %vm5246_vm0 = vweird.f32 %v6269_v63 }
 0x618   :  { %vm5247_vm2 = vmor %vm5245_vm15, %vm5246_vm0 }
 0x619   :  { %v5241_v31 = vmul.f32 %v6269_v63, %v5240_v60  ;;  %v5238_v1 = vsel %vm5237_vm14, %v6267_v62, %v5234_v40 }
 0x61a   :  { %v5263_v2 = vmul.f32 %v5238_v1, %v11256_v45 }
 0x61b   :  { %v5242_v55 = vmul.f32 0.5, %v5241_v31 }
 0x61c   :  { %v5279_v57 = vmul.f32 %v5263_v2, %v11221_v17 }
 0x61d   :  { %v5243_v50 = vsub.f32 1.5, %v5242_v55 }
 0x61e   :  { %5325 = vrot.lane.b32.xlu2 %v5279_v57, %s6274_s29  ;;  %5433 = vperm.xlu1 %6232, %v5263_v2   ;;  %v11273_v21 = vpop.permute.xlu1 %5363 }
 0x61f   :  { %v5244_v32 = vmul.f32 %v6269_v63, %v5243_v50 }
 0x620   :  { %v5298_v4 = vpop.permute.xlu0 %5297 }
 0x621   :  { %v5248_v20 = vsel %vm5247_vm2, %v6269_v63, %v5244_v32  ;;  %v5345_v61 = vsub.f32 %v11039_v8, %v5298_v4 }
 0x622   :  { %v5264_v62 = vmul.f32 %v5248_v20, %v11266_v28 }
 0x624   :  { %v5280_v17 = vmul.f32 %v5264_v62, %v4992_v5 }
 0x626   :  { %5438 = vperm.xlu2 %6233, %v5264_v62   ;;  %v11269_v46 = vpop.permute.xlu2 %5383  ;;  %5327 = vrot.lane.b32.xlu0 %v5280_v17, %s6274_s29 }
 0x627   :  { %6236 = vset.pattern.permute.xlu1 %v12131_v41 }
 0x628   :  { %v5300_v10 = vpop.permute.xlu0 %5299 }
 0x629   :  { %v5346_v9 = vsub.f32 %v11057_v36, %v5300_v10 }
 0x62b   :  { %5480 = vperm.xlu1 %6236, %v5346_v9  }
 0x62e   :  { %v5306_v16 = vpop.permute.xlu2 %5305  ;;  %5428 = vperm.xlu0 %6234, %v5262_v58   ;;  %6237 = vset.pattern.permute.xlu2 %v12131_v41 }
 0x62f   :  { %v5349_v40 = vsub.f32 %v11107_v52, %v5306_v16 }
 0x630   :  { %v5302_v43 = vpop.permute.xlu1 %5301  ;;  %v5374_v1 = vpop.permute.xlu0 %5373 }
 0x631   :  { %v5347_v5 = vsub.f32 %v11074_v7, %v5302_v43 }
 0x633   :  { %5485 = vperm.xlu2 %6237, %v5347_v5  }
 0x636   :  { %v5308_v63 = vpop.permute.xlu2 %5307  ;;  %6235 = vset.pattern.permute.xlu0 %v12131_v41 }
 0x637   :  { %5475 = vperm.xlu0 %6235, %v5345_v61   ;;  %v5350_v36 = vsub.f32 %v11128_v38, %v5308_v63 }
 0x638   :  { %v11280_v60 = vpop.permute.xlu1 %5378 }
 0x63b   :  { %5495 = vperm.xlu2 %6237, %v5349_v40   ;;  %v5446_v40 = vmul.f32 %v5374_v1, %v10852_v25 }
 0x63e   :  { %v11284_v58 = vpop.permute.xlu2 %5393 }
 0x63f   :  { %5500 = vperm.xlu0 %6235, %v5350_v36  }
 0x640   :  { %v5304_v31 = vpop.permute.xlu1 %5303 }
 0x641   :  { %v5348_v7 = vsub.f32 %v11096_v47, %v5304_v31 }
 0x643   :  { %5490 = vperm.xlu1 %6236, %v5348_v7  }
 0x648   :  { %v5314_v8 = vpop.permute.xlu2 %5313  ;;  %v11288_v55 = vpop.permute.xlu1 %5388 }
 0x649   :  { %v5353_v2 = vsub.f32 %v11177_v39, %v5314_v8 }
 0x64b   :  { %5515 = vperm.xlu0 %6235, %v5353_v2  }
 0x650   :  { %v5310_v57 = vpop.permute.xlu0 %5309  ;;  %v11291_v50 = vpop.permute.xlu2 %5408 }
 0x651   :  { %v5351_v52 = vsub.f32 %v11141_v42, %v5310_v57 }
 0x653   :  { %5505 = vperm.xlu1 %6236, %v5351_v52  }
 0x658   :  { %v5312_v38 = vpop.permute.xlu1 %5311  ;;  %v11294_v4 = vpop.permute.xlu0 %5398 }
 0x659   :  { %v5352_v32 = vsub.f32 %v11160_v29, %v5312_v38 }
 0x65b   :  { %5510 = vperm.xlu2 %6237, %v5352_v32  }
 0x660   :  { %v5320_v47 = vpop.permute.xlu2 %5319  ;;  %v11297_v39 = vpop.permute.xlu1 %5403 }
 0x661   :  { %v5356_v20 = vsub.f32 %v11228_v24, %v5320_v47 }
 0x663   :  { %5530 = vperm.xlu0 %6235, %v5356_v20  }
 0x668   :  { %v5316_v62 = vpop.permute.xlu0 %5315  ;;  %v11300_v42 = vpop.permute.xlu2 %5423 }
 0x669   :  { %v5354_v17 = vsub.f32 %v11195_v51, %v5316_v62 }
 0x66b   :  { %5520 = vperm.xlu1 %6236, %v5354_v17  }
 0x670   :  { %v5318_v41 = vpop.permute.xlu1 %5317  ;;  %v11303_v29 = vpop.permute.xlu0 %5413 }
 0x671   :  { %v5355_v10 = vsub.f32 %v11213_v22, %v5318_v41  ;;  %v5445_v22 = vmul.f32 %v5374_v1, %v10720_v30  ;;  %v5450_v30 = vmul.f32 %v11269_v46, %v10872_v26  ;;  %v5444_v26 = vmul.f32 %v11260_v33, %v10842_v11 }
 0x672   :  { %v5442_v11 = vmul.f32 %v11273_v21, %v10832_v49  ;;  %v5452_v49 = vmul.f32 %v11288_v55, %v10882_v14 }
 0x673   :  { %5525 = vperm.xlu2 %6237, %v5355_v10  }
 0x678   :  { %v5326_v9 = vpop.permute.xlu2 %5325  ;;  %v11306_v24 = vpop.permute.xlu1 %5418 }
 0x679   :  { %v5359_v16 = vsub.f32 %v11256_v45, %v5326_v9 }
 0x67b   :  { %5545 = vperm.xlu0 %6235, %v5359_v16  }
 0x680   :  { %v5322_v43 = vpop.permute.xlu0 %5321  ;;  %v11309_v51 = vpop.permute.xlu2 %5438 }
 0x681   :  { %v5357_v5 = vsub.f32 %v11239_v34, %v5322_v43  ;;  %v5449_v34 = vmul.f32 %v11269_v46, %v10734_v23  ;;  %v5443_v23 = vmul.f32 %v11260_v33, %v10713_v44  ;;  %v5441_v44 = vmul.f32 %v11273_v21, %v10706_v3 }
 0x682   :  { %v5451_v3 = vmul.f32 %v11288_v55, %v10741_v6 }
 0x683   :  { %5535 = vperm.xlu1 %6236, %v5357_v5  }
 0x688   :  { %v5324_v61 = vpop.permute.xlu1 %5323 }
 0x689   :  { %v5358_v63 = vsub.f32 %v11248_v12, %v5324_v61  ;;  %v5447_v61 = vmul.f32 %v11280_v60, %v10727_v27 }
 0x68b   :  { %5540 = vperm.xlu2 %6237, %v5358_v63   ;;  %v5448_v63 = vmul.f32 %v11280_v60, %v10862_v54 }
 0x68d   :  { %v5486_v36 = vpop.permute.xlu2 %5485 }
 0x68e   :  { %v5557_v31 = vadd.f32 %v5486_v36, %v5445_v22  ;;  %v5558_v45 = vadd.f32 %v5486_v36, %v5446_v40  ;;  %v5455_v22 = vmul.f32 %v11294_v4, %v10757_v13  ;;  %v5456_v40 = vmul.f32 %v11294_v4, %v10906_v56 }
 0x68f   :  { %v5457_v4 = vmul.f32 %v11297_v39, %v10896_v0  ;;  %v5453_v0 = vmul.f32 %v11284_v58, %v10748_v37  ;;  %v5461_v37 = vmul.f32 %v11303_v29, %v10924_v48  ;;  %v5463_v48 = vmul.f32 %v11306_v24, %v10938_v18 }
 0x690   :  { %v5589_v7 = vmax.f32 %v5557_v31, 0.0  ;;  %v5590_v8 = vmax.f32 %v5558_v45, 0.0  ;;  %v11325_v25 = vpop.permute.xlu1 %5433  ;;  %v5459_v18 = vmul.f32 %v11291_v50, %v10910_v59 }
 0x692   :  { %5621 = vst [vmem:[%s11495_s4 + $0x20] sm:$0xff] %v5589_v7 }
 0x693   :  { %5622 = vst.msk [vmem:[%s11495_s4 + $0x28] sm:$0xff] %vm279_vm1, %v5590_v8  ;;  %v5458_v8 = vmul.f32 %v11297_v39, %v10920_v19  ;;  %v5454_v19 = vmul.f32 %v11284_v58, %v10892_v15  ;;  %v5462_v15 = vmul.f32 %v11303_v29, %v10948_v35  ;;  %v5464_v35 = vmul.f32 %v11306_v24, %v10962_v53 }
 0x695   :  { %v5496_v12 = vpop.permute.xlu2 %5495 }
 0x696   :  { %v5561_v1 = vadd.f32 %v5496_v12, %v5449_v34  ;;  %v5562_v2 = vadd.f32 %v5496_v12, %v5450_v30 }
 0x698   :  { %v5593_v57 = vmax.f32 %v5561_v1, 0.0  ;;  %v5594_v52 = vmax.f32 %v5562_v2, 0.0  ;;  %v5328_v38 = vpop.permute.xlu0 %5327 }
 0x699   :  { %v5360_v32 = vsub.f32 %v11266_v28, %v5328_v38 }
 0x69a   :  { %5625 = vst [vmem:[%s11495_s4 + $0x40] sm:$0xff] %v5593_v57 }
 0x69b   :  { %5626 = vst.msk [vmem:[%s11495_s4 + $0x48] sm:$0xff] %vm279_vm1, %v5594_v52  ;;  %5550 = vperm.xlu1 %6236, %v5360_v32  }
 0x69d   :  { %v5481_v46 = vpop.permute.xlu1 %5480 }
 0x69e   :  { %v5555_v47 = vadd.f32 %v5481_v46, %v5443_v23  ;;  %v5556_v20 = vadd.f32 %v5481_v46, %v5444_v26 }
 0x6a0   :  { %v5587_v28 = vmax.f32 %v5555_v47, 0.0  ;;  %v5588_v62 = vmax.f32 %v5556_v20, 0.0  ;;  %v11339_v17 = vpop.permute.xlu0 %5428 }
 0x6a2   :  { %5619 = vst [vmem:[%s11495_s4 + $0x10] sm:$0xff] %v5587_v28 }
 0x6a3   :  { %5620 = vst.msk [vmem:[%s11495_s4 + $0x18] sm:$0xff] %vm279_vm1, %v5588_v62 }
 0x6a9   :  { %v5476_v33 = vpop.permute.xlu0 %5475 }
 0x6aa   :  { %v5553_v41 = vadd.f32 %v5476_v33, %v5441_v44  ;;  %v5554_v10 = vadd.f32 %v5476_v33, %v5442_v11  ;;  %v12132_v11 = vld [vmem:[#allocation96_spill] sm:$0xff] }
 0x6ab   :  { %v5460_v53 = vmul.f32 %v11291_v50, %v12132_v11 }
 0x6ac   :  { %v5585_v9 = vmax.f32 %v5553_v41, 0.0  ;;  %v5586_v16 = vmax.f32 %v5554_v10, 0.0 }
 0x6ae   :  { %5617 = vst [vmem:[%s11495_s4] sm:$0xff] %v5585_v9 }
 0x6af   :  { %5618 = vst.msk [vmem:[%s11495_s4 + $0x8] sm:$0xff] %vm279_vm1, %v5586_v16  ;;  %v12133_v16 = vld [vmem:[#allocation94_spill] sm:$0xff] }
 0x6b0   :  { %v5467_v59 = vmul.f32 %v11339_v17, %v12133_v16 }
 0x6b1   :  { %v5501_v21 = vpop.permute.xlu0 %5500 }
 0x6b2   :  { %v5563_v43 = vadd.f32 %v5501_v21, %v5451_v3  ;;  %v5564_v5 = vadd.f32 %v5501_v21, %v5452_v49  ;;  %v12134_v3 = vld [vmem:[#allocation88_spill] sm:$0xff] }
 0x6b3   :  { %v5468_v50 = vmul.f32 %v11339_v17, %v12134_v3 }
 0x6b4   :  { %v5595_v36 = vmax.f32 %v5563_v43, 0.0  ;;  %v5596_v6 = vmax.f32 %v5564_v5, 0.0 }
 0x6b5   :  { %v5511_v31 = vpop.permute.xlu2 %5510  ;;  %v5491_v45 = vpop.permute.xlu1 %5490 }
 0x6b6   :  { %5627 = vst [vmem:[%s11495_s4 + $0x50] sm:$0xff] %v5595_v36  ;;  %v5567_v14 = vadd.f32 %v5511_v31, %v5455_v22  ;;  %v5568_v55 = vadd.f32 %v5511_v31, %v5456_v40  ;;  %v5559_v27 = vadd.f32 %v5491_v45, %v5447_v61  ;;  %v5560_v7 = vadd.f32 %v5491_v45, %v5448_v63  ;;  %v12135_v63 = vld [vmem:[#allocation86_spill] sm:$0xff]  ;;  %v12136_v40 = vld [vmem:[#allocation80_spill] sm:$0xff] }
 0x6b7   :  { %5628 = vst.msk [vmem:[%s11495_s4 + $0x58] sm:$0xff] %vm279_vm1, %v5596_v6  ;;  %v5469_v22 = vmul.f32 %v11325_v25, %v12135_v63  ;;  %v5470_v17 = vmul.f32 %v11325_v25, %v12136_v40 }
 0x6b8   :  { %v5599_v13 = vmax.f32 %v5567_v14, 0.0  ;;  %v5600_v54 = vmax.f32 %v5568_v55, 0.0  ;;  %v5591_v56 = vmax.f32 %v5559_v27, 0.0  ;;  %v5592_v60 = vmax.f32 %v5560_v7, 0.0  ;;  %v12137_v55 = vld [vmem:[#allocation92_spill] sm:$0xff]  ;;  %v12138_v7 = vld [vmem:[#allocation90_spill] sm:$0xff] }
 0x6b9   :  { %v5465_v27 = vmul.f32 %v11300_v42, %v12137_v55  ;;  %v5466_v25 = vmul.f32 %v11300_v42, %v12138_v7 }
 0x6ba   :  { %5631 = vst [vmem:[%s11495_s4 + $0x70] sm:$0xff] %v5599_v13 }
 0x6bb   :  { %5632 = vst.msk [vmem:[%s11495_s4 + $0x78] sm:$0xff] %vm279_vm1, %v5600_v54 }
 0x6bc   :  { %5623 = vst [vmem:[%s11495_s4 + $0x30] sm:$0xff] %v5591_v56 }
 0x6bd   :  { %5624 = vst.msk [vmem:[%s11495_s4 + $0x38] sm:$0xff] %vm279_vm1, %v5592_v60  ;;  %v5516_v34 = vpop.permute.xlu0 %5515 }
 0x6be   :  { %v5569_v30 = vadd.f32 %v5516_v34, %v5457_v4  ;;  %v5570_v12 = vadd.f32 %v5516_v34, %v5458_v8  ;;  %v12139_v8 = vld [vmem:[#allocation84_spill] sm:$0xff] }
 0x6bf   :  { %v5471_v34 = vmul.f32 %v11309_v51, %v12139_v8 }
 0x6c0   :  { %v5601_v1 = vmax.f32 %v5569_v30, 0.0  ;;  %v5602_v2 = vmax.f32 %v5570_v12, 0.0  ;;  %v12140_v30 = vld [vmem:[#allocation113_spill] sm:$0xff] }
 0x6c1   :  { %v5472_v42 = vmul.f32 %v11309_v51, %v12140_v30 }
 0x6c2   :  { %5633 = vst [vmem:[%s11495_s4 + $0x80] sm:$0xff] %v5601_v1 }
 0x6c3   :  { %5634 = vst.msk [vmem:[%s11495_s4 + $0x88] sm:$0xff] %vm279_vm1, %v5602_v2 }
 0x6c5   :  { %v5506_v39 = vpop.permute.xlu1 %5505 }
 0x6c6   :  { %v5565_v57 = vadd.f32 %v5506_v39, %v5453_v0  ;;  %v5566_v52 = vadd.f32 %v5506_v39, %v5454_v19 }
 0x6c8   :  { %v5597_v38 = vmax.f32 %v5565_v57, 0.0  ;;  %v5598_v32 = vmax.f32 %v5566_v52, 0.0 }
 0x6ca   :  { %5629 = vst [vmem:[%s11495_s4 + $0x60] sm:$0xff] %v5597_v38 }
 0x6cb   :  { %5630 = vst.msk [vmem:[%s11495_s4 + $0x68] sm:$0xff] %vm279_vm1, %v5598_v32 }
 0x6cd   :  { %v5526_v58 = vpop.permute.xlu2 %5525 }
 0x6ce   :  { %v5573_v23 = vadd.f32 %v5526_v58, %v5461_v37  ;;  %v5574_v26 = vadd.f32 %v5526_v58, %v5462_v15 }
 0x6d0   :  { %v5605_v46 = vmax.f32 %v5573_v23, 0.0  ;;  %v5606_v47 = vmax.f32 %v5574_v26, 0.0 }
 0x6d2   :  { %5637 = vst [vmem:[%s11495_s4 + $0xa0] sm:$0xff] %v5605_v46 }
 0x6d3   :  { %5638 = vst.msk [vmem:[%s11495_s4 + $0xa8] sm:$0xff] %vm279_vm1, %v5606_v47 }
 0x6d5   :  { %v5531_v29 = vpop.permute.xlu0 %5530 }
 0x6d6   :  { %v5575_v20 = vadd.f32 %v5531_v29, %v5463_v48  ;;  %v5576_v28 = vadd.f32 %v5531_v29, %v5464_v35 }
 0x6d8   :  { %v5607_v62 = vmax.f32 %v5575_v20, 0.0  ;;  %v5608_v44 = vmax.f32 %v5576_v28, 0.0 }
 0x6da   :  { %5639 = vst [vmem:[%s11495_s4 + $0xb0] sm:$0xff] %v5607_v62 }
 0x6db   :  { %5640 = vst.msk [vmem:[%s11495_s4 + $0xb8] sm:$0xff] %vm279_vm1, %v5608_v44 }
 0x6dd   :  { %v5521_v24 = vpop.permute.xlu1 %5520 }
 0x6de   :  { %v5571_v33 = vadd.f32 %v5521_v24, %v5459_v18  ;;  %v5572_v41 = vadd.f32 %v5521_v24, %v5460_v53 }
 0x6e0   :  { %v5603_v10 = vmax.f32 %v5571_v33, 0.0  ;;  %v5604_v9 = vmax.f32 %v5572_v41, 0.0 }
 0x6e2   :  { %5635 = vst [vmem:[%s11495_s4 + $0x90] sm:$0xff] %v5603_v10 }
 0x6e3   :  { %5636 = vst.msk [vmem:[%s11495_s4 + $0x98] sm:$0xff] %vm279_vm1, %v5604_v9 }
 0x6e5   :  { %v5541_v49 = vpop.permute.xlu2 %5540 }
 0x6e6   :  { %v5579_v21 = vadd.f32 %v5541_v49, %v5467_v59  ;;  %v5580_v43 = vadd.f32 %v5541_v49, %v5468_v50 }
 0x6e8   :  { %v5611_v5 = vmax.f32 %v5579_v21, 0.0  ;;  %v5612_v61 = vmax.f32 %v5580_v43, 0.0 }
 0x6ea   :  { %5643 = vst [vmem:[%s11495_s4 + $0xd0] sm:$0xff] %v5611_v5 }
 0x6eb   :  { %5644 = vst.msk [vmem:[%s11495_s4 + $0xd8] sm:$0xff] %vm279_vm1, %v5612_v61 }
 0x6ed   :  { %v5546_v36 = vpop.permute.xlu0 %5545 }
 0x6ee   :  { %v5581_v6 = vadd.f32 %v5546_v36, %v5469_v22  ;;  %v5582_v31 = vadd.f32 %v5546_v36, %v5470_v17 }
 0x6f0   :  { %v5613_v45 = vmax.f32 %v5581_v6, 0.0  ;;  %v5614_v14 = vmax.f32 %v5582_v31, 0.0 }
 0x6f2   :  { %5645 = vst [vmem:[%s11495_s4 + $0xe0] sm:$0xff] %v5613_v45 }
 0x6f3   :  { %5646 = vst.msk [vmem:[%s11495_s4 + $0xe8] sm:$0xff] %vm279_vm1, %v5614_v14 }
 0x6f5   :  { %v5536_v13 = vpop.permute.xlu1 %5535 }
 0x6f6   :  { %v5577_v54 = vadd.f32 %v5536_v13, %v5465_v27  ;;  %v5578_v56 = vadd.f32 %v5536_v13, %v5466_v25 }
 0x6f8   :  { %v5609_v60 = vmax.f32 %v5577_v54, 0.0  ;;  %v5610_v4 = vmax.f32 %v5578_v56, 0.0 }
 0x6fa   :  { %5641 = vst [vmem:[%s11495_s4 + $0xc0] sm:$0xff] %v5609_v60 }
 0x6fb   :  { %5642 = vst.msk [vmem:[%s11495_s4 + $0xc8] sm:$0xff] %vm279_vm1, %v5610_v4 }
 0x70d   :  { %v5551_v12 = vpop.permute.xlu1 %5550 }
 0x70e   :  { %v5583_v1 = vadd.f32 %v5551_v12, %v5471_v34  ;;  %v5584_v2 = vadd.f32 %v5551_v12, %v5472_v42 }
 0x710   :  { %v5615_v0 = vmax.f32 %v5583_v1, 0.0  ;;  %v5616_v19 = vmax.f32 %v5584_v2, 0.0 }
 0x712   :  { %5647 = vst [vmem:[%s11495_s4 + $0xf0] sm:$0xff] %v5615_v0 }
 0x713   :  { %5648 = vst.msk [vmem:[%s11495_s4 + $0xf8] sm:$0xff] %vm279_vm1, %v5616_v19 }
 0x714   :  { %5653 = vsyncmov [#allocation3] }
 0x717   :  { %s5654_s25 = vpop.sfrf %5653 }
 0x718   :  { %p5851_p0 = scmp.ne.s32.totalorder %s5654_s25, 0 }
 0x71a   :  { %5658 = shalt.err (%p5851_p0)  }

</bundles_post_ra>
